<compile_context>
chip_gen: v5e
topology: v5e:2x2
jax: 0.10.0
libtpu: 0.0.40
codegen_flags: <defaults>
</compile_context>

<pallas_src>
import functools

import jax
import jax.numpy as jnp
from jax.experimental import pallas as pl
from jax.experimental.pallas import tpu as pltpu

EPS = 1e-5
_HEAD_PAD = 128                      # lane-dense width for the (B, 9) fc3 output
_VMEM_LIMIT = 48 * 1024 * 1024       # scoped-VMEM cap with headroom on v7x (64 MiB physical)


# --------------------------------------------------------------------------- helpers
def _bn_train(x, gamma, beta):
    """Training-mode BatchNorm1d over rows (biased variance, eps=1e-5)."""
    mean = jnp.mean(x, axis=0, keepdims=True)
    var = jnp.mean((x - mean) ** 2, axis=0, keepdims=True)
    return (x - mean) * jax.lax.rsqrt(var + EPS) * gamma + beta


def _bn_scale_shift(sum_parts, sq_parts, count, gamma, beta):
    """Fold partial sums into per-channel BN scale/shift (training-mode statistics).

    Note: E[x^2]-E[x]^2 in f32 with a hierarchical (per-tile then wrapper) reduction; fine
    at these magnitudes, clamp guards tiny negative variances from cancellation.
    """
    total = jnp.sum(sum_parts, axis=0)                 # (1, C)
    total_sq = jnp.sum(sq_parts, axis=0)               # (1, C)
    mean = total / count
    var = jnp.maximum(total_sq / count - mean * mean, 0.0)
    scale = gamma * jax.lax.rsqrt(var + EPS)
    shift = beta - mean * scale
    return scale, shift


def _pick_tile(total, cap, align=8):
    """Largest divisor of `total` that is <= cap and a multiple of `align` (or total)."""
    upper = min(cap, total)
    for t in range(upper, 0, -1):
        if total % t == 0 and (t % align == 0 or t == total):
            return t
    return total


# --------------------------------------------------------------------------- kernels
def _stats1_kernel(x_ref, w1_ref, sum_ref, sq_ref):
    """conv1 on a row tile -> per-tile sum / sumsq (h1 never stored)."""
    h = jnp.dot(x_ref[...], w1_ref[...], preferred_element_type=jnp.float32)
    sum_ref[...] = jnp.sum(h, axis=0, keepdims=True)[None]        # (1, 1, 64)
    sq_ref[...] = jnp.sum(h * h, axis=0, keepdims=True)[None]


def _stats2_kernel(x_ref, sc1_ref, sh1_ref, w1_ref, w2_ref, sum_ref, sq_ref):
    """Recompute conv1+BN1+ReLU then conv2 -> per-tile sum / sumsq (h2 never stored)."""
    h1 = jnp.dot(x_ref[...], w1_ref[...], preferred_element_type=jnp.float32)
    a1 = jnp.maximum(h1 * sc1_ref[...] + sh1_ref[...], 0.0)
    h2 = jnp.dot(a1, w2_ref[...], preferred_element_type=jnp.float32)
    sum_ref[...] = jnp.sum(h2, axis=0, keepdims=True)[None]       # (1, 1, 128)
    sq_ref[...] = jnp.sum(h2 * h2, axis=0, keepdims=True)[None]


def _conv3_pool_kernel(use_bf16, x_ref, sc1_ref, sh1_ref, sc2_ref, sh2_ref,
                       w1_ref, w2_ref, w3_ref, sum_ref, sq_ref, max_ref, min_ref):
    """Recompute the trunk, conv3 on the MXU, fused per-batch BN3 stats + max/min pool."""
    x = x_ref[0]                                                   # (n_tile, 8)
    a1 = jnp.maximum(jnp.dot(x, w1_ref[...], preferred_element_type=jnp.float32)
                     * sc1_ref[...] + sh1_ref[...], 0.0)
    a2 = jnp.maximum(jnp.dot(a1, w2_ref[...], preferred_element_type=jnp.float32)
                     * sc2_ref[...] + sh2_ref[...], 0.0)
    if use_bf16:
        a2 = a2.astype(jnp.bfloat16)                               # w3_ref is already bf16
    h3 = jnp.dot(a2, w3_ref[...], preferred_element_type=jnp.float32)   # (n_tile, 1024)

    t_sum = jnp.sum(h3, axis=0, keepdims=True)[None]               # (1, 1, 1024)
    t_sq = jnp.sum(h3 * h3, axis=0, keepdims=True)[None]
    t_max = jnp.max(h3, axis=0, keepdims=True)[None]
    t_min = jnp.min(h3, axis=0, keepdims=True)[None]

    @pl.when(pl.program_id(1) == 0)
    def _init():
        sum_ref[...] = t_sum
        sq_ref[...] = t_sq
        max_ref[...] = t_max
        min_ref[...] = t_min

    @pl.when(pl.program_id(1) > 0)
    def _acc():
        sum_ref[...] += t_sum
        sq_ref[...] += t_sq
        max_ref[...] = jnp.maximum(max_ref[...], t_max)
        min_ref[...] = jnp.minimum(min_ref[...], t_min)


def _fc_head_kernel(p_ref, wf1_ref, g4_ref, be4_ref, wf2_ref, g5_ref, be5_ref,
                    wf3_ref, bf3_ref, iden_ref, out_ref):
    """fc1 -> BN4 -> ReLU -> fc2 -> BN5 -> ReLU -> fc3(+bias) + identity (B rows only)."""
    # fc1/fc2 biases dropped: cancelled exactly by the training-mode BN that follows.
    f = jnp.dot(p_ref[...], wf1_ref[...], preferred_element_type=jnp.float32)
    f = jnp.maximum(_bn_train(f, g4_ref[...], be4_ref[...]), 0.0)        # (B, 512)
    f = jnp.dot(f, wf2_ref[...], preferred_element_type=jnp.float32)
    f = jnp.maximum(_bn_train(f, g5_ref[...], be5_ref[...]), 0.0)        # (B, 256)
    out = jnp.dot(f, wf3_ref[...], preferred_element_type=jnp.float32) + bf3_ref[...]
    out_ref[...] = out + iden_ref[...]                                   # (B, 128) lane-dense


# ----------------------------------------------------------------------- call wrappers
def _stats1_call(x, w1, row_tile):
    rows = x.shape[0]
    nt = rows // row_tile
    part = pl.BlockSpec((1, 1, 64), lambda i: (i, 0, 0))
    return pl.pallas_call(
        _stats1_kernel,
        grid=(nt,),
        in_specs=[pl.BlockSpec((row_tile, 8), lambda i: (i, 0)),
                  pl.BlockSpec((8, 64), lambda i: (0, 0))],
        out_specs=(part, part),
        out_shape=(jax.ShapeDtypeStruct((nt, 1, 64), jnp.float32),) * 2,
        compiler_params=pltpu.CompilerParams(
            dimension_semantics=("parallel",), vmem_limit_bytes=_VMEM_LIMIT),
    )(x, w1)


def _stats2_call(x, sc1, sh1, w1, w2, row_tile):
    rows = x.shape[0]
    nt = rows // row_tile
    part = pl.BlockSpec((1, 1, 128), lambda i: (i, 0, 0))
    return pl.pallas_call(
        _stats2_kernel,
        grid=(nt,),
        in_specs=[pl.BlockSpec((row_tile, 8), lambda i: (i, 0)),
                  pl.BlockSpec((1, 64), lambda i: (0, 0)),
                  pl.BlockSpec((1, 64), lambda i: (0, 0)),
                  pl.BlockSpec((8, 64), lambda i: (0, 0)),
                  pl.BlockSpec((64, 128), lambda i: (0, 0))],
        out_specs=(part, part),
        out_shape=(jax.ShapeDtypeStruct((nt, 1, 128), jnp.float32),) * 2,
        compiler_params=pltpu.CompilerParams(
            dimension_semantics=("parallel",), vmem_limit_bytes=_VMEM_LIMIT),
    )(x, sc1, sh1, w1, w2)


def _conv3_pool_call(x_b, sc1, sh1, sc2, sh2, w1, w2, w3, n_tile, use_bf16):
    B, N, _ = x_b.shape
    kernel = functools.partial(_conv3_pool_kernel, use_bf16)
    vec = lambda c: pl.BlockSpec((1, c), lambda b, n: (0, 0))
    batch_out = pl.BlockSpec((1, 1, 1024), lambda b, n: (b, 0, 0))
    return pl.pallas_call(
        kernel,
        grid=(B, N // n_tile),
        in_specs=[pl.BlockSpec((1, n_tile, 8), lambda b, n: (b, n, 0)),
                  vec(64), vec(64), vec(128), vec(128),
                  pl.BlockSpec((8, 64), lambda b, n: (0, 0)),
                  pl.BlockSpec((64, 128), lambda b, n: (0, 0)),
                  pl.BlockSpec((128, 1024), lambda b, n: (0, 0))],
        out_specs=(batch_out,) * 4,
        out_shape=(jax.ShapeDtypeStruct((B, 1, 1024), jnp.float32),) * 4,
        compiler_params=pltpu.CompilerParams(
            dimension_semantics=("parallel", "arbitrary"),
            vmem_limit_bytes=_VMEM_LIMIT),
    )(x_b, sc1, sh1, sc2, sh2, w1, w2, w3)


def _fc_head_call(pooled, wf1, g4, be4, wf2, g5, be5, wf3_p, bf3_p, iden_p):
    B = pooled.shape[0]
    vmem = pl.BlockSpec(memory_space=pltpu.MemorySpace.VMEM)
    return pl.pallas_call(
        _fc_head_kernel,
        out_shape=jax.ShapeDtypeStruct((B, _HEAD_PAD), jnp.float32),
        in_specs=[vmem] * 10,
        out_specs=vmem,
        compiler_params=pltpu.CompilerParams(vmem_limit_bytes=_VMEM_LIMIT),
    )(pooled, wf1, g4, be4, wf2, g5, be5, wf3_p, bf3_p, iden_p)


# --------------------------------------------------------------------------- forward
def stn3d_forward(x, params, *, row_tile=None, n_tile=None, use_bf16_matmul=True):
    """x: (B, 3, N) float32 (PyTorch NCW).  Returns (B, 3, 3)."""
    (w1, _b1, g1, be1, w2, _b2, g2, be2, w3, _b3, g3, be3,
     wf1, _bf1, g4, be4, wf2, _bf2, g5, be5, wf3, bf3) = params
    B, C, N = x.shape
    assert C == 3
    rows = B * N
    if row_tile is None:
        row_tile = _pick_tile(rows, cap=8192)     # stats passes: big tiles, tiny traffic
    if n_tile is None:
        n_tile = _pick_tile(N, cap=1024)          # conv3+pool pass: VMEM-safe on v7x
    assert rows % row_tile == 0 and (row_tile % 8 == 0 or row_tile == rows)
    assert N % n_tile == 0 and (n_tile % 8 == 0 or n_tile == N)

    # Channels-last point rows; pad channels 3 -> 8 (zero rows added to w1 keep the matmul
    # identical) so the conv1 contraction dim is sublane-aligned.
    x_rows = jnp.transpose(x, (0, 2, 1)).reshape(rows, C)
    x_pad = jnp.pad(x_rows, ((0, 0), (0, 8 - C)))                        # (rows, 8)
    w1_pad = jnp.pad(w1, ((0, 8 - C), (0, 0)))                           # (8, 64)

    # Pass 1: BN1 statistics (conv biases dropped -- cancelled exactly by train-mode BN).
    s1, q1 = _stats1_call(x_pad, w1_pad, row_tile)
    sc1, sh1 = _bn_scale_shift(s1, q1, rows, g1, be1)
    # Pass 2: recompute conv1/BN1/ReLU in-kernel -> conv2 -> BN2 statistics.
    s2, q2 = _stats2_call(x_pad, sc1, sh1, w1_pad, w2, row_tile)
    sc2, sh2 = _bn_scale_shift(s2, q2, rows, g2, be2)
    # Pass 3: recompute trunk -> conv3 (bf16 MXU) -> BN3 stats + fused per-batch max/min.
    w3_mm = w3.astype(jnp.bfloat16) if use_bf16_matmul else w3
    s3, q3, hmax, hmin = _conv3_pool_call(
        x_pad.reshape(B, N, 8), sc1, sh1, sc2, sh2, w1_pad, w2, w3_mm,
        n_tile, use_bf16_matmul)
    sc3, sh3 = _bn_scale_shift(s3, q3, rows, g3, be3)

    # Exact fused max-pool: BN3 is per-channel affine, ReLU/max are monotone, so the pooled
    # value comes from the pre-BN max (scale>=0) or min (scale<0) of conv3's output.
    hmax2, hmin2 = hmax[:, 0, :], hmin[:, 0, :]                          # (B, 1024)
    pooled = jnp.maximum(
        jnp.where(sc3 >= 0.0, sc3 * hmax2 + sh3, sc3 * hmin2 + sh3), 0.0)

    # Tiny fc head (B rows): pad the 9-wide fc3 output to 128 lanes for an unmasked store.
    wf3_p = jnp.pad(wf3, ((0, 0), (0, _HEAD_PAD - wf3.shape[1])))
    bf3_p = jnp.pad(bf3, ((0, 0), (0, _HEAD_PAD - bf3.shape[1])))
    iden_p = jnp.pad(jnp.array([[1, 0, 0, 0, 1, 0, 0, 0, 1]], jnp.float32),
                     ((0, 0), (0, _HEAD_PAD - 9)))
    out = _fc_head_call(pooled, wf1, g4, be4, wf2, g5, be5, wf3_p, bf3_p, iden_p)
    return out[:, :9].reshape(B, 3, 3)


# --------------------------------------------------------------- params / reference
def init_params(key):
    """Deterministic synthetic parameters (weights stored transposed: (C_in, C_out))."""
    dims = [(3, 64), (64, 128), (128, 1024), (1024, 512), (512, 256), (256, 9)]
    bn_dims = [64, 128, 1024, 512, 256]
    keys = jax.random.split(key, 2 * len(dims) + 2 * len(bn_dims))
    ki = iter(range(len(keys)))

    ws, bs = [], []
    for cin, cout in dims:
        ws.append(0.1 * jax.random.normal(keys[next(ki)], (cin, cout), jnp.float32))
        bs.append(0.1 * jax.random.normal(keys[next(ki)], (1, cout), jnp.float32))
    gs, betas = [], []
    for c in bn_dims:
        gs.append(1.0 + 0.1 * jax.random.normal(keys[next(ki)], (1, c), jnp.float32))
        betas.append(0.1 * jax.random.normal(keys[next(ki)], (1, c), jnp.float32))

    return (ws[0], bs[0], gs[0], betas[0],
            ws[1], bs[1], gs[1], betas[1],
            ws[2], bs[2], gs[2], betas[2],
            ws[3], bs[3], gs[3], betas[3],
            ws[4], bs[4], gs[4], betas[4],
            ws[5], bs[5])


def stn3d_reference(x, params):
    """Pure-JAX reference mirroring the PyTorch module (training-mode BN, with biases)."""
    (w1, b1, g1, be1, w2, b2, g2, be2, w3, b3, g3, be3,
     wf1, bf1, g4, be4, wf2, bf2, g5, be5, wf3, bf3) = params
    B, C, N = x.shape
    h = jnp.transpose(x, (0, 2, 1)).reshape(B * N, C)
    h = jnp.maximum(_bn_train(h @ w1 + b1, g1, be1), 0.0)
    h = jnp.maximum(_bn_train(h @ w2 + b2, g2, be2), 0.0)
    h = jnp.maximum(_bn_train(h @ w3 + b3, g3, be3), 0.0)
    pooled = jnp.max(h.reshape(B, N, -1), axis=1)
    f = jnp.maximum(_bn_train(pooled @ wf1 + bf1, g4, be4), 0.0)
    f = jnp.maximum(_bn_train(f @ wf2 + bf2, g5, be5), 0.0)
    out = f @ wf3 + bf3
    iden = jnp.array([1, 0, 0, 0, 1, 0, 0, 0, 1], dtype=jnp.float32)
    return (out + iden).reshape(B, 3, 3)


if __name__ == "__main__":
    key = jax.random.PRNGKey(0)
    pkey, xkey = jax.random.split(key)
    params = init_params(pkey)

    B, N = 8, 256
    x = jax.random.normal(xkey, (B, 3, N), jnp.float32)      # PyTorch NCW input

    ref = stn3d_reference(x, params)

    # Exactness gate: f32 MXU path vs the pure-JAX reference (validates the two-pass BN,
    # the conv1/conv2 recompute, and the fused pool-from-extrema algebra exactly).
    # Small explicit tiles so multi-tile grids and the running max/min accumulation run.
    fwd_f32 = jax.jit(functools.partial(stn3d_forward, row_tile=512, n_tile=64,
                                        use_bf16_matmul=False))
    out_f32 = jax.block_until_ready(fwd_f32(x, params))
    assert out_f32.shape == (B, 3, 3)
    err_f32 = float(jnp.max(jnp.abs(out_f32 - ref)))
    assert err_f32 < 2e-3, f"f32 mismatch vs reference: max abs err = {err_f32}"

    # Default path (bf16 conv3 inputs, f32 MXU accumulation): loose sanity bound only --
    # bf16 rounding of the dominant matmul perturbs the training-mode BN statistics and is
    # amplified by the 0.1-scale fc stack on this synthetic init; exact-math parity of the
    # kernel structure is covered by the f32 check above.
    fwd = jax.jit(functools.partial(stn3d_forward, row_tile=512, n_tile=64))
    out = jax.block_until_ready(fwd(x, params))
    assert out.shape == (B, 3, 3)
    assert bool(jnp.all(jnp.isfinite(out)))
    err_bf16 = float(jnp.max(jnp.abs(out - ref)))
    assert err_bf16 < 2.5e-1, f"bf16 path diverged from reference: max abs err = {err_bf16}"

    print("KERNEL_OK")
</pallas_src>

<mosaic_0001>
module attributes {stable_mosaic.version = 11 : i64} {
  func.func @_stats1_kernel(%arg0: i32, %arg1: memref<512x8xf32, #tpu.memory_space<vmem>>, %arg2: memref<8x64xf32, #tpu.memory_space<vmem>>, %arg3: memref<1x1x64xf32, #tpu.memory_space<vmem>>, %arg4: memref<1x1x64xf32, #tpu.memory_space<vmem>>) attributes {dimension_semantics = [#tpu.dimension_semantics<parallel>], iteration_bounds = array<i64: 4>, scalar_prefetch = 0 : i64, scratch_operands = 0 : i64, tpu.core_type = #tpu.core_type<tc>, window_params = [{transform_indices = @transform_0, window_bounds = array<i64: 512, 8>}, {pipeline_mode = #tpu.pipeline_mode<synchronous>, transform_indices = @transform_1, window_bounds = array<i64: 8, 64>}, {transform_indices = @transform_2, window_bounds = array<i64: 1, 1, 64>}, {transform_indices = @transform_3, window_bounds = array<i64: 1, 1, 64>}]} {
    %c0 = arith.constant 0 : index
    %c0_0 = arith.constant 0 : index
    %0 = vector.load %arg1[%c0, %c0_0] : memref<512x8xf32, #tpu.memory_space<vmem>>, vector<512x8xf32>
    %c0_1 = arith.constant 0 : index
    %c0_2 = arith.constant 0 : index
    %1 = vector.load %arg2[%c0_1, %c0_2] : memref<8x64xf32, #tpu.memory_space<vmem>>, vector<8x64xf32>
    %cst = arith.constant dense<0.000000e+00> : vector<512x64xf32>
    %2 = tpu.matmul %0, %1, %cst {dimension_numbers = #tpu.dot_dimension_numbers<[1], [0], [0], [1], [0, 0, 1, 1], [], []>} : vector<512x8xf32>, vector<8x64xf32>, vector<512x64xf32> -> vector<512x64xf32>
    %cst_3 = arith.constant dense<0.000000e+00> : vector<64xf32>
    %3 = vector.multi_reduction <add>, %2, %cst_3 [0] : vector<512x64xf32> to vector<64xf32>
    %4 = vector.shape_cast %3 : vector<64xf32> to vector<1x64xf32>
    %5 = vector.shape_cast %4 : vector<1x64xf32> to vector<1x1x64xf32>
    %c0_4 = arith.constant 0 : index
    %c0_5 = arith.constant 0 : index
    %c0_6 = arith.constant 0 : index
    %6 = vector.load %arg3[%c0_4, %c0_5, %c0_6] : memref<1x1x64xf32, #tpu.memory_space<vmem>>, vector<1x1x64xf32>
    tpu.vector_store %arg3[%c0_4, %c0_5, %c0_6], %5 {strides = array<i32>} : memref<1x1x64xf32, #tpu.memory_space<vmem>>, vector<1x1x64xf32>,
    %7 = arith.mulf %2, %2 : vector<512x64xf32>
    %cst_7 = arith.constant dense<0.000000e+00> : vector<64xf32>
    %8 = vector.multi_reduction <add>, %7, %cst_7 [0] : vector<512x64xf32> to vector<64xf32>
    %9 = vector.shape_cast %8 : vector<64xf32> to vector<1x64xf32>
    %10 = vector.shape_cast %9 : vector<1x64xf32> to vector<1x1x64xf32>
    %c0_8 = arith.constant 0 : index
    %c0_9 = arith.constant 0 : index
    %c0_10 = arith.constant 0 : index
    %11 = vector.load %arg4[%c0_8, %c0_9, %c0_10] : memref<1x1x64xf32, #tpu.memory_space<vmem>>, vector<1x1x64xf32>
    tpu.vector_store %arg4[%c0_8, %c0_9, %c0_10], %10 {strides = array<i32>} : memref<1x1x64xf32, #tpu.memory_space<vmem>>, vector<1x1x64xf32>,
    return
  }
  func.func @transform_0(%arg0: i32) -> (i32, i32) {
    %c0_i32 = arith.constant 0 : i32
    %c0_i32_0 = arith.constant 0 : i32
    return %arg0, %c0_i32 : i32, i32
  }
  func.func @transform_1(%arg0: i32) -> (i32, i32) {
    %c0_i32 = arith.constant 0 : i32
    %c0_i32_0 = arith.constant 0 : i32
    %c0_i32_1 = arith.constant 0 : i32
    return %c0_i32, %c0_i32_0 : i32, i32
  }
  func.func @transform_2(%arg0: i32) -> (i32, i32, i32) {
    %c0_i32 = arith.constant 0 : i32
    %c0_i32_0 = arith.constant 0 : i32
    %c0_i32_1 = arith.constant 0 : i32
    return %arg0, %c0_i32, %c0_i32_0 : i32, i32, i32
  }
  func.func @transform_3(%arg0: i32) -> (i32, i32, i32) {
    %c0_i32 = arith.constant 0 : i32
    %c0_i32_0 = arith.constant 0 : i32
    %c0_i32_1 = arith.constant 0 : i32
    return %arg0, %c0_i32, %c0_i32_0 : i32, i32, i32
  }
}

module attributes {stable_mosaic.version = 11 : i64} {
  func.func @_stats2_kernel(%arg0: i32, %arg1: memref<512x8xf32, #tpu.memory_space<vmem>>, %arg2: memref<1x64xf32, #tpu.memory_space<vmem>>, %arg3: memref<1x64xf32, #tpu.memory_space<vmem>>, %arg4: memref<8x64xf32, #tpu.memory_space<vmem>>, %arg5: memref<64x128xf32, #tpu.memory_space<vmem>>, %arg6: memref<1x1x128xf32, #tpu.memory_space<vmem>>, %arg7: memref<1x1x128xf32, #tpu.memory_space<vmem>>) attributes {dimension_semantics = [#tpu.dimension_semantics<parallel>], iteration_bounds = array<i64: 4>, scalar_prefetch = 0 : i64, scratch_operands = 0 : i64, tpu.core_type = #tpu.core_type<tc>, window_params = [{transform_indices = @transform_0, window_bounds = array<i64: 512, 8>}, {pipeline_mode = #tpu.pipeline_mode<synchronous>, transform_indices = @transform_1, window_bounds = array<i64: 1, 64>}, {pipeline_mode = #tpu.pipeline_mode<synchronous>, transform_indices = @transform_2, window_bounds = array<i64: 1, 64>}, {pipeline_mode = #tpu.pipeline_mode<synchronous>, transform_indices = @transform_3, window_bounds = array<i64: 8, 64>}, {pipeline_mode = #tpu.pipeline_mode<synchronous>, transform_indices = @transform_4, window_bounds = array<i64: 64, 128>}, {transform_indices = @transform_5, window_bounds = array<i64: 1, 1, 128>}, {transform_indices = @transform_6, window_bounds = array<i64: 1, 1, 128>}]} {
    %c0 = arith.constant 0 : index
    %c0_0 = arith.constant 0 : index
    %0 = vector.load %arg1[%c0, %c0_0] : memref<512x8xf32, #tpu.memory_space<vmem>>, vector<512x8xf32>
    %c0_1 = arith.constant 0 : index
    %c0_2 = arith.constant 0 : index
    %1 = vector.load %arg4[%c0_1, %c0_2] : memref<8x64xf32, #tpu.memory_space<vmem>>, vector<8x64xf32>
    %cst = arith.constant dense<0.000000e+00> : vector<512x64xf32>
    %2 = tpu.matmul %0, %1, %cst {dimension_numbers = #tpu.dot_dimension_numbers<[1], [0], [0], [1], [0, 0, 1, 1], [], []>} : vector<512x8xf32>, vector<8x64xf32>, vector<512x64xf32> -> vector<512x64xf32>
    %c0_3 = arith.constant 0 : index
    %c0_4 = arith.constant 0 : index
    %3 = vector.load %arg2[%c0_3, %c0_4] : memref<1x64xf32, #tpu.memory_space<vmem>>, vector<1x64xf32>
    %4 = vector.broadcast %3 : vector<1x64xf32> to vector<512x64xf32>
    %5 = arith.mulf %2, %4 : vector<512x64xf32>
    %c0_5 = arith.constant 0 : index
    %c0_6 = arith.constant 0 : index
    %6 = vector.load %arg3[%c0_5, %c0_6] : memref<1x64xf32, #tpu.memory_space<vmem>>, vector<1x64xf32>
    %7 = vector.broadcast %6 : vector<1x64xf32> to vector<512x64xf32>
    %8 = arith.addf %5, %7 : vector<512x64xf32>
    %cst_7 = arith.constant 0.000000e+00 : f32
    %9 = vector.broadcast %cst_7 : f32 to vector<512x64xf32>
    %10 = arith.maximumf %8, %9 : vector<512x64xf32>
    %c0_8 = arith.constant 0 : index
    %c0_9 = arith.constant 0 : index
    %11 = vector.load %arg5[%c0_8, %c0_9] : memref<64x128xf32, #tpu.memory_space<vmem>>, vector<64x128xf32>
    %cst_10 = arith.constant dense<0.000000e+00> : vector<512x128xf32>
    %12 = tpu.matmul %10, %11, %cst_10 {dimension_numbers = #tpu.dot_dimension_numbers<[1], [0], [0], [1], [0, 0, 1, 1], [], []>} : vector<512x64xf32>, vector<64x128xf32>, vector<512x128xf32> -> vector<512x128xf32>
    %cst_11 = arith.constant dense<0.000000e+00> : vector<128xf32>
    %13 = vector.multi_reduction <add>, %12, %cst_11 [0] : vector<512x128xf32> to vector<128xf32>
    %14 = vector.shape_cast %13 : vector<128xf32> to vector<1x128xf32>
    %15 = vector.shape_cast %14 : vector<1x128xf32> to vector<1x1x128xf32>
    %c0_12 = arith.constant 0 : index
    %c0_13 = arith.constant 0 : index
    %c0_14 = arith.constant 0 : index
    %16 = vector.load %arg6[%c0_12, %c0_13, %c0_14] : memref<1x1x128xf32, #tpu.memory_space<vmem>>, vector<1x1x128xf32>
    tpu.vector_store %arg6[%c0_12, %c0_13, %c0_14], %15 {strides = array<i32>} : memref<1x1x128xf32, #tpu.memory_space<vmem>>, vector<1x1x128xf32>,
    %17 = arith.mulf %12, %12 : vector<512x128xf32>
    %cst_15 = arith.constant dense<0.000000e+00> : vector<128xf32>
    %18 = vector.multi_reduction <add>, %17, %cst_15 [0] : vector<512x128xf32> to vector<128xf32>
    %19 = vector.shape_cast %18 : vector<128xf32> to vector<1x128xf32>
    %20 = vector.shape_cast %19 : vector<1x128xf32> to vector<1x1x128xf32>
    %c0_16 = arith.constant 0 : index
    %c0_17 = arith.constant 0 : index
    %c0_18 = arith.constant 0 : index
    %21 = vector.load %arg7[%c0_16, %c0_17, %c0_18] : memref<1x1x128xf32, #tpu.memory_space<vmem>>, vector<1x1x128xf32>
    tpu.vector_store %arg7[%c0_16, %c0_17, %c0_18], %20 {strides = array<i32>} : memref<1x1x128xf32, #tpu.memory_space<vmem>>, vector<1x1x128xf32>,
    return
  }
  func.func @transform_0(%arg0: i32) -> (i32, i32) {
    %c0_i32 = arith.constant 0 : i32
    %c0_i32_0 = arith.constant 0 : i32
    return %arg0, %c0_i32 : i32, i32
  }
  func.func @transform_1(%arg0: i32) -> (i32, i32) {
    %c0_i32 = arith.constant 0 : i32
    %c0_i32_0 = arith.constant 0 : i32
    %c0_i32_1 = arith.constant 0 : i32
    return %c0_i32, %c0_i32_0 : i32, i32
  }
  func.func @transform_2(%arg0: i32) -> (i32, i32) {
    %c0_i32 = arith.constant 0 : i32
    %c0_i32_0 = arith.constant 0 : i32
    %c0_i32_1 = arith.constant 0 : i32
    return %c0_i32, %c0_i32_0 : i32, i32
  }
  func.func @transform_3(%arg0: i32) -> (i32, i32) {
    %c0_i32 = arith.constant 0 : i32
    %c0_i32_0 = arith.constant 0 : i32
    %c0_i32_1 = arith.constant 0 : i32
    return %c0_i32, %c0_i32_0 : i32, i32
  }
  func.func @transform_4(%arg0: i32) -> (i32, i32) {
    %c0_i32 = arith.constant 0 : i32
    %c0_i32_0 = arith.constant 0 : i32
    %c0_i32_1 = arith.constant 0 : i32
    return %c0_i32, %c0_i32_0 : i32, i32
  }
  func.func @transform_5(%arg0: i32) -> (i32, i32, i32) {
    %c0_i32 = arith.constant 0 : i32
    %c0_i32_0 = arith.constant 0 : i32
    %c0_i32_1 = arith.constant 0 : i32
    return %arg0, %c0_i32, %c0_i32_0 : i32, i32, i32
  }
  func.func @transform_6(%arg0: i32) -> (i32, i32, i32) {
    %c0_i32 = arith.constant 0 : i32
    %c0_i32_0 = arith.constant 0 : i32
    %c0_i32_1 = arith.constant 0 : i32
    return %arg0, %c0_i32, %c0_i32_0 : i32, i32, i32
  }
}

module attributes {stable_mosaic.version = 11 : i64} {
  func.func @_conv3_pool_kernel(%arg0: i32, %arg1: i32, %arg2: memref<1x64x8xf32, #tpu.memory_space<vmem>>, %arg3: memref<1x64xf32, #tpu.memory_space<vmem>>, %arg4: memref<1x64xf32, #tpu.memory_space<vmem>>, %arg5: memref<1x128xf32, #tpu.memory_space<vmem>>, %arg6: memref<1x128xf32, #tpu.memory_space<vmem>>, %arg7: memref<8x64xf32, #tpu.memory_space<vmem>>, %arg8: memref<64x128xf32, #tpu.memory_space<vmem>>, %arg9: memref<128x1024xf32, #tpu.memory_space<vmem>>, %arg10: memref<1x1x1024xf32, #tpu.memory_space<vmem>>, %arg11: memref<1x1x1024xf32, #tpu.memory_space<vmem>>, %arg12: memref<1x1x1024xf32, #tpu.memory_space<vmem>>, %arg13: memref<1x1x1024xf32, #tpu.memory_space<vmem>>) attributes {dimension_semantics = [#tpu.dimension_semantics<parallel>, #tpu.dimension_semantics<arbitrary>], iteration_bounds = array<i64: 8, 4>, scalar_prefetch = 0 : i64, scratch_operands = 0 : i64, tpu.core_type = #tpu.core_type<tc>, window_params = [{transform_indices = @transform_0, window_bounds = array<i64: 1, 64, 8>}, {pipeline_mode = #tpu.pipeline_mode<synchronous>, transform_indices = @transform_1, window_bounds = array<i64: 1, 64>}, {pipeline_mode = #tpu.pipeline_mode<synchronous>, transform_indices = @transform_2, window_bounds = array<i64: 1, 64>}, {pipeline_mode = #tpu.pipeline_mode<synchronous>, transform_indices = @transform_3, window_bounds = array<i64: 1, 128>}, {pipeline_mode = #tpu.pipeline_mode<synchronous>, transform_indices = @transform_4, window_bounds = array<i64: 1, 128>}, {pipeline_mode = #tpu.pipeline_mode<synchronous>, transform_indices = @transform_5, window_bounds = array<i64: 8, 64>}, {pipeline_mode = #tpu.pipeline_mode<synchronous>, transform_indices = @transform_6, window_bounds = array<i64: 64, 128>}, {pipeline_mode = #tpu.pipeline_mode<synchronous>, transform_indices = @transform_7, window_bounds = array<i64: 128, 1024>}, {transform_indices = @transform_8, window_bounds = array<i64: 1, 1, 1024>}, {transform_indices = @transform_9, window_bounds = array<i64: 1, 1, 1024>}, {transform_indices = @transform_10, window_bounds = array<i64: 1, 1, 1024>}, {transform_indices = @transform_11, window_bounds = array<i64: 1, 1, 1024>}]} {
    %c0 = arith.constant 0 : index
    %c0_0 = arith.constant 0 : index
    %c0_1 = arith.constant 0 : index
    %0 = vector.load %arg2[%c0, %c0_0, %c0_1] : memref<1x64x8xf32, #tpu.memory_space<vmem>>, vector<1x64x8xf32>
    %1 = vector.shape_cast %0 : vector<1x64x8xf32> to vector<64x8xf32>
    %c0_2 = arith.constant 0 : index
    %c0_3 = arith.constant 0 : index
    %2 = vector.load %arg7[%c0_2, %c0_3] : memref<8x64xf32, #tpu.memory_space<vmem>>, vector<8x64xf32>
    %cst = arith.constant dense<0.000000e+00> : vector<64x64xf32>
    %3 = tpu.matmul %1, %2, %cst {dimension_numbers = #tpu.dot_dimension_numbers<[1], [0], [0], [1], [0, 0, 1, 1], [], []>} : vector<64x8xf32>, vector<8x64xf32>, vector<64x64xf32> -> vector<64x64xf32>
    %c0_4 = arith.constant 0 : index
    %c0_5 = arith.constant 0 : index
    %4 = vector.load %arg3[%c0_4, %c0_5] : memref<1x64xf32, #tpu.memory_space<vmem>>, vector<1x64xf32>
    %5 = vector.broadcast %4 : vector<1x64xf32> to vector<64x64xf32>
    %6 = arith.mulf %3, %5 : vector<64x64xf32>
    %c0_6 = arith.constant 0 : index
    %c0_7 = arith.constant 0 : index
    %7 = vector.load %arg4[%c0_6, %c0_7] : memref<1x64xf32, #tpu.memory_space<vmem>>, vector<1x64xf32>
    %8 = vector.broadcast %7 : vector<1x64xf32> to vector<64x64xf32>
    %9 = arith.addf %6, %8 : vector<64x64xf32>
    %cst_8 = arith.constant 0.000000e+00 : f32
    %10 = vector.broadcast %cst_8 : f32 to vector<64x64xf32>
    %11 = arith.maximumf %9, %10 : vector<64x64xf32>
    %c0_9 = arith.constant 0 : index
    %c0_10 = arith.constant 0 : index
    %12 = vector.load %arg8[%c0_9, %c0_10] : memref<64x128xf32, #tpu.memory_space<vmem>>, vector<64x128xf32>
    %cst_11 = arith.constant dense<0.000000e+00> : vector<64x128xf32>
    %13 = tpu.matmul %11, %12, %cst_11 {dimension_numbers = #tpu.dot_dimension_numbers<[1], [0], [0], [1], [0, 0, 1, 1], [], []>} : vector<64x64xf32>, vector<64x128xf32>, vector<64x128xf32> -> vector<64x128xf32>
    %c0_12 = arith.constant 0 : index
    %c0_13 = arith.constant 0 : index
    %14 = vector.load %arg5[%c0_12, %c0_13] : memref<1x128xf32, #tpu.memory_space<vmem>>, vector<1x128xf32>
    %15 = vector.broadcast %14 : vector<1x128xf32> to vector<64x128xf32>
    %16 = arith.mulf %13, %15 : vector<64x128xf32>
    %c0_14 = arith.constant 0 : index
    %c0_15 = arith.constant 0 : index
    %17 = vector.load %arg6[%c0_14, %c0_15] : memref<1x128xf32, #tpu.memory_space<vmem>>, vector<1x128xf32>
    %18 = vector.broadcast %17 : vector<1x128xf32> to vector<64x128xf32>
    %19 = arith.addf %16, %18 : vector<64x128xf32>
    %cst_16 = arith.constant 0.000000e+00 : f32
    %20 = vector.broadcast %cst_16 : f32 to vector<64x128xf32>
    %21 = arith.maximumf %19, %20 : vector<64x128xf32>
    %c0_17 = arith.constant 0 : index
    %c0_18 = arith.constant 0 : index
    %22 = vector.load %arg9[%c0_17, %c0_18] : memref<128x1024xf32, #tpu.memory_space<vmem>>, vector<128x1024xf32>
    %cst_19 = arith.constant dense<0.000000e+00> : vector<64x1024xf32>
    %23 = tpu.matmul %21, %22, %cst_19 {dimension_numbers = #tpu.dot_dimension_numbers<[1], [0], [0], [1], [0, 0, 1, 1], [], []>} : vector<64x128xf32>, vector<128x1024xf32>, vector<64x1024xf32> -> vector<64x1024xf32>
    %cst_20 = arith.constant dense<0.000000e+00> : vector<1024xf32>
    %24 = vector.multi_reduction <add>, %23, %cst_20 [0] : vector<64x1024xf32> to vector<1024xf32>
    %25 = vector.shape_cast %24 : vector<1024xf32> to vector<1x1024xf32>
    %26 = vector.shape_cast %25 : vector<1x1024xf32> to vector<1x1x1024xf32>
    %27 = arith.mulf %23, %23 : vector<64x1024xf32>
    %cst_21 = arith.constant dense<0.000000e+00> : vector<1024xf32>
    %28 = vector.multi_reduction <add>, %27, %cst_21 [0] : vector<64x1024xf32> to vector<1024xf32>
    %29 = vector.shape_cast %28 : vector<1024xf32> to vector<1x1024xf32>
    %30 = vector.shape_cast %29 : vector<1x1024xf32> to vector<1x1x1024xf32>
    %cst_22 = arith.constant dense<0xFF800000> : vector<1024xf32>
    %31 = vector.multi_reduction <maximumf>, %23, %cst_22 [0] : vector<64x1024xf32> to vector<1024xf32>
    %32 = vector.shape_cast %31 : vector<1024xf32> to vector<1x1024xf32>
    %33 = vector.shape_cast %32 : vector<1x1024xf32> to vector<1x1x1024xf32>
    %cst_23 = arith.constant dense<0x7F800000> : vector<1024xf32>
    %34 = vector.multi_reduction <minimumf>, %23, %cst_23 [0] : vector<64x1024xf32> to vector<1024xf32>
    %35 = vector.shape_cast %34 : vector<1024xf32> to vector<1x1024xf32>
    %36 = vector.shape_cast %35 : vector<1x1024xf32> to vector<1x1x1024xf32>
    %c0_i32 = arith.constant 0 : i32
    %37 = arith.cmpi eq, %arg1, %c0_i32 : i32
    %38 = arith.extui %37 : i1 to i32
    %c0_i32_24 = arith.constant 0 : i32
    %39 = arith.cmpi ne, %38, %c0_i32_24 : i32
    scf.if %39 {
      %c0_27 = arith.constant 0 : index
      %c0_28 = arith.constant 0 : index
      %c0_29 = arith.constant 0 : index
      %43 = vector.load %arg10[%c0_27, %c0_28, %c0_29] : memref<1x1x1024xf32, #tpu.memory_space<vmem>>, vector<1x1x1024xf32>
      tpu.vector_store %arg10[%c0_27, %c0_28, %c0_29], %26 {strides = array<i32>} : memref<1x1x1024xf32, #tpu.memory_space<vmem>>, vector<1x1x1024xf32>,
      %c0_30 = arith.constant 0 : index
      %c0_31 = arith.constant 0 : index
      %c0_32 = arith.constant 0 : index
      %44 = vector.load %arg11[%c0_30, %c0_31, %c0_32] : memref<1x1x1024xf32, #tpu.memory_space<vmem>>, vector<1x1x1024xf32>
      tpu.vector_store %arg11[%c0_30, %c0_31, %c0_32], %30 {strides = array<i32>} : memref<1x1x1024xf32, #tpu.memory_space<vmem>>, vector<1x1x1024xf32>,
      %c0_33 = arith.constant 0 : index
      %c0_34 = arith.constant 0 : index
      %c0_35 = arith.constant 0 : index
      %45 = vector.load %arg12[%c0_33, %c0_34, %c0_35] : memref<1x1x1024xf32, #tpu.memory_space<vmem>>, vector<1x1x1024xf32>
      tpu.vector_store %arg12[%c0_33, %c0_34, %c0_35], %33 {strides = array<i32>} : memref<1x1x1024xf32, #tpu.memory_space<vmem>>, vector<1x1x1024xf32>,
      %c0_36 = arith.constant 0 : index
      %c0_37 = arith.constant 0 : index
      %c0_38 = arith.constant 0 : index
      %46 = vector.load %arg13[%c0_36, %c0_37, %c0_38] : memref<1x1x1024xf32, #tpu.memory_space<vmem>>, vector<1x1x1024xf32>
      tpu.vector_store %arg13[%c0_36, %c0_37, %c0_38], %36 {strides = array<i32>} : memref<1x1x1024xf32, #tpu.memory_space<vmem>>, vector<1x1x1024xf32>,
    } else {
    }
    %c0_i32_25 = arith.constant 0 : i32
    %40 = arith.cmpi sgt, %arg1, %c0_i32_25 : i32
    %41 = arith.extui %40 : i1 to i32
    %c0_i32_26 = arith.constant 0 : i32
    %42 = arith.cmpi ne, %41, %c0_i32_26 : i32
    scf.if %42 {
      %c0_27 = arith.constant 0 : index
      %c0_28 = arith.constant 0 : index
      %c0_29 = arith.constant 0 : index
      %43 = vector.load %arg10[%c0_27, %c0_28, %c0_29] : memref<1x1x1024xf32, #tpu.memory_space<vmem>>, vector<1x1x1024xf32>
      %44 = arith.addf %43, %26 : vector<1x1x1024xf32>
      %c0_30 = arith.constant 0 : index
      %c0_31 = arith.constant 0 : index
      %c0_32 = arith.constant 0 : index
      %45 = vector.load %arg10[%c0_30, %c0_31, %c0_32] : memref<1x1x1024xf32, #tpu.memory_space<vmem>>, vector<1x1x1024xf32>
      tpu.vector_store %arg10[%c0_30, %c0_31, %c0_32], %44 {strides = array<i32>} : memref<1x1x1024xf32, #tpu.memory_space<vmem>>, vector<1x1x1024xf32>,
      %c0_33 = arith.constant 0 : index
      %c0_34 = arith.constant 0 : index
      %c0_35 = arith.constant 0 : index
      %46 = vector.load %arg11[%c0_33, %c0_34, %c0_35] : memref<1x1x1024xf32, #tpu.memory_space<vmem>>, vector<1x1x1024xf32>
      %47 = arith.addf %46, %30 : vector<1x1x1024xf32>
      %c0_36 = arith.constant 0 : index
      %c0_37 = arith.constant 0 : index
      %c0_38 = arith.constant 0 : index
      %48 = vector.load %arg11[%c0_36, %c0_37, %c0_38] : memref<1x1x1024xf32, #tpu.memory_space<vmem>>, vector<1x1x1024xf32>
      tpu.vector_store %arg11[%c0_36, %c0_37, %c0_38], %47 {strides = array<i32>} : memref<1x1x1024xf32, #tpu.memory_space<vmem>>, vector<1x1x1024xf32>,
      %c0_39 = arith.constant 0 : index
      %c0_40 = arith.constant 0 : index
      %c0_41 = arith.constant 0 : index
      %49 = vector.load %arg12[%c0_39, %c0_40, %c0_41] : memref<1x1x1024xf32, #tpu.memory_space<vmem>>, vector<1x1x1024xf32>
      %50 = arith.maximumf %49, %33 : vector<1x1x1024xf32>
      %c0_42 = arith.constant 0 : index
      %c0_43 = arith.constant 0 : index
      %c0_44 = arith.constant 0 : index
      %51 = vector.load %arg12[%c0_42, %c0_43, %c0_44] : memref<1x1x1024xf32, #tpu.memory_space<vmem>>, vector<1x1x1024xf32>
      tpu.vector_store %arg12[%c0_42, %c0_43, %c0_44], %50 {strides = array<i32>} : memref<1x1x1024xf32, #tpu.memory_space<vmem>>, vector<1x1x1024xf32>,
      %c0_45 = arith.constant 0 : index
      %c0_46 = arith.constant 0 : index
      %c0_47 = arith.constant 0 : index
      %52 = vector.load %arg13[%c0_45, %c0_46, %c0_47] : memref<1x1x1024xf32, #tpu.memory_space<vmem>>, vector<1x1x1024xf32>
      %53 = arith.minimumf %52, %36 : vector<1x1x1024xf32>
      %c0_48 = arith.constant 0 : index
      %c0_49 = arith.constant 0 : index
      %c0_50 = arith.constant 0 : index
      %54 = vector.load %arg13[%c0_48, %c0_49, %c0_50] : memref<1x1x1024xf32, #tpu.memory_space<vmem>>, vector<1x1x1024xf32>
      tpu.vector_store %arg13[%c0_48, %c0_49, %c0_50], %53 {strides = array<i32>} : memref<1x1x1024xf32, #tpu.memory_space<vmem>>, vector<1x1x1024xf32>,
    } else {
    }
    return
  }
  func.func @transform_0(%arg0: i32, %arg1: i32) -> (i32, i32, i32) {
    %c0_i32 = arith.constant 0 : i32
    %c0_i32_0 = arith.constant 0 : i32
    return %arg0, %arg1, %c0_i32 : i32, i32, i32
  }
  func.func @transform_1(%arg0: i32, %arg1: i32) -> (i32, i32) {
    %c0_i32 = arith.constant 0 : i32
    %c0_i32_0 = arith.constant 0 : i32
    %c0_i32_1 = arith.constant 0 : i32
    return %c0_i32, %c0_i32_0 : i32, i32
  }
  func.func @transform_2(%arg0: i32, %arg1: i32) -> (i32, i32) {
    %c0_i32 = arith.constant 0 : i32
    %c0_i32_0 = arith.constant 0 : i32
    %c0_i32_1 = arith.constant 0 : i32
    return %c0_i32, %c0_i32_0 : i32, i32
  }
  func.func @transform_3(%arg0: i32, %arg1: i32) -> (i32, i32) {
    %c0_i32 = arith.constant 0 : i32
    %c0_i32_0 = arith.constant 0 : i32
    %c0_i32_1 = arith.constant 0 : i32
    return %c0_i32, %c0_i32_0 : i32, i32
  }
  func.func @transform_4(%arg0: i32, %arg1: i32) -> (i32, i32) {
    %c0_i32 = arith.constant 0 : i32
    %c0_i32_0 = arith.constant 0 : i32
    %c0_i32_1 = arith.constant 0 : i32
    return %c0_i32, %c0_i32_0 : i32, i32
  }
  func.func @transform_5(%arg0: i32, %arg1: i32) -> (i32, i32) {
    %c0_i32 = arith.constant 0 : i32
    %c0_i32_0 = arith.constant 0 : i32
    %c0_i32_1 = arith.constant 0 : i32
    return %c0_i32, %c0_i32_0 : i32, i32
  }
  func.func @transform_6(%arg0: i32, %arg1: i32) -> (i32, i32) {
    %c0_i32 = arith.constant 0 : i32
    %c0_i32_0 = arith.constant 0 : i32
    %c0_i32_1 = arith.constant 0 : i32
    return %c0_i32, %c0_i32_0 : i32, i32
  }
  func.func @transform_7(%arg0: i32, %arg1: i32) -> (i32, i32) {
    %c0_i32 = arith.constant 0 : i32
    %c0_i32_0 = arith.constant 0 : i32
    %c0_i32_1 = arith.constant 0 : i32
    return %c0_i32, %c0_i32_0 : i32, i32
  }
  func.func @transform_8(%arg0: i32, %arg1: i32) -> (i32, i32, i32) {
    %c0_i32 = arith.constant 0 : i32
    %c0_i32_0 = arith.constant 0 : i32
    %c0_i32_1 = arith.constant 0 : i32
    return %arg0, %c0_i32, %c0_i32_0 : i32, i32, i32
  }
  func.func @transform_9(%arg0: i32, %arg1: i32) -> (i32, i32, i32) {
    %c0_i32 = arith.constant 0 : i32
    %c0_i32_0 = arith.constant 0 : i32
    %c0_i32_1 = arith.constant 0 : i32
    return %arg0, %c0_i32, %c0_i32_0 : i32, i32, i32
  }
  func.func @transform_10(%arg0: i32, %arg1: i32) -> (i32, i32, i32) {
    %c0_i32 = arith.constant 0 : i32
    %c0_i32_0 = arith.constant 0 : i32
    %c0_i32_1 = arith.constant 0 : i32
    return %arg0, %c0_i32, %c0_i32_0 : i32, i32, i32
  }
  func.func @transform_11(%arg0: i32, %arg1: i32) -> (i32, i32, i32) {
    %c0_i32 = arith.constant 0 : i32
    %c0_i32_0 = arith.constant 0 : i32
    %c0_i32_1 = arith.constant 0 : i32
    return %arg0, %c0_i32, %c0_i32_0 : i32, i32, i32
  }
}

module attributes {stable_mosaic.version = 11 : i64} {
  func.func @_fc_head_kernel(%arg0: memref<8x1024xf32, #tpu.memory_space<vmem>>, %arg1: memref<1024x512xf32, #tpu.memory_space<vmem>>, %arg2: memref<1x512xf32, #tpu.memory_space<vmem>>, %arg3: memref<1x512xf32, #tpu.memory_space<vmem>>, %arg4: memref<512x256xf32, #tpu.memory_space<vmem>>, %arg5: memref<1x256xf32, #tpu.memory_space<vmem>>, %arg6: memref<1x256xf32, #tpu.memory_space<vmem>>, %arg7: memref<256x128xf32, #tpu.memory_space<vmem>>, %arg8: memref<1x128xf32, #tpu.memory_space<vmem>>, %arg9: memref<1x128xf32, #tpu.memory_space<vmem>>, %arg10: memref<8x128xf32, #tpu.memory_space<vmem>>) attributes {dimension_semantics = [], scalar_prefetch = 0 : i64, scratch_operands = 0 : i64, tpu.core_type = #tpu.core_type<tc>} {
    %c0 = arith.constant 0 : index
    %c0_0 = arith.constant 0 : index
    %0 = vector.load %arg0[%c0, %c0_0] : memref<8x1024xf32, #tpu.memory_space<vmem>>, vector<8x1024xf32>
    %c0_1 = arith.constant 0 : index
    %c0_2 = arith.constant 0 : index
    %1 = vector.load %arg1[%c0_1, %c0_2] : memref<1024x512xf32, #tpu.memory_space<vmem>>, vector<1024x512xf32>
    %cst = arith.constant dense<0.000000e+00> : vector<8x512xf32>
    %2 = tpu.matmul %0, %1, %cst {dimension_numbers = #tpu.dot_dimension_numbers<[1], [0], [0], [1], [0, 0, 1, 1], [], []>} : vector<8x1024xf32>, vector<1024x512xf32>, vector<8x512xf32> -> vector<8x512xf32>
    %c0_3 = arith.constant 0 : index
    %c0_4 = arith.constant 0 : index
    %3 = vector.load %arg2[%c0_3, %c0_4] : memref<1x512xf32, #tpu.memory_space<vmem>>, vector<1x512xf32>
    %c0_5 = arith.constant 0 : index
    %c0_6 = arith.constant 0 : index
    %4 = vector.load %arg3[%c0_5, %c0_6] : memref<1x512xf32, #tpu.memory_space<vmem>>, vector<1x512xf32>
    %cst_7 = arith.constant dense<0.000000e+00> : vector<512xf32>
    %5 = vector.multi_reduction <add>, %2, %cst_7 [0] : vector<8x512xf32> to vector<512xf32>
    %6 = vector.shape_cast %5 : vector<512xf32> to vector<1x512xf32>
    %cst_8 = arith.constant 8.000000e+00 : f32
    %7 = vector.broadcast %cst_8 : f32 to vector<1x512xf32>
    %8 = arith.divf %6, %7 : vector<1x512xf32>
    %9 = vector.broadcast %8 : vector<1x512xf32> to vector<8x512xf32>
    %10 = arith.subf %2, %9 : vector<8x512xf32>
    %11 = arith.mulf %10, %10 : vector<8x512xf32>
    %cst_9 = arith.constant dense<0.000000e+00> : vector<512xf32>
    %12 = vector.multi_reduction <add>, %11, %cst_9 [0] : vector<8x512xf32> to vector<512xf32>
    %13 = vector.shape_cast %12 : vector<512xf32> to vector<1x512xf32>
    %cst_10 = arith.constant 8.000000e+00 : f32
    %14 = vector.broadcast %cst_10 : f32 to vector<1x512xf32>
    %15 = arith.divf %13, %14 : vector<1x512xf32>
    %16 = vector.broadcast %8 : vector<1x512xf32> to vector<8x512xf32>
    %17 = arith.subf %2, %16 : vector<8x512xf32>
    %cst_11 = arith.constant 9.99999974E-6 : f32
    %18 = vector.broadcast %cst_11 : f32 to vector<1x512xf32>
    %19 = arith.addf %15, %18 : vector<1x512xf32>
    %20 = math.rsqrt %19 : vector<1x512xf32>
    %21 = vector.broadcast %20 : vector<1x512xf32> to vector<8x512xf32>
    %22 = arith.mulf %17, %21 : vector<8x512xf32>
    %23 = vector.broadcast %3 : vector<1x512xf32> to vector<8x512xf32>
    %24 = arith.mulf %22, %23 : vector<8x512xf32>
    %25 = vector.broadcast %4 : vector<1x512xf32> to vector<8x512xf32>
    %26 = arith.addf %24, %25 : vector<8x512xf32>
    %cst_12 = arith.constant 0.000000e+00 : f32
    %27 = vector.broadcast %cst_12 : f32 to vector<8x512xf32>
    %28 = arith.maximumf %26, %27 : vector<8x512xf32>
    %c0_13 = arith.constant 0 : index
    %c0_14 = arith.constant 0 : index
    %29 = vector.load %arg4[%c0_13, %c0_14] : memref<512x256xf32, #tpu.memory_space<vmem>>, vector<512x256xf32>
    %cst_15 = arith.constant dense<0.000000e+00> : vector<8x256xf32>
    %30 = tpu.matmul %28, %29, %cst_15 {dimension_numbers = #tpu.dot_dimension_numbers<[1], [0], [0], [1], [0, 0, 1, 1], [], []>} : vector<8x512xf32>, vector<512x256xf32>, vector<8x256xf32> -> vector<8x256xf32>
    %c0_16 = arith.constant 0 : index
    %c0_17 = arith.constant 0 : index
    %31 = vector.load %arg5[%c0_16, %c0_17] : memref<1x256xf32, #tpu.memory_space<vmem>>, vector<1x256xf32>
    %c0_18 = arith.constant 0 : index
    %c0_19 = arith.constant 0 : index
    %32 = vector.load %arg6[%c0_18, %c0_19] : memref<1x256xf32, #tpu.memory_space<vmem>>, vector<1x256xf32>
    %cst_20 = arith.constant dense<0.000000e+00> : vector<256xf32>
    %33 = vector.multi_reduction <add>, %30, %cst_20 [0] : vector<8x256xf32> to vector<256xf32>
    %34 = vector.shape_cast %33 : vector<256xf32> to vector<1x256xf32>
    %cst_21 = arith.constant 8.000000e+00 : f32
    %35 = vector.broadcast %cst_21 : f32 to vector<1x256xf32>
    %36 = arith.divf %34, %35 : vector<1x256xf32>
    %37 = vector.broadcast %36 : vector<1x256xf32> to vector<8x256xf32>
    %38 = arith.subf %30, %37 : vector<8x256xf32>
    %39 = arith.mulf %38, %38 : vector<8x256xf32>
    %cst_22 = arith.constant dense<0.000000e+00> : vector<256xf32>
    %40 = vector.multi_reduction <add>, %39, %cst_22 [0] : vector<8x256xf32> to vector<256xf32>
    %41 = vector.shape_cast %40 : vector<256xf32> to vector<1x256xf32>
    %cst_23 = arith.constant 8.000000e+00 : f32
    %42 = vector.broadcast %cst_23 : f32 to vector<1x256xf32>
    %43 = arith.divf %41, %42 : vector<1x256xf32>
    %44 = vector.broadcast %36 : vector<1x256xf32> to vector<8x256xf32>
    %45 = arith.subf %30, %44 : vector<8x256xf32>
    %cst_24 = arith.constant 9.99999974E-6 : f32
    %46 = vector.broadcast %cst_24 : f32 to vector<1x256xf32>
    %47 = arith.addf %43, %46 : vector<1x256xf32>
    %48 = math.rsqrt %47 : vector<1x256xf32>
    %49 = vector.broadcast %48 : vector<1x256xf32> to vector<8x256xf32>
    %50 = arith.mulf %45, %49 : vector<8x256xf32>
    %51 = vector.broadcast %31 : vector<1x256xf32> to vector<8x256xf32>
    %52 = arith.mulf %50, %51 : vector<8x256xf32>
    %53 = vector.broadcast %32 : vector<1x256xf32> to vector<8x256xf32>
    %54 = arith.addf %52, %53 : vector<8x256xf32>
    %cst_25 = arith.constant 0.000000e+00 : f32
    %55 = vector.broadcast %cst_25 : f32 to vector<8x256xf32>
    %56 = arith.maximumf %54, %55 : vector<8x256xf32>
    %c0_26 = arith.constant 0 : index
    %c0_27 = arith.constant 0 : index
    %57 = vector.load %arg7[%c0_26, %c0_27] : memref<256x128xf32, #tpu.memory_space<vmem>>, vector<256x128xf32>
    %cst_28 = arith.constant dense<0.000000e+00> : vector<8x128xf32>
    %58 = tpu.matmul %56, %57, %cst_28 {dimension_numbers = #tpu.dot_dimension_numbers<[1], [0], [0], [1], [0, 0, 1, 1], [], []>} : vector<8x256xf32>, vector<256x128xf32>, vector<8x128xf32> -> vector<8x128xf32>
    %c0_29 = arith.constant 0 : index
    %c0_30 = arith.constant 0 : index
    %59 = vector.load %arg8[%c0_29, %c0_30] : memref<1x128xf32, #tpu.memory_space<vmem>>, vector<1x128xf32>
    %60 = vector.broadcast %59 : vector<1x128xf32> to vector<8x128xf32>
    %61 = arith.addf %58, %60 : vector<8x128xf32>
    %c0_31 = arith.constant 0 : index
    %c0_32 = arith.constant 0 : index
    %62 = vector.load %arg9[%c0_31, %c0_32] : memref<1x128xf32, #tpu.memory_space<vmem>>, vector<1x128xf32>
    %63 = vector.broadcast %62 : vector<1x128xf32> to vector<8x128xf32>
    %64 = arith.addf %61, %63 : vector<8x128xf32>
    %c0_33 = arith.constant 0 : index
    %c0_34 = arith.constant 0 : index
    %65 = vector.load %arg10[%c0_33, %c0_34] : memref<8x128xf32, #tpu.memory_space<vmem>>, vector<8x128xf32>
    tpu.vector_store %arg10[%c0_33, %c0_34], %64 {strides = array<i32>} : memref<8x128xf32, #tpu.memory_space<vmem>>, vector<8x128xf32>,
    return
  }
}

</mosaic_0001>

<bundles_post_ra>
// kernel: stn3d_forward.4
= control target key start
LH: loop header
LB: loop body
LE: loop exit
PB: predicated region body
PF: predicated region fallthrough
CT: control target
= control target key end

     0   :  { %s1163_s12 = smov 0   ;;  %s1649_s0 = inlined_call_operand.vmem [shape: f32[2048,8], index: 0, kind: input, shape index: {}]   ;;  %s1650_s1 = inlined_call_operand.vmem [shape: f32[8,64], index: 1, kind: input, shape index: {}]   ;;  %s1651_s2 = inlined_call_operand.vmem [shape: f32[4,1,64], index: 2, kind: output, shape index: {0}]   ;;  %s1652_s3 = inlined_call_operand.vmem [shape: f32[4,1,64], index: 3, kind: output, shape index: {1}]  }
   0x1 LB: > { %s1169_s13 = sadd.s32 4294967295, %s1141_s12   ;;  %p1055_p0 = scmp.ge.s32.totalorder %s1141_s12, 1  ;;  %s1141_s12 = sphi %s1163_s12, %s14_s12  }
   0x2   : > { %p141_p1 = scmp.lt.s32.totalorder %s1141_s12, 5 }
   0x4   : > { %p142_p2 = pnand %p1055_p0, %p141_p1 }
   0x5   : > { %s1056_s16 = sshll.u32 (!%p142_p2), %s1169_s13, 6  ;;  %p172_p4 = scmp.lt.s32.totalorder (!%p142_p2), %s1169_s13, 3 }
   0x6   : > { %145 = sbr.rel (%p142_p2) target bundleno = 375 (0x177), region = 28  ;;  %p167_p3 = scmp.lt.s32.totalorder (!%p142_p2), %s1056_s16, 255 }
   0xb   : > { %v242_v0 = vld [vmem:[%s1650_s1] sm:$0xff]  ;;  %s1654_s16 = smov (!%p167_p3, %s1056_s16), 255  ;;  %vm243_vm0 = vcmask 64512   ;;  %vm645_vm1 = vcmask 523264   ;;  %s1656_s13 = smov (!%p172_p4, %s1169_s13), 3  ;;  %vm779_vm2 = vcmask 516096  }
   0xc   : > { %451 = vmatpush.msra.mxu0 %v242_v0  ;;  %1124 = vmatpush.msra.mxu1 %v242_v0  ;;  %s1057_s17 = sshll.u32 %s1654_s16, 3  ;;  %s174_s23 = scalar_lea.vmem %s1651_s2, %s1656_s13 }
   0xd   : > { %1125 = vmatpush.msra.mxu2 %v242_v0  ;;  %1126 = vmatpush.msra.mxu3 %v242_v0  ;;  %s1180_s20 = scalar_lea.vmem %s1649_s0, %s1057_s17  ;;  %s177_s26 = scalar_lea.vmem %s1652_s3, %s1656_s13 }
   0xe   : > { %v178_v1 = vld [vmem:[%s1180_s20] sm:$0xff]  ;;  %v179_v3 = vld [vmem:[%s1180_s20 + $0x8] sm:$0xff]  ;;  %v180_v5 = vld [vmem:[%s1180_s20 + $0x10] sm:$0xff] }
   0xf   : > { %1058 = vmatmul.msk.f32.vlgmr.msra.gmra.mxu0 %vm243_vm0, %v178_v1  ;;  %v194_v2 = vld [vmem:[%s1180_s20 + $0x80] sm:$0xff]  ;;  %v195_v4 = vld [vmem:[%s1180_s20 + $0x88] sm:$0xff]  ;;  %v196_v6 = vld [vmem:[%s1180_s20 + $0x90] sm:$0xff] }
  0x10   : > { %1074 = vmatmul.msk.f32.vlgmr.msra.gmra.mxu1 %vm243_vm0, %v194_v2  ;;  %v181_v7 = vld [vmem:[%s1180_s20 + $0x18] sm:$0xff]  ;;  %v210_v9 = vld [vmem:[%s1180_s20 + $0x100] sm:$0xff]  ;;  %v211_v12 = vld [vmem:[%s1180_s20 + $0x108] sm:$0xff] }
  0x11   : > { %v197_v8 = vld [vmem:[%s1180_s20 + $0x98] sm:$0xff]  ;;  %1090 = vmatmul.msk.f32.vlgmr.msra.gmra.mxu2 %vm243_vm0, %v210_v9  ;;  %v182_v10 = vld [vmem:[%s1180_s20 + $0x20] sm:$0xff]  ;;  %v183_v13 = vld [vmem:[%s1180_s20 + $0x28] sm:$0xff] }
  0x12   : > { %v198_v11 = vld [vmem:[%s1180_s20 + $0xa0] sm:$0xff]  ;;  %v199_v14 = vld [vmem:[%s1180_s20 + $0xa8] sm:$0xff]  ;;  %v212_v15 = vld [vmem:[%s1180_s20 + $0x110] sm:$0xff] }
  0x13   : > { %v184_v16 = vld [vmem:[%s1180_s20 + $0x30] sm:$0xff]  ;;  %v213_v18 = vld [vmem:[%s1180_s20 + $0x118] sm:$0xff]  ;;  %v214_v21 = vld [vmem:[%s1180_s20 + $0x120] sm:$0xff] }
  0x14   : > { %v200_v17 = vld [vmem:[%s1180_s20 + $0xb0] sm:$0xff]  ;;  %v185_v19 = vld [vmem:[%s1180_s20 + $0x38] sm:$0xff]  ;;  %v226_v22 = vld [vmem:[%s1180_s20 + $0x180] sm:$0xff] }
  0x15   : > { %v201_v20 = vld [vmem:[%s1180_s20 + $0xb8] sm:$0xff]  ;;  %1106 = vmatmul.msk.f32.vlgmr.msra.gmra.mxu3 %vm243_vm0, %v226_v22  ;;  %v186_v23 = vld [vmem:[%s1180_s20 + $0x40] sm:$0xff]  ;;  %v215_v25 = vld [vmem:[%s1180_s20 + $0x128] sm:$0xff] }
  0x16   : > { %v202_v24 = vld [vmem:[%s1180_s20 + $0xc0] sm:$0xff]  ;;  %v227_v26 = vld [vmem:[%s1180_s20 + $0x188] sm:$0xff]  ;;  %v216_v29 = vld [vmem:[%s1180_s20 + $0x130] sm:$0xff] }
  0x17   : > { %1059 = vmatmul.msk.f32.gmra.mxu0 %vm243_vm0, %v179_v3  ;;  %v187_v27 = vld [vmem:[%s1180_s20 + $0x48] sm:$0xff]  ;;  %v228_v30 = vld [vmem:[%s1180_s20 + $0x190] sm:$0xff]  ;;  %v217_v33 = vld [vmem:[%s1180_s20 + $0x138] sm:$0xff] }
  0x18   : > { %1075 = vmatmul.msk.f32.gmra.mxu1 %vm243_vm0, %v195_v4  ;;  %v203_v28 = vld [vmem:[%s1180_s20 + $0xc8] sm:$0xff]  ;;  %v188_v31 = vld [vmem:[%s1180_s20 + $0x50] sm:$0xff]  ;;  %v229_v34 = vld [vmem:[%s1180_s20 + $0x198] sm:$0xff] }
  0x19   : > { %1091 = vmatmul.msk.f32.gmra.mxu2 %vm243_vm0, %v211_v12  ;;  %v204_v32 = vld [vmem:[%s1180_s20 + $0xd0] sm:$0xff]  ;;  %v189_v35 = vld [vmem:[%s1180_s20 + $0x58] sm:$0xff]  ;;  %v218_v37 = vld [vmem:[%s1180_s20 + $0x140] sm:$0xff] }
  0x1a   : > { %v205_v36 = vld [vmem:[%s1180_s20 + $0xd8] sm:$0xff]  ;;  %v230_v38 = vld [vmem:[%s1180_s20 + $0x1a0] sm:$0xff]  ;;  %v219_v41 = vld [vmem:[%s1180_s20 + $0x148] sm:$0xff] }
  0x1b   : > { %v190_v39 = vld [vmem:[%s1180_s20 + $0x60] sm:$0xff]  ;;  %v231_v42 = vld [vmem:[%s1180_s20 + $0x1a8] sm:$0xff]  ;;  %v220_v45 = vld [vmem:[%s1180_s20 + $0x150] sm:$0xff] }
  0x1c   : > { %v206_v40 = vld [vmem:[%s1180_s20 + $0xe0] sm:$0xff]  ;;  %v191_v43 = vld [vmem:[%s1180_s20 + $0x68] sm:$0xff]  ;;  %v232_v46 = vld [vmem:[%s1180_s20 + $0x1b0] sm:$0xff] }
  0x1d   : > { %1107 = vmatmul.msk.f32.gmra.mxu3 %vm243_vm0, %v227_v26  ;;  %v207_v44 = vld [vmem:[%s1180_s20 + $0xe8] sm:$0xff]  ;;  %v192_v47 = vld [vmem:[%s1180_s20 + $0x70] sm:$0xff]  ;;  %v221_v49 = vld [vmem:[%s1180_s20 + $0x158] sm:$0xff] }
  0x1e   : > { %v208_v48 = vld [vmem:[%s1180_s20 + $0xf0] sm:$0xff]  ;;  %v233_v50 = vld [vmem:[%s1180_s20 + $0x1b8] sm:$0xff]  ;;  %v222_v53 = vld [vmem:[%s1180_s20 + $0x160] sm:$0xff] }
  0x1f   : > { %1060 = vmatmul.msk.f32.gmra.mxu0 %vm243_vm0, %v180_v5  ;;  %v193_v51 = vld [vmem:[%s1180_s20 + $0x78] sm:$0xff]  ;;  %v234_v54 = vld [vmem:[%s1180_s20 + $0x1c0] sm:$0xff]  ;;  %v223_v57 = vld [vmem:[%s1180_s20 + $0x168] sm:$0xff] }
  0x20   : > { %1076 = vmatmul.msk.f32.gmra.mxu1 %vm243_vm0, %v196_v6  ;;  %v209_v52 = vld [vmem:[%s1180_s20 + $0xf8] sm:$0xff]  ;;  %v235_v58 = vld [vmem:[%s1180_s20 + $0x1c8] sm:$0xff]  ;;  %v224_v5 = vld [vmem:[%s1180_s20 + $0x170] sm:$0xff] }
  0x21   : > { %1092 = vmatmul.msk.f32.gmra.mxu2 %vm243_vm0, %v212_v15  ;;  %v236_v6 = vld [vmem:[%s1180_s20 + $0x1d0] sm:$0xff]  ;;  %v237_v15 = vld [vmem:[%s1180_s20 + $0x1d8] sm:$0xff] }
  0x25   : > { %1108 = vmatmul.msk.f32.gmra.mxu3 %vm243_vm0, %v228_v30 }
  0x27   : > { %1061 = vmatmul.msk.f32.gmra.mxu0 %vm243_vm0, %v181_v7 }
  0x28   : > { %1077 = vmatmul.msk.f32.gmra.mxu1 %vm243_vm0, %v197_v8 }
  0x29   : > { %1093 = vmatmul.msk.f32.gmra.mxu2 %vm243_vm0, %v213_v18 }
  0x2d   : > { %1109 = vmatmul.msk.f32.gmra.mxu3 %vm243_vm0, %v229_v34 }
  0x2f   : > { %1062 = vmatmul.msk.f32.gmra.mxu0 %vm243_vm0, %v182_v10 }
  0x30   : > { %1078 = vmatmul.msk.f32.gmra.mxu1 %vm243_vm0, %v198_v11 }
  0x31   : > { %1094 = vmatmul.msk.f32.gmra.mxu2 %vm243_vm0, %v214_v21 }
  0x35   : > { %1110 = vmatmul.msk.f32.gmra.mxu3 %vm243_vm0, %v230_v38 }
  0x37   : > { %1063 = vmatmul.msk.f32.gmra.mxu0 %vm243_vm0, %v183_v13 }
  0x38   : > { %1079 = vmatmul.msk.f32.gmra.mxu1 %vm243_vm0, %v199_v14  ;;  %v225_v14 = vld [vmem:[%s1180_s20 + $0x178] sm:$0xff] }
  0x39   : > { %1095 = vmatmul.msk.f32.gmra.mxu2 %vm243_vm0, %v215_v25 }
  0x3d   : > { %1111 = vmatmul.msk.f32.gmra.mxu3 %vm243_vm0, %v231_v42 }
  0x3f   : > { %1064 = vmatmul.msk.f32.gmra.mxu0 %vm243_vm0, %v184_v16 }
  0x40   : > { %1080 = vmatmul.msk.f32.gmra.mxu1 %vm243_vm0, %v200_v17 }
  0x41   : > { %1096 = vmatmul.msk.f32.gmra.mxu2 %vm243_vm0, %v216_v29 }
  0x45   : > { %1112 = vmatmul.msk.f32.gmra.mxu3 %vm243_vm0, %v232_v46 }
  0x47   : > { %1065 = vmatmul.msk.f32.gmra.mxu0 %vm243_vm0, %v185_v19 }
  0x48   : > { %1081 = vmatmul.msk.f32.gmra.mxu1 %vm243_vm0, %v201_v20 }
  0x49   : > { %1097 = vmatmul.msk.f32.gmra.mxu2 %vm243_vm0, %v217_v33 }
  0x4d   : > { %1113 = vmatmul.msk.f32.gmra.mxu3 %vm243_vm0, %v233_v50 }
  0x4f   : > { %1066 = vmatmul.msk.f32.gmra.mxu0 %vm243_vm0, %v186_v23  ;;  %v238_v23 = vld [vmem:[%s1180_s20 + $0x1e0] sm:$0xff] }
  0x50   : > { %1082 = vmatmul.msk.f32.gmra.mxu1 %vm243_vm0, %v202_v24 }
  0x51   : > { %1098 = vmatmul.msk.f32.gmra.mxu2 %vm243_vm0, %v218_v37 }
  0x55   : > { %1114 = vmatmul.msk.f32.gmra.mxu3 %vm243_vm0, %v234_v54 }
  0x57   : > { %1067 = vmatmul.msk.f32.gmra.mxu0 %vm243_vm0, %v187_v27 }
  0x58   : > { %1083 = vmatmul.msk.f32.gmra.mxu1 %vm243_vm0, %v203_v28 }
  0x59   : > { %1099 = vmatmul.msk.f32.gmra.mxu2 %vm243_vm0, %v219_v41 }
  0x5d   : > { %1115 = vmatmul.msk.f32.gmra.mxu3 %vm243_vm0, %v235_v58 }
  0x5f   : > { %1068 = vmatmul.msk.f32.gmra.mxu0 %vm243_vm0, %v188_v31 }
  0x60   : > { %1084 = vmatmul.msk.f32.gmra.mxu1 %vm243_vm0, %v204_v32  ;;  %v239_v32 = vld [vmem:[%s1180_s20 + $0x1e8] sm:$0xff] }
  0x61   : > { %1100 = vmatmul.msk.f32.gmra.mxu2 %vm243_vm0, %v220_v45 }
  0x65   : > { %1116 = vmatmul.msk.f32.gmra.mxu3 %vm243_vm0, %v236_v6 }
  0x67   : > { %1069 = vmatmul.msk.f32.gmra.mxu0 %vm243_vm0, %v189_v35  ;;  %v240_v35 = vld [vmem:[%s1180_s20 + $0x1f0] sm:$0xff] }
  0x68   : > { %1085 = vmatmul.msk.f32.gmra.mxu1 %vm243_vm0, %v205_v36 }
  0x69   : > { %1101 = vmatmul.msk.f32.gmra.mxu2 %vm243_vm0, %v221_v49 }
  0x6d   : > { %1117 = vmatmul.msk.f32.gmra.mxu3 %vm243_vm0, %v237_v15 }
  0x6f   : > { %1070 = vmatmul.msk.f32.gmra.mxu0 %vm243_vm0, %v190_v39  ;;  %v241_v39 = vld [vmem:[%s1180_s20 + $0x1f8] sm:$0xff] }
  0x70   : > { %1086 = vmatmul.msk.f32.gmra.mxu1 %vm243_vm0, %v206_v40 }
  0x71   : > { %1102 = vmatmul.msk.f32.gmra.mxu2 %vm243_vm0, %v222_v53 }
  0x75   : > { %1118 = vmatmul.msk.f32.gmra.mxu3 %vm243_vm0, %v238_v23 }
  0x77   : > { %1071 = vmatmul.msk.f32.gmra.mxu0 %vm243_vm0, %v191_v43 }
  0x78   : > { %1087 = vmatmul.msk.f32.gmra.mxu1 %vm243_vm0, %v207_v44 }
  0x79   : > { %1103 = vmatmul.msk.f32.gmra.mxu2 %vm243_vm0, %v223_v57 }
  0x7d   : > { %1119 = vmatmul.msk.f32.gmra.mxu3 %vm243_vm0, %v239_v32 }
  0x7f   : > { %1072 = vmatmul.msk.f32.gmra.mxu0 %vm243_vm0, %v192_v47 }
  0x80   : > { %1088 = vmatmul.msk.f32.gmra.mxu1 %vm243_vm0, %v208_v48 }
  0x81   : > { %1104 = vmatmul.msk.f32.gmra.mxu2 %vm243_vm0, %v224_v5 }
  0x85   : > { %1120 = vmatmul.msk.f32.gmra.mxu3 %vm243_vm0, %v240_v35 }
  0x87   : > { %1073 = vmatmul.msk.f32.gmra.mxu0 %vm243_vm0, %v193_v51 }
  0x88   : > { %1089 = vmatmul.msk.f32.gmra.mxu1 %vm243_vm0, %v209_v52 }
  0x89   : > { %1105 = vmatmul.msk.f32.gmra.mxu2 %vm243_vm0, %v225_v14 }
  0x8c   : > { %v453_v55 = vpop.f32.mrf.mxu0 }
  0x8d   : > { %v1290_v56 = vpop.f32.mrf.mxu1  ;;  %v781_v59 = vmul.f32 %v453_v55, %v453_v55  ;;  %v646_v61 = vsel %vm645_vm1, %v453_v55, 0.0  ;;  %1121 = vmatmul.msk.f32.gmra.mxu3 %vm243_vm0, %v241_v39 }
  0x8f   : > { %v845_v2 = vsel %vm645_vm1, %v781_v59, 0.0 }
  0x94   : > { %v456_v60 = vpop.f32.mrf.mxu0  ;;  %v1320_v25 = vpop.f32.mrf.mxu2 }
  0x95   : > { %v647_v62 = vsel %vm645_vm1, %v456_v60, 0.0  ;;  %v782_v63 = vmul.f32 %v456_v60, %v456_v60  ;;  %v1298_v0 = vpop.f32.mrf.mxu1 }
  0x96   : > { %v648_v1 = vadd.f32 %v647_v62, %v646_v61 }
  0x97   : > { %v846_v3 = vsel %vm645_vm1, %v782_v63, 0.0 }
  0x98   : > { %v847_v4 = vadd.f32 %v846_v3, %v845_v2  ;;  %v1342_v44 = vpop.f32.mrf.mxu3 }
  0x9c   : > { %v459_v7 = vpop.f32.mrf.mxu0  ;;  %v1328_v34 = vpop.f32.mrf.mxu2 }
  0x9d   : > { %v649_v8 = vsel %vm645_vm1, %v459_v7, 0.0  ;;  %v783_v9 = vmul.f32 %v459_v7, %v459_v7  ;;  %v1307_v10 = vpop.f32.mrf.mxu1 }
  0x9e   : > { %v650_v11 = vadd.f32 %v649_v8, %v648_v1 }
  0x9f   : > { %v848_v12 = vsel %vm645_vm1, %v783_v9, 0.0 }
  0xa0   : > { %v849_v13 = vadd.f32 %v848_v12, %v847_v4  ;;  %v1348_v48 = vpop.f32.mrf.mxu3 }
  0xa4   : > { %v462_v16 = vpop.f32.mrf.mxu0  ;;  %v1334_v38 = vpop.f32.mrf.mxu2 }
  0xa5   : > { %v651_v17 = vsel %vm645_vm1, %v462_v16, 0.0  ;;  %v784_v18 = vmul.f32 %v462_v16, %v462_v16  ;;  %v1315_v20 = vpop.f32.mrf.mxu1 }
  0xa6   : > { %v652_v19 = vadd.f32 %v651_v17, %v650_v11 }
  0xa7   : > { %v850_v21 = vsel %vm645_vm1, %v784_v18, 0.0 }
  0xa8   : > { %v851_v22 = vadd.f32 %v850_v21, %v849_v13  ;;  %v1354_v52 = vpop.f32.mrf.mxu3 }
  0xac   : > { %v465_v24 = vpop.f32.mrf.mxu0  ;;  %v1340_v42 = vpop.f32.mrf.mxu2 }
  0xad   : > { %v653_v26 = vsel %vm645_vm1, %v465_v24, 0.0  ;;  %v785_v27 = vmul.f32 %v465_v24, %v465_v24  ;;  %v1324_v31 = vpop.f32.mrf.mxu1 }
  0xae   : > { %v654_v28 = vadd.f32 %v653_v26, %v652_v19 }
  0xaf   : > { %v852_v29 = vsel %vm645_vm1, %v785_v27, 0.0 }
  0xb0   : > { %v853_v30 = vadd.f32 %v852_v29, %v851_v22  ;;  %v1360_v57 = vpop.f32.mrf.mxu3 }
  0xb4   : > { %v468_v33 = vpop.f32.mrf.mxu0  ;;  %v1346_v46 = vpop.f32.mrf.mxu2 }
  0xb5   : > { %v1332_v36 = vpop.f32.mrf.mxu1  ;;  %v786_v60 = vmul.f32 %v468_v33, %v468_v33  ;;  %v655_v62 = vsel %vm645_vm1, %v468_v33, 0.0 }
  0xb6   : > { %v656_v5 = vadd.f32 %v655_v62, %v654_v28 }
  0xb7   : > { %v854_v2 = vsel %vm645_vm1, %v786_v60, 0.0 }
  0xb8   : > { %v1367_v1 = vpop.f32.mrf.mxu3  ;;  %v855_v9 = vadd.f32 %v854_v2, %v853_v30 }
  0xbc   : > { %v471_v37 = vpop.f32.mrf.mxu0  ;;  %v1352_v50 = vpop.f32.mrf.mxu2 }
  0xbd   : > { %v1338_v41 = vpop.f32.mrf.mxu1  ;;  %v787_v63 = vmul.f32 %v471_v37, %v471_v37  ;;  %v657_v3 = vsel %vm645_vm1, %v471_v37, 0.0 }
  0xbe   : > { %v658_v11 = vadd.f32 %v657_v3, %v656_v5 }
  0xbf   : > { %v856_v6 = vsel %vm645_vm1, %v787_v63, 0.0 }
  0xc0   : > { %v857_v16 = vadd.f32 %v856_v6, %v855_v9  ;;  %v1383_v33 = vpop.f32.mrf.mxu3 }
  0xc4   : > { %v474_v40 = vpop.f32.mrf.mxu0  ;;  %v1358_v55 = vpop.f32.mrf.mxu2 }
  0xc5   : > { %v1344_v45 = vpop.f32.mrf.mxu1  ;;  %v788_v4 = vmul.f32 %v474_v40, %v474_v40  ;;  %v659_v7 = vsel %vm645_vm1, %v474_v40, 0.0 }
  0xc6   : > { %v660_v17 = vadd.f32 %v659_v7, %v658_v11 }
  0xc7   : > { %v858_v13 = vsel %vm645_vm1, %v788_v4, 0.0 }
  0xc8   : > { %v859_v23 = vadd.f32 %v858_v13, %v857_v16 }
  0xcc   : > { %v477_v43 = vpop.f32.mrf.mxu0  ;;  %v1364_v61 = vpop.f32.mrf.mxu2 }
  0xcd   : > { %v1350_v49 = vpop.f32.mrf.mxu1  ;;  %v789_v8 = vmul.f32 %v477_v43, %v477_v43  ;;  %v661_v14 = vsel %vm645_vm1, %v477_v43, 0.0 }
  0xce   : > { %v662_v24 = vadd.f32 %v661_v14, %v660_v17 }
  0xcf   : > { %v860_v19 = vsel %vm645_vm1, %v789_v8, 0.0 }
  0xd0   : > { %v861_v30 = vadd.f32 %v860_v19, %v859_v23  ;;  %v1398_v19 = vpop.f32.mrf.mxu3 }
  0xd4   : > { %v480_v47 = vpop.f32.mrf.mxu0  ;;  %v1379_v26 = vpop.f32.mrf.mxu2 }
  0xd5   : > { %v1356_v53 = vpop.f32.mrf.mxu1  ;;  %v790_v15 = vmul.f32 %v480_v47, %v480_v47  ;;  %v663_v21 = vsel %vm645_vm1, %v480_v47, 0.0 }
  0xd6   : > { %v664_v32 = vadd.f32 %v663_v21, %v662_v24 }
  0xd7   : > { %v862_v27 = vsel %vm645_vm1, %v790_v15, 0.0 }
  0xd8   : > { %v863_v40 = vadd.f32 %v862_v27, %v861_v30  ;;  %v677_v27 = vsel %vm645_vm1, %v1290_v56, 0.0 }
  0xdc   : > { %v483_v51 = vpop.f32.mrf.mxu0  ;;  %v1395_v14 = vpop.f32.mrf.mxu2 }
  0xdd   : > { %v1362_v59 = vpop.f32.mrf.mxu1  ;;  %v791_v22 = vmul.f32 %v483_v51, %v483_v51  ;;  %v665_v28 = vsel %vm645_vm1, %v483_v51, 0.0 }
  0xde   : > { %v666_v43 = vadd.f32 %v665_v28, %v664_v32  ;;  %v798_v28 = vmul.f32 %v1298_v0, %v1298_v0 }
  0xdf   : > { %v864_v35 = vsel %vm645_vm1, %v791_v22, 0.0 }
  0xe0   : > { %v865_v2 = vadd.f32 %v864_v35, %v863_v40 }
  0xe4   : > { %v486_v54 = vpop.f32.mrf.mxu0 }
  0xe5   : > { %v1375_v18 = vpop.f32.mrf.mxu1  ;;  %v792_v29 = vmul.f32 %v486_v54, %v486_v54  ;;  %v667_v37 = vsel %vm645_vm1, %v486_v54, 0.0 }
  0xe6   : > { %v668_v51 = vadd.f32 %v667_v37, %v666_v43  ;;  %v679_v37 = vsel %vm645_vm1, %v1298_v0, 0.0 }
  0xe7   : > { %v866_v60 = vsel %vm645_vm1, %v792_v29, 0.0 }
  0xe8   : > { %v867_v6 = vadd.f32 %v866_v60, %v865_v2  ;;  %v681_v60 = vsel %vm645_vm1, %v1307_v10, 0.0 }
  0xec   : > { %v489_v58 = vpop.f32.mrf.mxu0 }
  0xed   : > { %v793_v39 = vmul.f32 %v489_v58, %v489_v58  ;;  %v669_v62 = vsel %vm645_vm1, %v489_v58, 0.0  ;;  %v1391_v8 = vpop.f32.mrf.mxu1 }
  0xee   : > { %v670_v7 = vadd.f32 %v669_v62, %v668_v51  ;;  %v800_v62 = vmul.f32 %v1315_v20, %v1315_v20  ;;  %v1420_v51 = vpop.f32.mrf.mxu2 }
  0xef   : > { %v868_v3 = vsel %vm645_vm1, %v793_v39, 0.0  ;;  %v799_v39 = vmul.f32 %v1307_v10, %v1307_v10 }
  0xf0   : > { %v869_v11 = vadd.f32 %v868_v3, %v867_v6  ;;  %v683_v3 = vsel %vm645_vm1, %v1315_v20, 0.0  ;;  %v882_v10 = vsel %vm645_vm1, %v800_v62, 0.0  ;;  %v687_v20 = vsel %vm645_vm1, %v1332_v36, 0.0 }
  0xf1   : > { %v880_v0 = vsel %vm645_vm1, %v799_v39, 0.0 }
  0xf4   : > { %v492_v12 = vpop.f32.mrf.mxu0 }
  0xf5   : > { %v794_v63 = vmul.f32 %v492_v12, %v492_v12  ;;  %v671_v4 = vsel %vm645_vm1, %v492_v12, 0.0  ;;  %v797_v12 = vmul.f32 %v1290_v56, %v1290_v56  ;;  %v878_v56 = vsel %vm645_vm1, %v798_v28, 0.0 }
  0xf6   : > { %v672_v13 = vadd.f32 %v671_v4, %v670_v7  ;;  %v801_v4 = vmul.f32 %v1324_v31, %v1324_v31  ;;  %v1427_v7 = vpop.f32.mrf.mxu3  ;;  %v805_v28 = vmul.f32 %v1350_v49, %v1350_v49 }
  0xf7   : > { %v870_v54 = vsel %vm645_vm1, %v794_v63, 0.0  ;;  %v876_v35 = vsel %vm645_vm1, %v797_v12, 0.0 }
  0xf8   : > { %v871_v15 = vadd.f32 %v870_v54, %v869_v11  ;;  %v685_v54 = vsel %vm645_vm1, %v1324_v31, 0.0  ;;  %v689_v31 = vsel %vm645_vm1, %v1338_v41, 0.0 }
  0xfc   : > { %v495_v47 = vpop.f32.mrf.mxu0 }
  0xfd   : > { %v795_v5 = vmul.f32 %v495_v47, %v495_v47  ;;  %v673_v9 = vsel %vm645_vm1, %v495_v47, 0.0  ;;  %v1413_v47 = vpop.f32.mrf.mxu1 }
  0xfe   : > { %v674_v16 = vadd.f32 %v673_v9, %v672_v13  ;;  %v802_v9 = vmul.f32 %v1332_v36, %v1332_v36  ;;  %v691_v36 = vsel %vm645_vm1, %v1344_v45, 0.0 }
  0xff   : > { %v872_v58 = vsel %vm645_vm1, %v795_v5, 0.0 }
 0x100   : > { %v873_v23 = vadd.f32 %v872_v58, %v871_v15  ;;  %v884_v58 = vsel %vm645_vm1, %v801_v4, 0.0  ;;  %v803_v15 = vmul.f32 %v1338_v41, %v1338_v41  ;;  %v886_v12 = vsel %vm645_vm1, %v802_v9, 0.0 }
 0x104   : > { %v498_v17 = vpop.f32.mrf.mxu0 }
 0x105   : > { %v675_v21 = vsel %vm645_vm1, %v498_v17, 0.0  ;;  %v796_v22 = vmul.f32 %v498_v17, %v498_v17 }
 0x106   : > { %v676_v24 = vadd.f32 %v675_v21, %v674_v16  ;;  %v804_v21 = vmul.f32 %v1344_v45, %v1344_v45  ;;  %v892_v45 = vsel %vm645_vm1, %v805_v28, 0.0 }
 0x107   : > { %v874_v29 = vsel %vm645_vm1, %v796_v22, 0.0 }
 0x108   : > { %v678_v30 = vadd.f32 %v677_v27, %v676_v24  ;;  %v875_v32 = vadd.f32 %v874_v29, %v873_v23  ;;  %v543_v24 = vpop.f32.mrf.mxu1  ;;  %v888_v27 = vsel %vm645_vm1, %v803_v15, 0.0  ;;  %v890_v41 = vsel %vm645_vm1, %v804_v21, 0.0 }
 0x10a   : > { %v680_v40 = vadd.f32 %v679_v37, %v678_v30  ;;  %v877_v43 = vadd.f32 %v876_v35, %v875_v32  ;;  %v1449_v32 = vpop.f32.mrf.mxu2  ;;  %v693_v35 = vsel %vm645_vm1, %v1350_v49, 0.0  ;;  %v806_v37 = vmul.f32 %v1356_v53, %v1356_v53 }
 0x10b   : > { %v697_v49 = vsel %vm645_vm1, %v1362_v59, 0.0 }
 0x10c   : > { %v682_v63 = vadd.f32 %v681_v60, %v680_v40  ;;  %v879_v2 = vadd.f32 %v878_v56, %v877_v43  ;;  %v1456_v43 = vpop.f32.mrf.mxu3  ;;  %v695_v56 = vsel %vm645_vm1, %v1356_v53, 0.0  ;;  %v807_v60 = vmul.f32 %v1362_v59, %v1362_v59 }
 0x10d   : > { %v699_v53 = vsel %vm645_vm1, %v1375_v18, 0.0  ;;  %v701_v59 = vsel %vm645_vm1, %v1391_v8, 0.0 }
 0x10e   : > { %v684_v5 = vadd.f32 %v683_v3, %v682_v63  ;;  %v881_v6 = vadd.f32 %v880_v0, %v879_v2  ;;  %v894_v2 = vsel %vm645_vm1, %v806_v37, 0.0  ;;  %v808_v0 = vmul.f32 %v1375_v18, %v1375_v18 }
 0x10f   : > { %v709_v37 = vsel %vm645_vm1, %v1320_v25, 0.0 }
 0x110   : > { %v686_v11 = vadd.f32 %v685_v54, %v684_v5  ;;  %v883_v13 = vadd.f32 %v882_v10, %v881_v6  ;;  %v896_v5 = vsel %vm645_vm1, %v807_v60, 0.0  ;;  %v809_v6 = vmul.f32 %v1391_v8, %v1391_v8  ;;  %v546_v9 = vpop.f32.mrf.mxu1 }
 0x111   : > { %v815_v60 = vmul.f32 %v1334_v38, %v1334_v38 }
 0x112   : > { %v688_v16 = vadd.f32 %v687_v20, %v686_v11  ;;  %v885_v17 = vadd.f32 %v884_v58, %v883_v13  ;;  %v898_v11 = vsel %vm645_vm1, %v808_v0, 0.0  ;;  %v810_v13 = vmul.f32 %v1413_v47, %v1413_v47  ;;  %v1478_v15 = vpop.f32.mrf.mxu2 }
 0x113   : > { %v900_v18 = vsel %vm645_vm1, %v809_v6, 0.0  ;;  %v816_v0 = vmul.f32 %v1340_v42, %v1340_v42  ;;  %v817_v6 = vmul.f32 %v1346_v46, %v1346_v46 }
 0x114   : > { %v887_v22 = vadd.f32 %v886_v12, %v885_v17  ;;  %v690_v23 = vadd.f32 %v689_v31, %v688_v16  ;;  %v703_v16 = vsel %vm645_vm1, %v1413_v47, 0.0  ;;  %v811_v17 = vmul.f32 %v543_v24, %v543_v24 }
 0x115   : > { %v812_v12 = vmul.f32 %v546_v9, %v546_v9  ;;  %v902_v8 = vsel %vm645_vm1, %v810_v13, 0.0 }
 0x116   : > { %v692_v29 = vadd.f32 %v691_v36, %v690_v23  ;;  %v889_v30 = vadd.f32 %v888_v27, %v887_v22  ;;  %v1483_v22 = vpop.f32.mrf.mxu3  ;;  %v705_v23 = vsel %vm645_vm1, %v543_v24, 0.0  ;;  %v707_v27 = vsel %vm645_vm1, %v546_v9, 0.0 }
 0x117   : > { %v906_v47 = vsel %vm645_vm1, %v812_v12, 0.0  ;;  %v914_v9 = vsel %vm645_vm1, %v816_v0, 0.0  ;;  %v820_v12 = vmul.f32 %v1364_v61, %v1364_v61 }
 0x118   : > { %v694_v39 = vadd.f32 %v693_v35, %v692_v29  ;;  %v891_v40 = vadd.f32 %v890_v41, %v889_v30  ;;  %v813_v29 = vmul.f32 %v1320_v25, %v1320_v25  ;;  %v904_v30 = vsel %vm645_vm1, %v811_v17, 0.0 }
 0x119   : > { %v713_v25 = vsel %vm645_vm1, %v1334_v38, 0.0  ;;  %v717_v38 = vsel %vm645_vm1, %v1346_v46, 0.0  ;;  %v721_v46 = vsel %vm645_vm1, %v1358_v55, 0.0 }
 0x11a   : > { %v696_v62 = vadd.f32 %v695_v56, %v694_v39  ;;  %v893_v63 = vadd.f32 %v892_v45, %v891_v40  ;;  %v814_v39 = vmul.f32 %v1328_v34, %v1328_v34  ;;  %v908_v45 = vsel %vm645_vm1, %v813_v29, 0.0 }
 0x11b   : > { %v711_v56 = vsel %vm645_vm1, %v1328_v34, 0.0  ;;  %v912_v34 = vsel %vm645_vm1, %v815_v60, 0.0 }
 0x11c   : > { %v698_v3 = vadd.f32 %v697_v49, %v696_v62  ;;  %v895_v4 = vadd.f32 %v894_v2, %v893_v63  ;;  %v588_v2 = vpop.f32.mrf.mxu2  ;;  %v910_v49 = vsel %vm645_vm1, %v814_v39, 0.0  ;;  %v823_v39 = vmul.f32 %v1420_v51, %v1420_v51 }
 0x11e   : > { %v700_v10 = vadd.f32 %v699_v53, %v698_v3  ;;  %v897_v54 = vadd.f32 %v896_v5, %v895_v4  ;;  %v1506_v5 = vpop.f32.mrf.mxu3  ;;  %v715_v53 = vsel %vm645_vm1, %v1340_v42, 0.0  ;;  %v719_v42 = vsel %vm645_vm1, %v1352_v50, 0.0 }
 0x120   : > { %v899_v58 = vadd.f32 %v898_v11, %v897_v54  ;;  %v702_v20 = vadd.f32 %v701_v59, %v700_v10  ;;  %v818_v11 = vmul.f32 %v1352_v50, %v1352_v50  ;;  %v723_v50 = vsel %vm645_vm1, %v1364_v61, 0.0 }
 0x121   : > { %v727_v61 = vsel %vm645_vm1, %v1395_v14, 0.0 }
 0x122   : > { %v901_v31 = vadd.f32 %v900_v18, %v899_v58  ;;  %v704_v21 = vadd.f32 %v703_v16, %v702_v20  ;;  %v916_v58 = vsel %vm645_vm1, %v817_v6, 0.0  ;;  %v819_v20 = vmul.f32 %v1358_v55, %v1358_v55 }
 0x123   : > { %v918_v17 = vsel %vm645_vm1, %v818_v11, 0.0  ;;  %v922_v55 = vsel %vm645_vm1, %v820_v12, 0.0  ;;  %v741_v12 = vsel %vm645_vm1, %v1342_v44, 0.0 }
 0x124   : > { %v903_v36 = vadd.f32 %v902_v8, %v901_v31  ;;  %v706_v28 = vadd.f32 %v705_v23, %v704_v21  ;;  %v591_v8 = vpop.f32.mrf.mxu2  ;;  %v920_v23 = vsel %vm645_vm1, %v819_v20, 0.0 }
 0x126   : > { %v905_v41 = vadd.f32 %v904_v30, %v903_v36  ;;  %v708_v35 = vadd.f32 %v707_v27, %v706_v28  ;;  %v821_v27 = vmul.f32 %v1379_v26, %v1379_v26  ;;  %v1533_v29 = vpop.f32.mrf.mxu3  ;;  %v725_v30 = vsel %vm645_vm1, %v1379_v26, 0.0 }
 0x127   : > { %v729_v26 = vsel %vm645_vm1, %v1420_v51, 0.0  ;;  %v733_v51 = vsel %vm645_vm1, %v1478_v15, 0.0 }
 0x128   : > { %v710_v24 = vadd.f32 %v709_v37, %v708_v35  ;;  %v907_v40 = vadd.f32 %v906_v47, %v905_v41  ;;  %v822_v47 = vmul.f32 %v1395_v14, %v1395_v14  ;;  %v924_v37 = vsel %vm645_vm1, %v821_v27, 0.0 }
 0x129   : > { %v731_v14 = vsel %vm645_vm1, %v1449_v32, 0.0  ;;  %v831_v27 = vmul.f32 %v1354_v52, %v1354_v52 }
 0x12a   : > { %v712_v62 = vadd.f32 %v711_v56, %v710_v24  ;;  %v909_v63 = vadd.f32 %v908_v45, %v907_v40  ;;  %v926_v45 = vsel %vm645_vm1, %v822_v47, 0.0  ;;  %v824_v56 = vmul.f32 %v1449_v32, %v1449_v32 }
 0x12b   : > { %v735_v32 = vsel %vm645_vm1, %v588_v2, 0.0  ;;  %v832_v47 = vmul.f32 %v1360_v57, %v1360_v57 }
 0x12c   : > { %v714_v3 = vadd.f32 %v713_v25, %v712_v62  ;;  %v911_v4 = vadd.f32 %v910_v49, %v909_v63  ;;  %v928_v63 = vsel %vm645_vm1, %v823_v39, 0.0  ;;  %v825_v49 = vmul.f32 %v1478_v15, %v1478_v15 }
 0x12e   : > { %v716_v10 = vadd.f32 %v715_v53, %v714_v3  ;;  %v913_v54 = vadd.f32 %v912_v34, %v911_v4  ;;  %v594_v3 = vpop.f32.mrf.mxu2  ;;  %v930_v4 = vsel %vm645_vm1, %v824_v56, 0.0  ;;  %v826_v34 = vmul.f32 %v588_v2, %v588_v2 }
 0x130   : > { %v718_v59 = vadd.f32 %v717_v38, %v716_v10  ;;  %v915_v13 = vadd.f32 %v914_v9, %v913_v54  ;;  %v1558_v10 = vpop.f32.mrf.mxu3  ;;  %v932_v54 = vsel %vm645_vm1, %v825_v49, 0.0  ;;  %v827_v9 = vmul.f32 %v591_v8, %v591_v8 }
 0x131   : > { %v828_v38 = vmul.f32 %v594_v3, %v594_v3 }
 0x132   : > { %v720_v18 = vadd.f32 %v719_v42, %v718_v59  ;;  %v917_v16 = vadd.f32 %v916_v58, %v915_v13  ;;  %v934_v13 = vsel %vm645_vm1, %v826_v34, 0.0  ;;  %v737_v58 = vsel %vm645_vm1, %v591_v8, 0.0 }
 0x133   : > { %v739_v42 = vsel %vm645_vm1, %v594_v3, 0.0  ;;  %v837_v34 = vmul.f32 %v1456_v43, %v1456_v43 }
 0x134   : > { %v919_v31 = vadd.f32 %v918_v17, %v917_v16  ;;  %v722_v21 = vadd.f32 %v721_v46, %v720_v18  ;;  %v829_v18 = vmul.f32 %v1342_v44, %v1342_v44  ;;  %v936_v16 = vsel %vm645_vm1, %v827_v9, 0.0 }
 0x135   : > { %v938_v17 = vsel %vm645_vm1, %v828_v38, 0.0  ;;  %v745_v44 = vsel %vm645_vm1, %v1354_v52, 0.0  ;;  %v749_v52 = vsel %vm645_vm1, %v1367_v1, 0.0 }
 0x136   : > { %v724_v36 = vadd.f32 %v723_v50, %v722_v21  ;;  %v921_v28 = vadd.f32 %v920_v23, %v919_v31  ;;  %v830_v31 = vmul.f32 %v1348_v48, %v1348_v48  ;;  %v940_v23 = vsel %vm645_vm1, %v829_v18, 0.0 }
 0x137   : > { %v743_v50 = vsel %vm645_vm1, %v1348_v48, 0.0  ;;  %v747_v48 = vsel %vm645_vm1, %v1360_v57, 0.0  ;;  %v751_v57 = vsel %vm645_vm1, %v1383_v33, 0.0 }
 0x138   : > { %v726_v41 = vadd.f32 %v725_v30, %v724_v36  ;;  %v923_v35 = vadd.f32 %v922_v55, %v921_v28  ;;  %v636_v55 = vpop.f32.mrf.mxu3  ;;  %v942_v30 = vsel %vm645_vm1, %v830_v31, 0.0 }
 0x13a   : > { %v728_v24 = vadd.f32 %v727_v61, %v726_v41  ;;  %v925_v40 = vadd.f32 %v924_v37, %v923_v35  ;;  %v944_v37 = vsel %vm645_vm1, %v831_v27, 0.0  ;;  %v833_v61 = vmul.f32 %v1367_v1, %v1367_v1 }
 0x13b   : > { %v753_v1 = vsel %vm645_vm1, %v1398_v19, 0.0  ;;  %v767_v27 = vsel %vm645_vm1, %v636_v55, 0.0 }
 0x13c   : > { %v730_v60 = vadd.f32 %v729_v26, %v728_v24  ;;  %v927_v62 = vadd.f32 %v926_v45, %v925_v40  ;;  %v946_v40 = vsel %vm645_vm1, %v832_v47, 0.0  ;;  %v834_v45 = vmul.f32 %v1383_v33, %v1383_v33 }
 0x13d   : > { %v755_v33 = vsel %vm645_vm1, %v1427_v7, 0.0 }
 0x13e   : > { %v732_v25 = vadd.f32 %v731_v14, %v730_v60  ;;  %v929_v0 = vadd.f32 %v928_v63, %v927_v62  ;;  %v948_v60 = vsel %vm645_vm1, %v833_v61, 0.0  ;;  %v835_v62 = vmul.f32 %v1398_v19, %v1398_v19 }
 0x13f   : > { %v950_v49 = vsel %vm645_vm1, %v834_v45, 0.0  ;;  %v757_v19 = vsel %vm645_vm1, %v1456_v43, 0.0  ;;  %v761_v43 = vsel %vm645_vm1, %v1506_v5, 0.0 }
 0x140   : > { %v931_v53 = vadd.f32 %v930_v4, %v929_v0  ;;  %v734_v6 = vadd.f32 %v733_v51, %v732_v25  ;;  %v836_v25 = vmul.f32 %v1427_v7, %v1427_v7  ;;  %v639_v4 = vpop.f32.mrf.mxu3  ;;  %v952_v51 = vsel %vm645_vm1, %v835_v62, 0.0 }
 0x141   : > { %v759_v7 = vsel %vm645_vm1, %v1483_v22, 0.0  ;;  %v769_v47 = vsel %vm645_vm1, %v639_v4, 0.0 }
 0x142   : > { %v933_v11 = vadd.f32 %v932_v54, %v931_v53  ;;  %v736_v59 = vadd.f32 %v735_v32, %v734_v6  ;;  %v954_v54 = vsel %vm645_vm1, %v836_v25, 0.0  ;;  %v838_v32 = vmul.f32 %v1483_v22, %v1483_v22 }
 0x143   : > { %v763_v22 = vsel %vm645_vm1, %v1533_v29, 0.0 }
 0x144   : > { %v935_v15 = vadd.f32 %v934_v13, %v933_v11  ;;  %v738_v20 = vadd.f32 %v737_v58, %v736_v59  ;;  %v956_v11 = vsel %vm645_vm1, %v837_v34, 0.0  ;;  %v839_v59 = vmul.f32 %v1506_v5, %v1506_v5 }
 0x145   : > { %v765_v5 = vsel %vm645_vm1, %v1558_v10, 0.0 }
 0x146   : > { %v937_v2 = vadd.f32 %v936_v16, %v935_v15  ;;  %v740_v46 = vadd.f32 %v739_v42, %v738_v20  ;;  %v958_v42 = vsel %vm645_vm1, %v838_v32, 0.0  ;;  %v840_v15 = vmul.f32 %v1533_v29, %v1533_v29 }
 0x147   : > { %v960_v16 = vsel %vm645_vm1, %v839_v59, 0.0  ;;  %v843_v29 = vmul.f32 %v639_v4, %v639_v4 }
 0x148   : > { %v742_v21 = vadd.f32 %v741_v12, %v740_v46  ;;  %v939_v8 = vadd.f32 %v938_v17, %v937_v2  ;;  %v841_v17 = vmul.f32 %v1558_v10, %v1558_v10  ;;  %v642_v12 = vpop.f32.mrf.mxu3  ;;  %v962_v31 = vsel %vm645_vm1, %v840_v15, 0.0 }
 0x14a   : > { %v744_v36 = vadd.f32 %v743_v50, %v742_v21  ;;  %v941_v28 = vadd.f32 %v940_v23, %v939_v8  ;;  %v842_v21 = vmul.f32 %v636_v55, %v636_v55  ;;  %v964_v50 = vsel %vm645_vm1, %v841_v17, 0.0 }
 0x14c   : > { %v746_v41 = vadd.f32 %v745_v44, %v744_v36  ;;  %v943_v35 = vadd.f32 %v942_v30, %v941_v28  ;;  %v844_v36 = vmul.f32 %v642_v12, %v642_v12  ;;  %v966_v44 = vsel %vm645_vm1, %v842_v21, 0.0 }
 0x14e   : > { %v748_v39 = vadd.f32 %v747_v48, %v746_v41  ;;  %v945_v24 = vadd.f32 %v944_v37, %v943_v35  ;;  %v771_v41 = vsel %vm645_vm1, %v642_v12, 0.0  ;;  %v968_v37 = vsel %vm645_vm1, %v843_v29, 0.0 }
 0x14f   : > { %v970_v48 = vsel %vm645_vm1, %v844_v36, 0.0 }
 0x150   : > { %v750_v26 = vadd.f32 %v749_v52, %v748_v39  ;;  %v947_v56 = vadd.f32 %v946_v40, %v945_v24 }
 0x152   : > { %v752_v63 = vadd.f32 %v751_v57, %v750_v26  ;;  %v949_v14 = vadd.f32 %v948_v60, %v947_v56 }
 0x154   : > { %v951_v0 = vadd.f32 %v950_v49, %v949_v14  ;;  %v754_v3 = vadd.f32 %v753_v1, %v752_v63 }
 0x156   : > { %v756_v53 = vadd.f32 %v755_v33, %v754_v3  ;;  %v953_v6 = vadd.f32 %v952_v51, %v951_v0 }
 0x158   : > { %v758_v9 = vadd.f32 %v757_v19, %v756_v53  ;;  %v955_v38 = vadd.f32 %v954_v54, %v953_v6 }
 0x15a   : > { %v760_v13 = vadd.f32 %v759_v7, %v758_v9  ;;  %v957_v58 = vadd.f32 %v956_v11, %v955_v38 }
 0x15c   : > { %v762_v20 = vadd.f32 %v761_v43, %v760_v13  ;;  %v959_v18 = vadd.f32 %v958_v42, %v957_v58 }
 0x15e   : > { %v764_v2 = vadd.f32 %v763_v22, %v762_v20  ;;  %v961_v46 = vadd.f32 %v960_v16, %v959_v18 }
 0x160   : > { %v963_v8 = vadd.f32 %v962_v31, %v961_v46  ;;  %v766_v23 = vadd.f32 %v765_v5, %v764_v2 }
 0x162   : > { %v965_v28 = vadd.f32 %v964_v50, %v963_v8  ;;  %v768_v30 = vadd.f32 %v767_v27, %v766_v23 }
 0x164   : > { %v967_v10 = vadd.f32 %v966_v44, %v965_v28  ;;  %v770_v35 = vadd.f32 %v769_v47, %v768_v30 }
 0x166   : > { %v969_v61 = vadd.f32 %v968_v37, %v967_v10  ;;  %v772_v55 = vadd.f32 %v771_v41, %v770_v35 }
 0x168   : > { %v773_v39 = vrot.slane %v772_v55, 4  ;;  %v971_v24 = vadd.f32 %v970_v48, %v969_v61 }
 0x16a   : > { %v774_v40 = vadd.f32 %v773_v39, %v772_v55  ;;  %v972_v52 = vrot.slane %v971_v24, 4 }
 0x16c   : > { %v775_v45 = vrot.slane %v774_v40, 2  ;;  %v973_v26 = vadd.f32 %v972_v52, %v971_v24 }
 0x16e   : > { %v776_v56 = vadd.f32 %v775_v45, %v774_v40  ;;  %v974_v60 = vrot.slane %v973_v26, 2 }
 0x170   : > { %v777_v57 = vrot.slane %v776_v56, 1  ;;  %v975_v62 = vadd.f32 %v974_v60, %v973_v26 }
 0x172   : > { %v778_v63 = vadd.f32 %v777_v57, %v776_v56  ;;  %v976_v14 = vrot.slane %v975_v62, 1 }
 0x174   : > { %780 = vst.msk [vmem:[%s174_s23] sm:$0x1] %vm779_vm2, %v778_v63  ;;  %v977_v49 = vadd.f32 %v976_v14, %v975_v62 }
 0x176   : > { %978 = vst.msk [vmem:[%s177_s26] sm:$0x1] %vm779_vm2, %v977_v49 }
 0x177 PF: > { %s14_s12 = sadd.s32 1, %s1141_s12  }
 0x178   : > { %p11_p5 = scmp.ge.s32.totalorder %s14_s12, 6  }
 0x17a   :  { %13 = sbr.rel (!%p11_p5) target bundleno = 1 (0x1), region = 70 }

// kernel: stn3d_forward.5
= control target key start
LH: loop header
LB: loop body
LE: loop exit
PB: predicated region body
PF: predicated region fallthrough
CT: control target
= control target key end

     0   :  { %s1821_s21 = smov 0   ;;  %s2234_s0 = inlined_call_operand.vmem [shape: f32[2048,8], index: 0, kind: input, shape index: {}]   ;;  %s2235_s1 = inlined_call_operand.vmem [shape: f32[1,64], index: 1, kind: input, shape index: {}]   ;;  %s2236_s2 = inlined_call_operand.vmem [shape: f32[1,64], index: 2, kind: input, shape index: {}]   ;;  %s2237_s3 = inlined_call_operand.vmem [shape: f32[8,64], index: 3, kind: input, shape index: {}]   ;;  %s2238_s4 = inlined_call_operand.vmem [shape: f32[64,128], index: 4, kind: input, shape index: {}]   ;;  %s2239_s5 = inlined_call_operand.vmem [shape: f32[4,1,128], index: 5, kind: output, shape index: {0}]   ;;  %s2240_s6 = inlined_call_operand.vmem [shape: f32[4,1,128], index: 6, kind: output, shape index: {1}]  }
   0x1 LB: > { %s1827_s22 = sadd.s32 4294967295, %s1784_s21   ;;  %p1616_p0 = scmp.ge.s32.totalorder %s1784_s21, 1  ;;  %s1784_s21 = sphi %s1821_s21, %s17_s21  }
   0x2   : > { %p216_p1 = scmp.lt.s32.totalorder %s1784_s21, 5 }
   0x4   : > { %p217_p2 = pnand %p1616_p0, %p216_p1 }
   0x5   : > { %s1617_s25 = sshll.u32 (!%p217_p2), %s1827_s22, 6  ;;  %p253_p4 = scmp.lt.s32.totalorder (!%p217_p2), %s1827_s22, 3 }
   0x6   : > { %220 = sbr.rel (%p217_p2) target bundleno = 794 (0x31a), region = 40  ;;  %p248_p3 = scmp.lt.s32.totalorder (!%p217_p2), %s1617_s25, 255 }
   0xb   : > { %v323_v0 = vld [vmem:[%s2237_s3] sm:$0xff]  ;;  %s2242_s25 = smov (!%p248_p3, %s1617_s25), 255  ;;  %vm324_vm0 = vcmask 64512   ;;  %v933_v12 = vld [vmem:[%s2238_s4 + $0x38] sm:$0xff]  ;;  %v932_v13 = vld [vmem:[%s2238_s4 + $0x30] sm:$0xff]  ;;  %vm934_vm1 = vcmask 523264  }
   0xc   : > { %532 = vmatpush.msra.mxu0 %v323_v0  ;;  %1749 = vmatpush.msra.mxu3 %v323_v0  ;;  %s1618_s26 = sshll.u32 %s2242_s25, 3  ;;  %v931_v15 = vld [vmem:[%s2238_s4 + $0x28] sm:$0xff]  ;;  %v930_v16 = vld [vmem:[%s2238_s4 + $0x20] sm:$0xff]  ;;  %v929_v17 = vld [vmem:[%s2238_s4 + $0x18] sm:$0xff]  ;;  %s2244_s22 = smov (!%p253_p4, %s1827_s22), 3 }
   0xd   : > { %s1838_s29 = scalar_lea.vmem %s2234_s0, %s1618_s26  ;;  %1135 = vmatpush.msra.mxu1 %v933_v12  ;;  %1750 = vmatpush.msra.mxu2 %v933_v12  ;;  %v928_v19 = vld [vmem:[%s2238_s4 + $0x10] sm:$0xff]  ;;  %v927_v20 = vld [vmem:[%s2238_s4 + $0x8] sm:$0xff]  ;;  %v926_v21 = vld [vmem:[%s2238_s4] sm:$0xff]  ;;  %s255_s10 = scalar_lea.vmem %s2239_s5, %s2244_s22 }
   0xe   : > { %v259_v1 = vld [vmem:[%s1838_s29] sm:$0xff]  ;;  %v260_v2 = vld [vmem:[%s1838_s29 + $0x8] sm:$0xff]  ;;  %v261_v3 = vld [vmem:[%s1838_s29 + $0x10] sm:$0xff]  ;;  %1751 = vmatpush.msrb.mxu3 %v933_v12  ;;  %s258_s13 = scalar_lea.vmem %s2240_s6, %s2244_s22 }
   0xf   : > { %1619 = vmatmul.msk.f32.vlgmr.msra.gmra.mxu0 %vm324_vm0, %v259_v1  ;;  %v262_v4 = vld [vmem:[%s1838_s29 + $0x18] sm:$0xff]  ;;  %v263_v5 = vld [vmem:[%s1838_s29 + $0x20] sm:$0xff]  ;;  %v264_v6 = vld [vmem:[%s1838_s29 + $0x28] sm:$0xff]  ;;  %1136 = vmatpush.msra.mxu1 %v932_v13 }
  0x10   : > { %v265_v7 = vld [vmem:[%s1838_s29 + $0x30] sm:$0xff]  ;;  %v266_v8 = vld [vmem:[%s1838_s29 + $0x38] sm:$0xff]  ;;  %v267_v9 = vld [vmem:[%s1838_s29 + $0x40] sm:$0xff]  ;;  %1752 = vmatpush.msra.mxu2 %v932_v13  ;;  %1753 = vmatpush.msrb.mxu3 %v932_v13 }
  0x11   : > { %v268_v10 = vld [vmem:[%s1838_s29 + $0x48] sm:$0xff]  ;;  %v269_v11 = vld [vmem:[%s1838_s29 + $0x50] sm:$0xff]  ;;  %v270_v14 = vld [vmem:[%s1838_s29 + $0x58] sm:$0xff]  ;;  %1137 = vmatpush.msra.mxu1 %v931_v15 }
  0x12   : > { %1754 = vmatpush.msra.mxu2 %v931_v15  ;;  %1755 = vmatpush.msrb.mxu3 %v931_v15  ;;  %v271_v18 = vld [vmem:[%s1838_s29 + $0x60] sm:$0xff]  ;;  %v272_v22 = vld [vmem:[%s1838_s29 + $0x68] sm:$0xff]  ;;  %v273_v23 = vld [vmem:[%s1838_s29 + $0x70] sm:$0xff] }
  0x13   : > { %1138 = vmatpush.msra.mxu1 %v930_v16  ;;  %v274_v24 = vld [vmem:[%s1838_s29 + $0x78] sm:$0xff]  ;;  %v1899_v25 = vld [vmem:[%s2235_s1] ss:$0 sm:$0xff]  ;;  %v276_v33 = vld [vmem:[%s1838_s29 + $0x88] sm:$0xff] }
  0x14   : > { %1756 = vmatpush.msra.mxu2 %v930_v16  ;;  %1757 = vmatpush.msrb.mxu3 %v930_v16  ;;  %v1904_v26 = vld [vmem:[%s2236_s2] ss:$0 sm:$0xff]  ;;  %v277_v38 = vld [vmem:[%s1838_s29 + $0x90] sm:$0xff]  ;;  %v278_v43 = vld [vmem:[%s1838_s29 + $0x98] sm:$0xff] }
  0x15   : > { %1139 = vmatpush.msra.mxu1 %v929_v17  ;;  %v275_v28 = vld [vmem:[%s1838_s29 + $0x80] sm:$0xff]  ;;  %v280_v53 = vld [vmem:[%s1838_s29 + $0xa8] sm:$0xff]  ;;  %v281_v58 = vld [vmem:[%s1838_s29 + $0xb0] sm:$0xff] }
  0x16   : > { %1758 = vmatpush.msra.mxu2 %v929_v17  ;;  %1759 = vmatpush.msrb.mxu3 %v929_v17  ;;  %v279_v48 = vld [vmem:[%s1838_s29 + $0xa0] sm:$0xff]  ;;  %v282_v63 = vld [vmem:[%s1838_s29 + $0xb8] sm:$0xff] }
  0x17   : > { %1620 = vmatmul.msk.f32.gmra.mxu0 %vm324_vm0, %v260_v2  ;;  %1140 = vmatpush.msra.mxu1 %v928_v19 }
  0x18   : > { %1760 = vmatpush.msra.mxu2 %v928_v19  ;;  %1761 = vmatpush.msrb.mxu3 %v928_v19  ;;  %v286_v19 = vld [vmem:[%s1838_s29 + $0xd8] sm:$0xff] }
  0x19   : > { %1141 = vmatpush.msra.mxu1 %v927_v20 }
  0x1a   : > { %1762 = vmatpush.msra.mxu2 %v927_v20  ;;  %1763 = vmatpush.msrb.mxu3 %v927_v20 }
  0x1b   : > { %1142 = vmatpush.msra.mxu1 %v926_v21 }
  0x1c   : > { %1764 = vmatpush.msra.mxu2 %v926_v21  ;;  %1765 = vmatpush.msrb.mxu3 %v926_v21 }
  0x1f   : > { %1621 = vmatmul.msk.f32.gmra.mxu0 %vm324_vm0, %v261_v3 }
  0x27   : > { %1622 = vmatmul.msk.f32.gmra.mxu0 %vm324_vm0, %v262_v4  ;;  %v283_v4 = vld [vmem:[%s1838_s29 + $0xc0] sm:$0xff] }
  0x2f   : > { %1623 = vmatmul.msk.f32.gmra.mxu0 %vm324_vm0, %v263_v5 }
  0x37   : > { %1624 = vmatmul.msk.f32.gmra.mxu0 %vm324_vm0, %v264_v6 }
  0x3f   : > { %1625 = vmatmul.msk.f32.gmra.mxu0 %vm324_vm0, %v265_v7 }
  0x47   : > { %1626 = vmatmul.msk.f32.gmra.mxu0 %vm324_vm0, %v266_v8 }
  0x4f   : > { %1627 = vmatmul.msk.f32.gmra.mxu0 %vm324_vm0, %v267_v9  ;;  %v284_v9 = vld [vmem:[%s1838_s29 + $0xc8] sm:$0xff] }
  0x57   : > { %1628 = vmatmul.msk.f32.gmra.mxu0 %vm324_vm0, %v268_v10 }
  0x5f   : > { %1629 = vmatmul.msk.f32.gmra.mxu0 %vm324_vm0, %v269_v11 }
  0x67   : > { %1630 = vmatmul.msk.f32.gmra.mxu0 %vm324_vm0, %v270_v14  ;;  %v285_v14 = vld [vmem:[%s1838_s29 + $0xd0] sm:$0xff] }
  0x6f   : > { %1631 = vmatmul.msk.f32.gmra.mxu0 %vm324_vm0, %v271_v18 }
  0x77   : > { %1632 = vmatmul.msk.f32.gmra.mxu0 %vm324_vm0, %v272_v22 }
  0x7f   : > { %1633 = vmatmul.msk.f32.gmra.mxu0 %vm324_vm0, %v273_v23  ;;  %v292_v23 = vld [vmem:[%s1838_s29 + $0x108] sm:$0xff] }
  0x80   : > { %1652 = vmatmul.msk.f32.vlgmr.msra.gmra.mxu3 %vm324_vm0, %v292_v23 }
  0x87   : > { %1634 = vmatmul.msk.f32.gmra.mxu0 %vm324_vm0, %v274_v24 }
  0x8c   : > { %v534_v27 = vpop.f32.mrf.mxu0 }
  0x8d   : > { %v730_v29 = vmul.f32 %v1899_v25, %v534_v27  ;;  %v287_v27 = vld [vmem:[%s1838_s29 + $0xe0] sm:$0xff] }
  0x8f   : > { %v798_v30 = vadd.f32 %v1904_v26, %v730_v29  ;;  %1635 = vmatmul.msk.f32.gmra.mxu0 %vm324_vm0, %v275_v28 }
  0x91   : > { %v862_v31 = vmax.f32 %v798_v30, 0.0 }
  0x93   : > { %1683 = vmatmul.msk.f32.vlgmr.msra.gmra.mxu1 %vm934_vm1, %v862_v31  ;;  %v293_v31 = vld [vmem:[%s1838_s29 + $0x110] sm:$0xff] }
  0x94   : > { %v537_v32 = vpop.f32.mrf.mxu0  ;;  %1653 = vmatmul.msk.f32.gmra.mxu3 %vm324_vm0, %v293_v31  ;;  %v303_v31 = vld [vmem:[%s1838_s29 + $0x160] sm:$0xff] }
  0x95   : > { %v731_v34 = vmul.f32 %v1899_v25, %v537_v32 }
  0x97   : > { %v799_v35 = vadd.f32 %v1904_v26, %v731_v34  ;;  %1636 = vmatmul.msk.f32.gmra.mxu0 %vm324_vm0, %v276_v33  ;;  %v288_v33 = vld [vmem:[%s1838_s29 + $0xe8] sm:$0xff] }
  0x99   : > { %v863_v36 = vmax.f32 %v799_v35, 0.0 }
  0x9b   : > { %1684 = vmatmul.msk.f32.gmra.mxu1 %vm934_vm1, %v863_v36 }
  0x9c   : > { %v540_v37 = vpop.f32.mrf.mxu0 }
  0x9d   : > { %v732_v39 = vmul.f32 %v1899_v25, %v540_v37  ;;  %v294_v37 = vld [vmem:[%s1838_s29 + $0x118] sm:$0xff] }
  0x9e   : > { %1654 = vmatmul.msk.f32.gmra.mxu3 %vm324_vm0, %v294_v37 }
  0x9f   : > { %v800_v40 = vadd.f32 %v1904_v26, %v732_v39  ;;  %1637 = vmatmul.msk.f32.gmra.mxu0 %vm324_vm0, %v277_v38  ;;  %v289_v39 = vld [vmem:[%s1838_s29 + $0xf0] sm:$0xff] }
  0xa1   : > { %v864_v41 = vmax.f32 %v800_v40, 0.0 }
  0xa3   : > { %1685 = vmatmul.msk.f32.gmra.mxu1 %vm934_vm1, %v864_v41 }
  0xa4   : > { %v543_v42 = vpop.f32.mrf.mxu0 }
  0xa5   : > { %v733_v44 = vmul.f32 %v1899_v25, %v543_v42 }
  0xa7   : > { %v801_v45 = vadd.f32 %v1904_v26, %v733_v44  ;;  %1638 = vmatmul.msk.f32.gmra.mxu0 %vm324_vm0, %v278_v43  ;;  %v295_v43 = vld [vmem:[%s1838_s29 + $0x120] sm:$0xff] }
  0xa8   : > { %1655 = vmatmul.msk.f32.gmra.mxu3 %vm324_vm0, %v295_v43 }
  0xa9   : > { %v865_v46 = vmax.f32 %v801_v45, 0.0  ;;  %v290_v45 = vld [vmem:[%s1838_s29 + $0xf8] sm:$0xff] }
  0xab   : > { %1686 = vmatmul.msk.f32.gmra.mxu1 %vm934_vm1, %v865_v46 }
  0xac   : > { %v546_v47 = vpop.f32.mrf.mxu0 }
  0xad   : > { %v734_v49 = vmul.f32 %v1899_v25, %v546_v47 }
  0xaf   : > { %v802_v50 = vadd.f32 %v1904_v26, %v734_v49  ;;  %1639 = vmatmul.msk.f32.gmra.mxu0 %vm324_vm0, %v279_v48  ;;  %v296_v49 = vld [vmem:[%s1838_s29 + $0x128] sm:$0xff] }
  0xb0   : > { %1656 = vmatmul.msk.f32.gmra.mxu3 %vm324_vm0, %v296_v49  ;;  %v304_v49 = vld [vmem:[%s1838_s29 + $0x168] sm:$0xff] }
  0xb1   : > { %v866_v51 = vmax.f32 %v802_v50, 0.0 }
  0xb3   : > { %1687 = vmatmul.msk.f32.gmra.mxu1 %vm934_vm1, %v866_v51  ;;  %v291_v51 = vld [vmem:[%s1838_s29 + $0x100] sm:$0xff] }
  0xb4   : > { %v549_v52 = vpop.f32.mrf.mxu0 }
  0xb5   : > { %v735_v54 = vmul.f32 %v1899_v25, %v549_v52 }
  0xb7   : > { %v803_v55 = vadd.f32 %v1904_v26, %v735_v54  ;;  %1640 = vmatmul.msk.f32.gmra.mxu0 %vm324_vm0, %v280_v53 }
  0xb9   : > { %v867_v56 = vmax.f32 %v803_v55, 0.0 }
  0xbb   : > { %1688 = vmatmul.msk.f32.gmra.mxu1 %vm934_vm1, %v867_v56  ;;  %v297_v56 = vld [vmem:[%s1838_s29 + $0x130] sm:$0xff] }
  0xbc   : > { %v552_v57 = vpop.f32.mrf.mxu0  ;;  %1657 = vmatmul.msk.f32.gmra.mxu3 %vm324_vm0, %v297_v56 }
  0xbd   : > { %v736_v59 = vmul.f32 %v1899_v25, %v552_v57 }
  0xbf   : > { %v804_v60 = vadd.f32 %v1904_v26, %v736_v59  ;;  %1641 = vmatmul.msk.f32.gmra.mxu0 %vm324_vm0, %v281_v58 }
  0xc1   : > { %v868_v61 = vmax.f32 %v804_v60, 0.0 }
  0xc3   : > { %1689 = vmatmul.msk.f32.gmra.mxu1 %vm934_vm1, %v868_v61 }
  0xc4   : > { %v555_v62 = vpop.f32.mrf.mxu0 }
  0xc5   : > { %v737_v0 = vmul.f32 %v1899_v25, %v555_v62  ;;  %v298_v62 = vld [vmem:[%s1838_s29 + $0x138] sm:$0xff] }
  0xc6   : > { %1658 = vmatmul.msk.f32.gmra.mxu3 %vm324_vm0, %v298_v62 }
  0xc7   : > { %v805_v1 = vadd.f32 %v1904_v26, %v737_v0  ;;  %1642 = vmatmul.msk.f32.gmra.mxu0 %vm324_vm0, %v282_v63 }
  0xc9   : > { %v869_v2 = vmax.f32 %v805_v1, 0.0 }
  0xcb   : > { %1690 = vmatmul.msk.f32.gmra.mxu1 %vm934_vm1, %v869_v2 }
  0xcc   : > { %v558_v3 = vpop.f32.mrf.mxu0 }
  0xcd   : > { %v738_v5 = vmul.f32 %v1899_v25, %v558_v3 }
  0xcf   : > { %v806_v6 = vadd.f32 %v1904_v26, %v738_v5  ;;  %1643 = vmatmul.msk.f32.gmra.mxu0 %vm324_vm0, %v283_v4  ;;  %v299_v4 = vld [vmem:[%s1838_s29 + $0x140] sm:$0xff] }
  0xd0   : > { %1659 = vmatmul.msk.f32.gmra.mxu3 %vm324_vm0, %v299_v4 }
  0xd1   : > { %v870_v7 = vmax.f32 %v806_v6, 0.0 }
  0xd3   : > { %1691 = vmatmul.msk.f32.gmra.mxu1 %vm934_vm1, %v870_v7 }
  0xd4   : > { %v561_v8 = vpop.f32.mrf.mxu0 }
  0xd5   : > { %v739_v10 = vmul.f32 %v1899_v25, %v561_v8 }
  0xd7   : > { %v807_v11 = vadd.f32 %v1904_v26, %v739_v10  ;;  %1644 = vmatmul.msk.f32.gmra.mxu0 %vm324_vm0, %v284_v9  ;;  %v300_v10 = vld [vmem:[%s1838_s29 + $0x148] sm:$0xff] }
  0xd8   : > { %1660 = vmatmul.msk.f32.gmra.mxu3 %vm324_vm0, %v300_v10 }
  0xd9   : > { %v871_v12 = vmax.f32 %v807_v11, 0.0 }
  0xdb   : > { %1692 = vmatmul.msk.f32.gmra.mxu1 %vm934_vm1, %v871_v12 }
  0xdc   : > { %v564_v13 = vpop.f32.mrf.mxu0 }
  0xdd   : > { %v740_v15 = vmul.f32 %v1899_v25, %v564_v13 }
  0xdf   : > { %v808_v16 = vadd.f32 %v1904_v26, %v740_v15  ;;  %1645 = vmatmul.msk.f32.gmra.mxu0 %vm324_vm0, %v285_v14 }
  0xe1   : > { %v872_v17 = vmax.f32 %v808_v16, 0.0  ;;  %v301_v16 = vld [vmem:[%s1838_s29 + $0x150] sm:$0xff] }
  0xe2   : > { %1661 = vmatmul.msk.f32.gmra.mxu3 %vm324_vm0, %v301_v16 }
  0xe3   : > { %1693 = vmatmul.msk.f32.gmra.mxu1 %vm934_vm1, %v872_v17 }
  0xe4   : > { %v567_v18 = vpop.f32.mrf.mxu0 }
  0xe5   : > { %v741_v20 = vmul.f32 %v1899_v25, %v567_v18 }
  0xe7   : > { %v809_v21 = vadd.f32 %v1904_v26, %v741_v20  ;;  %1646 = vmatmul.msk.f32.gmra.mxu0 %vm324_vm0, %v286_v19 }
  0xe9   : > { %v873_v22 = vmax.f32 %v809_v21, 0.0 }
  0xeb   : > { %1694 = vmatmul.msk.f32.gmra.mxu1 %vm934_vm1, %v873_v22  ;;  %v302_v22 = vld [vmem:[%s1838_s29 + $0x158] sm:$0xff] }
  0xec   : > { %v570_v24 = vpop.f32.mrf.mxu0  ;;  %1662 = vmatmul.msk.f32.gmra.mxu3 %vm324_vm0, %v302_v22 }
  0xed   : > { %v742_v28 = vmul.f32 %v1899_v25, %v570_v24 }
  0xef   : > { %v810_v29 = vadd.f32 %v1904_v26, %v742_v28  ;;  %1647 = vmatmul.msk.f32.gmra.mxu0 %vm324_vm0, %v287_v27 }
  0xf1   : > { %v874_v30 = vmax.f32 %v810_v29, 0.0 }
  0xf3   : > { %1695 = vmatmul.msk.f32.gmra.mxu1 %vm934_vm1, %v874_v30 }
  0xf4   : > { %v573_v32 = vpop.f32.mrf.mxu0  ;;  %1663 = vmatmul.msk.f32.gmra.mxu3 %vm324_vm0, %v303_v31  ;;  %v308_v31 = vld [vmem:[%s1838_s29 + $0x188] sm:$0xff] }
  0xf5   : > { %v743_v34 = vmul.f32 %v1899_v25, %v573_v32 }
  0xf7   : > { %v811_v35 = vadd.f32 %v1904_v26, %v743_v34  ;;  %1648 = vmatmul.msk.f32.gmra.mxu0 %vm324_vm0, %v288_v33 }
  0xf9   : > { %v875_v36 = vmax.f32 %v811_v35, 0.0 }
  0xfb   : > { %1696 = vmatmul.msk.f32.gmra.mxu1 %vm934_vm1, %v875_v36 }
  0xfc   : > { %v576_v38 = vpop.f32.mrf.mxu0  ;;  %1664 = vmatmul.msk.f32.gmra.mxu3 %vm324_vm0, %v304_v49 }
  0xfd   : > { %v744_v40 = vmul.f32 %v1899_v25, %v576_v38 }
  0xff   : > { %v812_v41 = vadd.f32 %v1904_v26, %v744_v40  ;;  %1649 = vmatmul.msk.f32.gmra.mxu0 %vm324_vm0, %v289_v39 }
 0x101   : > { %v876_v42 = vmax.f32 %v812_v41, 0.0 }
 0x103   : > { %1697 = vmatmul.msk.f32.gmra.mxu1 %vm934_vm1, %v876_v42 }
 0x104   : > { %v579_v44 = vpop.f32.mrf.mxu0 }
 0x105   : > { %v745_v46 = vmul.f32 %v1899_v25, %v579_v44 }
 0x107   : > { %v813_v47 = vadd.f32 %v1904_v26, %v745_v46  ;;  %1650 = vmatmul.msk.f32.gmra.mxu0 %vm324_vm0, %v290_v45 }
 0x109   : > { %v877_v48 = vmax.f32 %v813_v47, 0.0 }
 0x10b   : > { %1698 = vmatmul.msk.f32.gmra.mxu1 %vm934_vm1, %v877_v48 }
 0x10c   : > { %v582_v50 = vpop.f32.mrf.mxu0 }
 0x10d   : > { %v746_v52 = vmul.f32 %v1899_v25, %v582_v50 }
 0x10f   : > { %v814_v53 = vadd.f32 %v1904_v26, %v746_v52  ;;  %1651 = vmatmul.msk.f32.gmra.mxu0 %vm324_vm0, %v291_v51 }
 0x110   : > { %v1144_v54 = vpop.f32.mrf.mxu1 }
 0x111   : > { %v878_v55 = vmax.f32 %v814_v53, 0.0  ;;  %v1406_v32 = vmul.f32 %v1144_v54, %v1144_v54 }
 0x113   : > { %1699 = vmatmul.msk.f32.gmra.mxu1 %vm934_vm1, %v878_v55 }
 0x114   : > { %v585_v57 = vpop.f32.mrf.mxu0 }
 0x115   : > { %v747_v58 = vmul.f32 %v1899_v25, %v585_v57 }
 0x117   : > { %v815_v59 = vadd.f32 %v1904_v26, %v747_v58 }
 0x118   : > { %v1147_v60 = vpop.f32.mrf.mxu1 }
 0x119   : > { %v879_v61 = vmax.f32 %v815_v59, 0.0  ;;  %v1407_v29 = vmul.f32 %v1147_v60, %v1147_v60  ;;  %v1336_v33 = vadd.f32 %v1147_v60, %v1144_v54 }
 0x11b   : > { %1700 = vmatmul.msk.f32.gmra.mxu1 %vm934_vm1, %v879_v61  ;;  %v1470_v36 = vadd.f32 %v1407_v29, %v1406_v32 }
 0x11c   : > { %v588_v63 = vpop.f32.mrf.mxu0 }
 0x11d   : > { %v748_v0 = vmul.f32 %v1899_v25, %v588_v63 }
 0x11f   : > { %v816_v1 = vadd.f32 %v1904_v26, %v748_v0 }
 0x120   : > { %v1150_v2 = vpop.f32.mrf.mxu1 }
 0x121   : > { %v880_v3 = vmax.f32 %v816_v1, 0.0  ;;  %v1408_v34 = vmul.f32 %v1150_v2, %v1150_v2  ;;  %v1337_v37 = vadd.f32 %v1336_v33, %v1150_v2  ;;  %v305_v2 = vld [vmem:[%s1838_s29 + $0x170] sm:$0xff] }
 0x122   : > { %1665 = vmatmul.msk.f32.gmra.mxu3 %vm324_vm0, %v305_v2 }
 0x123   : > { %1701 = vmatmul.msk.f32.gmra.mxu1 %vm934_vm1, %v880_v3  ;;  %v1471_v40 = vadd.f32 %v1470_v36, %v1408_v34 }
 0x124   : > { %v591_v5 = vpop.f32.mrf.mxu0 }
 0x125   : > { %v749_v6 = vmul.f32 %v1899_v25, %v591_v5 }
 0x127   : > { %v817_v7 = vadd.f32 %v1904_v26, %v749_v6 }
 0x128   : > { %v1153_v8 = vpop.f32.mrf.mxu1 }
 0x129   : > { %v881_v9 = vmax.f32 %v817_v7, 0.0  ;;  %v1409_v38 = vmul.f32 %v1153_v8, %v1153_v8  ;;  %v1338_v41 = vadd.f32 %v1337_v37, %v1153_v8 }
 0x12b   : > { %1702 = vmatmul.msk.f32.gmra.mxu1 %vm934_vm1, %v881_v9  ;;  %v1472_v45 = vadd.f32 %v1471_v40, %v1409_v38 }
 0x12c   : > { %v594_v11 = vpop.f32.mrf.mxu0 }
 0x12d   : > { %v750_v12 = vmul.f32 %v1899_v25, %v594_v11  ;;  %v306_v11 = vld [vmem:[%s1838_s29 + $0x178] sm:$0xff] }
 0x12e   : > { %1666 = vmatmul.msk.f32.gmra.mxu3 %vm324_vm0, %v306_v11 }
 0x12f   : > { %v818_v13 = vadd.f32 %v1904_v26, %v750_v12 }
 0x130   : > { %v1156_v14 = vpop.f32.mrf.mxu1 }
 0x131   : > { %v882_v15 = vmax.f32 %v818_v13, 0.0  ;;  %v1410_v42 = vmul.f32 %v1156_v14, %v1156_v14  ;;  %v1339_v46 = vadd.f32 %v1338_v41, %v1156_v14  ;;  %v309_v41 = vld [vmem:[%s1838_s29 + $0x190] sm:$0xff] }
 0x133   : > { %1703 = vmatmul.msk.f32.gmra.mxu1 %vm934_vm1, %v882_v15  ;;  %v1473_v50 = vadd.f32 %v1472_v45, %v1410_v42 }
 0x134   : > { %v597_v17 = vpop.f32.mrf.mxu0 }
 0x135   : > { %v751_v18 = vmul.f32 %v1899_v25, %v597_v17 }
 0x137   : > { %v819_v19 = vadd.f32 %v1904_v26, %v751_v18 }
 0x138   : > { %v1159_v20 = vpop.f32.mrf.mxu1 }
 0x139   : > { %v883_v21 = vmax.f32 %v819_v19, 0.0  ;;  %v1411_v47 = vmul.f32 %v1159_v20, %v1159_v20  ;;  %v1340_v51 = vadd.f32 %v1339_v46, %v1159_v20  ;;  %v307_v20 = vld [vmem:[%s1838_s29 + $0x180] sm:$0xff] }
 0x13a   : > { %1667 = vmatmul.msk.f32.gmra.mxu3 %vm324_vm0, %v307_v20 }
 0x13b   : > { %1704 = vmatmul.msk.f32.gmra.mxu1 %vm934_vm1, %v883_v21  ;;  %v1474_v54 = vadd.f32 %v1473_v50, %v1411_v47 }
 0x13c   : > { %v600_v23 = vpop.f32.mrf.mxu0 }
 0x13d   : > { %v752_v24 = vmul.f32 %v1899_v25, %v600_v23 }
 0x13f   : > { %v820_v27 = vadd.f32 %v1904_v26, %v752_v24 }
 0x140   : > { %v1162_v28 = vpop.f32.mrf.mxu1 }
 0x141   : > { %v884_v30 = vmax.f32 %v820_v27, 0.0  ;;  %v1412_v52 = vmul.f32 %v1162_v28, %v1162_v28  ;;  %v1341_v55 = vadd.f32 %v1340_v51, %v1162_v28  ;;  %v310_v51 = vld [vmem:[%s1838_s29 + $0x198] sm:$0xff] }
 0x142   : > { %1668 = vmatmul.msk.f32.gmra.mxu3 %vm324_vm0, %v308_v31 }
 0x143   : > { %1705 = vmatmul.msk.f32.gmra.mxu1 %vm934_vm1, %v884_v30  ;;  %v1475_v58 = vadd.f32 %v1474_v54, %v1412_v52 }
 0x144   : > { %v603_v35 = vpop.f32.mrf.mxu0 }
 0x145   : > { %v753_v39 = vmul.f32 %v1899_v25, %v603_v35  ;;  %v633_v35 = vpop.f32.mrf.mxu3 }
 0x147   : > { %v821_v43 = vadd.f32 %v1904_v26, %v753_v39 }
 0x148   : > { %v1165_v44 = vpop.f32.mrf.mxu1 }
 0x149   : > { %v885_v48 = vmax.f32 %v821_v43, 0.0  ;;  %v1413_v56 = vmul.f32 %v1165_v44, %v1165_v44  ;;  %v1342_v59 = vadd.f32 %v1341_v55, %v1165_v44 }
 0x14a   : > { %1669 = vmatmul.msk.f32.gmra.mxu3 %vm324_vm0, %v309_v41 }
 0x14b   : > { %1706 = vmatmul.msk.f32.gmra.mxu1 %vm934_vm1, %v885_v48  ;;  %v1476_v62 = vadd.f32 %v1475_v58, %v1413_v56 }
 0x14c   : > { %v606_v53 = vpop.f32.mrf.mxu0 }
 0x14d   : > { %v754_v57 = vmul.f32 %v1899_v25, %v606_v53  ;;  %v636_v45 = vpop.f32.mrf.mxu3 }
 0x14f   : > { %v822_v60 = vadd.f32 %v1904_v26, %v754_v57 }
 0x150   : > { %v1168_v61 = vpop.f32.mrf.mxu1 }
 0x151   : > { %v886_v63 = vmax.f32 %v822_v60, 0.0  ;;  %v1343_v0 = vadd.f32 %v1342_v59, %v1168_v61  ;;  %v1414_v1 = vmul.f32 %v1168_v61, %v1168_v61  ;;  %v311_v61 = vld [vmem:[%s1838_s29 + $0x1a0] sm:$0xff] }
 0x152   : > { %1670 = vmatmul.msk.f32.gmra.mxu3 %vm324_vm0, %v310_v51 }
 0x153   : > { %v1477_v3 = vadd.f32 %v1476_v62, %v1414_v1  ;;  %1707 = vmatmul.msk.f32.gmra.mxu1 %vm934_vm1, %v886_v63 }
 0x154   : > { %v609_v4 = vpop.f32.mrf.mxu0 }
 0x155   : > { %v755_v5 = vmul.f32 %v1899_v25, %v609_v4  ;;  %v639_v55 = vpop.f32.mrf.mxu3 }
 0x157   : > { %v823_v6 = vadd.f32 %v1904_v26, %v755_v5 }
 0x158   : > { %v1171_v7 = vpop.f32.mrf.mxu1 }
 0x159   : > { %v887_v8 = vmax.f32 %v823_v6, 0.0  ;;  %v1344_v9 = vadd.f32 %v1343_v0, %v1171_v7  ;;  %v1415_v10 = vmul.f32 %v1171_v7, %v1171_v7  ;;  %v312_v7 = vld [vmem:[%s1838_s29 + $0x1a8] sm:$0xff] }
 0x15a   : > { %1671 = vmatmul.msk.f32.gmra.mxu3 %vm324_vm0, %v311_v61 }
 0x15b   : > { %v1478_v12 = vadd.f32 %v1477_v3, %v1415_v10  ;;  %1708 = vmatmul.msk.f32.gmra.mxu1 %vm934_vm1, %v887_v8 }
 0x15c   : > { %v612_v13 = vpop.f32.mrf.mxu0 }
 0x15d   : > { %v756_v14 = vmul.f32 %v1899_v25, %v612_v13  ;;  %v642_v1 = vpop.f32.mrf.mxu3 }
 0x15f   : > { %v824_v15 = vadd.f32 %v1904_v26, %v756_v14 }
 0x160   : > { %v1174_v16 = vpop.f32.mrf.mxu1 }
 0x161   : > { %v888_v17 = vmax.f32 %v824_v15, 0.0  ;;  %v1345_v18 = vadd.f32 %v1344_v9, %v1174_v16  ;;  %v1416_v19 = vmul.f32 %v1174_v16, %v1174_v16  ;;  %v763_v15 = vmul.f32 %v1899_v25, %v633_v35 }
 0x162   : > { %1672 = vmatmul.msk.f32.gmra.mxu3 %vm324_vm0, %v312_v7 }
 0x163   : > { %v1479_v21 = vadd.f32 %v1478_v12, %v1416_v19  ;;  %1709 = vmatmul.msk.f32.gmra.mxu1 %vm934_vm1, %v888_v17  ;;  %v831_v20 = vadd.f32 %v1904_v26, %v763_v15 }
 0x164   : > { %v615_v22 = vpop.f32.mrf.mxu0 }
 0x165   : > { %v757_v23 = vmul.f32 %v1899_v25, %v615_v22  ;;  %v645_v11 = vpop.f32.mrf.mxu3 }
 0x167   : > { %v825_v24 = vadd.f32 %v1904_v26, %v757_v23  ;;  %v764_v23 = vmul.f32 %v1899_v25, %v636_v45 }
 0x168   : > { %v1177_v27 = vpop.f32.mrf.mxu1 }
 0x169   : > { %v889_v28 = vmax.f32 %v825_v24, 0.0  ;;  %v1346_v29 = vadd.f32 %v1345_v18, %v1177_v27  ;;  %v1417_v30 = vmul.f32 %v1177_v27, %v1177_v27  ;;  %v313_v18 = vld [vmem:[%s1838_s29 + $0x1b0] sm:$0xff]  ;;  %v832_v31 = vadd.f32 %v1904_v26, %v764_v23 }
 0x16a   : > { %1673 = vmatmul.msk.f32.gmra.mxu3 %vm324_vm0, %v313_v18 }
 0x16b   : > { %v1480_v32 = vadd.f32 %v1479_v21, %v1417_v30  ;;  %1710 = vmatmul.msk.f32.gmra.mxu1 %vm934_vm1, %v889_v28  ;;  %v895_v28 = vmax.f32 %v831_v20, 0.0  ;;  %v322_v20 = vld [vmem:[%s1838_s29 + $0x1f8] sm:$0xff] }
 0x16c   : > { %v618_v33 = vpop.f32.mrf.mxu0 }
 0x16d   : > { %v758_v34 = vmul.f32 %v1899_v25, %v618_v33  ;;  %v648_v21 = vpop.f32.mrf.mxu3 }
 0x16f   : > { %v826_v36 = vadd.f32 %v1904_v26, %v758_v34  ;;  %v765_v34 = vmul.f32 %v1899_v25, %v639_v55 }
 0x170   : > { %v1180_v37 = vpop.f32.mrf.mxu1 }
 0x171   : > { %v890_v38 = vmax.f32 %v826_v36, 0.0  ;;  %v1347_v39 = vadd.f32 %v1346_v29, %v1180_v37  ;;  %v1418_v40 = vmul.f32 %v1180_v37, %v1180_v37  ;;  %v314_v29 = vld [vmem:[%s1838_s29 + $0x1b8] sm:$0xff]  ;;  %v896_v37 = vmax.f32 %v832_v31, 0.0 }
 0x172   : > { %1674 = vmatmul.msk.f32.gmra.mxu3 %vm324_vm0, %v314_v29 }
 0x173   : > { %v1481_v42 = vadd.f32 %v1480_v32, %v1418_v40  ;;  %1711 = vmatmul.msk.f32.gmra.mxu1 %vm934_vm1, %v890_v38  ;;  %v315_v38 = vld [vmem:[%s1838_s29 + $0x1c0] sm:$0xff]  ;;  %v833_v40 = vadd.f32 %v1904_v26, %v765_v34 }
 0x174   : > { %v621_v43 = vpop.f32.mrf.mxu0 }
 0x175   : > { %v759_v44 = vmul.f32 %v1899_v25, %v621_v43  ;;  %v651_v32 = vpop.f32.mrf.mxu3  ;;  %v766_v43 = vmul.f32 %v1899_v25, %v642_v1 }
 0x177   : > { %v827_v46 = vadd.f32 %v1904_v26, %v759_v44 }
 0x178   : > { %v1183_v47 = vpop.f32.mrf.mxu1 }
 0x179   : > { %v891_v48 = vmax.f32 %v827_v46, 0.0  ;;  %v1348_v49 = vadd.f32 %v1347_v39, %v1183_v47  ;;  %v1419_v50 = vmul.f32 %v1183_v47, %v1183_v47  ;;  %v897_v46 = vmax.f32 %v833_v40, 0.0  ;;  %v316_v47 = vld [vmem:[%s1838_s29 + $0x1c8] sm:$0xff] }
 0x17a   : > { %1675 = vmatmul.msk.f32.gmra.mxu3 %vm324_vm0, %v315_v38 }
 0x17b   : > { %v1482_v52 = vadd.f32 %v1481_v42, %v1419_v50  ;;  %1712 = vmatmul.msk.f32.gmra.mxu1 %vm934_vm1, %v891_v48 }
 0x17c   : > { %v624_v53 = vpop.f32.mrf.mxu0 }
 0x17d   : > { %v760_v54 = vmul.f32 %v1899_v25, %v624_v53  ;;  %v654_v41 = vpop.f32.mrf.mxu3 }
 0x17f   : > { %v828_v56 = vadd.f32 %v1904_v26, %v760_v54  ;;  %v317_v54 = vld [vmem:[%s1838_s29 + $0x1d0] sm:$0xff] }
 0x180   : > { %v1186_v57 = vpop.f32.mrf.mxu1 }
 0x181   : > { %v892_v58 = vmax.f32 %v828_v56, 0.0  ;;  %v1349_v59 = vadd.f32 %v1348_v49, %v1186_v57  ;;  %v1420_v60 = vmul.f32 %v1186_v57, %v1186_v57  ;;  %v834_v49 = vadd.f32 %v1904_v26, %v766_v43 }
 0x182   : > { %1676 = vmatmul.msk.f32.gmra.mxu3 %vm324_vm0, %v316_v47 }
 0x183   : > { %v1483_v62 = vadd.f32 %v1482_v52, %v1420_v60  ;;  %1713 = vmatmul.msk.f32.gmra.mxu1 %vm934_vm1, %v892_v58  ;;  %v767_v52 = vmul.f32 %v1899_v25, %v645_v11  ;;  %v898_v53 = vmax.f32 %v834_v49, 0.0  ;;  %v768_v58 = vmul.f32 %v1899_v25, %v648_v21  ;;  %v318_v60 = vld [vmem:[%s1838_s29 + $0x1d8] sm:$0xff] }
 0x184   : > { %v627_v63 = vpop.f32.mrf.mxu0 }
 0x185   : > { %v761_v0 = vmul.f32 %v1899_v25, %v627_v63  ;;  %v657_v50 = vpop.f32.mrf.mxu3  ;;  %v835_v55 = vadd.f32 %v1904_v26, %v767_v52  ;;  %v836_v61 = vadd.f32 %v1904_v26, %v768_v58 }
 0x187   : > { %v829_v2 = vadd.f32 %v1904_v26, %v761_v0  ;;  %v769_v0 = vmul.f32 %v1899_v25, %v651_v32  ;;  %v900_v1 = vmax.f32 %v836_v61, 0.0 }
 0x188   : > { %v1189_v3 = vpop.f32.mrf.mxu1 }
 0x189   : > { %v893_v4 = vmax.f32 %v829_v2, 0.0  ;;  %v1350_v5 = vadd.f32 %v1349_v59, %v1189_v3  ;;  %v1421_v6 = vmul.f32 %v1189_v3, %v1189_v3  ;;  %v899_v59 = vmax.f32 %v835_v55, 0.0  ;;  %v319_v2 = vld [vmem:[%s1838_s29 + $0x1e0] sm:$0xff] }
 0x18a   : > { %1677 = vmatmul.msk.f32.gmra.mxu3 %vm324_vm0, %v317_v54  ;;  %v837_v3 = vadd.f32 %v1904_v26, %v769_v0 }
 0x18b   : > { %v1484_v8 = vadd.f32 %v1483_v62, %v1421_v6  ;;  %1714 = vmatmul.msk.f32.vlgmr.msra.gmra.mxu2 %vm934_vm1, %v893_v4  ;;  %v770_v6 = vmul.f32 %v1899_v25, %v654_v41 }
 0x18c   : > { %v630_v9 = vpop.f32.mrf.mxu0  ;;  %v901_v7 = vmax.f32 %v837_v3, 0.0 }
 0x18d   : > { %v762_v10 = vmul.f32 %v1899_v25, %v630_v9  ;;  %v660_v56 = vpop.f32.mrf.mxu3  ;;  %v838_v9 = vadd.f32 %v1904_v26, %v770_v6 }
 0x18f   : > { %v830_v12 = vadd.f32 %v1904_v26, %v762_v10 }
 0x190   : > { %v1192_v13 = vpop.f32.mrf.mxu1 }
 0x191   : > { %v894_v14 = vmax.f32 %v830_v12, 0.0  ;;  %v1351_v16 = vadd.f32 %v1350_v5, %v1192_v13  ;;  %v1422_v17 = vmul.f32 %v1192_v13, %v1192_v13  ;;  %v771_v12 = vmul.f32 %v1899_v25, %v657_v50 }
 0x192   : > { %1678 = vmatmul.msk.f32.gmra.mxu3 %vm324_vm0, %v318_v60  ;;  %v902_v13 = vmax.f32 %v838_v9, 0.0 }
 0x193   : > { %v1485_v19 = vadd.f32 %v1484_v8, %v1422_v17  ;;  %1715 = vmatmul.msk.f32.gmra.mxu2 %vm934_vm1, %v894_v14  ;;  %v320_v8 = vld [vmem:[%s1838_s29 + $0x1e8] sm:$0xff]  ;;  %v321_v14 = vld [vmem:[%s1838_s29 + $0x1f0] sm:$0xff]  ;;  %v839_v15 = vadd.f32 %v1904_v26, %v771_v12 }
 0x195   : > { %v663_v62 = vpop.f32.mrf.mxu3  ;;  %v903_v18 = vmax.f32 %v839_v15, 0.0 }
 0x198   : > { %v1195_v22 = vpop.f32.mrf.mxu1 }
 0x199   : > { %v1352_v24 = vadd.f32 %v1351_v16, %v1195_v22  ;;  %v1423_v27 = vmul.f32 %v1195_v22, %v1195_v22 }
 0x19a   : > { %1679 = vmatmul.msk.f32.gmra.mxu3 %vm324_vm0, %v319_v2 }
 0x19b   : > { %v1486_v30 = vadd.f32 %v1485_v19, %v1423_v27  ;;  %1716 = vmatmul.msk.f32.gmra.mxu2 %vm934_vm1, %v895_v28  ;;  %v772_v19 = vmul.f32 %v1899_v25, %v660_v56  ;;  %v773_v27 = vmul.f32 %v1899_v25, %v663_v62 }
 0x19d   : > { %v666_v4 = vpop.f32.mrf.mxu3  ;;  %v840_v21 = vadd.f32 %v1904_v26, %v772_v19  ;;  %v841_v28 = vadd.f32 %v1904_v26, %v773_v27 }
 0x19e   : > { %v774_v31 = vmul.f32 %v1899_v25, %v666_v4 }
 0x1a0   : > { %v1198_v33 = vpop.f32.mrf.mxu1 }
 0x1a1   : > { %v1353_v35 = vadd.f32 %v1352_v24, %v1198_v33  ;;  %v1424_v36 = vmul.f32 %v1198_v33, %v1198_v33  ;;  %v904_v24 = vmax.f32 %v840_v21, 0.0  ;;  %v842_v33 = vadd.f32 %v1904_v26, %v774_v31 }
 0x1a2   : > { %1680 = vmatmul.msk.f32.gmra.mxu3 %vm324_vm0, %v320_v8 }
 0x1a3   : > { %v1487_v39 = vadd.f32 %v1486_v30, %v1424_v36  ;;  %1717 = vmatmul.msk.f32.gmra.mxu2 %vm934_vm1, %v896_v37  ;;  %v905_v30 = vmax.f32 %v841_v28, 0.0 }
 0x1a5   : > { %v669_v10 = vpop.f32.mrf.mxu3 }
 0x1a6   : > { %v775_v36 = vmul.f32 %v1899_v25, %v669_v10 }
 0x1a8   : > { %v1201_v42 = vpop.f32.mrf.mxu1  ;;  %v843_v38 = vadd.f32 %v1904_v26, %v775_v36 }
 0x1a9   : > { %v2096_v44 = vadd.f32 %v1353_v35, %v1201_v42  ;;  %v1425_v45 = vmul.f32 %v1201_v42, %v1201_v42  ;;  %v906_v35 = vmax.f32 %v842_v33, 0.0 }
 0x1aa   : > { %1681 = vmatmul.msk.f32.gmra.mxu3 %vm324_vm0, %v321_v14  ;;  %v907_v43 = vmax.f32 %v843_v38, 0.0 }
 0x1ab   : > { %v2099_v48 = vadd.f32 %v1487_v39, %v1425_v45  ;;  %1718 = vmatmul.msk.f32.gmra.mxu2 %vm934_vm1, %v897_v46 }
 0x1ad   : > { %v672_v16 = vpop.f32.mrf.mxu3 }
 0x1ae   : > { %v776_v45 = vmul.f32 %v1899_v25, %v672_v16 }
 0x1b0   : > { %v2104_v51 = vpop.f32.mrf.mxu1  ;;  %v844_v54 = vadd.f32 %v1904_v26, %v776_v45 }
 0x1b1   : > { %v1426_v40 = vmul.f32 %v2104_v51, %v2104_v51  ;;  %v1355_v41 = vadd.f32 %v2096_v44, %v2104_v51 }
 0x1b2   : > { %1682 = vmatmul.msk.f32.gmra.mxu3 %vm324_vm0, %v322_v20  ;;  %v908_v62 = vmax.f32 %v844_v54, 0.0 }
 0x1b3   : > { %1719 = vmatmul.msk.f32.gmra.mxu2 %vm934_vm1, %v898_v53  ;;  %v1489_v46 = vadd.f32 %v2099_v48, %v1426_v40 }
 0x1b5   : > { %v675_v22 = vpop.f32.mrf.mxu3 }
 0x1b8   : > { %v2111_v57 = vpop.f32.mrf.mxu1 }
 0x1b9   : > { %v1427_v42 = vmul.f32 %v2111_v57, %v2111_v57  ;;  %v1356_v47 = vadd.f32 %v1355_v41, %v2111_v57 }
 0x1bb   : > { %1720 = vmatmul.msk.f32.gmra.mxu2 %vm934_vm1, %v899_v59  ;;  %v1490_v50 = vadd.f32 %v1489_v46, %v1427_v42  ;;  %v777_v59 = vmul.f32 %v1899_v25, %v675_v22 }
 0x1bd   : > { %v678_v29 = vpop.f32.mrf.mxu3 }
 0x1be   : > { %v778_v14 = vmul.f32 %v1899_v25, %v678_v29 }
 0x1c0   : > { %v1210_v63 = vpop.f32.mrf.mxu1  ;;  %v846_v20 = vadd.f32 %v1904_v26, %v778_v14 }
 0x1c1   : > { %v1428_v49 = vmul.f32 %v1210_v63, %v1210_v63  ;;  %v1357_v52 = vadd.f32 %v1356_v47, %v1210_v63  ;;  %v845_v63 = vadd.f32 %v1904_v26, %v777_v59 }
 0x1c2   : > { %v910_v28 = vmax.f32 %v846_v20, 0.0 }
 0x1c3   : > { %1721 = vmatmul.msk.f32.gmra.mxu2 %vm934_vm1, %v900_v1  ;;  %v1491_v51 = vadd.f32 %v1490_v50, %v1428_v49  ;;  %v909_v9 = vmax.f32 %v845_v63, 0.0 }
 0x1c5   : > { %v681_v34 = vpop.f32.mrf.mxu3 }
 0x1c8   : > { %v1213_v5 = vpop.f32.mrf.mxu1 }
 0x1c9   : > { %v1429_v53 = vmul.f32 %v1213_v5, %v1213_v5  ;;  %v1358_v56 = vadd.f32 %v1357_v52, %v1213_v5 }
 0x1cb   : > { %1722 = vmatmul.msk.f32.gmra.mxu2 %vm934_vm1, %v901_v7  ;;  %v1492_v60 = vadd.f32 %v1491_v51, %v1429_v53 }
 0x1cd   : > { %v2147_v39 = vpop.f32.mrf.mxu3 }
 0x1ce   : > { %v780_v38 = vmul.f32 %v1899_v25, %v2147_v39 }
 0x1d0   : > { %v1216_v11 = vpop.f32.mrf.mxu1  ;;  %v848_v41 = vadd.f32 %v1904_v26, %v780_v38 }
 0x1d1   : > { %v1430_v58 = vmul.f32 %v1216_v11, %v1216_v11  ;;  %v1359_v61 = vadd.f32 %v1358_v56, %v1216_v11 }
 0x1d2   : > { %v912_v46 = vmax.f32 %v848_v41, 0.0 }
 0x1d3   : > { %1723 = vmatmul.msk.f32.gmra.mxu2 %vm934_vm1, %v902_v13  ;;  %v1493_v57 = vadd.f32 %v1492_v60, %v1430_v58 }
 0x1d5   : > { %v687_v44 = vpop.f32.mrf.mxu3 }
 0x1d6   : > { %v781_v47 = vmul.f32 %v1899_v25, %v687_v44 }
 0x1d8   : > { %v1219_v17 = vpop.f32.mrf.mxu1  ;;  %v849_v50 = vadd.f32 %v1904_v26, %v781_v47 }
 0x1d9   : > { %v1431_v48 = vmul.f32 %v1219_v17, %v1219_v17  ;;  %v1360_v0 = vadd.f32 %v1359_v61, %v1219_v17 }
 0x1db   : > { %1724 = vmatmul.msk.f32.gmra.mxu2 %vm934_vm1, %v903_v18  ;;  %v1494_v2 = vadd.f32 %v1493_v57, %v1431_v48 }
 0x1dd   : > { %v690_v6 = vpop.f32.mrf.mxu3 }
 0x1de   : > { %v782_v51 = vmul.f32 %v1899_v25, %v690_v6  ;;  %v2185_v6 = vld [vmem:[%s2235_s1] ss:$0 sm:$0xff] }
 0x1e0   : > { %v1222_v23 = vpop.f32.mrf.mxu1  ;;  %v850_v58 = vadd.f32 %v1904_v26, %v782_v51 }
 0x1e1   : > { %v1432_v1 = vmul.f32 %v1222_v23, %v1222_v23  ;;  %v1361_v3 = vadd.f32 %v1360_v0, %v1222_v23 }
 0x1e2   : > { %v914_v48 = vmax.f32 %v850_v58, 0.0 }
 0x1e3   : > { %1725 = vmatmul.msk.f32.gmra.mxu2 %vm934_vm1, %v904_v24  ;;  %v1495_v7 = vadd.f32 %v1494_v2, %v1432_v1 }
 0x1e5   : > { %v693_v22 = vpop.f32.mrf.mxu3 }
 0x1e8   : > { %v1225_v32 = vpop.f32.mrf.mxu1 }
 0x1e9   : > { %v1433_v4 = vmul.f32 %v1225_v32, %v1225_v32  ;;  %v1362_v5 = vadd.f32 %v1361_v3, %v1225_v32 }
 0x1eb   : > { %1726 = vmatmul.msk.f32.gmra.mxu2 %vm934_vm1, %v905_v30  ;;  %v1496_v12 = vadd.f32 %v1495_v7, %v1433_v4  ;;  %v779_v30 = vmul.f32 %v1899_v25, %v681_v34 }
 0x1ed   : > { %v847_v29 = vadd.f32 %v1904_v26, %v779_v30  ;;  %v696_v33 = vpop.f32.mrf.mxu3 }
 0x1ee   : > { %v784_v7 = vmul.f32 %v2185_v6, %v696_v33 }
 0x1f0   : > { %v1228_v37 = vpop.f32.mrf.mxu1 }
 0x1f1   : > { %v1434_v8 = vmul.f32 %v1228_v37, %v1228_v37  ;;  %v1363_v11 = vadd.f32 %v1362_v5, %v1228_v37  ;;  %v911_v37 = vmax.f32 %v847_v29, 0.0 }
 0x1f3   : > { %1727 = vmatmul.msk.f32.gmra.mxu2 %vm934_vm1, %v906_v35  ;;  %v1497_v15 = vadd.f32 %v1496_v12, %v1434_v8 }
 0x1f5   : > { %v699_v34 = vpop.f32.mrf.mxu3 }
 0x1f8   : > { %v1231_v55 = vpop.f32.mrf.mxu1 }
 0x1f9   : > { %v1435_v13 = vmul.f32 %v1231_v55, %v1231_v55  ;;  %v1364_v16 = vadd.f32 %v1363_v11, %v1231_v55  ;;  %v913_v55 = vmax.f32 %v849_v50, 0.0 }
 0x1fb   : > { %1728 = vmatmul.msk.f32.gmra.mxu2 %vm934_vm1, %v907_v43  ;;  %v1498_v18 = vadd.f32 %v1497_v15, %v1435_v13  ;;  %v785_v13 = vmul.f32 %v2185_v6, %v699_v34 }
 0x1fd   : > { %v702_v53 = vpop.f32.mrf.mxu3 }
 0x200   : > { %v1234_v10 = vpop.f32.mrf.mxu1 }
 0x201   : > { %v1436_v17 = vmul.f32 %v1234_v10, %v1234_v10  ;;  %v1365_v19 = vadd.f32 %v1364_v16, %v1234_v10 }
 0x203   : > { %1729 = vmatmul.msk.f32.gmra.mxu2 %vm934_vm1, %v908_v62  ;;  %v1499_v23 = vadd.f32 %v1498_v18, %v1436_v17  ;;  %v783_v62 = vmul.f32 %v1899_v25, %v693_v22  ;;  %v2192_v25 = vld [vmem:[%s2236_s2] ss:$0 sm:$0xff] }
 0x204   : > { %v853_v15 = vadd.f32 %v2192_v25, %v785_v13 }
 0x205   : > { %v705_v60 = vpop.f32.mrf.mxu3  ;;  %v851_v0 = vadd.f32 %v1904_v26, %v783_v62  ;;  %v852_v26 = vadd.f32 %v2192_v25, %v784_v7 }
 0x206   : > { %v917_v20 = vmax.f32 %v853_v15, 0.0  ;;  %v787_v29 = vmul.f32 %v2185_v6, %v705_v60 }
 0x207   : > { %v915_v4 = vmax.f32 %v851_v0, 0.0  ;;  %v916_v11 = vmax.f32 %v852_v26, 0.0 }
 0x208   : > { %v855_v33 = vadd.f32 %v2192_v25, %v787_v29 }
 0x20b   : > { %1730 = vmatmul.msk.f32.gmra.mxu2 %vm934_vm1, %v909_v9 }
 0x20d   : > { %v708_v63 = vpop.f32.mrf.mxu3 }
 0x20e   : > { %v1237_v21 = vpop.f32.mrf.mxu2  ;;  %v788_v41 = vmul.f32 %v2185_v6, %v708_v63 }
 0x20f   : > { %v1366_v24 = vadd.f32 %v1365_v19, %v1237_v21  ;;  %v1437_v27 = vmul.f32 %v1237_v21, %v1237_v21  ;;  %v786_v21 = vmul.f32 %v2185_v6, %v702_v53 }
 0x210   : > { %v856_v34 = vadd.f32 %v2192_v25, %v788_v41 }
 0x211   : > { %v1500_v31 = vadd.f32 %v1499_v23, %v1437_v27  ;;  %v854_v23 = vadd.f32 %v2192_v25, %v786_v21 }
 0x212   : > { %v920_v50 = vmax.f32 %v856_v34, 0.0 }
 0x213   : > { %1731 = vmatmul.msk.f32.gmra.mxu2 %vm934_vm1, %v910_v28 }
 0x215   : > { %v711_v9 = vpop.f32.mrf.mxu3 }
 0x216   : > { %v1240_v32 = vpop.f32.mrf.mxu2 }
 0x217   : > { %v1367_v35 = vadd.f32 %v1366_v24, %v1240_v32  ;;  %v1438_v36 = vmul.f32 %v1240_v32, %v1240_v32 }
 0x219   : > { %v1501_v40 = vadd.f32 %v1500_v31, %v1438_v36  ;;  %v918_v31 = vmax.f32 %v854_v23, 0.0 }
 0x21b   : > { %1732 = vmatmul.msk.f32.gmra.mxu2 %vm934_vm1, %v911_v37 }
 0x21d   : > { %v714_v17 = vpop.f32.mrf.mxu3 }
 0x21e   : > { %v1243_v42 = vpop.f32.mrf.mxu2  ;;  %v790_v60 = vmul.f32 %v2185_v6, %v714_v17 }
 0x21f   : > { %v1368_v43 = vadd.f32 %v1367_v35, %v1243_v42  ;;  %v1439_v45 = vmul.f32 %v1243_v42, %v1243_v42 }
 0x221   : > { %v1502_v49 = vadd.f32 %v1501_v40, %v1439_v45  ;;  %v919_v40 = vmax.f32 %v855_v33, 0.0 }
 0x223   : > { %1733 = vmatmul.msk.f32.gmra.mxu2 %vm934_vm1, %v912_v46 }
 0x225   : > { %v717_v27 = vpop.f32.mrf.mxu3 }
 0x226   : > { %v1246_v52 = vpop.f32.mrf.mxu2 }
 0x227   : > { %v1369_v39 = vadd.f32 %v1368_v43, %v1246_v52  ;;  %v1440_v54 = vmul.f32 %v1246_v52, %v1246_v52  ;;  %v789_v52 = vmul.f32 %v2185_v6, %v711_v9 }
 0x229   : > { %v1503_v56 = vadd.f32 %v1502_v49, %v1440_v54 }
 0x22b   : > { %1734 = vmatmul.msk.f32.gmra.mxu2 %vm934_vm1, %v913_v55  ;;  %v857_v55 = vadd.f32 %v2192_v25, %v789_v52 }
 0x22d   : > { %v720_v36 = vpop.f32.mrf.mxu3 }
 0x22e   : > { %v1249_v59 = vpop.f32.mrf.mxu2  ;;  %v792_v26 = vmul.f32 %v2185_v6, %v720_v36 }
 0x22f   : > { %v1370_v44 = vadd.f32 %v1369_v39, %v1249_v59  ;;  %v1441_v61 = vmul.f32 %v1249_v59, %v1249_v59  ;;  %v921_v59 = vmax.f32 %v857_v55, 0.0 }
 0x230   : > { %v860_v9 = vadd.f32 %v2192_v25, %v792_v26 }
 0x231   : > { %v1504_v57 = vadd.f32 %v1503_v56, %v1441_v61  ;;  %v858_v61 = vadd.f32 %v2192_v25, %v790_v60 }
 0x232   : > { %v924_v13 = vmax.f32 %v860_v9, 0.0 }
 0x233   : > { %1735 = vmatmul.msk.f32.gmra.mxu2 %vm934_vm1, %v914_v48  ;;  %v922_v0 = vmax.f32 %v858_v61, 0.0 }
 0x235   : > { %v723_v45 = vpop.f32.mrf.mxu3 }
 0x236   : > { %v1252_v1 = vpop.f32.mrf.mxu2  ;;  %v793_v49 = vmul.f32 %v2185_v6, %v723_v45 }
 0x237   : > { %v1371_v2 = vadd.f32 %v1370_v44, %v1252_v1  ;;  %v1442_v3 = vmul.f32 %v1252_v1, %v1252_v1  ;;  %v791_v1 = vmul.f32 %v2185_v6, %v717_v27 }
 0x238   : > { %v861_v39 = vadd.f32 %v2192_v25, %v793_v49 }
 0x239   : > { %v1505_v5 = vadd.f32 %v1504_v57, %v1442_v3 }
 0x23a   : > { %v925_v54 = vmax.f32 %v861_v39, 0.0 }
 0x23b   : > { %1736 = vmatmul.msk.f32.gmra.mxu2 %vm934_vm1, %v915_v4 }
 0x23c   : > { %1746 = vmatmul.msk.f32.vlgmr.msrb.gmra.mxu3 %vm934_vm1, %v925_v54 }
 0x23e   : > { %v1255_v8 = vpop.f32.mrf.mxu2 }
 0x23f   : > { %v1372_v10 = vadd.f32 %v1371_v2, %v1255_v8  ;;  %v1443_v12 = vmul.f32 %v1255_v8, %v1255_v8  ;;  %v859_v2 = vadd.f32 %v2192_v25, %v791_v1 }
 0x241   : > { %v1506_v14 = vadd.f32 %v1505_v5, %v1443_v12  ;;  %v923_v5 = vmax.f32 %v859_v2, 0.0 }
 0x243   : > { %1737 = vmatmul.msk.f32.gmra.mxu2 %vm934_vm1, %v916_v11 }
 0x246   : > { %v1258_v16 = vpop.f32.mrf.mxu2 }
 0x247   : > { %v1373_v18 = vadd.f32 %v1372_v10, %v1258_v16  ;;  %v1444_v19 = vmul.f32 %v1258_v16, %v1258_v16 }
 0x249   : > { %v1507_v22 = vadd.f32 %v1506_v14, %v1444_v19 }
 0x24b   : > { %1738 = vmatmul.msk.f32.gmra.mxu2 %vm934_vm1, %v917_v20 }
 0x24e   : > { %v1261_v24 = vpop.f32.mrf.mxu2 }
 0x24f   : > { %v1374_v28 = vadd.f32 %v1373_v18, %v1261_v24  ;;  %v1445_v30 = vmul.f32 %v1261_v24, %v1261_v24 }
 0x251   : > { %v1508_v32 = vadd.f32 %v1507_v22, %v1445_v30 }
 0x253   : > { %1739 = vmatmul.msk.f32.gmra.mxu2 %vm934_vm1, %v918_v31 }
 0x256   : > { %v1264_v35 = vpop.f32.mrf.mxu2 }
 0x257   : > { %v1375_v37 = vadd.f32 %v1374_v28, %v1264_v35  ;;  %v1446_v38 = vmul.f32 %v1264_v35, %v1264_v35 }
 0x259   : > { %v1509_v42 = vadd.f32 %v1508_v32, %v1446_v38 }
 0x25b   : > { %1740 = vmatmul.msk.f32.gmra.mxu2 %vm934_vm1, %v919_v40 }
 0x25e   : > { %v1267_v43 = vpop.f32.mrf.mxu2 }
 0x25f   : > { %v1376_v46 = vadd.f32 %v1375_v37, %v1267_v43  ;;  %v1447_v47 = vmul.f32 %v1267_v43, %v1267_v43 }
 0x261   : > { %v1510_v53 = vadd.f32 %v1509_v42, %v1447_v47 }
 0x263   : > { %1741 = vmatmul.msk.f32.gmra.mxu2 %vm934_vm1, %v920_v50 }
 0x266   : > { %v1270_v51 = vpop.f32.mrf.mxu2 }
 0x267   : > { %v1377_v56 = vadd.f32 %v1376_v46, %v1270_v51  ;;  %v1448_v58 = vmul.f32 %v1270_v51, %v1270_v51 }
 0x269   : > { %v1511_v44 = vadd.f32 %v1510_v53, %v1448_v58 }
 0x26b   : > { %1742 = vmatmul.msk.f32.gmra.mxu2 %vm934_vm1, %v921_v59 }
 0x26e   : > { %v1273_v48 = vpop.f32.mrf.mxu2 }
 0x26f   : > { %v1378_v62 = vadd.f32 %v1377_v56, %v1273_v48  ;;  %v1449_v57 = vmul.f32 %v1273_v48, %v1273_v48 }
 0x271   : > { %v1512_v63 = vadd.f32 %v1511_v44, %v1449_v57 }
 0x273   : > { %1743 = vmatmul.msk.f32.gmra.mxu2 %vm934_vm1, %v922_v0 }
 0x276   : > { %v1276_v3 = vpop.f32.mrf.mxu2 }
 0x277   : > { %v1379_v4 = vadd.f32 %v1378_v62, %v1276_v3  ;;  %v1450_v7 = vmul.f32 %v1276_v3, %v1276_v3 }
 0x279   : > { %v1513_v8 = vadd.f32 %v1512_v63, %v1450_v7 }
 0x27b   : > { %1744 = vmatmul.msk.f32.gmra.mxu2 %vm934_vm1, %v923_v5 }
 0x27e   : > { %v1279_v10 = vpop.f32.mrf.mxu2 }
 0x27f   : > { %v1380_v12 = vadd.f32 %v1379_v4, %v1279_v10  ;;  %v1451_v11 = vmul.f32 %v1279_v10, %v1279_v10 }
 0x281   : > { %v1514_v14 = vadd.f32 %v1513_v8, %v1451_v11 }
 0x283   : > { %1745 = vmatmul.msk.f32.gmra.mxu2 %vm934_vm1, %v924_v13 }
 0x286   : > { %v1282_v15 = vpop.f32.mrf.mxu2 }
 0x287   : > { %v1381_v16 = vadd.f32 %v1380_v12, %v1282_v15  ;;  %v1452_v17 = vmul.f32 %v1282_v15, %v1282_v15 }
 0x289   : > { %v1515_v18 = vadd.f32 %v1514_v14, %v1452_v17 }
 0x28e   : > { %v1285_v19 = vpop.f32.mrf.mxu2 }
 0x28f   : > { %v1382_v20 = vadd.f32 %v1381_v16, %v1285_v19  ;;  %v1453_v21 = vmul.f32 %v1285_v19, %v1285_v19 }
 0x291   : > { %v1516_v6 = vadd.f32 %v1515_v18, %v1453_v21 }
 0x296   : > { %v1288_v22 = vpop.f32.mrf.mxu2 }
 0x297   : > { %v1383_v23 = vadd.f32 %v1382_v20, %v1288_v22  ;;  %v1454_v24 = vmul.f32 %v1288_v22, %v1288_v22 }
 0x299   : > { %v1517_v27 = vadd.f32 %v1516_v6, %v1454_v24 }
 0x29e   : > { %v1291_v25 = vpop.f32.mrf.mxu2 }
 0x29f   : > { %v1384_v28 = vadd.f32 %v1383_v23, %v1291_v25  ;;  %v1455_v30 = vmul.f32 %v1291_v25, %v1291_v25 }
 0x2a1   : > { %v1518_v31 = vadd.f32 %v1517_v27, %v1455_v30 }
 0x2a6   : > { %v1294_v29 = vpop.f32.mrf.mxu2 }
 0x2a7   : > { %v1385_v32 = vadd.f32 %v1384_v28, %v1294_v29  ;;  %v1456_v33 = vmul.f32 %v1294_v29, %v1294_v29 }
 0x2a9   : > { %v1519_v35 = vadd.f32 %v1518_v31, %v1456_v33 }
 0x2ae   : > { %v1297_v36 = vpop.f32.mrf.mxu2 }
 0x2af   : > { %v1386_v37 = vadd.f32 %v1385_v32, %v1297_v36  ;;  %v1457_v38 = vmul.f32 %v1297_v36, %v1297_v36 }
 0x2b1   : > { %v1520_v40 = vadd.f32 %v1519_v35, %v1457_v38 }
 0x2b6   : > { %v1300_v41 = vpop.f32.mrf.mxu2 }
 0x2b7   : > { %v1458_v50 = vmul.f32 %v1300_v41, %v1300_v41  ;;  %v1387_v52 = vadd.f32 %v1386_v37, %v1300_v41 }
 0x2b9   : > { %v1521_v39 = vadd.f32 %v1520_v40, %v1458_v50 }
 0x2be   : > { %v1303_v42 = vpop.f32.mrf.mxu2 }
 0x2bf   : > { %v1459_v53 = vmul.f32 %v1303_v42, %v1303_v42  ;;  %v1388_v54 = vadd.f32 %v1387_v52, %v1303_v42  ;;  %v1333_v11 = vpop.f32.mrf.mxu3 }
 0x2c0   : > { %v1469_v19 = vmul.f32 %v1333_v11, %v1333_v11 }
 0x2c1   : > { %v1522_v56 = vadd.f32 %v1521_v39, %v1459_v53 }
 0x2c6   : > { %v1306_v34 = vpop.f32.mrf.mxu2 }
 0x2c7   : > { %v1460_v55 = vmul.f32 %v1306_v34, %v1306_v34  ;;  %v1389_v58 = vadd.f32 %v1388_v54, %v1306_v34 }
 0x2c9   : > { %v1523_v60 = vadd.f32 %v1522_v56, %v1460_v55 }
 0x2ce   : > { %v1309_v43 = vpop.f32.mrf.mxu2 }
 0x2cf   : > { %v1461_v59 = vmul.f32 %v1309_v43, %v1309_v43  ;;  %v1390_v44 = vadd.f32 %v1389_v58, %v1309_v43 }
 0x2d1   : > { %v1524_v48 = vadd.f32 %v1523_v60, %v1461_v59 }
 0x2d6   : > { %v1312_v45 = vpop.f32.mrf.mxu2 }
 0x2d7   : > { %v1462_v61 = vmul.f32 %v1312_v45, %v1312_v45  ;;  %v1391_v62 = vadd.f32 %v1390_v44, %v1312_v45 }
 0x2d9   : > { %v1525_v0 = vadd.f32 %v1524_v48, %v1462_v61 }
 0x2de   : > { %v1315_v46 = vpop.f32.mrf.mxu2 }
 0x2df   : > { %v1463_v57 = vmul.f32 %v1315_v46, %v1315_v46  ;;  %v1392_v1 = vadd.f32 %v1391_v62, %v1315_v46 }
 0x2e1   : > { %v1526_v3 = vadd.f32 %v1525_v0, %v1463_v57 }
 0x2e6   : > { %v1318_v47 = vpop.f32.mrf.mxu2 }
 0x2e7   : > { %v1464_v63 = vmul.f32 %v1318_v47, %v1318_v47  ;;  %v1393_v4 = vadd.f32 %v1392_v1, %v1318_v47 }
 0x2e9   : > { %v1527_v5 = vadd.f32 %v1526_v3, %v1464_v63 }
 0x2ee   : > { %v1321_v49 = vpop.f32.mrf.mxu2 }
 0x2ef   : > { %v1465_v7 = vmul.f32 %v1321_v49, %v1321_v49  ;;  %v1394_v26 = vadd.f32 %v1393_v4, %v1321_v49 }
 0x2f1   : > { %v1528_v9 = vadd.f32 %v1527_v5, %v1465_v7 }
 0x2f6   : > { %v1324_v51 = vpop.f32.mrf.mxu2 }
 0x2f7   : > { %v1466_v8 = vmul.f32 %v1324_v51, %v1324_v51  ;;  %v1395_v10 = vadd.f32 %v1394_v26, %v1324_v51 }
 0x2f9   : > { %v1529_v13 = vadd.f32 %v1528_v9, %v1466_v8 }
 0x2fe   : > { %v1327_v2 = vpop.f32.mrf.mxu2 }
 0x2ff   : > { %v1467_v12 = vmul.f32 %v1327_v2, %v1327_v2  ;;  %v1396_v14 = vadd.f32 %v1395_v10, %v1327_v2 }
 0x301   : > { %v1530_v16 = vadd.f32 %v1529_v13, %v1467_v12 }
 0x306   : > { %v1330_v15 = vpop.f32.mrf.mxu2 }
 0x307   : > { %v1397_v17 = vadd.f32 %v1396_v14, %v1330_v15  ;;  %v1468_v18 = vmul.f32 %v1330_v15, %v1330_v15 }
 0x309   : > { %v1531_v20 = vadd.f32 %v1530_v16, %v1468_v18  ;;  %v1398_v21 = vadd.f32 %v1397_v17, %v1333_v11 }
 0x30b   : > { %v1399_v6 = vrot.slane %v1398_v21, 4  ;;  %v1532_v22 = vadd.f32 %v1531_v20, %v1469_v19 }
 0x30d   : > { %v1400_v23 = vadd.f32 %v1399_v6, %v1398_v21  ;;  %v1533_v24 = vrot.slane %v1532_v22, 4 }
 0x30f   : > { %v1401_v27 = vrot.slane %v1400_v23, 2  ;;  %v1534_v25 = vadd.f32 %v1533_v24, %v1532_v22 }
 0x311   : > { %v1402_v28 = vadd.f32 %v1401_v27, %v1400_v23  ;;  %v1535_v30 = vrot.slane %v1534_v25, 2 }
 0x313   : > { %v1403_v31 = vrot.slane %v1402_v28, 1  ;;  %v1536_v29 = vadd.f32 %v1535_v30, %v1534_v25 }
 0x315   : > { %v1404_v32 = vadd.f32 %v1403_v31, %v1402_v28  ;;  %v1537_v33 = vrot.slane %v1536_v29, 1 }
 0x317   : > { %1405 = vst [vmem:[%s255_s10] sm:$0x1] %v1404_v32  ;;  %v1538_v35 = vadd.f32 %v1537_v33, %v1536_v29 }
 0x319   : > { %1539 = vst [vmem:[%s258_s13] sm:$0x1] %v1538_v35 }
 0x31a PF: > { %s17_s21 = sadd.s32 1, %s1784_s21  }
 0x31b   : > { %p14_p5 = scmp.ge.s32.totalorder %s17_s21, 6  }
 0x31d   :  { %16 = sbr.rel (!%p14_p5) target bundleno = 1 (0x1), region = 82 }

// kernel: stn3d_forward.6
= control target key start
LH: loop header
LB: loop body
LE: loop exit
PB: predicated region body
PF: predicated region fallthrough
CT: control target
= control target key end

     0   :  { %s2163_s17 = smov 0   ;;  %s2165_s18 = smov 0   ;;  %s3097_s0 = inlined_call_operand.vmem [shape: f32[8,256,8], index: 0, kind: input, shape index: {}]   ;;  %s3098_s1 = inlined_call_operand.vmem [shape: f32[1,64], index: 1, kind: input, shape index: {}]   ;;  %s3099_s2 = inlined_call_operand.vmem [shape: f32[1,64], index: 2, kind: input, shape index: {}]   ;;  %s3100_s3 = inlined_call_operand.vmem [shape: f32[1,128], index: 3, kind: input, shape index: {}]   ;;  %s3101_s4 = inlined_call_operand.vmem [shape: f32[1,128], index: 4, kind: input, shape index: {}]   ;;  %s3102_s5 = inlined_call_operand.vmem [shape: f32[8,64], index: 5, kind: input, shape index: {}]   ;;  %s3103_s6 = inlined_call_operand.vmem [shape: f32[64,128], index: 6, kind: input, shape index: {}]   ;;  %s3104_s7 = inlined_call_operand.vmem [shape: f32[128,1024], index: 7, kind: input, shape index: {}]   ;;  %s3105_s8 = inlined_call_operand.vmem [shape: f32[8,1,1024], index: 8, kind: output, shape index: {0}]   ;;  %s3106_s9 = inlined_call_operand.vmem [shape: f32[8,1,1024], index: 9, kind: output, shape index: {1}]   ;;  %s3107_s10 = inlined_call_operand.vmem [shape: f32[8,1,1024], index: 10, kind: output, shape index: {2}]   ;;  %s3108_s11 = inlined_call_operand.vmem [shape: f32[8,1,1024], index: 11, kind: output, shape index: {3}]  }
   0x1   :  { %3109 = sst [smem:[#allocation3_spill]] %s3102_s5  ;;  %s2167_s19 = smov 0  }
   0x2   :  { %s2169_s20 = smov 0   ;;  %s2171_s21 = smov 0  }
   0x3 LB: > { %s31_s22 = sadd.s32 1, %s2093_s19  ;;  %s34_s23 = sadd.s32 1, %s2097_s20  ;;  %s2101_s21 = sphi %s2171_s21, %s22_s21   ;;  %s2097_s20 = sphi %s2169_s20, %s3116_s20   ;;  %s2093_s19 = sphi %s2167_s19, %s3115_s19   ;;  %s2089_s18 = sphi %s2165_s18, %s3114_s18   ;;  %s2085_s17 = sphi %s2163_s17, %s3113_s17  }
   0x4   : > { %p32_p0 = scmp.ge.s32.totalorder %s31_s22, 4  ;;  %p1982_p1 = scmp.ge.s32.totalorder %s2101_s21, 1 }
   0x5   : > { %p363_p2 = scmp.lt.s32.totalorder %s2101_s21, 33 }
   0x6   : > { %s3118_s22 = smov (%p32_p0, %s31_s22), 0  ;;  %s3120_s23 = smov (!%p32_p0, %s34_s23), %s2097_s20 }
   0x7   : > { %p364_p3 = pnand %p1982_p1, %p363_p2  ;;  %p36_p4 = scmp.ge.s32.totalorder %s3120_s23, 8 }
   0x8   : > { %s3111_s5 = sld [smem:[#allocation3_spill]] (!%p364_p3)  ;;  %s1983_s26 = sshll.u32 (!%p364_p3), %s2085_s17, 3 }
   0x9   : > { %s3122_s23 = smov (%p36_p4, %s3120_s23), 0  ;;  %367 = sbr.rel (%p364_p3) target bundleno = 610 (0x262), region = 52 }
   0xa   : > { %3110 = sst [smem:[#allocation2_spill]] %s3122_s23  ;;  %p419_p5 = scmp.lt.s32.totalorder (!%p364_p3), %s2089_s18, 7 }
   0xb   : > { %p421_p6 = scmp.lt.s32.totalorder (!%p364_p3), %s1983_s26, 31  ;;  %p2006_p7 = scmp.ne.s32.totalorder (!%p364_p3), %s2085_s17, 0 }
   0xe   : > { %v452_v0 = vld [vmem:[%s3111_s5] sm:$0xff]  ;;  %s3124_s18 = smov (!%p419_p5, %s2089_s18), 7  ;;  %v558_v1 = vld [vmem:[%s3103_s6 + $0x38] sm:$0xff]  ;;  %v557_v2 = vld [vmem:[%s3103_s6 + $0x30] sm:$0xff]  ;;  %s3126_s26 = smov (!%p421_p6, %s1983_s26), 31  ;;  %vm453_vm0 = vcmask 64512  }
   0xf   : > { %493 = vmatpush.msra.mxu0 %v452_v0  ;;  %2010 = vmatpush.msra.mxu3 %v452_v0  ;;  %s1984_s12 = sshll.u32 %s3124_s18, 5  ;;  %s1986_s13 = sshll.u32 %s3124_s18, 3  ;;  %v556_v3 = vld [vmem:[%s3103_s6 + $0x28] sm:$0xff]  ;;  %v555_v4 = vld [vmem:[%s3103_s6 + $0x20] sm:$0xff]  ;;  %v554_v13 = vld [vmem:[%s3103_s6 + $0x18] sm:$0xff]  ;;  %vm559_vm1 = vcmask 523264  }
  0x10   : > { %592 = vmatpush.msra.mxu1 %v558_v1  ;;  %2011 = vmatpush.msra.mxu2 %v558_v1  ;;  %s424_s16 = sadd.s32 %s1984_s12, %s3126_s26  ;;  %s2211_s5 = scalar_lea.vmem %s3105_s8, %s1986_s13  ;;  %v553_v14 = vld [vmem:[%s3103_s6 + $0x10] sm:$0xff]  ;;  %v552_v15 = vld [vmem:[%s3103_s6 + $0x8] sm:$0xff]  ;;  %v551_v16 = vld [vmem:[%s3103_s6] sm:$0xff] }
  0x11   : > { %s1985_s27 = sshll.u32 %s424_s16, 3  ;;  %s2216_s30 = scalar_lea.vmem %s3106_s9, %s1986_s13  ;;  %v2257_v17 = vld [vmem:[%s3098_s1] ss:$0 sm:$0xff]  ;;  %v778_v24 = vld [vmem:[%s3104_s7 + $0x3c8] sm:$0xff]  ;;  %v779_v25 = vld [vmem:[%s3104_s7 + $0x3d0] sm:$0xff] }
  0x12   : > { %593 = vmatpush.msra.mxu1 %v557_v2  ;;  %2012 = vmatpush.msra.mxu2 %v557_v2  ;;  %s426_s12 = scalar_lea.vmem %s3097_s0, %s1985_s27  ;;  %s2227_s25 = scalar_lea.vmem %s3107_s10, %s1986_s13  ;;  %v2262_v18 = vld [vmem:[%s3099_s2] ss:$0 sm:$0xff]  ;;  %v780_v27 = vld [vmem:[%s3104_s7 + $0x3d8] sm:$0xff]  ;;  %v770_v29 = vld [vmem:[%s3104_s7 + $0x388] sm:$0xff] }
  0x13   : > { %s2232_s29 = scalar_lea.vmem %s3108_s11, %s1986_s13  ;;  %v444_v5 = vld [vmem:[%s426_s12] sm:$0xff]  ;;  %v445_v7 = vld [vmem:[%s426_s12 + $0x8] sm:$0xff]  ;;  %v446_v9 = vld [vmem:[%s426_s12 + $0x10] sm:$0xff]  ;;  %826 = vmatpush.msrb.mxu3 %v778_v24  ;;  %867 = vmatpush.msrb.mxu0 %v779_v25 }
  0x14   : > { %594 = vmatpush.msra.mxu1 %v556_v3  ;;  %2013 = vmatpush.msra.mxu2 %v556_v3  ;;  %v448_v6 = vld [vmem:[%s426_s12 + $0x20] sm:$0xff]  ;;  %v449_v8 = vld [vmem:[%s426_s12 + $0x28] sm:$0xff]  ;;  %v450_v10 = vld [vmem:[%s426_s12 + $0x30] sm:$0xff] }
  0x15   : > { %1990 = vmatmul.msk.f32.vlgmr.msra.gmra.mxu0 %vm453_vm0, %v444_v5  ;;  %1994 = vmatmul.msk.f32.vlgmr.msra.gmra.mxu3 %vm453_vm0, %v448_v6  ;;  %v447_v11 = vld [vmem:[%s426_s12 + $0x18] sm:$0xff]  ;;  %v777_v23 = vld [vmem:[%s3104_s7 + $0x3c0] sm:$0xff]  ;;  %v771_v32 = vld [vmem:[%s3104_s7 + $0x390] sm:$0xff] }
  0x16   : > { %595 = vmatpush.msra.mxu1 %v555_v4  ;;  %2014 = vmatpush.msra.mxu2 %v555_v4  ;;  %v451_v12 = vld [vmem:[%s426_s12 + $0x38] sm:$0xff]  ;;  %v769_v28 = vld [vmem:[%s3104_s7 + $0x380] sm:$0xff]  ;;  %v762_v36 = vld [vmem:[%s3104_s7 + $0x348] sm:$0xff] }
  0x17   : > { %v772_v33 = vld [vmem:[%s3104_s7 + $0x398] sm:$0xff]  ;;  %v761_v34 = vld [vmem:[%s3104_s7 + $0x340] sm:$0xff]  ;;  %v763_v37 = vld [vmem:[%s3104_s7 + $0x350] sm:$0xff]  ;;  %827 = vmatpush.msrb.mxu3 %v770_v29  ;;  %868 = vmatpush.msrb.mxu0 %v771_v32 }
  0x18   : > { %596 = vmatpush.msra.mxu1 %v554_v13  ;;  %2015 = vmatpush.msra.mxu2 %v554_v13  ;;  %v764_v39 = vld [vmem:[%s3104_s7 + $0x358] sm:$0xff]  ;;  %v753_v40 = vld [vmem:[%s3104_s7 + $0x300] sm:$0xff]  ;;  %v754_v42 = vld [vmem:[%s3104_s7 + $0x308] sm:$0xff] }
  0x19   : > { %828 = vmatpush.msrb.mxu3 %v762_v36  ;;  %869 = vmatpush.msrb.mxu0 %v763_v37  ;;  %v755_v44 = vld [vmem:[%s3104_s7 + $0x310] sm:$0xff]  ;;  %v756_v46 = vld [vmem:[%s3104_s7 + $0x318] sm:$0xff]  ;;  %v745_v47 = vld [vmem:[%s3104_s7 + $0x2c0] sm:$0xff] }
  0x1a   : > { %597 = vmatpush.msra.mxu1 %v553_v14  ;;  %2016 = vmatpush.msra.mxu2 %v553_v14  ;;  %v746_v48 = vld [vmem:[%s3104_s7 + $0x2c8] sm:$0xff]  ;;  %v747_v49 = vld [vmem:[%s3104_s7 + $0x2d0] sm:$0xff]  ;;  %v748_v51 = vld [vmem:[%s3104_s7 + $0x2d8] sm:$0xff] }
  0x1b   : > { %829 = vmatpush.msrb.mxu3 %v754_v42  ;;  %870 = vmatpush.msrb.mxu0 %v755_v44  ;;  %v737_v52 = vld [vmem:[%s3104_s7 + $0x280] sm:$0xff]  ;;  %v738_v55 = vld [vmem:[%s3104_s7 + $0x288] sm:$0xff]  ;;  %v739_v56 = vld [vmem:[%s3104_s7 + $0x290] sm:$0xff] }
  0x1c   : > { %598 = vmatpush.msra.mxu1 %v552_v15  ;;  %2017 = vmatpush.msra.mxu2 %v552_v15  ;;  %v740_v58 = vld [vmem:[%s3104_s7 + $0x298] sm:$0xff]  ;;  %v729_v59 = vld [vmem:[%s3104_s7 + $0x240] sm:$0xff]  ;;  %v730_v61 = vld [vmem:[%s3104_s7 + $0x248] sm:$0xff] }
  0x1d   : > { %1991 = vmatmul.msk.f32.gmra.mxu0 %vm453_vm0, %v445_v7  ;;  %1995 = vmatmul.msk.f32.gmra.mxu3 %vm453_vm0, %v449_v8  ;;  %v731_v62 = vld [vmem:[%s3104_s7 + $0x250] sm:$0xff]  ;;  %v732_v0 = vld [vmem:[%s3104_s7 + $0x258] sm:$0xff]  ;;  %v721_v2 = vld [vmem:[%s3104_s7 + $0x200] sm:$0xff] }
  0x1e   : > { %599 = vmatpush.msra.mxu1 %v551_v16  ;;  %2018 = vmatpush.msra.mxu2 %v551_v16  ;;  %v722_v4 = vld [vmem:[%s3104_s7 + $0x208] sm:$0xff]  ;;  %v723_v5 = vld [vmem:[%s3104_s7 + $0x210] sm:$0xff]  ;;  %v724_v6 = vld [vmem:[%s3104_s7 + $0x218] sm:$0xff] }
  0x1f   : > { %830 = vmatpush.msrb.mxu3 %v746_v48  ;;  %871 = vmatpush.msrb.mxu0 %v747_v49  ;;  %v713_v7 = vld [vmem:[%s3104_s7 + $0x1c0] sm:$0xff]  ;;  %v716_v13 = vld [vmem:[%s3104_s7 + $0x1d8] sm:$0xff]  ;;  %v706_v16 = vld [vmem:[%s3104_s7 + $0x188] sm:$0xff] }
  0x20   : > { %785 = vmatpush.msrb.mxu2 %v777_v23  ;;  %908 = vmatpush.msrb.mxu1 %v780_v27  ;;  %v705_v14 = vld [vmem:[%s3104_s7 + $0x180] sm:$0xff]  ;;  %v698_v24 = vld [vmem:[%s3104_s7 + $0x148] sm:$0xff]  ;;  %v676_v42 = vld [vmem:[%s3104_s7 + $0x98] sm:$0xff] }
  0x21   : > { %831 = vmatpush.msrb.mxu3 %v738_v55  ;;  %872 = vmatpush.msrb.mxu0 %v739_v56  ;;  %v689_v29 = vld [vmem:[%s3104_s7 + $0x100] sm:$0xff]  ;;  %v682_v36 = vld [vmem:[%s3104_s7 + $0xc8] sm:$0xff]  ;;  %v659_v49 = vld [vmem:[%s3104_s7 + $0x10] sm:$0xff] }
  0x22   : > { %786 = vmatpush.msrb.mxu2 %v769_v28  ;;  %909 = vmatpush.msrb.mxu1 %v772_v33  ;;  %v700_v28 = vld [vmem:[%s3104_s7 + $0x158] sm:$0xff]  ;;  %v666_v44 = vld [vmem:[%s3104_s7 + $0x48] sm:$0xff]  ;;  %v783_v55 = vld [vmem:[%s3104_s7 + $0x3f0] sm:$0xff] }
  0x23   : > { %832 = vmatpush.msrb.mxu3 %v730_v61  ;;  %873 = vmatpush.msrb.mxu0 %v731_v62  ;;  %v692_v33 = vld [vmem:[%s3104_s7 + $0x118] sm:$0xff]  ;;  %v658_v48 = vld [vmem:[%s3104_s7 + $0x8] sm:$0xff]  ;;  %v757_v61 = vld [vmem:[%s3104_s7 + $0x320] sm:$0xff] }
  0x24   : > { %787 = vmatpush.msrb.mxu2 %v761_v34  ;;  %910 = vmatpush.msrb.mxu1 %v764_v39  ;;  %v681_v34 = vld [vmem:[%s3104_s7 + $0xc0] sm:$0xff]  ;;  %v684_v39 = vld [vmem:[%s3104_s7 + $0xd8] sm:$0xff]  ;;  %v758_v62 = vld [vmem:[%s3104_s7 + $0x328] sm:$0xff] }
  0x25   : > { %1992 = vmatmul.msk.f32.gmra.mxu0 %vm453_vm0, %v446_v9  ;;  %1996 = vmatmul.msk.f32.gmra.mxu3 %vm453_vm0, %v450_v10  ;;  %v714_v9 = vld [vmem:[%s3104_s7 + $0x1c8] sm:$0xff]  ;;  %v715_v10 = vld [vmem:[%s3104_s7 + $0x1d0] sm:$0xff]  ;;  %v784_v56 = vld [vmem:[%s3104_s7 + $0x3f8] sm:$0xff] }
  0x26   : > { %788 = vmatpush.msrb.mxu2 %v753_v40  ;;  %911 = vmatpush.msrb.mxu1 %v756_v46  ;;  %v674_v40 = vld [vmem:[%s3104_s7 + $0x88] sm:$0xff]  ;;  %v668_v46 = vld [vmem:[%s3104_s7 + $0x58] sm:$0xff] }
  0x27   : > { %833 = vmatpush.msrb.mxu3 %v722_v4  ;;  %874 = vmatpush.msrb.mxu0 %v723_v5  ;;  %v759_v4 = vld [vmem:[%s3104_s7 + $0x330] sm:$0xff]  ;;  %v760_v5 = vld [vmem:[%s3104_s7 + $0x338] sm:$0xff] }
  0x28   : > { %789 = vmatpush.msrb.mxu2 %v745_v47  ;;  %912 = vmatpush.msrb.mxu1 %v748_v51  ;;  %v657_v47 = vld [vmem:[%s3104_s7] sm:$0xff] }
  0x29   : > { %834 = vmatpush.msrb.mxu3 %v714_v9  ;;  %875 = vmatpush.msrb.mxu0 %v715_v10  ;;  %v781_v51 = vld [vmem:[%s3104_s7 + $0x3e0] sm:$0xff]  ;;  %v752_v9 = vld [vmem:[%s3104_s7 + $0x2f8] sm:$0xff] }
  0x2a   : > { %790 = vmatpush.msrb.mxu2 %v737_v52  ;;  %913 = vmatpush.msrb.mxu1 %v740_v58  ;;  %v782_v52 = vld [vmem:[%s3104_s7 + $0x3e8] sm:$0xff]  ;;  %v2554_v10 = vld [vmem:[%s3101_s4] ss:$0 sm:$0xff] }
  0x2b   : > { %835 = vmatpush.msrb.mxu3 %v706_v16  ;;  %v766_v58 = vld [vmem:[%s3104_s7 + $0x368] sm:$0xff]  ;;  %v744_v16 = vld [vmem:[%s3104_s7 + $0x2b8] sm:$0xff] }
  0x2c   : > { %791 = vmatpush.msrb.mxu2 %v729_v59  ;;  %914 = vmatpush.msrb.mxu1 %v732_v0  ;;  %v775_v59 = vld [vmem:[%s3104_s7 + $0x3b0] sm:$0xff]  ;;  %v768_v0 = vld [vmem:[%s3104_s7 + $0x378] sm:$0xff] }
  0x2d   : > { %1993 = vmatmul.msk.f32.gmra.mxu0 %vm453_vm0, %v447_v11  ;;  %1997 = vmatmul.msk.f32.gmra.mxu3 %vm453_vm0, %v451_v12 }
  0x2e   : > { %792 = vmatpush.msrb.mxu2 %v721_v2  ;;  %915 = vmatpush.msrb.mxu1 %v724_v6  ;;  %v750_v2 = vld [vmem:[%s3104_s7 + $0x2e8] sm:$0xff]  ;;  %v741_v6 = vld [vmem:[%s3104_s7 + $0x2a0] sm:$0xff] }
  0x2f   : > { %836 = vmatpush.msrb.mxu3 %v698_v24 }
  0x30   : > { %793 = vmatpush.msrb.mxu2 %v713_v7  ;;  %916 = vmatpush.msrb.mxu1 %v716_v13  ;;  %v742_v7 = vld [vmem:[%s3104_s7 + $0x2a8] sm:$0xff] }
  0x31   : > { %v734_v13 = vld [vmem:[%s3104_s7 + $0x268] sm:$0xff] }
  0x32   : > { %794 = vmatpush.msrb.mxu2 %v705_v14  ;;  %v743_v14 = vld [vmem:[%s3104_s7 + $0x2b0] sm:$0xff] }
  0x92   : > { %v495_v19 = vpop.f32.mrf.mxu0 }
  0x93   : > { %v523_v20 = vmul.f32 %v2257_v17, %v495_v19  ;;  %v707_v19 = vld [vmem:[%s3104_s7 + $0x190] sm:$0xff] }
  0x94   : > { %876 = vmatpush.msrb.mxu0 %v707_v19  ;;  %v725_v19 = vld [vmem:[%s3104_s7 + $0x220] sm:$0xff] }
  0x95   : > { %v535_v21 = vadd.f32 %v2262_v18, %v523_v20 }
  0x97   : > { %v543_v22 = vmax.f32 %v535_v21, 0.0  ;;  %v708_v21 = vld [vmem:[%s3104_s7 + $0x198] sm:$0xff] }
  0x98   : > { %v507_v26 = vpop.f32.mrf.mxu3  ;;  %917 = vmatpush.msrb.mxu1 %v708_v21  ;;  %v735_v21 = vld [vmem:[%s3104_s7 + $0x270] sm:$0xff] }
  0x99   : > { %1998 = vmatmul.msk.f32.vlgmr.msra.gmra.mxu1 %vm559_vm1, %v543_v22  ;;  %v527_v31 = vmul.f32 %v2257_v17, %v507_v26  ;;  %v697_v22 = vld [vmem:[%s3104_s7 + $0x140] sm:$0xff]  ;;  %v699_v26 = vld [vmem:[%s3104_s7 + $0x150] sm:$0xff] }
  0x9a   : > { %v498_v30 = vpop.f32.mrf.mxu0  ;;  %795 = vmatpush.msrb.mxu2 %v697_v22  ;;  %877 = vmatpush.msrb.mxu0 %v699_v26  ;;  %v736_v22 = vld [vmem:[%s3104_s7 + $0x278] sm:$0xff]  ;;  %v717_v26 = vld [vmem:[%s3104_s7 + $0x1e0] sm:$0xff] }
  0x9b   : > { %v524_v35 = vmul.f32 %v2257_v17, %v498_v30  ;;  %v539_v38 = vadd.f32 %v2262_v18, %v527_v31  ;;  %v690_v30 = vld [vmem:[%s3104_s7 + $0x108] sm:$0xff]  ;;  %v691_v31 = vld [vmem:[%s3104_s7 + $0x110] sm:$0xff]  ;;  %918 = vmatpush.msrb.mxu1 %v700_v28 }
  0x9c   : > { %796 = vmatpush.msrb.mxu2 %v689_v29  ;;  %837 = vmatpush.msrb.mxu3 %v690_v30  ;;  %v727_v28 = vld [vmem:[%s3104_s7 + $0x230] sm:$0xff]  ;;  %v728_v30 = vld [vmem:[%s3104_s7 + $0x238] sm:$0xff] }
  0x9d   : > { %v536_v41 = vadd.f32 %v2262_v18, %v524_v35  ;;  %v547_v43 = vmax.f32 %v539_v38, 0.0  ;;  %878 = vmatpush.msrb.mxu0 %v691_v31  ;;  %919 = vmatpush.msrb.mxu1 %v692_v33  ;;  %v709_v31 = vld [vmem:[%s3104_s7 + $0x1a0] sm:$0xff]  ;;  %v719_v33 = vld [vmem:[%s3104_s7 + $0x1f0] sm:$0xff] }
  0x9e   : > { %797 = vmatpush.msrb.mxu2 %v681_v34  ;;  %838 = vmatpush.msrb.mxu3 %v682_v36  ;;  %v720_v34 = vld [vmem:[%s3104_s7 + $0x1f8] sm:$0xff] }
  0x9f   : > { %v544_v45 = vmax.f32 %v536_v41, 0.0  ;;  %2002 = vmatmul.msk.f32.vlgmr.msra.gmra.mxu2 %vm559_vm1, %v547_v43  ;;  %920 = vmatpush.msrb.mxu1 %v684_v39  ;;  %v675_v41 = vld [vmem:[%s3104_s7 + $0x90] sm:$0xff]  ;;  %v665_v43 = vld [vmem:[%s3104_s7 + $0x40] sm:$0xff] }
  0xa0   : > { %v510_v50 = vpop.f32.mrf.mxu3  ;;  %839 = vmatpush.msrb.mxu3 %v674_v40  ;;  %v711_v39 = vld [vmem:[%s3104_s7 + $0x1b0] sm:$0xff]  ;;  %v712_v40 = vld [vmem:[%s3104_s7 + $0x1b8] sm:$0xff] }
  0xa1   : > { %1999 = vmatmul.msk.f32.gmra.mxu1 %vm559_vm1, %v544_v45  ;;  %v528_v54 = vmul.f32 %v2257_v17, %v510_v50  ;;  %v667_v45 = vld [vmem:[%s3104_s7 + $0x50] sm:$0xff]  ;;  %v660_v50 = vld [vmem:[%s3104_s7 + $0x18] sm:$0xff] }
  0xa2   : > { %v501_v53 = vpop.f32.mrf.mxu0  ;;  %921 = vmatpush.msrb.mxu1 %v676_v42  ;;  %840 = vmatpush.msrb.mxu3 %v666_v44  ;;  %v694_v42 = vld [vmem:[%s3104_s7 + $0x128] sm:$0xff]  ;;  %v703_v44 = vld [vmem:[%s3104_s7 + $0x170] sm:$0xff] }
  0xa3   : > { %v525_v57 = vmul.f32 %v2257_v17, %v501_v53  ;;  %v540_v60 = vadd.f32 %v2262_v18, %v528_v54  ;;  %v773_v53 = vld [vmem:[%s3104_s7 + $0x3a0] sm:$0xff]  ;;  %v774_v54 = vld [vmem:[%s3104_s7 + $0x3a8] sm:$0xff] }
  0xa4   : > { %922 = vmatpush.msrb.mxu1 %v668_v46  ;;  %841 = vmatpush.msrb.mxu3 %v658_v48 }
  0xa5   : > { %v537_v63 = vadd.f32 %v2262_v18, %v525_v57  ;;  %v548_v1 = vmax.f32 %v540_v60, 0.0  ;;  %v765_v57 = vld [vmem:[%s3104_s7 + $0x360] sm:$0xff]  ;;  %v776_v60 = vld [vmem:[%s3104_s7 + $0x3b8] sm:$0xff] }
  0xa6   : > { %923 = vmatpush.msrb.mxu1 %v660_v50  ;;  %990 = vmatpush.msra.mxu3 %v782_v52  ;;  %v686_v50 = vld [vmem:[%s3104_s7 + $0xe8] sm:$0xff] }
  0xa7   : > { %v545_v3 = vmax.f32 %v537_v63, 0.0  ;;  %2003 = vmatmul.msk.f32.gmra.mxu2 %vm559_vm1, %v548_v1  ;;  %v767_v63 = vld [vmem:[%s3104_s7 + $0x370] sm:$0xff]  ;;  %v749_v1 = vld [vmem:[%s3104_s7 + $0x2e0] sm:$0xff] }
  0xa8   : > { %v513_v8 = vpop.f32.mrf.mxu3  ;;  %991 = vmatpush.msra.mxu3 %v774_v54  ;;  %1072 = vmatpush.msra.mxu1 %v784_v56  ;;  %v677_v54 = vld [vmem:[%s3104_s7 + $0xa0] sm:$0xff]  ;;  %v687_v56 = vld [vmem:[%s3104_s7 + $0xf0] sm:$0xff] }
  0xa9   : > { %2000 = vmatmul.msk.f32.gmra.mxu1 %vm559_vm1, %v545_v3  ;;  %v529_v12 = vmul.f32 %v2257_v17, %v513_v8  ;;  %v2531_v3 = vld [vmem:[%s3100_s3] ss:$0 sm:$0xff]  ;;  %v751_v8 = vld [vmem:[%s3104_s7 + $0x2f0] sm:$0xff] }
  0xaa   : > { %v504_v11 = vpop.f32.mrf.mxu0  ;;  %992 = vmatpush.msra.mxu3 %v766_v58  ;;  %1073 = vmatpush.msra.mxu1 %v776_v60 }
  0xab   : > { %v526_v15 = vmul.f32 %v2257_v17, %v504_v11  ;;  %v541_v20 = vadd.f32 %v2262_v18, %v529_v12  ;;  %v733_v12 = vld [vmem:[%s3104_s7 + $0x260] sm:$0xff] }
  0xac   : > { %993 = vmatpush.msra.mxu3 %v758_v62  ;;  %1074 = vmatpush.msra.mxu1 %v768_v0  ;;  %v670_v0 = vld [vmem:[%s3104_s7 + $0x68] sm:$0xff] }
  0xad   : > { %v538_v23 = vadd.f32 %v2262_v18, %v526_v15  ;;  %v549_v25 = vmax.f32 %v541_v20, 0.0  ;;  %v726_v20 = vld [vmem:[%s3104_s7 + $0x228] sm:$0xff] }
  0xae   : > { %994 = vmatpush.msra.mxu3 %v750_v2  ;;  %1075 = vmatpush.msra.mxu1 %v760_v5  ;;  %v680_v2 = vld [vmem:[%s3104_s7 + $0xb8] sm:$0xff]  ;;  %v662_v5 = vld [vmem:[%s3104_s7 + $0x28] sm:$0xff] }
  0xaf   : > { %v546_v27 = vmax.f32 %v538_v23, 0.0  ;;  %2004 = vmatmul.msk.f32.gmra.mxu2 %vm559_vm1, %v549_v25 }
  0xb0   : > { %v516_v32 = vpop.f32.mrf.mxu3  ;;  %995 = vmatpush.msra.mxu3 %v742_v7  ;;  %1076 = vmatpush.msra.mxu1 %v752_v9  ;;  %v672_v7 = vld [vmem:[%s3104_s7 + $0x78] sm:$0xff] }
  0xb1   : > { %2001 = vmatmul.msk.f32.gmra.mxu1 %vm559_vm1, %v546_v27  ;;  %v530_v35 = vmul.f32 %v2257_v17, %v516_v32  ;;  %v683_v17 = vld [vmem:[%s3104_s7 + $0xd0] sm:$0xff]  ;;  %v718_v27 = vld [vmem:[%s3104_s7 + $0x1e8] sm:$0xff] }
  0xb2   : > { %879 = vmatpush.msrb.mxu0 %v683_v17  ;;  %996 = vmatpush.msra.mxu3 %v734_v13  ;;  %v710_v32 = vld [vmem:[%s3104_s7 + $0x1a8] sm:$0xff] }
  0xb3   : > { %v542_v37 = vadd.f32 %v2262_v18, %v530_v35  ;;  %v673_v18 = vld [vmem:[%s3104_s7 + $0x80] sm:$0xff]  ;;  %1077 = vmatpush.msra.mxu1 %v744_v16  ;;  %v702_v17 = vld [vmem:[%s3104_s7 + $0x168] sm:$0xff] }
  0xb4   : > { %798 = vmatpush.msrb.mxu2 %v673_v18  ;;  %880 = vmatpush.msrb.mxu0 %v675_v41  ;;  %v693_v41 = vld [vmem:[%s3104_s7 + $0x120] sm:$0xff] }
  0xb5   : > { %v550_v38 = vmax.f32 %v542_v37, 0.0  ;;  %997 = vmatpush.msra.mxu3 %v726_v20  ;;  %1078 = vmatpush.msra.mxu1 %v736_v22 }
  0xb6   : > { %799 = vmatpush.msrb.mxu2 %v665_v43  ;;  %881 = vmatpush.msrb.mxu0 %v667_v45  ;;  %v704_v45 = vld [vmem:[%s3104_s7 + $0x178] sm:$0xff] }
  0xb7   : > { %2005 = vmatmul.msk.f32.gmra.mxu2 %vm559_vm1, %v550_v38  ;;  %998 = vmatpush.msra.mxu3 %v718_v27  ;;  %v701_v38 = vld [vmem:[%s3104_s7 + $0x160] sm:$0xff] }
  0xb8   : > { %800 = vmatpush.msrb.mxu2 %v657_v47  ;;  %882 = vmatpush.msrb.mxu0 %v659_v49  ;;  %v685_v49 = vld [vmem:[%s3104_s7 + $0xe0] sm:$0xff] }
  0xb9   : > { %1079 = vmatpush.msra.mxu1 %v728_v30  ;;  %999 = vmatpush.msra.mxu3 %v710_v32 }
  0xba   : > { %949 = vmatpush.msra.mxu2 %v781_v51  ;;  %1031 = vmatpush.msra.mxu0 %v783_v55  ;;  %v695_v51 = vld [vmem:[%s3104_s7 + $0x130] sm:$0xff]  ;;  %v678_v55 = vld [vmem:[%s3104_s7 + $0xa8] sm:$0xff] }
  0xbb   : > { %1080 = vmatpush.msra.mxu1 %v720_v34  ;;  %1000 = vmatpush.msra.mxu3 %v702_v17 }
  0xbc   : > { %950 = vmatpush.msra.mxu2 %v773_v53  ;;  %1032 = vmatpush.msra.mxu0 %v775_v59  ;;  %v696_v53 = vld [vmem:[%s3104_s7 + $0x138] sm:$0xff] }
  0xbd   : > { %1081 = vmatpush.msra.mxu1 %v712_v40  ;;  %1001 = vmatpush.msra.mxu3 %v694_v42 }
  0xbe   : > { %951 = vmatpush.msra.mxu2 %v765_v57  ;;  %1033 = vmatpush.msra.mxu0 %v767_v63  ;;  %v688_v57 = vld [vmem:[%s3104_s7 + $0xf8] sm:$0xff]  ;;  %v669_v63 = vld [vmem:[%s3104_s7 + $0x60] sm:$0xff] }
  0xbf   : > { %1082 = vmatpush.msra.mxu1 %v704_v45  ;;  %1002 = vmatpush.msra.mxu3 %v686_v50 }
  0xc0   : > { %952 = vmatpush.msra.mxu2 %v757_v61  ;;  %1034 = vmatpush.msra.mxu0 %v759_v4  ;;  %v661_v4 = vld [vmem:[%s3104_s7 + $0x20] sm:$0xff] }
  0xc1   : > { %1083 = vmatpush.msra.mxu1 %v696_v53  ;;  %1003 = vmatpush.msra.mxu3 %v678_v55 }
  0xc2   : > { %953 = vmatpush.msra.mxu2 %v749_v1  ;;  %1035 = vmatpush.msra.mxu0 %v751_v8  ;;  %v679_v1 = vld [vmem:[%s3104_s7 + $0xb0] sm:$0xff] }
  0xc3   : > { %1084 = vmatpush.msra.mxu1 %v688_v57  ;;  %1004 = vmatpush.msra.mxu3 %v670_v0 }
  0xc4   : > { %954 = vmatpush.msra.mxu2 %v741_v6  ;;  %1036 = vmatpush.msra.mxu0 %v743_v14  ;;  %v671_v6 = vld [vmem:[%s3104_s7 + $0x70] sm:$0xff] }
  0xc5   : > { %1085 = vmatpush.msra.mxu1 %v680_v2  ;;  %1005 = vmatpush.msra.mxu3 %v662_v5 }
  0xc6   : > { %955 = vmatpush.msra.mxu2 %v733_v12  ;;  %1037 = vmatpush.msra.mxu0 %v735_v21  ;;  %v664_v12 = vld [vmem:[%s3104_s7 + $0x38] sm:$0xff] }
  0xc7   : > { %1086 = vmatpush.msra.mxu1 %v672_v7 }
  0xc8   : > { %956 = vmatpush.msra.mxu2 %v725_v19  ;;  %1038 = vmatpush.msra.mxu0 %v727_v28 }
  0xc9   : > { %1087 = vmatpush.msra.mxu1 %v664_v12 }
  0xca   : > { %957 = vmatpush.msra.mxu2 %v717_v26  ;;  %1039 = vmatpush.msra.mxu0 %v719_v33 }
  0xcc   : > { %958 = vmatpush.msra.mxu2 %v709_v31  ;;  %1040 = vmatpush.msra.mxu0 %v711_v39 }
  0xce   : > { %959 = vmatpush.msra.mxu2 %v701_v38  ;;  %1041 = vmatpush.msra.mxu0 %v703_v44 }
  0xd0   : > { %960 = vmatpush.msra.mxu2 %v693_v41  ;;  %1042 = vmatpush.msra.mxu0 %v695_v51 }
  0xd2   : > { %961 = vmatpush.msra.mxu2 %v685_v49  ;;  %1043 = vmatpush.msra.mxu0 %v687_v56 }
  0xd4   : > { %962 = vmatpush.msra.mxu2 %v677_v54  ;;  %1044 = vmatpush.msra.mxu0 %v679_v1 }
  0xd6   : > { %963 = vmatpush.msra.mxu2 %v669_v63  ;;  %1045 = vmatpush.msra.mxu0 %v671_v6 }
  0xd8   : > { %964 = vmatpush.msra.mxu2 %v661_v4 }
 0x116   : > { %v601_v11 = vpop.f32.mrf.mxu1 }
 0x117   : > { %v629_v15 = vmul.f32 %v2531_v3, %v601_v11  ;;  %v663_v11 = vld [vmem:[%s3104_s7 + $0x30] sm:$0xff] }
 0x118   : > { %1046 = vmatpush.msra.mxu0 %v663_v11 }
 0x119   : > { %v641_v23 = vadd.f32 %v2554_v10, %v629_v15 }
 0x11b   : > { %v2582_v24 = vmax.f32 %v641_v23, 0.0 }
 0x11d   : > { %801 = vmatmul.f32.vlgmr.msrb.gmra.mxu2 %v2582_v24  ;;  %842 = vmatmul.f32.vlgmr.msrb.gmra.mxu3 %v2582_v24 }
 0x11e   : > { %883 = vmatmul.f32.vlgmr.msrb.gmra.mxu0 %v2582_v24  ;;  %924 = vmatmul.f32.vlgmr.msrb.gmra.mxu1 %v2582_v24  ;;  %v604_v25 = vpop.f32.mrf.mxu1 }
 0x11f   : > { %v630_v29 = vmul.f32 %v2531_v3, %v604_v25 }
 0x121   : > { %v642_v35 = vadd.f32 %v2554_v10, %v630_v29 }
 0x122   : > { %v613_v43 = vpop.f32.mrf.mxu2 }
 0x123   : > { %v2614_v36 = vmax.f32 %v642_v35, 0.0  ;;  %v633_v59 = vmul.f32 %v2531_v3, %v613_v43 }
 0x125   : > { %804 = vmatmul.f32.gmra.mxu2 %v2614_v36  ;;  %845 = vmatmul.f32.gmra.mxu3 %v2614_v36  ;;  %v645_v62 = vadd.f32 %v2554_v10, %v633_v59 }
 0x126   : > { %886 = vmatmul.f32.gmra.mxu0 %v2614_v36  ;;  %927 = vmatmul.f32.gmra.mxu1 %v2614_v36  ;;  %v607_v37 = vpop.f32.mrf.mxu1 }
 0x127   : > { %v631_v18 = vmul.f32 %v2531_v3, %v607_v37  ;;  %v653_v8 = vmax.f32 %v645_v62, 0.0 }
 0x129   : > { %v643_v46 = vadd.f32 %v2554_v10, %v631_v18 }
 0x12a   : > { %v616_v60 = vpop.f32.mrf.mxu2 }
 0x12b   : > { %v2646_v47 = vmax.f32 %v643_v46, 0.0  ;;  %v634_v9 = vmul.f32 %v2531_v3, %v616_v60 }
 0x12d   : > { %807 = vmatmul.f32.gmra.mxu2 %v2646_v47  ;;  %848 = vmatmul.f32.gmra.mxu3 %v2646_v47  ;;  %v646_v14 = vadd.f32 %v2554_v10, %v634_v9 }
 0x12e   : > { %889 = vmatmul.f32.gmra.mxu0 %v2646_v47  ;;  %930 = vmatmul.f32.gmra.mxu1 %v2646_v47  ;;  %v610_v48 = vpop.f32.mrf.mxu1 }
 0x12f   : > { %v632_v52 = vmul.f32 %v2531_v3, %v610_v48  ;;  %v654_v15 = vmax.f32 %v646_v14, 0.0 }
 0x131   : > { %v644_v58 = vadd.f32 %v2554_v10, %v632_v52 }
 0x132   : > { %v619_v13 = vpop.f32.mrf.mxu2 }
 0x133   : > { %v2679_v61 = vmax.f32 %v644_v58, 0.0  ;;  %v635_v16 = vmul.f32 %v2531_v3, %v619_v13 }
 0x135   : > { %810 = vmatmul.f32.gmra.mxu2 %v2679_v61  ;;  %851 = vmatmul.f32.gmra.mxu3 %v2679_v61  ;;  %v647_v19 = vadd.f32 %v2554_v10, %v635_v16 }
 0x136   : > { %892 = vmatmul.f32.gmra.mxu0 %v2679_v61  ;;  %933 = vmatmul.f32.gmra.mxu1 %v2679_v61 }
 0x137   : > { %v655_v21 = vmax.f32 %v647_v19, 0.0 }
 0x13a   : > { %v622_v20 = vpop.f32.mrf.mxu2 }
 0x13b   : > { %v636_v22 = vmul.f32 %v2531_v3, %v622_v20 }
 0x13d   : > { %813 = vmatmul.f32.gmra.mxu2 %v653_v8  ;;  %854 = vmatmul.f32.gmra.mxu3 %v653_v8  ;;  %v648_v23 = vadd.f32 %v2554_v10, %v636_v22 }
 0x13e   : > { %895 = vmatmul.f32.gmra.mxu0 %v653_v8  ;;  %936 = vmatmul.f32.gmra.mxu1 %v653_v8 }
 0x13f   : > { %v656_v25 = vmax.f32 %v648_v23, 0.0 }
 0x145   : > { %816 = vmatmul.f32.gmra.mxu2 %v654_v15  ;;  %857 = vmatmul.f32.gmra.mxu3 %v654_v15 }
 0x146   : > { %898 = vmatmul.f32.gmra.mxu0 %v654_v15  ;;  %939 = vmatmul.f32.gmra.mxu1 %v654_v15 }
 0x14d   : > { %819 = vmatmul.f32.gmra.mxu2 %v655_v21  ;;  %860 = vmatmul.f32.gmra.mxu3 %v655_v21 }
 0x14e   : > { %901 = vmatmul.f32.gmra.mxu0 %v655_v21  ;;  %942 = vmatmul.f32.gmra.mxu1 %v655_v21 }
 0x155   : > { %822 = vmatmul.f32.gmra.mxu2 %v656_v25  ;;  %863 = vmatmul.f32.gmra.mxu3 %v656_v25 }
 0x156   : > { %904 = vmatmul.f32.gmra.mxu0 %v656_v25  ;;  %945 = vmatmul.f32.gmra.mxu1 %v656_v25 }
 0x15d   : > { %965 = vmatmul.f32.vlgmr.msra.gmra.mxu2 %v2582_v24  ;;  %1006 = vmatmul.f32.vlgmr.msra.gmra.mxu3 %v2582_v24 }
 0x15e   : > { %1047 = vmatmul.f32.vlgmr.msra.gmra.mxu0 %v2582_v24  ;;  %1088 = vmatmul.f32.vlgmr.msra.gmra.mxu1 %v2582_v24 }
 0x165   : > { %968 = vmatmul.f32.gmra.mxu2 %v2614_v36  ;;  %1009 = vmatmul.f32.gmra.mxu3 %v2614_v36 }
 0x166   : > { %1050 = vmatmul.f32.gmra.mxu0 %v2614_v36  ;;  %1091 = vmatmul.f32.gmra.mxu1 %v2614_v36 }
 0x16d   : > { %971 = vmatmul.f32.gmra.mxu2 %v2646_v47  ;;  %1012 = vmatmul.f32.gmra.mxu3 %v2646_v47 }
 0x16e   : > { %1053 = vmatmul.f32.gmra.mxu0 %v2646_v47  ;;  %1094 = vmatmul.f32.gmra.mxu1 %v2646_v47 }
 0x175   : > { %974 = vmatmul.f32.gmra.mxu2 %v2679_v61  ;;  %1015 = vmatmul.f32.gmra.mxu3 %v2679_v61 }
 0x176   : > { %1056 = vmatmul.f32.gmra.mxu0 %v2679_v61  ;;  %1097 = vmatmul.f32.gmra.mxu1 %v2679_v61 }
 0x17d   : > { %977 = vmatmul.f32.gmra.mxu2 %v653_v8  ;;  %1018 = vmatmul.f32.gmra.mxu3 %v653_v8 }
 0x17e   : > { %1059 = vmatmul.f32.gmra.mxu0 %v653_v8  ;;  %1100 = vmatmul.f32.gmra.mxu1 %v653_v8 }
 0x185   : > { %980 = vmatmul.f32.gmra.mxu2 %v654_v15  ;;  %1021 = vmatmul.f32.gmra.mxu3 %v654_v15 }
 0x186   : > { %1062 = vmatmul.f32.gmra.mxu0 %v654_v15  ;;  %1103 = vmatmul.f32.gmra.mxu1 %v654_v15 }
 0x18d   : > { %983 = vmatmul.f32.gmra.mxu2 %v655_v21  ;;  %1024 = vmatmul.f32.gmra.mxu3 %v655_v21 }
 0x18e   : > { %1065 = vmatmul.f32.gmra.mxu0 %v655_v21  ;;  %1106 = vmatmul.f32.gmra.mxu1 %v655_v21 }
 0x195   : > { %986 = vmatmul.f32.gmra.mxu2 %v656_v25  ;;  %1027 = vmatmul.f32.gmra.mxu3 %v656_v25 }
 0x196   : > { %1068 = vmatmul.f32.gmra.mxu0 %v656_v25  ;;  %1109 = vmatmul.f32.gmra.mxu1 %v656_v25 }
 0x19b   : > { %v884_v3 = vpop.f32.mrf.mxu0  ;;  %v925_v10 = vpop.f32.mrf.mxu1 }
 0x19c   : > { %v1219_v27 = vmul.f32 %v884_v3, %v884_v3  ;;  %v1220_v28 = vmul.f32 %v925_v10, %v925_v10 }
 0x1a0   : > { %v802_v24 = vpop.f32.mrf.mxu2  ;;  %v843_v26 = vpop.f32.mrf.mxu3 }
 0x1a1   : > { %v1217_v18 = vmul.f32 %v802_v24, %v802_v24  ;;  %v1218_v40 = vmul.f32 %v843_v26, %v843_v26 }
 0x1a3   : > { %v887_v29 = vpop.f32.mrf.mxu0  ;;  %v928_v30 = vpop.f32.mrf.mxu1 }
 0x1a4   : > { %v1139_v31 = vadd.f32 %v887_v29, %v884_v3  ;;  %v1227_v32 = vmul.f32 %v887_v29, %v887_v29  ;;  %v1411_v33 = vmax.f32 %v884_v3, %v887_v29  ;;  %v1515_v34 = vmin.f32 %v884_v3, %v887_v29 }
 0x1a5   : > { %v1152_v35 = vadd.f32 %v928_v30, %v925_v10  ;;  %v1228_v36 = vmul.f32 %v928_v30, %v928_v30  ;;  %v1424_v37 = vmax.f32 %v925_v10, %v928_v30  ;;  %v1528_v38 = vmin.f32 %v925_v10, %v928_v30 }
 0x1a6   : > { %v1307_v17 = vadd.f32 %v1227_v32, %v1219_v27 }
 0x1a7   : > { %v1320_v39 = vadd.f32 %v1228_v36, %v1220_v28 }
 0x1a8   : > { %v805_v41 = vpop.f32.mrf.mxu2  ;;  %v846_v42 = vpop.f32.mrf.mxu3 }
 0x1a9   : > { %v1113_v43 = vadd.f32 %v805_v41, %v802_v24  ;;  %v1225_v44 = vmul.f32 %v805_v41, %v805_v41  ;;  %v1385_v45 = vmax.f32 %v802_v24, %v805_v41  ;;  %v1489_v46 = vmin.f32 %v802_v24, %v805_v41 }
 0x1aa   : > { %v1126_v47 = vadd.f32 %v846_v42, %v843_v26  ;;  %v1226_v48 = vmul.f32 %v846_v42, %v846_v42  ;;  %v1398_v49 = vmax.f32 %v843_v26, %v846_v42  ;;  %v1502_v50 = vmin.f32 %v843_v26, %v846_v42 }
 0x1ab   : > { %v1281_v51 = vadd.f32 %v1225_v44, %v1217_v18  ;;  %v890_v52 = vpop.f32.mrf.mxu0  ;;  %v931_v53 = vpop.f32.mrf.mxu1 }
 0x1ac   : > { %v1294_v54 = vadd.f32 %v1226_v48, %v1218_v40  ;;  %v1140_v55 = vadd.f32 %v1139_v31, %v890_v52  ;;  %v1235_v56 = vmul.f32 %v890_v52, %v890_v52  ;;  %v1412_v57 = vmax.f32 %v1411_v33, %v890_v52 }
 0x1ad   : > { %v1516_v58 = vmin.f32 %v1515_v34, %v890_v52  ;;  %v1153_v59 = vadd.f32 %v1152_v35, %v931_v53  ;;  %v1236_v60 = vmul.f32 %v931_v53, %v931_v53  ;;  %v1425_v61 = vmax.f32 %v1424_v37, %v931_v53 }
 0x1ae   : > { %v1308_v62 = vadd.f32 %v1307_v17, %v1235_v56  ;;  %v1529_v63 = vmin.f32 %v1528_v38, %v931_v53 }
 0x1af   : > { %v1321_v0 = vadd.f32 %v1320_v39, %v1236_v60 }
 0x1b0   : > { %v808_v1 = vpop.f32.mrf.mxu2  ;;  %v849_v2 = vpop.f32.mrf.mxu3 }
 0x1b1   : > { %v1114_v4 = vadd.f32 %v1113_v43, %v808_v1  ;;  %v1233_v5 = vmul.f32 %v808_v1, %v808_v1  ;;  %v1386_v6 = vmax.f32 %v1385_v45, %v808_v1  ;;  %v1490_v7 = vmin.f32 %v1489_v46, %v808_v1 }
 0x1b2   : > { %v1127_v8 = vadd.f32 %v1126_v47, %v849_v2  ;;  %v1234_v9 = vmul.f32 %v849_v2, %v849_v2  ;;  %v1399_v11 = vmax.f32 %v1398_v49, %v849_v2  ;;  %v1503_v12 = vmin.f32 %v1502_v50, %v849_v2 }
 0x1b3   : > { %v1282_v13 = vadd.f32 %v1281_v51, %v1233_v5  ;;  %v893_v14 = vpop.f32.mrf.mxu0  ;;  %v934_v15 = vpop.f32.mrf.mxu1 }
 0x1b4   : > { %v1295_v16 = vadd.f32 %v1294_v54, %v1234_v9  ;;  %v1141_v19 = vadd.f32 %v1140_v55, %v893_v14  ;;  %v1243_v20 = vmul.f32 %v893_v14, %v893_v14  ;;  %v1413_v21 = vmax.f32 %v1412_v57, %v893_v14 }
 0x1b5   : > { %v1517_v22 = vmin.f32 %v1516_v58, %v893_v14  ;;  %v1154_v23 = vadd.f32 %v1153_v59, %v934_v15  ;;  %v1244_v25 = vmul.f32 %v934_v15, %v934_v15  ;;  %v1426_v3 = vmax.f32 %v1425_v61, %v934_v15 }
 0x1b6   : > { %v1309_v10 = vadd.f32 %v1308_v62, %v1243_v20  ;;  %v1530_v24 = vmin.f32 %v1529_v63, %v934_v15 }
 0x1b7   : > { %v1322_v26 = vadd.f32 %v1321_v0, %v1244_v25 }
 0x1b8   : > { %v811_v27 = vpop.f32.mrf.mxu2  ;;  %v852_v28 = vpop.f32.mrf.mxu3 }
 0x1b9   : > { %v1115_v29 = vadd.f32 %v1114_v4, %v811_v27  ;;  %v1241_v30 = vmul.f32 %v811_v27, %v811_v27  ;;  %v1387_v31 = vmax.f32 %v1386_v6, %v811_v27  ;;  %v1491_v32 = vmin.f32 %v1490_v7, %v811_v27 }
 0x1ba   : > { %v1128_v33 = vadd.f32 %v1127_v8, %v852_v28  ;;  %v1242_v34 = vmul.f32 %v852_v28, %v852_v28  ;;  %v1400_v35 = vmax.f32 %v1399_v11, %v852_v28  ;;  %v1504_v36 = vmin.f32 %v1503_v12, %v852_v28 }
 0x1bb   : > { %v1283_v37 = vadd.f32 %v1282_v13, %v1241_v30  ;;  %v896_v38 = vpop.f32.mrf.mxu0  ;;  %v937_v17 = vpop.f32.mrf.mxu1 }
 0x1bc   : > { %v1296_v39 = vadd.f32 %v1295_v16, %v1242_v34  ;;  %v1142_v18 = vadd.f32 %v1141_v19, %v896_v38  ;;  %v1251_v40 = vmul.f32 %v896_v38, %v896_v38  ;;  %v1414_v41 = vmax.f32 %v1413_v21, %v896_v38 }
 0x1bd   : > { %v1518_v42 = vmin.f32 %v1517_v22, %v896_v38  ;;  %v1155_v43 = vadd.f32 %v1154_v23, %v937_v17  ;;  %v1252_v44 = vmul.f32 %v937_v17, %v937_v17  ;;  %v1427_v45 = vmax.f32 %v1426_v3, %v937_v17 }
 0x1be   : > { %v1310_v46 = vadd.f32 %v1309_v10, %v1251_v40  ;;  %v1531_v47 = vmin.f32 %v1530_v24, %v937_v17 }
 0x1bf   : > { %v1323_v48 = vadd.f32 %v1322_v26, %v1252_v44 }
 0x1c0   : > { %v814_v49 = vpop.f32.mrf.mxu2  ;;  %v855_v50 = vpop.f32.mrf.mxu3 }
 0x1c1   : > { %v1116_v51 = vadd.f32 %v1115_v29, %v814_v49  ;;  %v1249_v52 = vmul.f32 %v814_v49, %v814_v49  ;;  %v1388_v53 = vmax.f32 %v1387_v31, %v814_v49  ;;  %v1492_v54 = vmin.f32 %v1491_v32, %v814_v49 }
 0x1c2   : > { %v1129_v55 = vadd.f32 %v1128_v33, %v855_v50  ;;  %v1250_v56 = vmul.f32 %v855_v50, %v855_v50  ;;  %v1401_v57 = vmax.f32 %v1400_v35, %v855_v50  ;;  %v1505_v58 = vmin.f32 %v1504_v36, %v855_v50 }
 0x1c3   : > { %v1284_v59 = vadd.f32 %v1283_v37, %v1249_v52  ;;  %v899_v60 = vpop.f32.mrf.mxu0  ;;  %v940_v61 = vpop.f32.mrf.mxu1 }
 0x1c4   : > { %v1297_v62 = vadd.f32 %v1296_v39, %v1250_v56  ;;  %v1143_v63 = vadd.f32 %v1142_v18, %v899_v60  ;;  %v1259_v0 = vmul.f32 %v899_v60, %v899_v60  ;;  %v1415_v1 = vmax.f32 %v1414_v41, %v899_v60 }
 0x1c5   : > { %v1519_v2 = vmin.f32 %v1518_v42, %v899_v60  ;;  %v1156_v4 = vadd.f32 %v1155_v43, %v940_v61  ;;  %v1260_v5 = vmul.f32 %v940_v61, %v940_v61  ;;  %v1428_v6 = vmax.f32 %v1427_v45, %v940_v61 }
 0x1c6   : > { %v1311_v7 = vadd.f32 %v1310_v46, %v1259_v0  ;;  %v1532_v8 = vmin.f32 %v1531_v47, %v940_v61 }
 0x1c7   : > { %v1324_v9 = vadd.f32 %v1323_v48, %v1260_v5 }
 0x1c8   : > { %v817_v11 = vpop.f32.mrf.mxu2  ;;  %v858_v12 = vpop.f32.mrf.mxu3 }
 0x1c9   : > { %v1117_v13 = vadd.f32 %v1116_v51, %v817_v11  ;;  %v1257_v14 = vmul.f32 %v817_v11, %v817_v11  ;;  %v1389_v15 = vmax.f32 %v1388_v53, %v817_v11  ;;  %v1493_v16 = vmin.f32 %v1492_v54, %v817_v11 }
 0x1ca   : > { %v1130_v19 = vadd.f32 %v1129_v55, %v858_v12  ;;  %v1258_v20 = vmul.f32 %v858_v12, %v858_v12  ;;  %v1402_v21 = vmax.f32 %v1401_v57, %v858_v12  ;;  %v1506_v22 = vmin.f32 %v1505_v58, %v858_v12 }
 0x1cb   : > { %v1285_v23 = vadd.f32 %v1284_v59, %v1257_v14  ;;  %v902_v25 = vpop.f32.mrf.mxu0  ;;  %v943_v3 = vpop.f32.mrf.mxu1 }
 0x1cc   : > { %v1298_v10 = vadd.f32 %v1297_v62, %v1258_v20  ;;  %v1144_v24 = vadd.f32 %v1143_v63, %v902_v25  ;;  %v1267_v26 = vmul.f32 %v902_v25, %v902_v25  ;;  %v1416_v27 = vmax.f32 %v1415_v1, %v902_v25 }
 0x1cd   : > { %v1520_v28 = vmin.f32 %v1519_v2, %v902_v25  ;;  %v1157_v29 = vadd.f32 %v1156_v4, %v943_v3  ;;  %v1268_v30 = vmul.f32 %v943_v3, %v943_v3  ;;  %v1429_v31 = vmax.f32 %v1428_v6, %v943_v3 }
 0x1ce   : > { %v1312_v32 = vadd.f32 %v1311_v7, %v1267_v26  ;;  %v1533_v33 = vmin.f32 %v1532_v8, %v943_v3 }
 0x1cf   : > { %v1325_v34 = vadd.f32 %v1324_v9, %v1268_v30 }
 0x1d0   : > { %v820_v35 = vpop.f32.mrf.mxu2  ;;  %v861_v36 = vpop.f32.mrf.mxu3 }
 0x1d1   : > { %v2738_v37 = vadd.f32 %v1117_v13, %v820_v35  ;;  %v1265_v38 = vmul.f32 %v820_v35, %v820_v35  ;;  %v2740_v17 = vmax.f32 %v1389_v15, %v820_v35  ;;  %v2742_v39 = vmin.f32 %v1493_v16, %v820_v35 }
 0x1d2   : > { %v2744_v18 = vadd.f32 %v1130_v19, %v861_v36  ;;  %v1266_v40 = vmul.f32 %v861_v36, %v861_v36  ;;  %v2746_v41 = vmax.f32 %v1402_v21, %v861_v36  ;;  %v2748_v42 = vmin.f32 %v1506_v22, %v861_v36 }
 0x1d3   : > { %v2750_v43 = vadd.f32 %v1285_v23, %v1265_v38  ;;  %v905_v44 = vpop.f32.mrf.mxu0  ;;  %v946_v45 = vpop.f32.mrf.mxu1 }
 0x1d4   : > { %v2752_v46 = vadd.f32 %v1298_v10, %v1266_v40  ;;  %v1145_v47 = vadd.f32 %v1144_v24, %v905_v44  ;;  %v1275_v48 = vmul.f32 %v905_v44, %v905_v44  ;;  %v1417_v49 = vmax.f32 %v1416_v27, %v905_v44 }
 0x1d5   : > { %v1521_v50 = vmin.f32 %v1520_v28, %v905_v44  ;;  %v1158_v51 = vadd.f32 %v1157_v29, %v946_v45  ;;  %v1276_v52 = vmul.f32 %v946_v45, %v946_v45  ;;  %v1430_v53 = vmax.f32 %v1429_v31, %v946_v45 }
 0x1d6   : > { %v1146_v54 = vrot.slane %v1145_v47, 4  ;;  %v1313_v55 = vadd.f32 %v1312_v32, %v1275_v48  ;;  %v1418_v56 = vrot.slane %v1417_v49, 4  ;;  %v1534_v57 = vmin.f32 %v1533_v33, %v946_v45 }
 0x1d7   : > { %v1522_v58 = vrot.slane %v1521_v50, 4  ;;  %v1159_v59 = vrot.slane %v1158_v51, 4  ;;  %v1326_v60 = vadd.f32 %v1325_v34, %v1276_v52  ;;  %v1431_v61 = vrot.slane %v1430_v53, 4 }
 0x1d8   : > { %v1147_v62 = vadd.f32 %v1146_v54, %v1145_v47  ;;  %v1314_v63 = vrot.slane %v1313_v55, 4  ;;  %v1419_v0 = vmax.f32 %v1417_v49, %v1418_v56  ;;  %v1535_v1 = vrot.slane %v1534_v57, 4  ;;  %v823_v2 = vpop.f32.mrf.mxu2  ;;  %v864_v4 = vpop.f32.mrf.mxu3 }
 0x1d9   : > { %v1523_v5 = vmin.f32 %v1521_v50, %v1522_v58  ;;  %v1160_v6 = vadd.f32 %v1159_v59, %v1158_v51  ;;  %v1327_v7 = vrot.slane %v1326_v60, 4  ;;  %v1432_v8 = vmax.f32 %v1430_v53, %v1431_v61 }
 0x1da   : > { %v1148_v9 = vrot.slane %v1147_v62, 2  ;;  %v1315_v11 = vadd.f32 %v1314_v63, %v1313_v55  ;;  %v1420_v12 = vrot.slane %v1419_v0, 2  ;;  %v1536_v13 = vmin.f32 %v1534_v57, %v1535_v1 }
 0x1db   : > { %v1524_v14 = vrot.slane %v1523_v5, 2  ;;  %v1161_v15 = vrot.slane %v1160_v6, 2  ;;  %v1328_v16 = vadd.f32 %v1327_v7, %v1326_v60  ;;  %v1433_v19 = vrot.slane %v1432_v8, 2  ;;  %v2754_v20 = vpop.f32.mrf.mxu0  ;;  %v2756_v21 = vpop.f32.mrf.mxu1 }
 0x1dc   : > { %v1149_v22 = vadd.f32 %v1148_v9, %v1147_v62  ;;  %v1316_v23 = vrot.slane %v1315_v11, 2  ;;  %v1421_v25 = vmax.f32 %v1419_v0, %v1420_v12  ;;  %v1537_v3 = vrot.slane %v1536_v13, 2 }
 0x1dd   : > { %v1525_v10 = vmin.f32 %v1523_v5, %v1524_v14  ;;  %v1162_v24 = vadd.f32 %v1161_v15, %v1160_v6  ;;  %v1329_v26 = vrot.slane %v1328_v16, 2  ;;  %v1434_v27 = vmax.f32 %v1432_v8, %v1433_v19 }
 0x1de   : > { %v1150_v28 = vrot.slane %v1149_v22, 1  ;;  %v1317_v29 = vadd.f32 %v1316_v23, %v1315_v11  ;;  %v1422_v30 = vrot.slane %v1421_v25, 1  ;;  %v1538_v31 = vmin.f32 %v1536_v13, %v1537_v3 }
 0x1df   : > { %v1526_v32 = vrot.slane %v1525_v10, 1  ;;  %v1163_v33 = vrot.slane %v1162_v24, 1  ;;  %v1330_v34 = vadd.f32 %v1329_v26, %v1328_v16  ;;  %v1435_v35 = vrot.slane %v1434_v27, 1 }
 0x1e0   : > { %v2758_v36 = vadd.f32 %v1150_v28, %v1149_v22  ;;  %v1318_v38 = vrot.slane %v1317_v29, 1  ;;  %v2760_v40 = vmax.f32 %v1421_v25, %v1422_v30  ;;  %v1539_v44 = vrot.slane %v1538_v31, 1  ;;  %v2762_v45 = vpop.f32.mrf.mxu2  ;;  %v2764_v47 = vpop.f32.mrf.mxu3 }
 0x1e1   : > { %v2766_v48 = vmin.f32 %v1525_v10, %v1526_v32  ;;  %v2768_v49 = vadd.f32 %v1163_v33, %v1162_v24  ;;  %v1331_v50 = vrot.slane %v1330_v34, 1  ;;  %v2770_v51 = vmax.f32 %v1434_v27, %v1435_v35 }
 0x1e2   : > { %v2772_v52 = vadd.f32 %v1318_v38, %v1317_v29  ;;  %v2774_v53 = vmin.f32 %v1538_v31, %v1539_v44  ;;  %v1119_v54 = vadd.f32 %v2738_v37, %v823_v2  ;;  %v1273_v55 = vmul.f32 %v823_v2, %v823_v2 }
 0x1e3   : > { %v2777_v56 = vadd.f32 %v1331_v50, %v1330_v34  ;;  %v1391_v57 = vmax.f32 %v2740_v17, %v823_v2  ;;  %v1495_v58 = vmin.f32 %v2742_v39, %v823_v2  ;;  %v1132_v59 = vadd.f32 %v2744_v18, %v864_v4  ;;  %v2782_v60 = vpop.f32.mrf.mxu0  ;;  %v2784_v61 = vpop.f32.mrf.mxu1 }
 0x1e4   : > { %v1120_v62 = vrot.slane %v1119_v54, 4  ;;  %v1287_v63 = vadd.f32 %v2750_v43, %v1273_v55  ;;  %v1274_v0 = vmul.f32 %v864_v4, %v864_v4  ;;  %v1404_v1 = vmax.f32 %v2746_v41, %v864_v4 }
 0x1e5   : > { %v1392_v37 = vrot.slane %v1391_v57, 4  ;;  %v1496_v5 = vrot.slane %v1495_v58, 4  ;;  %v1133_v6 = vrot.slane %v1132_v59, 4  ;;  %v1508_v7 = vmin.f32 %v2748_v42, %v864_v4 }
 0x1e6   : > { %v1121_v17 = vadd.f32 %v1120_v62, %v1119_v54  ;;  %v1288_v8 = vrot.slane %v1287_v63, 4  ;;  %v1300_v39 = vadd.f32 %v2752_v46, %v1274_v0  ;;  %v1405_v18 = vrot.slane %v1404_v1, 4 }
 0x1e7   : > { %v1393_v2 = vmax.f32 %v1391_v57, %v1392_v37  ;;  %v1497_v9 = vmin.f32 %v1495_v58, %v1496_v5  ;;  %v1134_v11 = vadd.f32 %v1133_v6, %v1132_v59  ;;  %v1509_v12 = vrot.slane %v1508_v7, 4 }
 0x1e8   : > { %v1122_v13 = vrot.slane %v1121_v17, 2  ;;  %v1289_v14 = vadd.f32 %v1288_v8, %v1287_v63  ;;  %v1301_v43 = vrot.slane %v1300_v39, 4  ;;  %v1406_v15 = vmax.f32 %v1404_v1, %v1405_v18  ;;  %v2790_v16 = vpop.f32.mrf.mxu2  ;;  %v2792_v41 = vpop.f32.mrf.mxu3 }
 0x1e9   : > { %v1394_v19 = vrot.slane %v1393_v2, 2  ;;  %v1498_v22 = vrot.slane %v1497_v9, 2  ;;  %v1135_v42 = vrot.slane %v1134_v11, 2  ;;  %v1510_v4 = vmin.f32 %v1508_v7, %v1509_v12 }
 0x1ea   : > { %v1123_v23 = vadd.f32 %v1122_v13, %v1121_v17  ;;  %v1290_v25 = vrot.slane %v1289_v14, 2  ;;  %v1302_v46 = vadd.f32 %v1301_v43, %v1300_v39  ;;  %v1407_v3 = vrot.slane %v1406_v15, 2 }
 0x1eb   : > { %v1395_v10 = vmax.f32 %v1393_v2, %v1394_v19  ;;  %v1499_v24 = vmin.f32 %v1497_v9, %v1498_v22  ;;  %v1136_v26 = vadd.f32 %v1135_v42, %v1134_v11  ;;  %v1511_v27 = vrot.slane %v1510_v4, 2  ;;  %v1054_v28 = vpop.f32.mrf.mxu0  ;;  %v2794_v29 = vpop.f32.mrf.mxu1 }
 0x1ec   : > { %v1124_v30 = vrot.slane %v1123_v23, 1  ;;  %v1291_v31 = vadd.f32 %v1290_v25, %v1289_v14  ;;  %v1303_v32 = vrot.slane %v1302_v46, 2  ;;  %v1408_v33 = vmax.f32 %v1406_v15, %v1407_v3 }
 0x1ed   : > { %v1396_v34 = vrot.slane %v1395_v10, 1  ;;  %v1500_v35 = vrot.slane %v1499_v24, 1  ;;  %v1137_v38 = vrot.slane %v1136_v26, 1  ;;  %v1512_v44 = vmin.f32 %v1510_v4, %v1511_v27 }
 0x1ee   : > { %v2796_v50 = vadd.f32 %v1124_v30, %v1123_v23  ;;  %v1292_v54 = vrot.slane %v1291_v31, 1  ;;  %v1304_v55 = vadd.f32 %v1303_v32, %v1302_v46  ;;  %v1409_v57 = vrot.slane %v1408_v33, 1 }
 0x1ef   : > { %v2798_v58 = vmax.f32 %v1395_v10, %v1396_v34  ;;  %v2800_v59 = vmin.f32 %v1499_v24, %v1500_v35  ;;  %v2802_v62 = vadd.f32 %v1137_v38, %v1136_v26  ;;  %v1513_v63 = vrot.slane %v1512_v44, 1 }
 0x1f0   : > { %v2804_v0 = vadd.f32 %v1292_v54, %v1291_v31  ;;  %v1305_v1 = vrot.slane %v1304_v55, 1  ;;  %v2806_v37 = vmax.f32 %v1408_v33, %v1409_v57  ;;  %v972_v5 = vpop.f32.mrf.mxu2  ;;  %v1013_v6 = vpop.f32.mrf.mxu3  ;;  %v1231_v18 = vmul.f32 %v2782_v60, %v2782_v60 }
 0x1f1   : > { %v2808_v7 = vmin.f32 %v1512_v44, %v1513_v63  ;;  %v1223_v2 = vmul.f32 %v2754_v20, %v2754_v20  ;;  %v1224_v9 = vmul.f32 %v2756_v21, %v2756_v21  ;;  %v1232_v11 = vmul.f32 %v2784_v61, %v2784_v61 }
 0x1f2   : > { %v2810_v17 = vadd.f32 %v1305_v1, %v1304_v55  ;;  %v1221_v12 = vmul.f32 %v2762_v45, %v2762_v45  ;;  %v1222_v13 = vmul.f32 %v2764_v47, %v2764_v47  ;;  %v1191_v14 = vadd.f32 %v2782_v60, %v2754_v20 }
 0x1f3   : > { %v2812_v8 = vpop.f32.mrf.mxu0  ;;  %v2814_v39 = vpop.f32.mrf.mxu1  ;;  %v1229_v43 = vmul.f32 %v2790_v16, %v2790_v16  ;;  %v1463_v15 = vmax.f32 %v2754_v20, %v2782_v60  ;;  %v1567_v19 = vmin.f32 %v2754_v20, %v2782_v60  ;;  %v1204_v22 = vadd.f32 %v2784_v61, %v2756_v21 }
 0x1f4   : > { %v1476_v42 = vmax.f32 %v2756_v21, %v2784_v61  ;;  %v1359_v4 = vadd.f32 %v1231_v18, %v1223_v2  ;;  %v1580_v23 = vmin.f32 %v2756_v21, %v2784_v61  ;;  %v1165_v25 = vadd.f32 %v2790_v16, %v2762_v45 }
 0x1f5   : > { %v1230_v46 = vmul.f32 %v2792_v41, %v2792_v41  ;;  %v1372_v20 = vadd.f32 %v1232_v11, %v1224_v9  ;;  %v1437_v60 = vmax.f32 %v2762_v45, %v2790_v16  ;;  %v1541_v24 = vmin.f32 %v2762_v45, %v2790_v16 }
 0x1f6   : > { %v1239_v26 = vmul.f32 %v1054_v28, %v1054_v28  ;;  %v1333_v27 = vadd.f32 %v1229_v43, %v1221_v12  ;;  %v1178_v21 = vadd.f32 %v2792_v41, %v2764_v47  ;;  %v1450_v61 = vmax.f32 %v2764_v47, %v2792_v41 }
 0x1f7   : > { %v1240_v30 = vmul.f32 %v2794_v29, %v2794_v29  ;;  %v1554_v31 = vmin.f32 %v2764_v47, %v2792_v41  ;;  %v1192_v32 = vadd.f32 %v1191_v14, %v1054_v28  ;;  %v1464_v33 = vmax.f32 %v1463_v15, %v1054_v28 }
 0x1f8   : > { %v2846_v3 = vpop.f32.mrf.mxu2  ;;  %v2848_v10 = vpop.f32.mrf.mxu3  ;;  %v1237_v34 = vmul.f32 %v972_v5, %v972_v5  ;;  %v1346_v45 = vadd.f32 %v1230_v46, %v1222_v13  ;;  %v1568_v16 = vmin.f32 %v1567_v19, %v1054_v28  ;;  %v1205_v44 = vadd.f32 %v1204_v22, %v2794_v29 }
 0x1f9   : > { %v1477_v54 = vmax.f32 %v1476_v42, %v2794_v29  ;;  %v1360_v55 = vadd.f32 %v1359_v4, %v1239_v26  ;;  %v1581_v57 = vmin.f32 %v1580_v23, %v2794_v29  ;;  %v1166_v63 = vadd.f32 %v1165_v25, %v972_v5 }
 0x1fa   : > { %v1238_v1 = vmul.f32 %v1013_v6, %v1013_v6  ;;  %v1373_v18 = vadd.f32 %v1372_v20, %v1240_v30  ;;  %v1438_v2 = vmax.f32 %v1437_v60, %v972_v5  ;;  %v1542_v9 = vmin.f32 %v1541_v24, %v972_v5 }
 0x1fb   : > { %v1060_v35 = vpop.f32.mrf.mxu0  ;;  %v1101_v38 = vpop.f32.mrf.mxu1  ;;  %v1247_v47 = vmul.f32 %v2812_v8, %v2812_v8  ;;  %v1334_v41 = vadd.f32 %v1333_v27, %v1237_v34  ;;  %v1179_v11 = vadd.f32 %v1178_v21, %v1013_v6  ;;  %v1451_v12 = vmax.f32 %v1450_v61, %v1013_v6 }
 0x1fc   : > { %v1248_v28 = vmul.f32 %v2814_v39, %v2814_v39  ;;  %v1555_v13 = vmin.f32 %v1554_v31, %v1013_v6  ;;  %v1193_v14 = vadd.f32 %v1192_v32, %v2812_v8  ;;  %v1465_v43 = vmax.f32 %v1464_v33, %v2812_v8 }
 0x1fd   : > { %v1245_v29 = vmul.f32 %v2846_v3, %v2846_v3  ;;  %v1347_v5 = vadd.f32 %v1346_v45, %v1238_v1  ;;  %v1569_v22 = vmin.f32 %v1568_v16, %v2812_v8  ;;  %v1206_v42 = vadd.f32 %v1205_v44, %v2814_v39 }
 0x1fe   : > { %v1478_v4 = vmax.f32 %v1477_v54, %v2814_v39  ;;  %v1361_v23 = vadd.f32 %v1360_v55, %v1247_v47  ;;  %v1582_v25 = vmin.f32 %v1581_v57, %v2814_v39  ;;  %v1167_v6 = vadd.f32 %v1166_v63, %v2846_v3 }
 0x1ff   : > { %v1246_v46 = vmul.f32 %v2848_v10, %v2848_v10  ;;  %v1374_v20 = vadd.f32 %v1373_v18, %v1248_v28  ;;  %v1439_v60 = vmax.f32 %v1438_v2, %v2846_v3  ;;  %v1543_v24 = vmin.f32 %v1542_v9, %v2846_v3 }
 0x200   : > { %v978_v15 = vpop.f32.mrf.mxu2  ;;  %v1019_v19 = vpop.f32.mrf.mxu3  ;;  %v1255_v26 = vmul.f32 %v1060_v35, %v1060_v35  ;;  %v1335_v21 = vadd.f32 %v1334_v41, %v1245_v29  ;;  %v1180_v61 = vadd.f32 %v1179_v11, %v2848_v10  ;;  %v1452_v30 = vmax.f32 %v1451_v12, %v2848_v10 }
 0x201   : > { %v1256_v39 = vmul.f32 %v1101_v38, %v1101_v38  ;;  %v1556_v31 = vmin.f32 %v1555_v13, %v2848_v10  ;;  %v1194_v32 = vadd.f32 %v1193_v14, %v1060_v35  ;;  %v1466_v33 = vmax.f32 %v1465_v43, %v1060_v35 }
 0x202   : > { %v1253_v34 = vmul.f32 %v978_v15, %v978_v15  ;;  %v1348_v45 = vadd.f32 %v1347_v5, %v1246_v46  ;;  %v1570_v16 = vmin.f32 %v1569_v22, %v1060_v35  ;;  %v1207_v44 = vadd.f32 %v1206_v42, %v1101_v38 }
 0x203   : > { %v1063_v27 = vpop.f32.mrf.mxu0  ;;  %v2882_v8 = vpop.f32.mrf.mxu1  ;;  %v1479_v54 = vmax.f32 %v1478_v4, %v1101_v38  ;;  %v1362_v3 = vadd.f32 %v1361_v23, %v1255_v26  ;;  %v1583_v55 = vmin.f32 %v1582_v25, %v1101_v38  ;;  %v1168_v57 = vadd.f32 %v1167_v6, %v978_v15 }
 0x204   : > { %v1254_v63 = vmul.f32 %v1019_v19, %v1019_v19  ;;  %v1375_v1 = vadd.f32 %v1374_v20, %v1256_v39  ;;  %v1440_v18 = vmax.f32 %v1439_v60, %v978_v15  ;;  %v1544_v2 = vmin.f32 %v1543_v24, %v978_v15 }
 0x205   : > { %v1263_v9 = vmul.f32 %v1063_v27, %v1063_v27  ;;  %v1336_v11 = vadd.f32 %v1335_v21, %v1253_v34  ;;  %v1181_v12 = vadd.f32 %v1180_v61, %v1019_v19  ;;  %v1453_v10 = vmax.f32 %v1452_v30, %v1019_v19 }
 0x206   : > { %v1264_v28 = vmul.f32 %v2882_v8, %v2882_v8  ;;  %v1557_v13 = vmin.f32 %v1556_v31, %v1019_v19  ;;  %v1195_v35 = vadd.f32 %v1194_v32, %v1063_v27  ;;  %v1467_v14 = vmax.f32 %v1466_v33, %v1063_v27 }
 0x207   : > { %v1349_v29 = vadd.f32 %v1348_v45, %v1254_v63  ;;  %v1571_v38 = vmin.f32 %v1570_v16, %v1063_v27  ;;  %v1208_v5 = vadd.f32 %v1207_v44, %v2882_v8  ;;  %v1363_v4 = vadd.f32 %v1362_v3, %v1263_v9 }
 0x208   : > { %v981_v47 = vpop.f32.mrf.mxu2  ;;  %v1022_v41 = vpop.f32.mrf.mxu3  ;;  %v1480_v23 = vmax.f32 %v1479_v54, %v2882_v8  ;;  %v1584_v25 = vmin.f32 %v1583_v55, %v2882_v8  ;;  %v1376_v46 = vadd.f32 %v1375_v1, %v1264_v28 }
 0x209   : > { %v1261_v43 = vmul.f32 %v981_v47, %v981_v47  ;;  %v1262_v22 = vmul.f32 %v1022_v41, %v1022_v41  ;;  %v1169_v20 = vadd.f32 %v1168_v57, %v981_v47  ;;  %v1441_v60 = vmax.f32 %v1440_v18, %v981_v47 }
 0x20a   : > { %v1545_v26 = vmin.f32 %v1544_v2, %v981_v47  ;;  %v1182_v21 = vadd.f32 %v1181_v12, %v1022_v41  ;;  %v1454_v61 = vmax.f32 %v1453_v10, %v1022_v41  ;;  %v1558_v30 = vmin.f32 %v1557_v13, %v1022_v41 }
 0x20b   : > { %v1066_v42 = vpop.f32.mrf.mxu0  ;;  %v1107_v15 = vpop.f32.mrf.mxu1  ;;  %v1337_v24 = vadd.f32 %v1336_v11, %v1261_v43  ;;  %v1350_v27 = vadd.f32 %v1349_v29, %v1262_v22 }
 0x20c   : > { %v1271_v6 = vmul.f32 %v1066_v42, %v1066_v42  ;;  %v1272_v19 = vmul.f32 %v1107_v15, %v1107_v15  ;;  %v1196_v39 = vadd.f32 %v1195_v35, %v1066_v42  ;;  %v1468_v31 = vmax.f32 %v1467_v14, %v1066_v42 }
 0x20d   : > { %v1572_v45 = vmin.f32 %v1571_v38, %v1066_v42  ;;  %v1209_v16 = vadd.f32 %v1208_v5, %v1107_v15  ;;  %v1481_v44 = vmax.f32 %v1480_v23, %v1107_v15  ;;  %v1585_v55 = vmin.f32 %v1584_v25, %v1107_v15 }
 0x20e   : > { %v1364_v34 = vadd.f32 %v1363_v4, %v1271_v6  ;;  %v1377_v3 = vadd.f32 %v1376_v46, %v1272_v19 }
 0x210   : > { %v984_v32 = vpop.f32.mrf.mxu2  ;;  %v1025_v33 = vpop.f32.mrf.mxu3 }
 0x211   : > { %v1269_v8 = vmul.f32 %v984_v32, %v984_v32  ;;  %v1270_v54 = vmul.f32 %v1025_v33, %v1025_v33  ;;  %v2892_v57 = vadd.f32 %v1169_v20, %v984_v32  ;;  %v2894_v63 = vmax.f32 %v1441_v60, %v984_v32 }
 0x212   : > { %v2896_v1 = vmin.f32 %v1545_v26, %v984_v32  ;;  %v2898_v18 = vadd.f32 %v1182_v21, %v1025_v33  ;;  %v2904_v11 = vmax.f32 %v1454_v61, %v1025_v33  ;;  %v2906_v12 = vmin.f32 %v1558_v30, %v1025_v33 }
 0x213   : > { %v1069_v2 = vpop.f32.mrf.mxu0  ;;  %v1110_v9 = vpop.f32.mrf.mxu1  ;;  %v2900_v47 = vadd.f32 %v1337_v24, %v1269_v8  ;;  %v2902_v41 = vadd.f32 %v1350_v27, %v1270_v54 }
 0x214   : > { %v1197_v10 = vadd.f32 %v1196_v39, %v1069_v2  ;;  %v1279_v28 = vmul.f32 %v1069_v2, %v1069_v2  ;;  %v1469_v13 = vmax.f32 %v1468_v31, %v1069_v2  ;;  %v1573_v35 = vmin.f32 %v1572_v45, %v1069_v2 }
 0x215   : > { %v1210_v14 = vadd.f32 %v1209_v16, %v1110_v9  ;;  %v1280_v43 = vmul.f32 %v1110_v9, %v1110_v9  ;;  %v1482_v29 = vmax.f32 %v1481_v44, %v1110_v9  ;;  %v1586_v38 = vmin.f32 %v1585_v55, %v1110_v9 }
 0x216   : > { %v1198_v5 = vrot.slane %v1197_v10, 4  ;;  %v1365_v22 = vadd.f32 %v1364_v34, %v1279_v28  ;;  %v1470_v42 = vrot.slane %v1469_v13, 4  ;;  %v1574_v15 = vrot.slane %v1573_v35, 4 }
 0x217   : > { %v1211_v4 = vrot.slane %v1210_v14, 4  ;;  %v1378_v23 = vadd.f32 %v1377_v3, %v1280_v43  ;;  %v1483_v25 = vrot.slane %v1482_v29, 4  ;;  %v1587_v6 = vrot.slane %v1586_v38, 4 }
 0x218   : > { %v1199_v46 = vadd.f32 %v1198_v5, %v1197_v10  ;;  %v1366_v20 = vrot.slane %v1365_v22, 4  ;;  %v1471_v60 = vmax.f32 %v1469_v13, %v1470_v42  ;;  %v1575_v19 = vmin.f32 %v1573_v35, %v1574_v15  ;;  %v987_v5 = vpop.f32.mrf.mxu2 }
 0x219   : > { %v1212_v24 = vadd.f32 %v1211_v4, %v1210_v14  ;;  %v1379_v26 = vrot.slane %v1378_v23, 4  ;;  %v1484_v21 = vmax.f32 %v1482_v29, %v1483_v25  ;;  %v1588_v61 = vmin.f32 %v1586_v38, %v1587_v6 }
 0x21a   : > { %v1200_v27 = vrot.slane %v1199_v46, 2  ;;  %v1367_v30 = vadd.f32 %v1366_v20, %v1365_v22  ;;  %v1472_v39 = vrot.slane %v1471_v60, 2  ;;  %v1576_v31 = vrot.slane %v1575_v19, 2 }
 0x21b   : > { %v1213_v32 = vrot.slane %v1212_v24, 2  ;;  %v1380_v33 = vadd.f32 %v1379_v26, %v1378_v23  ;;  %v1485_v34 = vrot.slane %v1484_v21, 2  ;;  %v1589_v45 = vrot.slane %v1588_v61, 2  ;;  %v1028_v23 = vpop.f32.mrf.mxu3 }
 0x21c   : > { %v1201_v16 = vadd.f32 %v1200_v27, %v1199_v46  ;;  %v1368_v44 = vrot.slane %v1367_v30, 2  ;;  %v1473_v8 = vmax.f32 %v1471_v60, %v1472_v39  ;;  %v1577_v54 = vmin.f32 %v1575_v19, %v1576_v31 }
 0x21d   : > { %v1214_v3 = vadd.f32 %v1213_v32, %v1212_v24  ;;  %v1381_v55 = vrot.slane %v1380_v33, 2  ;;  %v1486_v2 = vmax.f32 %v1484_v21, %v1485_v34  ;;  %v1590_v9 = vmin.f32 %v1588_v61, %v1589_v45 }
 0x21e   : > { %v1202_v10 = vrot.slane %v1201_v16, 1  ;;  %v1369_v28 = vadd.f32 %v1368_v44, %v1367_v30  ;;  %v1474_v13 = vrot.slane %v1473_v8, 1  ;;  %v1578_v35 = vrot.slane %v1577_v54, 1 }
 0x21f   : > { %v1215_v14 = vrot.slane %v1214_v3, 1  ;;  %v1382_v43 = vadd.f32 %v1381_v55, %v1380_v33  ;;  %v1487_v29 = vrot.slane %v1486_v2, 1  ;;  %v1591_v38 = vrot.slane %v1590_v9, 1 }
 0x220   : > { %v2908_v22 = vadd.f32 %v1202_v10, %v1201_v16  ;;  %v1370_v42 = vrot.slane %v1369_v28, 1  ;;  %v2910_v15 = vmax.f32 %v1473_v8, %v1474_v13  ;;  %v2912_v4 = vmin.f32 %v1577_v54, %v1578_v35 }
 0x221   : > { %v2914_v25 = vadd.f32 %v1215_v14, %v1214_v3  ;;  %v1383_v6 = vrot.slane %v1382_v43, 1  ;;  %v2916_v46 = vmax.f32 %v1486_v2, %v1487_v29  ;;  %v2918_v20 = vmin.f32 %v1590_v9, %v1591_v38 }
 0x222   : > { %v2920_v60 = vadd.f32 %v1370_v42, %v1369_v28  ;;  %v1171_v19 = vadd.f32 %v2892_v57, %v987_v5  ;;  %v1277_v24 = vmul.f32 %v987_v5, %v987_v5  ;;  %v1443_v26 = vmax.f32 %v2894_v63, %v987_v5 }
 0x223   : > { %v2924_v21 = vadd.f32 %v1383_v6, %v1382_v43  ;;  %v1547_v61 = vmin.f32 %v2896_v1, %v987_v5  ;;  %v1184_v27 = vadd.f32 %v2898_v18, %v1028_v23  ;;  %v1278_v30 = vmul.f32 %v1028_v23, %v1028_v23 }
 0x224   : > { %v1172_v39 = vrot.slane %v1171_v19, 4  ;;  %v1339_v31 = vadd.f32 %v2900_v47, %v1277_v24  ;;  %v1444_v32 = vrot.slane %v1443_v26, 4  ;;  %v1456_v33 = vmax.f32 %v2904_v11, %v1028_v23 }
 0x225   : > { %v1548_v34 = vrot.slane %v1547_v61, 4  ;;  %v1185_v45 = vrot.slane %v1184_v27, 4  ;;  %v1352_v57 = vadd.f32 %v2902_v41, %v1278_v30  ;;  %v1560_v16 = vmin.f32 %v2906_v12, %v1028_v23 }
 0x226   : > { %v1173_v63 = vadd.f32 %v1172_v39, %v1171_v19  ;;  %v1340_v44 = vrot.slane %v1339_v31, 4  ;;  %v1445_v8 = vmax.f32 %v1443_v26, %v1444_v32  ;;  %v1457_v54 = vrot.slane %v1456_v33, 4 }
 0x227   : > { %v1549_v1 = vmin.f32 %v1547_v61, %v1548_v34  ;;  %v1186_v3 = vadd.f32 %v1185_v45, %v1184_v27  ;;  %v1353_v18 = vrot.slane %v1352_v57, 4  ;;  %v1561_v55 = vrot.slane %v1560_v16, 4 }
 0x228   : > { %v1174_v2 = vrot.slane %v1173_v63, 2  ;;  %v1341_v9 = vadd.f32 %v1340_v44, %v1339_v31  ;;  %v1446_v47 = vrot.slane %v1445_v8, 2  ;;  %v1458_v10 = vmax.f32 %v1456_v33, %v1457_v54 }
 0x229   : > { %v1550_v28 = vrot.slane %v1549_v1, 2  ;;  %v1187_v11 = vrot.slane %v1186_v3, 2  ;;  %v1354_v13 = vadd.f32 %v1353_v18, %v1352_v57  ;;  %v1562_v35 = vmin.f32 %v1560_v16, %v1561_v55 }
 0x22a   : > { %v1175_v14 = vadd.f32 %v1174_v2, %v1173_v63  ;;  %v1342_v41 = vrot.slane %v1341_v9, 2  ;;  %v1447_v43 = vmax.f32 %v1445_v8, %v1446_v47  ;;  %v1459_v12 = vrot.slane %v1458_v10, 2 }
 0x22b   : > { %v1551_v29 = vmin.f32 %v1549_v1, %v1550_v28  ;;  %v1188_v38 = vadd.f32 %v1187_v11, %v1186_v3  ;;  %v1355_v5 = vrot.slane %v1354_v13, 2  ;;  %v1563_v42 = vrot.slane %v1562_v35, 2 }
 0x22c   : > { %v1176_v23 = vrot.slane %v1175_v14, 1  ;;  %v1343_v6 = vadd.f32 %v1342_v41, %v1341_v9  ;;  %v1448_v19 = vrot.slane %v1447_v43, 1  ;;  %v1460_v24 = vmax.f32 %v1458_v10, %v1459_v12 }
 0x22d   : > { %v1552_v26 = vrot.slane %v1551_v29, 1  ;;  %v1189_v61 = vrot.slane %v1188_v38, 1  ;;  %v1356_v27 = vadd.f32 %v1355_v5, %v1354_v13  ;;  %v1564_v30 = vmin.f32 %v1562_v35, %v1563_v42  ;;  %1596 = sbr.rel (%p2006_p7) target bundleno = 581 (0x245), region = 56 }
 0x22e   : > { %v2932_v39 = vadd.f32 %v1176_v23, %v1175_v14  ;;  %v1344_v31 = vrot.slane %v1343_v6, 1  ;;  %v2934_v32 = vmax.f32 %v1447_v43, %v1448_v19  ;;  %v1461_v33 = vrot.slane %v1460_v24, 1 }
 0x22f   : > { %v2936_v34 = vmin.f32 %v1551_v29, %v1552_v26  ;;  %v2938_v45 = vadd.f32 %v1189_v61, %v1188_v38  ;;  %v1357_v57 = vrot.slane %v1356_v27, 1  ;;  %v1565_v16 = vrot.slane %v1564_v30, 1 }
 0x230   : > { %v2940_v63 = vadd.f32 %v1344_v31, %v1343_v6  ;;  %v2942_v44 = vmax.f32 %v1460_v24, %v1461_v33 }
 0x231   : > { %v2944_v8 = vadd.f32 %v1357_v57, %v1356_v27  ;;  %v2946_v54 = vmin.f32 %v1564_v30, %v1565_v16 }
 0x232   : > { %v1605_v1 = vrot.slane %v2802_v62, 7  ;;  %v1606_v3 = vrot.slane %v2758_v36, 6  ;;  %v1607_v18 = vrot.slane %v2768_v49, 5  ;;  %v1608_v55 = vrot.slane %v2932_v39, 4 }
 0x233   : > { %v1609_v2 = vrot.slane %v2938_v45, 3  ;;  %v1610_v9 = vrot.slane %v2908_v22, 2  ;;  %v1611_v47 = vrot.slane %v2914_v25, 1  ;;  %vm1612_vm2 = vcmask 1040384  }
 0x234   : > { %v1613_v10 = vsel %vm1612_vm2, %v2796_v50, %v1605_v1  ;;  %vm1614_vm3 = vcmask 1042434   ;;  %vm1616_vm4 = vcmask 1041408   ;;  %vm1618_vm5 = vcmask 1044484  }
 0x235   : > { %v1615_v28 = vsel %vm1614_vm3, %v1606_v3, %v1607_v18  ;;  %v1619_v11 = vsel %vm1618_vm5, %v1608_v55, %v1609_v2  ;;  %vm1620_vm6 = vcmask 1046534   ;;  %vm1622_vm7 = vcmask 1045508  }
 0x236   : > { %v1617_v13 = vsel %vm1616_vm4, %v1613_v10, %v1615_v28  ;;  %v1621_v35 = vsel %vm1620_vm6, %v1610_v9, %v1611_v47  ;;  %vm1624_vm8 = vcmask 1043456   ;;  %v1636_v14 = vrot.slane %v2810_v17, 7 }
 0x237   : > { %v1623_v41 = vsel %vm1622_vm7, %v1619_v11, %v1621_v35  ;;  %v1637_v43 = vrot.slane %v2772_v52, 6  ;;  %v1638_v12 = vrot.slane %v2777_v56, 5  ;;  %v1639_v29 = vrot.slane %v2940_v63, 4 }
 0x238   : > { %v1625_v38 = vsel %vm1624_vm8, %v1617_v13, %v1623_v41  ;;  %v1640_v5 = vrot.slane %v2944_v8, 3  ;;  %v1641_v42 = vrot.slane %v2920_v60, 2  ;;  %v1642_v23 = vrot.slane %v2924_v21, 1 }
 0x239   : > { %1627 = vst [vmem:[%s2211_s5] sm:$0xff] %v1625_v38  ;;  %v1643_v6 = vsel %vm1612_vm2, %v2804_v0, %v1636_v14  ;;  %v1644_v19 = vsel %vm1614_vm3, %v1637_v43, %v1638_v12  ;;  %v1660_v24 = vrot.slane %v2806_v37, 7  ;;  %v1661_v26 = vrot.slane %v2760_v40, 6 }
 0x23a   : > { %v1645_v61 = vsel %vm1616_vm4, %v1643_v6, %v1644_v19  ;;  %v1646_v27 = vsel %vm1618_vm5, %v1639_v29, %v1640_v5  ;;  %v1647_v30 = vsel %vm1620_vm6, %v1641_v42, %v1642_v23  ;;  %v1662_v31 = vrot.slane %v2770_v51, 5 }
 0x23b   : > { %v1648_v33 = vsel %vm1622_vm7, %v1646_v27, %v1647_v30  ;;  %v1663_v57 = vrot.slane %v2934_v32, 4  ;;  %v1664_v16 = vrot.slane %v2942_v44, 3  ;;  %v1665_v1 = vrot.slane %v2910_v15, 2 }
 0x23c   : > { %v1649_v3 = vsel %vm1624_vm8, %v1645_v61, %v1648_v33  ;;  %v1666_v18 = vrot.slane %v2916_v46, 1  ;;  %v1667_v55 = vsel %vm1612_vm2, %v2798_v58, %v1660_v24  ;;  %v1668_v2 = vsel %vm1614_vm3, %v1661_v26, %v1662_v31 }
 0x23d   : > { %1651 = vst [vmem:[%s2216_s30] sm:$0xff] %v1649_v3  ;;  %v1669_v9 = vsel %vm1616_vm4, %v1667_v55, %v1668_v2  ;;  %v1670_v47 = vsel %vm1618_vm5, %v1663_v57, %v1664_v16  ;;  %v1684_v10 = vrot.slane %v2808_v7, 7  ;;  %v1685_v28 = vrot.slane %v2766_v48, 6 }
 0x23e   : > { %v1671_v11 = vsel %vm1620_vm6, %v1665_v1, %v1666_v18  ;;  %v1686_v13 = vrot.slane %v2774_v53, 5  ;;  %v1687_v35 = vrot.slane %v2936_v34, 4  ;;  %v1688_v14 = vrot.slane %v2946_v54, 3 }
 0x23f   : > { %v1672_v41 = vsel %vm1622_vm7, %v1670_v47, %v1671_v11  ;;  %v1689_v43 = vrot.slane %v2912_v4, 2  ;;  %v1690_v12 = vrot.slane %v2918_v20, 1  ;;  %v1691_v29 = vsel %vm1612_vm2, %v2800_v59, %v1684_v10 }
 0x240   : > { %v1673_v38 = vsel %vm1624_vm8, %v1669_v9, %v1672_v41  ;;  %v1692_v5 = vsel %vm1614_vm3, %v1685_v28, %v1686_v13  ;;  %v1694_v42 = vsel %vm1618_vm5, %v1687_v35, %v1688_v14 }
 0x241   : > { %1675 = vst [vmem:[%s2227_s25] sm:$0xff] %v1673_v38  ;;  %v1693_v23 = vsel %vm1616_vm4, %v1691_v29, %v1692_v5  ;;  %v1695_v6 = vsel %vm1620_vm6, %v1689_v43, %v1690_v12 }
 0x242   : > { %v1696_v19 = vsel %vm1622_vm7, %v1694_v42, %v1695_v6 }
 0x243   : > { %v1697_v24 = vsel %vm1624_vm8, %v1693_v23, %v1696_v19 }
 0x244   : > { %1699 = vst [vmem:[%s2232_s29] sm:$0xff] %v1697_v24 }
 0x245 PF: > { %p2007_p8 = scmp.le.s32.totalorder %s2085_s17, 0 }
 0x247   : > { %1703 = sbr.rel (%p2007_p8) target bundleno = 610 (0x262), region = 60 }
 0x24c   : > { %v1713_v26 = vrot.slane %v2802_v62, 7  ;;  %v1714_v61 = vrot.slane %v2758_v36, 6  ;;  %v1715_v27 = vrot.slane %v2768_v49, 5  ;;  %v1716_v30 = vrot.slane %v2932_v39, 4  ;;  %v1704_v49 = vld [vmem:[%s2211_s5] sm:$0xff] }
 0x24d   : > { %v1717_v31 = vrot.slane %v2938_v45, 3  ;;  %v1718_v33 = vrot.slane %v2908_v22, 2  ;;  %v1719_v57 = vrot.slane %v2914_v25, 1  ;;  %vm1720_vm9 = vcmask 1040384   ;;  %v1737_v28 = vld [vmem:[%s2216_s30] sm:$0xff] }
 0x24e   : > { %v1721_v16 = vsel %vm1720_vm9, %v2796_v50, %v1713_v26  ;;  %vm1722_vm10 = vcmask 1042434   ;;  %vm1724_vm11 = vcmask 1041408   ;;  %vm1726_vm12 = vcmask 1044484   ;;  %v1763_v29 = vld [vmem:[%s2227_s25] sm:$0xff] }
 0x24f   : > { %v1723_v62 = vsel %vm1722_vm10, %v1714_v61, %v1715_v27  ;;  %v1727_v36 = vsel %vm1726_vm12, %v1716_v30, %v1717_v31  ;;  %vm1728_vm13 = vcmask 1046534   ;;  %vm1730_vm14 = vcmask 1045508  }
 0x250   : > { %v1725_v39 = vsel %vm1724_vm11, %v1721_v16, %v1723_v62  ;;  %v1729_v22 = vsel %vm1728_vm13, %v1718_v33, %v1719_v57  ;;  %vm1732_vm15 = vcmask 1043456   ;;  %v1746_v25 = vrot.slane %v2810_v17, 7 }
 0x251   : > { %v1731_v50 = vsel %vm1730_vm14, %v1727_v36, %v1729_v22  ;;  %v1747_v45 = vrot.slane %v2772_v52, 6  ;;  %v1748_v1 = vrot.slane %v2777_v56, 5  ;;  %v1749_v3 = vrot.slane %v2940_v63, 4 }
 0x252   : > { %v1733_v18 = vsel %vm1732_vm15, %v1725_v39, %v1731_v50  ;;  %v1750_v55 = vrot.slane %v2944_v8, 3  ;;  %v1751_v2 = vrot.slane %v2920_v60, 2  ;;  %v1752_v9 = vrot.slane %v2924_v21, 1 }
 0x253   : > { %v1735_v47 = vadd.f32 %v1733_v18, %v1704_v49  ;;  %v1753_v17 = vsel %vm1720_vm9, %v2804_v0, %v1746_v25  ;;  %v1754_v10 = vsel %vm1722_vm10, %v1747_v45, %v1748_v1  ;;  %v1772_v52 = vrot.slane %v2806_v37, 7 }
 0x254   : > { %v1755_v56 = vsel %vm1724_vm11, %v1753_v17, %v1754_v10  ;;  %v1756_v63 = vsel %vm1726_vm12, %v1749_v3, %v1750_v55  ;;  %v1757_v8 = vsel %vm1728_vm13, %v1751_v2, %v1752_v9  ;;  %v1773_v60 = vrot.slane %v2760_v40, 6 }
 0x255   : > { %1736 = vst [vmem:[%s2211_s5] sm:$0xff] %v1735_v47  ;;  %v1758_v21 = vsel %vm1730_vm14, %v1756_v63, %v1757_v8  ;;  %v1774_v11 = vrot.slane %v2770_v51, 5  ;;  %v1775_v0 = vrot.slane %v2934_v32, 4  ;;  %v1776_v37 = vrot.slane %v2942_v44, 3 }
 0x256   : > { %v1759_v13 = vsel %vm1732_vm15, %v1755_v56, %v1758_v21  ;;  %v1777_v35 = vrot.slane %v2910_v15, 2  ;;  %v1778_v14 = vrot.slane %v2916_v46, 1  ;;  %v1779_v41 = vsel %vm1720_vm9, %v2798_v58, %v1772_v52 }
 0x257   : > { %v1761_v40 = vadd.f32 %v1759_v13, %v1737_v28  ;;  %v1780_v43 = vsel %vm1722_vm10, %v1773_v60, %v1774_v11  ;;  %v1782_v12 = vsel %vm1726_vm12, %v1775_v0, %v1776_v37  ;;  %v1798_v51 = vrot.slane %v2808_v7, 7 }
 0x258   : > { %v1781_v32 = vsel %vm1724_vm11, %v1779_v41, %v1780_v43  ;;  %v1783_v44 = vsel %vm1728_vm13, %v1777_v35, %v1778_v14  ;;  %v1799_v15 = vrot.slane %v2766_v48, 6  ;;  %v1800_v46 = vrot.slane %v2774_v53, 5 }
 0x259   : > { %1762 = vst [vmem:[%s2216_s30] sm:$0xff] %v1761_v40  ;;  %v1784_v58 = vsel %vm1730_vm14, %v1782_v12, %v1783_v44  ;;  %v1801_v38 = vrot.slane %v2936_v34, 4  ;;  %v1802_v5 = vrot.slane %v2946_v54, 3  ;;  %v1803_v7 = vrot.slane %v2912_v4, 2  ;;  %v1789_v34 = vld [vmem:[%s2232_s29] sm:$0xff] }
 0x25a   : > { %v1785_v42 = vsel %vm1732_vm15, %v1781_v32, %v1784_v58  ;;  %v1804_v23 = vrot.slane %v2918_v20, 1  ;;  %v1805_v48 = vsel %vm1720_vm9, %v2800_v59, %v1798_v51  ;;  %v1806_v6 = vsel %vm1722_vm10, %v1799_v15, %v1800_v46 }
 0x25b   : > { %v1787_v53 = vmax.f32 %v1763_v29, %v1785_v42  ;;  %v1807_v19 = vsel %vm1724_vm11, %v1805_v48, %v1806_v6  ;;  %v1808_v24 = vsel %vm1726_vm12, %v1801_v38, %v1802_v5 }
 0x25c   : > { %v1809_v26 = vsel %vm1728_vm13, %v1803_v7, %v1804_v23 }
 0x25d   : > { %1788 = vst [vmem:[%s2227_s25] sm:$0xff] %v1787_v53  ;;  %v1810_v4 = vsel %vm1730_vm14, %v1808_v24, %v1809_v26 }
 0x25e   : > { %v1811_v54 = vsel %vm1732_vm15, %v1807_v19, %v1810_v4 }
 0x25f   : > { %v1813_v61 = vmin.f32 %v1789_v34, %v1811_v54 }
 0x261   : > { %1814 = vst [vmem:[%s2232_s29] sm:$0xff] %v1813_v61 }
 0x262 PF: > { %s22_s21 = sadd.s32 1, %s2101_s21   ;;  %s3112_s5 = sld [smem:[#allocation2_spill]] }
 0x263   : > { %p19_p9 = scmp.ge.s32.totalorder %s22_s21, 34   ;;  %s3113_s17 = smov %s2093_s19 }
 0x264   : > { %s3114_s18 = smov %s2097_s20  ;;  %s3115_s19 = smov %s3118_s22 }
 0x265   :  { %21 = sbr.rel (!%p19_p9) target bundleno = 3 (0x3), region = 126 }
 0x268   : > { %s3116_s20 = smov %s3112_s5 }

// kernel: stn3d_forward.7
= control target key start
LH: loop header
LB: loop body
LE: loop exit
PB: predicated region body
PF: predicated region fallthrough
CT: control target
= control target key end

     0   :  { %s4106_s1 = inlined_call_operand.vmem [shape: f32[1024,512], index: 1, kind: input, shape index: {}]   ;;  %s4107_s0 = inlined_call_operand.vmem [shape: f32[8,1024], index: 0, kind: input, shape index: {}]   ;;  %s4108_s4 = inlined_call_operand.vmem [shape: f32[512,256], index: 4, kind: input, shape index: {}]   ;;  %s4109_s2 = inlined_call_operand.vmem [shape: f32[1,512], index: 2, kind: input, shape index: {}]   ;;  %s4110_s3 = inlined_call_operand.vmem [shape: f32[1,512], index: 3, kind: input, shape index: {}]   ;;  %s4111_s8 = inlined_call_operand.vmem [shape: f32[1,128], index: 8, kind: input, shape index: {}]   ;;  %s4112_s7 = inlined_call_operand.vmem [shape: f32[256,128], index: 7, kind: input, shape index: {}]   ;;  %s4113_s5 = inlined_call_operand.vmem [shape: f32[1,256], index: 5, kind: input, shape index: {}]   ;;  %s4114_s6 = inlined_call_operand.vmem [shape: f32[1,256], index: 6, kind: input, shape index: {}]   ;;  %s4115_s9 = inlined_call_operand.vmem [shape: f32[1,128], index: 9, kind: input, shape index: {}]   ;;  %s4116_s10 = inlined_call_operand.vmem [shape: f32[8,128], index: 10, kind: output, shape index: {}]  }
   0x1   :  { %v103_v0 = vld [vmem:[%s4106_s1 + $0x1e0] sm:$0xff] }
   0x2   :  { %v231_v1 = vld [vmem:[%s4106_s1 + $0x5e0] sm:$0xff]  ;;  %555 = vmatpush.msra.mxu0 %v103_v0 }
   0x3   :  { %v99_v2 = vld [vmem:[%s4106_s1 + $0x1c0] sm:$0xff]  ;;  %595 = vmatpush.msra.mxu2 %v231_v1 }
   0x4   :  { %v167_v3 = vld [vmem:[%s4106_s1 + $0x3e0] sm:$0xff]  ;;  %556 = vmatpush.msra.mxu0 %v99_v2 }
   0x5   :  { %v227_v4 = vld [vmem:[%s4106_s1 + $0x5c0] sm:$0xff]  ;;  %575 = vmatpush.msra.mxu1 %v167_v3 }
   0x6   :  { %v295_v5 = vld [vmem:[%s4106_s1 + $0x7e0] sm:$0xff]  ;;  %596 = vmatpush.msra.mxu2 %v227_v4 }
   0x7   :  { %615 = vmatpush.msra.mxu3 %v295_v5  ;;  %v95_v6 = vld [vmem:[%s4106_s1 + $0x1a0] sm:$0xff] }
   0x8   :  { %v163_v7 = vld [vmem:[%s4106_s1 + $0x3c0] sm:$0xff]  ;;  %557 = vmatpush.msra.mxu0 %v95_v6 }
   0x9   :  { %v223_v8 = vld [vmem:[%s4106_s1 + $0x5a0] sm:$0xff]  ;;  %576 = vmatpush.msra.mxu1 %v163_v7 }
   0xa   :  { %v291_v9 = vld [vmem:[%s4106_s1 + $0x7c0] sm:$0xff]  ;;  %597 = vmatpush.msra.mxu2 %v223_v8 }
   0xb   :  { %v159_v10 = vld [vmem:[%s4106_s1 + $0x3a0] sm:$0xff]  ;;  %616 = vmatpush.msra.mxu3 %v291_v9 }
   0xc   :  { %v91_v11 = vld [vmem:[%s4106_s1 + $0x180] sm:$0xff]  ;;  %577 = vmatpush.msra.mxu1 %v159_v10 }
   0xd   :  { %v219_v12 = vld [vmem:[%s4106_s1 + $0x580] sm:$0xff]  ;;  %558 = vmatpush.msra.mxu0 %v91_v11 }
   0xe   :  { %v287_v13 = vld [vmem:[%s4106_s1 + $0x7a0] sm:$0xff]  ;;  %598 = vmatpush.msra.mxu2 %v219_v12 }
   0xf   :  { %v155_v14 = vld [vmem:[%s4106_s1 + $0x380] sm:$0xff]  ;;  %617 = vmatpush.msra.mxu3 %v287_v13 }
  0x10   :  { %v283_v15 = vld [vmem:[%s4106_s1 + $0x780] sm:$0xff]  ;;  %578 = vmatpush.msra.mxu1 %v155_v14 }
  0x11   :  { %v87_v16 = vld [vmem:[%s4106_s1 + $0x160] sm:$0xff]  ;;  %618 = vmatpush.msra.mxu3 %v283_v15 }
  0x12   :  { %v215_v17 = vld [vmem:[%s4106_s1 + $0x560] sm:$0xff]  ;;  %559 = vmatpush.msra.mxu0 %v87_v16 }
  0x13   :  { %v151_v18 = vld [vmem:[%s4106_s1 + $0x360] sm:$0xff]  ;;  %599 = vmatpush.msra.mxu2 %v215_v17 }
  0x14   :  { %v279_v19 = vld [vmem:[%s4106_s1 + $0x760] sm:$0xff]  ;;  %579 = vmatpush.msra.mxu1 %v151_v18 }
  0x15   :  { %v83_v20 = vld [vmem:[%s4106_s1 + $0x140] sm:$0xff]  ;;  %619 = vmatpush.msra.mxu3 %v279_v19 }
  0x16   :  { %v211_v21 = vld [vmem:[%s4106_s1 + $0x540] sm:$0xff]  ;;  %560 = vmatpush.msra.mxu0 %v83_v20 }
  0x17   :  { %v147_v22 = vld [vmem:[%s4106_s1 + $0x340] sm:$0xff]  ;;  %600 = vmatpush.msra.mxu2 %v211_v21 }
  0x18   :  { %v275_v23 = vld [vmem:[%s4106_s1 + $0x740] sm:$0xff]  ;;  %580 = vmatpush.msra.mxu1 %v147_v22 }
  0x19   :  { %v79_v24 = vld [vmem:[%s4106_s1 + $0x120] sm:$0xff]  ;;  %620 = vmatpush.msra.mxu3 %v275_v23 }
  0x1a   :  { %v207_v25 = vld [vmem:[%s4106_s1 + $0x520] sm:$0xff]  ;;  %561 = vmatpush.msra.mxu0 %v79_v24 }
  0x1b   :  { %v143_v26 = vld [vmem:[%s4106_s1 + $0x320] sm:$0xff]  ;;  %601 = vmatpush.msra.mxu2 %v207_v25 }
  0x1c   :  { %v271_v27 = vld [vmem:[%s4106_s1 + $0x720] sm:$0xff]  ;;  %581 = vmatpush.msra.mxu1 %v143_v26 }
  0x1d   :  { %v75_v28 = vld [vmem:[%s4106_s1 + $0x100] sm:$0xff]  ;;  %621 = vmatpush.msra.mxu3 %v271_v27 }
  0x1e   :  { %v203_v29 = vld [vmem:[%s4106_s1 + $0x500] sm:$0xff]  ;;  %562 = vmatpush.msra.mxu0 %v75_v28 }
  0x1f   :  { %v139_v30 = vld [vmem:[%s4106_s1 + $0x300] sm:$0xff]  ;;  %602 = vmatpush.msra.mxu2 %v203_v29 }
  0x20   :  { %v267_v31 = vld [vmem:[%s4106_s1 + $0x700] sm:$0xff]  ;;  %582 = vmatpush.msra.mxu1 %v139_v30 }
  0x21   :  { %v71_v32 = vld [vmem:[%s4106_s1 + $0xe0] sm:$0xff]  ;;  %622 = vmatpush.msra.mxu3 %v267_v31 }
  0x22   :  { %v199_v33 = vld [vmem:[%s4106_s1 + $0x4e0] sm:$0xff]  ;;  %563 = vmatpush.msra.mxu0 %v71_v32 }
  0x23   :  { %v135_v34 = vld [vmem:[%s4106_s1 + $0x2e0] sm:$0xff]  ;;  %603 = vmatpush.msra.mxu2 %v199_v33 }
  0x24   :  { %v263_v35 = vld [vmem:[%s4106_s1 + $0x6e0] sm:$0xff]  ;;  %583 = vmatpush.msra.mxu1 %v135_v34 }
  0x25   :  { %v67_v36 = vld [vmem:[%s4106_s1 + $0xc0] sm:$0xff]  ;;  %623 = vmatpush.msra.mxu3 %v263_v35 }
  0x26   :  { %v195_v37 = vld [vmem:[%s4106_s1 + $0x4c0] sm:$0xff]  ;;  %564 = vmatpush.msra.mxu0 %v67_v36 }
  0x27   :  { %v131_v38 = vld [vmem:[%s4106_s1 + $0x2c0] sm:$0xff]  ;;  %604 = vmatpush.msra.mxu2 %v195_v37 }
  0x28   :  { %v259_v39 = vld [vmem:[%s4106_s1 + $0x6c0] sm:$0xff]  ;;  %584 = vmatpush.msra.mxu1 %v131_v38 }
  0x29   :  { %v63_v40 = vld [vmem:[%s4106_s1 + $0xa0] sm:$0xff]  ;;  %624 = vmatpush.msra.mxu3 %v259_v39 }
  0x2a   :  { %v191_v41 = vld [vmem:[%s4106_s1 + $0x4a0] sm:$0xff]  ;;  %565 = vmatpush.msra.mxu0 %v63_v40 }
  0x2b   :  { %v127_v42 = vld [vmem:[%s4106_s1 + $0x2a0] sm:$0xff]  ;;  %605 = vmatpush.msra.mxu2 %v191_v41 }
  0x2c   :  { %v255_v43 = vld [vmem:[%s4106_s1 + $0x6a0] sm:$0xff]  ;;  %585 = vmatpush.msra.mxu1 %v127_v42 }
  0x2d   :  { %v59_v44 = vld [vmem:[%s4106_s1 + $0x80] sm:$0xff]  ;;  %625 = vmatpush.msra.mxu3 %v255_v43 }
  0x2e   :  { %v187_v45 = vld [vmem:[%s4106_s1 + $0x480] sm:$0xff]  ;;  %566 = vmatpush.msra.mxu0 %v59_v44 }
  0x2f   :  { %v123_v46 = vld [vmem:[%s4106_s1 + $0x280] sm:$0xff]  ;;  %606 = vmatpush.msra.mxu2 %v187_v45 }
  0x30   :  { %v251_v47 = vld [vmem:[%s4106_s1 + $0x680] sm:$0xff]  ;;  %586 = vmatpush.msra.mxu1 %v123_v46  ;;  %v2208_v46 = vld [vmem:[%s4107_s0 + $0x10] sm:$0xff] }
  0x31   :  { %v55_v48 = vld [vmem:[%s4106_s1 + $0x60] sm:$0xff]  ;;  %626 = vmatpush.msra.mxu3 %v251_v47 }
  0x32   :  { %v183_v49 = vld [vmem:[%s4106_s1 + $0x460] sm:$0xff]  ;;  %567 = vmatpush.msra.mxu0 %v55_v48 }
  0x33   :  { %v119_v50 = vld [vmem:[%s4106_s1 + $0x260] sm:$0xff]  ;;  %607 = vmatpush.msra.mxu2 %v183_v49 }
  0x34   :  { %v247_v51 = vld [vmem:[%s4106_s1 + $0x660] sm:$0xff]  ;;  %587 = vmatpush.msra.mxu1 %v119_v50 }
  0x35   :  { %v51_v52 = vld [vmem:[%s4106_s1 + $0x40] sm:$0xff]  ;;  %627 = vmatpush.msra.mxu3 %v247_v51 }
  0x36   :  { %v179_v53 = vld [vmem:[%s4106_s1 + $0x440] sm:$0xff]  ;;  %568 = vmatpush.msra.mxu0 %v51_v52  ;;  %v2231_v52 = vld [vmem:[%s4107_s0 + $0x18] sm:$0xff] }
  0x37   :  { %v115_v54 = vld [vmem:[%s4106_s1 + $0x240] sm:$0xff]  ;;  %608 = vmatpush.msra.mxu2 %v179_v53 }
  0x38   :  { %v243_v55 = vld [vmem:[%s4106_s1 + $0x640] sm:$0xff]  ;;  %588 = vmatpush.msra.mxu1 %v115_v54 }
  0x39   :  { %v47_v56 = vld [vmem:[%s4106_s1 + $0x20] sm:$0xff]  ;;  %628 = vmatpush.msra.mxu3 %v243_v55 }
  0x3a   :  { %v175_v57 = vld [vmem:[%s4106_s1 + $0x420] sm:$0xff]  ;;  %569 = vmatpush.msra.mxu0 %v47_v56 }
  0x3b   :  { %v111_v58 = vld [vmem:[%s4106_s1 + $0x220] sm:$0xff]  ;;  %609 = vmatpush.msra.mxu2 %v175_v57  ;;  %v2249_v57 = vld [vmem:[%s4107_s0 + $0x8] sm:$0xff] }
  0x3c   :  { %v239_v59 = vld [vmem:[%s4106_s1 + $0x620] sm:$0xff]  ;;  %589 = vmatpush.msra.mxu1 %v111_v58 }
  0x3d   :  { %v43_v60 = vld [vmem:[%s4106_s1] sm:$0xff]  ;;  %629 = vmatpush.msra.mxu3 %v239_v59 }
  0x3e   :  { %v171_v61 = vld [vmem:[%s4106_s1 + $0x400] sm:$0xff]  ;;  %570 = vmatpush.msra.mxu0 %v43_v60 }
  0x3f   :  { %v359_v62 = vld [vmem:[%s4106_s1 + $0x9e0] sm:$0xff]  ;;  %610 = vmatpush.msra.mxu2 %v171_v61 }
  0x40   :  { %v487_v63 = vld [vmem:[%s4106_s1 + $0xde0] sm:$0xff]  ;;  %635 = vmatpush.msrb.mxu0 %v359_v62  ;;  %611 = vmatmul.f32.vlgmr.msra.gmra.mxu2 %v2208_v46 }
  0x41   :  { %v107_v0 = vld [vmem:[%s4106_s1 + $0x200] sm:$0xff]  ;;  %675 = vmatpush.msrb.mxu2 %v487_v63 }
  0x42   :  { %v235_v1 = vld [vmem:[%s4106_s1 + $0x600] sm:$0xff]  ;;  %590 = vmatpush.msra.mxu1 %v107_v0 }
  0x43   :  { %v355_v2 = vld [vmem:[%s4106_s1 + $0x9c0] sm:$0xff]  ;;  %630 = vmatpush.msra.mxu3 %v235_v1  ;;  %591 = vmatmul.f32.vlgmr.msra.gmra.mxu1 %v2249_v57 }
  0x44   :  { %v423_v3 = vld [vmem:[%s4106_s1 + $0xbe0] sm:$0xff]  ;;  %636 = vmatpush.msrb.mxu0 %v355_v2  ;;  %631 = vmatmul.f32.vlgmr.msra.gmra.mxu3 %v2231_v52  ;;  %v2280_v2 = vld [vmem:[%s4107_s0 + $0x30] sm:$0xff] }
  0x45   :  { %v483_v4 = vld [vmem:[%s4106_s1 + $0xdc0] sm:$0xff]  ;;  %655 = vmatpush.msrb.mxu1 %v423_v3  ;;  %v104_v3 = vld [vmem:[%s4106_s1 + $0x1e8] sm:$0xff] }
  0x46   :  { %v551_v5 = vld [vmem:[%s4106_s1 + $0xfe0] sm:$0xff]  ;;  %676 = vmatpush.msrb.mxu2 %v483_v4  ;;  %v232_v4 = vld [vmem:[%s4106_s1 + $0x5e8] sm:$0xff] }
  0x47   :  { %v351_v6 = vld [vmem:[%s4106_s1 + $0x9a0] sm:$0xff]  ;;  %695 = vmatpush.msrb.mxu3 %v551_v5 }
  0x48   :  { %v419_v7 = vld [vmem:[%s4106_s1 + $0xbc0] sm:$0xff]  ;;  %637 = vmatpush.msrb.mxu0 %v351_v6 }
  0x49   :  { %v479_v8 = vld [vmem:[%s4106_s1 + $0xda0] sm:$0xff]  ;;  %656 = vmatpush.msrb.mxu1 %v419_v7 }
  0x4a   :  { %v547_v9 = vld [vmem:[%s4106_s1 + $0xfc0] sm:$0xff]  ;;  %677 = vmatpush.msrb.mxu2 %v479_v8  ;;  %v2303_v8 = vld [vmem:[%s4107_s0 + $0x38] sm:$0xff] }
  0x4b   :  { %v347_v10 = vld [vmem:[%s4106_s1 + $0x980] sm:$0xff]  ;;  %696 = vmatpush.msrb.mxu3 %v547_v9  ;;  %v100_v9 = vld [vmem:[%s4106_s1 + $0x1c8] sm:$0xff] }
  0x4c   :  { %v415_v11 = vld [vmem:[%s4106_s1 + $0xba0] sm:$0xff]  ;;  %638 = vmatpush.msrb.mxu0 %v347_v10  ;;  %v168_v10 = vld [vmem:[%s4106_s1 + $0x3e8] sm:$0xff] }
  0x4d   :  { %v475_v12 = vld [vmem:[%s4106_s1 + $0xd80] sm:$0xff]  ;;  %657 = vmatpush.msrb.mxu1 %v415_v11  ;;  %v228_v11 = vld [vmem:[%s4106_s1 + $0x5c8] sm:$0xff] }
  0x4e   :  { %v543_v13 = vld [vmem:[%s4106_s1 + $0xfa0] sm:$0xff]  ;;  %678 = vmatpush.msrb.mxu2 %v475_v12  ;;  %v296_v12 = vld [vmem:[%s4106_s1 + $0x7e8] sm:$0xff] }
  0x4f   :  { %v343_v14 = vld [vmem:[%s4106_s1 + $0x960] sm:$0xff]  ;;  %697 = vmatpush.msrb.mxu3 %v543_v13  ;;  %v2321_v13 = vld [vmem:[%s4107_s0 + $0x28] sm:$0xff] }
  0x50   :  { %v411_v15 = vld [vmem:[%s4106_s1 + $0xb80] sm:$0xff]  ;;  %639 = vmatpush.msrb.mxu0 %v343_v14  ;;  %v96_v14 = vld [vmem:[%s4106_s1 + $0x1a8] sm:$0xff] }
  0x51   :  { %v471_v16 = vld [vmem:[%s4106_s1 + $0xd60] sm:$0xff]  ;;  %658 = vmatpush.msrb.mxu1 %v411_v15  ;;  %v164_v15 = vld [vmem:[%s4106_s1 + $0x3c8] sm:$0xff] }
  0x52   :  { %v539_v17 = vld [vmem:[%s4106_s1 + $0xf80] sm:$0xff]  ;;  %679 = vmatpush.msrb.mxu2 %v471_v16  ;;  %v224_v16 = vld [vmem:[%s4106_s1 + $0x5a8] sm:$0xff] }
  0x53   :  { %v339_v18 = vld [vmem:[%s4106_s1 + $0x940] sm:$0xff]  ;;  %698 = vmatpush.msrb.mxu3 %v539_v17  ;;  %v292_v17 = vld [vmem:[%s4106_s1 + $0x7c8] sm:$0xff] }
  0x54   :  { %v407_v19 = vld [vmem:[%s4106_s1 + $0xb60] sm:$0xff]  ;;  %640 = vmatpush.msrb.mxu0 %v339_v18  ;;  %v92_v18 = vld [vmem:[%s4106_s1 + $0x188] sm:$0xff] }
  0x55   :  { %v467_v20 = vld [vmem:[%s4106_s1 + $0xd40] sm:$0xff]  ;;  %659 = vmatpush.msrb.mxu1 %v407_v19  ;;  %v160_v19 = vld [vmem:[%s4106_s1 + $0x3a8] sm:$0xff] }
  0x56   :  { %v535_v21 = vld [vmem:[%s4106_s1 + $0xf60] sm:$0xff]  ;;  %680 = vmatpush.msrb.mxu2 %v467_v20  ;;  %v220_v20 = vld [vmem:[%s4106_s1 + $0x588] sm:$0xff] }
  0x57   :  { %v335_v22 = vld [vmem:[%s4106_s1 + $0x920] sm:$0xff]  ;;  %699 = vmatpush.msrb.mxu3 %v535_v21  ;;  %v288_v21 = vld [vmem:[%s4106_s1 + $0x7a8] sm:$0xff] }
  0x58   :  { %v403_v23 = vld [vmem:[%s4106_s1 + $0xb40] sm:$0xff]  ;;  %641 = vmatpush.msrb.mxu0 %v335_v22  ;;  %v88_v22 = vld [vmem:[%s4106_s1 + $0x168] sm:$0xff] }
  0x59   :  { %v463_v24 = vld [vmem:[%s4106_s1 + $0xd20] sm:$0xff]  ;;  %660 = vmatpush.msrb.mxu1 %v403_v23  ;;  %v156_v23 = vld [vmem:[%s4106_s1 + $0x388] sm:$0xff] }
  0x5a   :  { %v531_v25 = vld [vmem:[%s4106_s1 + $0xf40] sm:$0xff]  ;;  %681 = vmatpush.msrb.mxu2 %v463_v24  ;;  %v216_v24 = vld [vmem:[%s4106_s1 + $0x568] sm:$0xff] }
  0x5b   :  { %v331_v26 = vld [vmem:[%s4106_s1 + $0x900] sm:$0xff]  ;;  %700 = vmatpush.msrb.mxu3 %v531_v25  ;;  %v284_v25 = vld [vmem:[%s4106_s1 + $0x788] sm:$0xff] }
  0x5c   :  { %v399_v27 = vld [vmem:[%s4106_s1 + $0xb20] sm:$0xff]  ;;  %642 = vmatpush.msrb.mxu0 %v331_v26  ;;  %v84_v26 = vld [vmem:[%s4106_s1 + $0x148] sm:$0xff] }
  0x5d   :  { %v459_v28 = vld [vmem:[%s4106_s1 + $0xd00] sm:$0xff]  ;;  %661 = vmatpush.msrb.mxu1 %v399_v27  ;;  %v152_v27 = vld [vmem:[%s4106_s1 + $0x368] sm:$0xff] }
  0x5e   :  { %v527_v29 = vld [vmem:[%s4106_s1 + $0xf20] sm:$0xff]  ;;  %682 = vmatpush.msrb.mxu2 %v459_v28  ;;  %v212_v28 = vld [vmem:[%s4106_s1 + $0x548] sm:$0xff] }
  0x5f   :  { %v327_v30 = vld [vmem:[%s4106_s1 + $0x8e0] sm:$0xff]  ;;  %701 = vmatpush.msrb.mxu3 %v527_v29  ;;  %v280_v29 = vld [vmem:[%s4106_s1 + $0x768] sm:$0xff] }
  0x60   :  { %v395_v31 = vld [vmem:[%s4106_s1 + $0xb00] sm:$0xff]  ;;  %643 = vmatpush.msrb.mxu0 %v327_v30  ;;  %v80_v30 = vld [vmem:[%s4106_s1 + $0x128] sm:$0xff] }
  0x61   :  { %v455_v32 = vld [vmem:[%s4106_s1 + $0xce0] sm:$0xff]  ;;  %662 = vmatpush.msrb.mxu1 %v395_v31  ;;  %v148_v31 = vld [vmem:[%s4106_s1 + $0x348] sm:$0xff] }
  0x62   :  { %v523_v33 = vld [vmem:[%s4106_s1 + $0xf00] sm:$0xff]  ;;  %683 = vmatpush.msrb.mxu2 %v455_v32  ;;  %v208_v32 = vld [vmem:[%s4106_s1 + $0x528] sm:$0xff] }
  0x63   :  { %v323_v34 = vld [vmem:[%s4106_s1 + $0x8c0] sm:$0xff]  ;;  %702 = vmatpush.msrb.mxu3 %v523_v33  ;;  %v276_v33 = vld [vmem:[%s4106_s1 + $0x748] sm:$0xff] }
  0x64   :  { %v391_v35 = vld [vmem:[%s4106_s1 + $0xae0] sm:$0xff]  ;;  %644 = vmatpush.msrb.mxu0 %v323_v34  ;;  %v76_v34 = vld [vmem:[%s4106_s1 + $0x108] sm:$0xff] }
  0x65   :  { %v451_v36 = vld [vmem:[%s4106_s1 + $0xcc0] sm:$0xff]  ;;  %663 = vmatpush.msrb.mxu1 %v391_v35  ;;  %v144_v35 = vld [vmem:[%s4106_s1 + $0x328] sm:$0xff] }
  0x66   :  { %v519_v37 = vld [vmem:[%s4106_s1 + $0xee0] sm:$0xff]  ;;  %684 = vmatpush.msrb.mxu2 %v451_v36  ;;  %v204_v36 = vld [vmem:[%s4106_s1 + $0x508] sm:$0xff] }
  0x67   :  { %v319_v38 = vld [vmem:[%s4106_s1 + $0x8a0] sm:$0xff]  ;;  %703 = vmatpush.msrb.mxu3 %v519_v37  ;;  %v272_v37 = vld [vmem:[%s4106_s1 + $0x728] sm:$0xff] }
  0x68   :  { %v387_v39 = vld [vmem:[%s4106_s1 + $0xac0] sm:$0xff]  ;;  %645 = vmatpush.msrb.mxu0 %v319_v38  ;;  %v72_v38 = vld [vmem:[%s4106_s1 + $0xe8] sm:$0xff] }
  0x69   :  { %v447_v40 = vld [vmem:[%s4106_s1 + $0xca0] sm:$0xff]  ;;  %664 = vmatpush.msrb.mxu1 %v387_v39  ;;  %v140_v39 = vld [vmem:[%s4106_s1 + $0x308] sm:$0xff] }
  0x6a   :  { %v515_v41 = vld [vmem:[%s4106_s1 + $0xec0] sm:$0xff]  ;;  %685 = vmatpush.msrb.mxu2 %v447_v40  ;;  %v200_v40 = vld [vmem:[%s4106_s1 + $0x4e8] sm:$0xff] }
  0x6b   :  { %v315_v42 = vld [vmem:[%s4106_s1 + $0x880] sm:$0xff]  ;;  %704 = vmatpush.msrb.mxu3 %v515_v41  ;;  %v268_v41 = vld [vmem:[%s4106_s1 + $0x708] sm:$0xff] }
  0x6c   :  { %v383_v43 = vld [vmem:[%s4106_s1 + $0xaa0] sm:$0xff]  ;;  %646 = vmatpush.msrb.mxu0 %v315_v42  ;;  %v68_v42 = vld [vmem:[%s4106_s1 + $0xc8] sm:$0xff] }
  0x6d   :  { %v443_v44 = vld [vmem:[%s4106_s1 + $0xc80] sm:$0xff]  ;;  %665 = vmatpush.msrb.mxu1 %v383_v43  ;;  %v136_v43 = vld [vmem:[%s4106_s1 + $0x2e8] sm:$0xff] }
  0x6e   :  { %v511_v45 = vld [vmem:[%s4106_s1 + $0xea0] sm:$0xff]  ;;  %686 = vmatpush.msrb.mxu2 %v443_v44  ;;  %v196_v44 = vld [vmem:[%s4106_s1 + $0x4c8] sm:$0xff] }
  0x6f   :  { %v311_v47 = vld [vmem:[%s4106_s1 + $0x860] sm:$0xff]  ;;  %705 = vmatpush.msrb.mxu3 %v511_v45  ;;  %v264_v45 = vld [vmem:[%s4106_s1 + $0x6e8] sm:$0xff] }
  0x70   :  { %v379_v48 = vld [vmem:[%s4106_s1 + $0xa80] sm:$0xff]  ;;  %647 = vmatpush.msrb.mxu0 %v311_v47  ;;  %v64_v47 = vld [vmem:[%s4106_s1 + $0xa8] sm:$0xff] }
  0x71   :  { %v439_v49 = vld [vmem:[%s4106_s1 + $0xc60] sm:$0xff]  ;;  %666 = vmatpush.msrb.mxu1 %v379_v48  ;;  %v132_v48 = vld [vmem:[%s4106_s1 + $0x2c8] sm:$0xff] }
  0x72   :  { %v507_v50 = vld [vmem:[%s4106_s1 + $0xe80] sm:$0xff]  ;;  %687 = vmatpush.msrb.mxu2 %v439_v49  ;;  %v192_v49 = vld [vmem:[%s4106_s1 + $0x4a8] sm:$0xff] }
  0x73   :  { %v2225_v51 = vld [vmem:[%s4107_s0] sm:$0xff]  ;;  %706 = vmatpush.msrb.mxu3 %v507_v50  ;;  %v260_v50 = vld [vmem:[%s4106_s1 + $0x6c8] sm:$0xff] }
  0x74   :  { %v307_v53 = vld [vmem:[%s4106_s1 + $0x840] sm:$0xff]  ;;  %571 = vmatmul.f32.vlgmr.msra.gmra.mxu0 %v2225_v51 }
  0x75   :  { %v375_v54 = vld [vmem:[%s4106_s1 + $0xa60] sm:$0xff]  ;;  %648 = vmatpush.msrb.mxu0 %v307_v53  ;;  %v60_v53 = vld [vmem:[%s4106_s1 + $0x88] sm:$0xff] }
  0x76   :  { %v435_v55 = vld [vmem:[%s4106_s1 + $0xc40] sm:$0xff]  ;;  %667 = vmatpush.msrb.mxu1 %v375_v54  ;;  %v128_v54 = vld [vmem:[%s4106_s1 + $0x2a8] sm:$0xff] }
  0x77   :  { %v503_v56 = vld [vmem:[%s4106_s1 + $0xe60] sm:$0xff]  ;;  %688 = vmatpush.msrb.mxu2 %v435_v55  ;;  %v188_v55 = vld [vmem:[%s4106_s1 + $0x488] sm:$0xff] }
  0x78   :  { %v303_v58 = vld [vmem:[%s4106_s1 + $0x820] sm:$0xff]  ;;  %707 = vmatpush.msrb.mxu3 %v503_v56  ;;  %v256_v56 = vld [vmem:[%s4106_s1 + $0x6a8] sm:$0xff] }
  0x79   :  { %v371_v59 = vld [vmem:[%s4106_s1 + $0xa40] sm:$0xff]  ;;  %649 = vmatpush.msrb.mxu0 %v303_v58  ;;  %v56_v58 = vld [vmem:[%s4106_s1 + $0x68] sm:$0xff] }
  0x7a   :  { %v431_v60 = vld [vmem:[%s4106_s1 + $0xc20] sm:$0xff]  ;;  %668 = vmatpush.msrb.mxu1 %v371_v59  ;;  %v124_v59 = vld [vmem:[%s4106_s1 + $0x288] sm:$0xff] }
  0x7b   :  { %v499_v61 = vld [vmem:[%s4106_s1 + $0xe40] sm:$0xff]  ;;  %689 = vmatpush.msrb.mxu2 %v431_v60  ;;  %v184_v60 = vld [vmem:[%s4106_s1 + $0x468] sm:$0xff] }
  0x7c   :  { %v299_v62 = vld [vmem:[%s4106_s1 + $0x800] sm:$0xff]  ;;  %708 = vmatpush.msrb.mxu3 %v499_v61  ;;  %v252_v61 = vld [vmem:[%s4106_s1 + $0x688] sm:$0xff] }
  0x7d   :  { %v367_v63 = vld [vmem:[%s4106_s1 + $0xa20] sm:$0xff]  ;;  %650 = vmatpush.msrb.mxu0 %v299_v62  ;;  %v52_v62 = vld [vmem:[%s4106_s1 + $0x48] sm:$0xff] }
  0x7e   :  { %v427_v0 = vld [vmem:[%s4106_s1 + $0xc00] sm:$0xff]  ;;  %669 = vmatpush.msrb.mxu1 %v367_v63  ;;  %v120_v63 = vld [vmem:[%s4106_s1 + $0x268] sm:$0xff] }
  0x7f   :  { %v495_v1 = vld [vmem:[%s4106_s1 + $0xe20] sm:$0xff]  ;;  %690 = vmatpush.msrb.mxu2 %v427_v0  ;;  %715 = vmatpush.msra.mxu0 %v104_v3  ;;  %v180_v0 = vld [vmem:[%s4106_s1 + $0x448] sm:$0xff] }
  0x80   :  { %v363_v5 = vld [vmem:[%s4106_s1 + $0xa00] sm:$0xff]  ;;  %709 = vmatpush.msrb.mxu3 %v495_v1  ;;  %691 = vmatmul.f32.vlgmr.msrb.gmra.mxu2 %v2280_v2  ;;  %v248_v1 = vld [vmem:[%s4106_s1 + $0x668] sm:$0xff] }
  0x81   :  { %v491_v6 = vld [vmem:[%s4106_s1 + $0xe00] sm:$0xff]  ;;  %755 = vmatpush.msra.mxu2 %v232_v4  ;;  %670 = vmatpush.msrb.mxu1 %v363_v5  ;;  %v48_v3 = vld [vmem:[%s4106_s1 + $0x28] sm:$0xff] }
  0x82   :  { %v2297_v7 = vld [vmem:[%s4107_s0 + $0x20] sm:$0xff]  ;;  %710 = vmatpush.msrb.mxu3 %v491_v6  ;;  %716 = vmatpush.msra.mxu0 %v100_v9  ;;  %v116_v4 = vld [vmem:[%s4106_s1 + $0x248] sm:$0xff] }
  0x83   :  { %651 = vmatmul.f32.vlgmr.msrb.gmra.mxu0 %v2297_v7  ;;  %711 = vmatmul.f32.vlgmr.msrb.gmra.mxu3 %v2303_v8  ;;  %v176_v5 = vld [vmem:[%s4106_s1 + $0x428] sm:$0xff] }
  0x84   :  { %735 = vmatpush.msra.mxu1 %v168_v10  ;;  %756 = vmatpush.msra.mxu2 %v228_v11  ;;  %v244_v6 = vld [vmem:[%s4106_s1 + $0x648] sm:$0xff] }
  0x85   :  { %775 = vmatpush.msra.mxu3 %v296_v12  ;;  %671 = vmatmul.f32.vlgmr.msrb.gmra.mxu1 %v2321_v13  ;;  %v44_v9 = vld [vmem:[%s4106_s1 + $0x8] sm:$0xff] }
  0x86   :  { %717 = vmatpush.msra.mxu0 %v96_v14  ;;  %736 = vmatpush.msra.mxu1 %v164_v15  ;;  %v112_v10 = vld [vmem:[%s4106_s1 + $0x228] sm:$0xff] }
  0x87   :  { %757 = vmatpush.msra.mxu2 %v224_v16  ;;  %776 = vmatpush.msra.mxu3 %v292_v17  ;;  %v172_v11 = vld [vmem:[%s4106_s1 + $0x408] sm:$0xff] }
  0x88   :  { %718 = vmatpush.msra.mxu0 %v92_v18  ;;  %737 = vmatpush.msra.mxu1 %v160_v19  ;;  %v240_v12 = vld [vmem:[%s4106_s1 + $0x628] sm:$0xff] }
  0x89   :  { %758 = vmatpush.msra.mxu2 %v220_v20  ;;  %777 = vmatpush.msra.mxu3 %v288_v21  ;;  %v360_v14 = vld [vmem:[%s4106_s1 + $0x9e8] sm:$0xff] }
  0x8a   :  { %719 = vmatpush.msra.mxu0 %v88_v22  ;;  %738 = vmatpush.msra.mxu1 %v156_v23  ;;  %v488_v15 = vld [vmem:[%s4106_s1 + $0xde8] sm:$0xff] }
  0x8b   :  { %759 = vmatpush.msra.mxu2 %v216_v24  ;;  %778 = vmatpush.msra.mxu3 %v284_v25  ;;  %v108_v16 = vld [vmem:[%s4106_s1 + $0x208] sm:$0xff] }
  0x8c   :  { %720 = vmatpush.msra.mxu0 %v84_v26  ;;  %739 = vmatpush.msra.mxu1 %v152_v27  ;;  %v236_v17 = vld [vmem:[%s4106_s1 + $0x608] sm:$0xff] }
  0x8d   :  { %760 = vmatpush.msra.mxu2 %v212_v28  ;;  %779 = vmatpush.msra.mxu3 %v280_v29  ;;  %v356_v18 = vld [vmem:[%s4106_s1 + $0x9c8] sm:$0xff] }
  0x8e   :  { %721 = vmatpush.msra.mxu0 %v80_v30  ;;  %740 = vmatpush.msra.mxu1 %v148_v31  ;;  %v424_v19 = vld [vmem:[%s4106_s1 + $0xbe8] sm:$0xff] }
  0x8f   :  { %761 = vmatpush.msra.mxu2 %v208_v32  ;;  %780 = vmatpush.msra.mxu3 %v276_v33  ;;  %v484_v20 = vld [vmem:[%s4106_s1 + $0xdc8] sm:$0xff] }
  0x90   :  { %722 = vmatpush.msra.mxu0 %v76_v34  ;;  %741 = vmatpush.msra.mxu1 %v144_v35  ;;  %v552_v21 = vld [vmem:[%s4106_s1 + $0xfe8] sm:$0xff] }
  0x91   :  { %762 = vmatpush.msra.mxu2 %v204_v36  ;;  %781 = vmatpush.msra.mxu3 %v272_v37  ;;  %v352_v22 = vld [vmem:[%s4106_s1 + $0x9a8] sm:$0xff] }
  0x92   :  { %723 = vmatpush.msra.mxu0 %v72_v38  ;;  %742 = vmatpush.msra.mxu1 %v140_v39  ;;  %v420_v23 = vld [vmem:[%s4106_s1 + $0xbc8] sm:$0xff] }
  0x93   :  { %763 = vmatpush.msra.mxu2 %v200_v40  ;;  %782 = vmatpush.msra.mxu3 %v268_v41  ;;  %v480_v24 = vld [vmem:[%s4106_s1 + $0xda8] sm:$0xff] }
  0x94   :  { %724 = vmatpush.msra.mxu0 %v68_v42  ;;  %743 = vmatpush.msra.mxu1 %v136_v43  ;;  %v548_v25 = vld [vmem:[%s4106_s1 + $0xfc8] sm:$0xff] }
  0x95   :  { %764 = vmatpush.msra.mxu2 %v196_v44  ;;  %783 = vmatpush.msra.mxu3 %v264_v45  ;;  %v348_v26 = vld [vmem:[%s4106_s1 + $0x988] sm:$0xff] }
  0x96   :  { %725 = vmatpush.msra.mxu0 %v64_v47  ;;  %744 = vmatpush.msra.mxu1 %v132_v48  ;;  %v416_v27 = vld [vmem:[%s4106_s1 + $0xba8] sm:$0xff] }
  0x97   :  { %765 = vmatpush.msra.mxu2 %v192_v49  ;;  %784 = vmatpush.msra.mxu3 %v260_v50  ;;  %v476_v28 = vld [vmem:[%s4106_s1 + $0xd88] sm:$0xff] }
  0x98   :  { %726 = vmatpush.msra.mxu0 %v60_v53  ;;  %745 = vmatpush.msra.mxu1 %v128_v54  ;;  %v544_v29 = vld [vmem:[%s4106_s1 + $0xfa8] sm:$0xff] }
  0x99   :  { %766 = vmatpush.msra.mxu2 %v188_v55  ;;  %785 = vmatpush.msra.mxu3 %v256_v56  ;;  %v344_v30 = vld [vmem:[%s4106_s1 + $0x968] sm:$0xff] }
  0x9a   :  { %727 = vmatpush.msra.mxu0 %v56_v58  ;;  %746 = vmatpush.msra.mxu1 %v124_v59  ;;  %v412_v31 = vld [vmem:[%s4106_s1 + $0xb88] sm:$0xff] }
  0x9b   :  { %767 = vmatpush.msra.mxu2 %v184_v60  ;;  %786 = vmatpush.msra.mxu3 %v252_v61  ;;  %v472_v32 = vld [vmem:[%s4106_s1 + $0xd68] sm:$0xff] }
  0x9c   :  { %728 = vmatpush.msra.mxu0 %v52_v62  ;;  %747 = vmatpush.msra.mxu1 %v120_v63  ;;  %v540_v33 = vld [vmem:[%s4106_s1 + $0xf88] sm:$0xff] }
  0x9d   :  { %768 = vmatpush.msra.mxu2 %v180_v0  ;;  %787 = vmatpush.msra.mxu3 %v248_v1  ;;  %v340_v34 = vld [vmem:[%s4106_s1 + $0x948] sm:$0xff] }
  0x9e   :  { %729 = vmatpush.msra.mxu0 %v48_v3  ;;  %748 = vmatpush.msra.mxu1 %v116_v4  ;;  %v408_v35 = vld [vmem:[%s4106_s1 + $0xb68] sm:$0xff] }
  0x9f   :  { %769 = vmatpush.msra.mxu2 %v176_v5  ;;  %788 = vmatpush.msra.mxu3 %v244_v6  ;;  %v468_v36 = vld [vmem:[%s4106_s1 + $0xd48] sm:$0xff] }
  0xa0   :  { %730 = vmatpush.msra.mxu0 %v44_v9  ;;  %749 = vmatpush.msra.mxu1 %v112_v10  ;;  %v536_v37 = vld [vmem:[%s4106_s1 + $0xf68] sm:$0xff] }
  0xa1   :  { %770 = vmatpush.msra.mxu2 %v172_v11  ;;  %789 = vmatpush.msra.mxu3 %v240_v12  ;;  %v336_v38 = vld [vmem:[%s4106_s1 + $0x928] sm:$0xff] }
  0xa2   :  { %795 = vmatpush.msrb.mxu0 %v360_v14  ;;  %750 = vmatpush.msra.mxu1 %v108_v16  ;;  %v404_v39 = vld [vmem:[%s4106_s1 + $0xb48] sm:$0xff] }
  0xa3   :  { %835 = vmatpush.msrb.mxu2 %v488_v15  ;;  %790 = vmatpush.msra.mxu3 %v236_v17  ;;  %v464_v40 = vld [vmem:[%s4106_s1 + $0xd28] sm:$0xff] }
  0xa4   :  { %796 = vmatpush.msrb.mxu0 %v356_v18  ;;  %815 = vmatpush.msrb.mxu1 %v424_v19  ;;  %v532_v41 = vld [vmem:[%s4106_s1 + $0xf48] sm:$0xff]  ;;  %v233_v19 = vld [vmem:[%s4106_s1 + $0x5f0] sm:$0xff] }
  0xa5   :  { %836 = vmatpush.msrb.mxu2 %v484_v20  ;;  %855 = vmatpush.msrb.mxu3 %v552_v21  ;;  %v332_v42 = vld [vmem:[%s4106_s1 + $0x908] sm:$0xff] }
  0xa6   :  { %797 = vmatpush.msrb.mxu0 %v352_v22  ;;  %816 = vmatpush.msrb.mxu1 %v420_v23  ;;  %v400_v43 = vld [vmem:[%s4106_s1 + $0xb28] sm:$0xff]  ;;  %v101_v22 = vld [vmem:[%s4106_s1 + $0x1d0] sm:$0xff] }
  0xa7   :  { %837 = vmatpush.msrb.mxu2 %v480_v24  ;;  %856 = vmatpush.msrb.mxu3 %v548_v25  ;;  %v460_v44 = vld [vmem:[%s4106_s1 + $0xd08] sm:$0xff]  ;;  %v169_v23 = vld [vmem:[%s4106_s1 + $0x3f0] sm:$0xff] }
  0xa8   :  { %798 = vmatpush.msrb.mxu0 %v348_v26  ;;  %817 = vmatpush.msrb.mxu1 %v416_v27  ;;  %v528_v45 = vld [vmem:[%s4106_s1 + $0xf28] sm:$0xff]  ;;  %v229_v24 = vld [vmem:[%s4106_s1 + $0x5d0] sm:$0xff] }
  0xa9   :  { %838 = vmatpush.msrb.mxu2 %v476_v28  ;;  %857 = vmatpush.msrb.mxu3 %v544_v29  ;;  %v328_v47 = vld [vmem:[%s4106_s1 + $0x8e8] sm:$0xff]  ;;  %v97_v25 = vld [vmem:[%s4106_s1 + $0x1b0] sm:$0xff] }
  0xaa   :  { %799 = vmatpush.msrb.mxu0 %v344_v30  ;;  %818 = vmatpush.msrb.mxu1 %v412_v31  ;;  %v396_v48 = vld [vmem:[%s4106_s1 + $0xb08] sm:$0xff]  ;;  %v165_v26 = vld [vmem:[%s4106_s1 + $0x3d0] sm:$0xff] }
  0xab   :  { %839 = vmatpush.msrb.mxu2 %v472_v32  ;;  %858 = vmatpush.msrb.mxu3 %v540_v33  ;;  %v456_v49 = vld [vmem:[%s4106_s1 + $0xce8] sm:$0xff]  ;;  %v293_v27 = vld [vmem:[%s4106_s1 + $0x7d0] sm:$0xff] }
  0xac   :  { %800 = vmatpush.msrb.mxu0 %v340_v34  ;;  %819 = vmatpush.msrb.mxu1 %v408_v35  ;;  %v524_v50 = vld [vmem:[%s4106_s1 + $0xf08] sm:$0xff]  ;;  %v161_v28 = vld [vmem:[%s4106_s1 + $0x3b0] sm:$0xff] }
  0xad   :  { %840 = vmatpush.msrb.mxu2 %v468_v36  ;;  %859 = vmatpush.msrb.mxu3 %v536_v37  ;;  %v324_v53 = vld [vmem:[%s4106_s1 + $0x8c8] sm:$0xff]  ;;  %v221_v29 = vld [vmem:[%s4106_s1 + $0x590] sm:$0xff] }
  0xae   :  { %801 = vmatpush.msrb.mxu0 %v336_v38  ;;  %820 = vmatpush.msrb.mxu1 %v404_v39  ;;  %v392_v54 = vld [vmem:[%s4106_s1 + $0xae8] sm:$0xff]  ;;  %v289_v30 = vld [vmem:[%s4106_s1 + $0x7b0] sm:$0xff] }
  0xaf   :  { %841 = vmatpush.msrb.mxu2 %v464_v40  ;;  %860 = vmatpush.msrb.mxu3 %v532_v41  ;;  %v452_v55 = vld [vmem:[%s4106_s1 + $0xcc8] sm:$0xff]  ;;  %v157_v31 = vld [vmem:[%s4106_s1 + $0x390] sm:$0xff] }
  0xb0   :  { %802 = vmatpush.msrb.mxu0 %v332_v42  ;;  %821 = vmatpush.msrb.mxu1 %v400_v43  ;;  %v520_v56 = vld [vmem:[%s4106_s1 + $0xee8] sm:$0xff]  ;;  %v217_v32 = vld [vmem:[%s4106_s1 + $0x570] sm:$0xff] }
  0xb1   :  { %842 = vmatpush.msrb.mxu2 %v460_v44  ;;  %861 = vmatpush.msrb.mxu3 %v528_v45  ;;  %v320_v58 = vld [vmem:[%s4106_s1 + $0x8a8] sm:$0xff]  ;;  %v285_v33 = vld [vmem:[%s4106_s1 + $0x790] sm:$0xff] }
  0xb2   :  { %803 = vmatpush.msrb.mxu0 %v328_v47  ;;  %822 = vmatpush.msrb.mxu1 %v396_v48  ;;  %v388_v59 = vld [vmem:[%s4106_s1 + $0xac8] sm:$0xff]  ;;  %v85_v34 = vld [vmem:[%s4106_s1 + $0x150] sm:$0xff] }
  0xb3   :  { %843 = vmatpush.msrb.mxu2 %v456_v49  ;;  %862 = vmatpush.msrb.mxu3 %v524_v50  ;;  %v448_v60 = vld [vmem:[%s4106_s1 + $0xca8] sm:$0xff]  ;;  %v153_v35 = vld [vmem:[%s4106_s1 + $0x370] sm:$0xff] }
  0xb4   :  { %804 = vmatpush.msrb.mxu0 %v324_v53  ;;  %823 = vmatpush.msrb.mxu1 %v392_v54  ;;  %v516_v61 = vld [vmem:[%s4106_s1 + $0xec8] sm:$0xff]  ;;  %v213_v36 = vld [vmem:[%s4106_s1 + $0x550] sm:$0xff] }
  0xb5   :  { %844 = vmatpush.msrb.mxu2 %v452_v55  ;;  %863 = vmatpush.msrb.mxu3 %v520_v56  ;;  %v316_v62 = vld [vmem:[%s4106_s1 + $0x888] sm:$0xff]  ;;  %v281_v37 = vld [vmem:[%s4106_s1 + $0x770] sm:$0xff] }
  0xb6   :  { %v384_v63 = vld [vmem:[%s4106_s1 + $0xaa8] sm:$0xff]  ;;  %805 = vmatpush.msrb.mxu0 %v320_v58  ;;  %824 = vmatpush.msrb.mxu1 %v388_v59  ;;  %v81_v38 = vld [vmem:[%s4106_s1 + $0x130] sm:$0xff] }
  0xb7   :  { %v444_v0 = vld [vmem:[%s4106_s1 + $0xc88] sm:$0xff]  ;;  %845 = vmatpush.msrb.mxu2 %v448_v60  ;;  %864 = vmatpush.msrb.mxu3 %v516_v61  ;;  %v149_v39 = vld [vmem:[%s4106_s1 + $0x350] sm:$0xff] }
  0xb8   :  { %v512_v1 = vld [vmem:[%s4106_s1 + $0xea8] sm:$0xff]  ;;  %806 = vmatpush.msrb.mxu0 %v316_v62  ;;  %825 = vmatpush.msrb.mxu1 %v384_v63  ;;  %v209_v40 = vld [vmem:[%s4106_s1 + $0x530] sm:$0xff] }
  0xb9   :  { %v312_v3 = vld [vmem:[%s4106_s1 + $0x868] sm:$0xff]  ;;  %846 = vmatpush.msrb.mxu2 %v444_v0  ;;  %865 = vmatpush.msrb.mxu3 %v512_v1  ;;  %v277_v41 = vld [vmem:[%s4106_s1 + $0x750] sm:$0xff] }
  0xba   :  { %v380_v4 = vld [vmem:[%s4106_s1 + $0xa88] sm:$0xff]  ;;  %771 = vmatmul.f32.vlgmr.msra.gmra.mxu2 %v2208_v46  ;;  %807 = vmatpush.msrb.mxu0 %v312_v3  ;;  %v77_v42 = vld [vmem:[%s4106_s1 + $0x110] sm:$0xff] }
  0xbb   :  { %v440_v5 = vld [vmem:[%s4106_s1 + $0xc68] sm:$0xff]  ;;  %826 = vmatpush.msrb.mxu1 %v380_v4  ;;  %731 = vmatmul.f32.vlgmr.msra.gmra.mxu0 %v2225_v51  ;;  %v145_v43 = vld [vmem:[%s4106_s1 + $0x330] sm:$0xff] }
  0xbc   :  { %v508_v6 = vld [vmem:[%s4106_s1 + $0xe88] sm:$0xff]  ;;  %847 = vmatpush.msrb.mxu2 %v440_v5  ;;  %791 = vmatmul.f32.vlgmr.msra.gmra.mxu3 %v2231_v52  ;;  %v205_v44 = vld [vmem:[%s4106_s1 + $0x510] sm:$0xff] }
  0xbd   :  { %v308_v9 = vld [vmem:[%s4106_s1 + $0x848] sm:$0xff]  ;;  %866 = vmatpush.msrb.mxu3 %v508_v6  ;;  %751 = vmatmul.f32.vlgmr.msra.gmra.mxu1 %v2249_v57  ;;  %v105_v57 = vld [vmem:[%s4106_s1 + $0x1f0] sm:$0xff] }
  0xbe   :  { %v376_v10 = vld [vmem:[%s4106_s1 + $0xa68] sm:$0xff]  ;;  %808 = vmatpush.msrb.mxu0 %v308_v9  ;;  %v273_v45 = vld [vmem:[%s4106_s1 + $0x730] sm:$0xff] }
  0xbf   :  { %v436_v11 = vld [vmem:[%s4106_s1 + $0xc48] sm:$0xff]  ;;  %827 = vmatpush.msrb.mxu1 %v376_v10  ;;  %v73_v47 = vld [vmem:[%s4106_s1 + $0xf0] sm:$0xff] }
  0xc0   :  { %v504_v46 = vld [vmem:[%s4106_s1 + $0xe68] sm:$0xff]  ;;  %848 = vmatpush.msrb.mxu2 %v436_v11  ;;  %v141_v48 = vld [vmem:[%s4106_s1 + $0x310] sm:$0xff] }
  0xc1   :  { %v304_v12 = vld [vmem:[%s4106_s1 + $0x828] sm:$0xff]  ;;  %867 = vmatpush.msrb.mxu3 %v504_v46  ;;  %v201_v49 = vld [vmem:[%s4106_s1 + $0x4f0] sm:$0xff] }
  0xc2   :  { %v372_v14 = vld [vmem:[%s4106_s1 + $0xa48] sm:$0xff]  ;;  %809 = vmatpush.msrb.mxu0 %v304_v12  ;;  %v269_v50 = vld [vmem:[%s4106_s1 + $0x710] sm:$0xff] }
  0xc3   :  { %v432_v51 = vld [vmem:[%s4106_s1 + $0xc28] sm:$0xff]  ;;  %828 = vmatpush.msrb.mxu1 %v372_v14  ;;  %v69_v53 = vld [vmem:[%s4106_s1 + $0xd0] sm:$0xff] }
  0xc4   :  { %v500_v15 = vld [vmem:[%s4106_s1 + $0xe48] sm:$0xff]  ;;  %849 = vmatpush.msrb.mxu2 %v432_v51  ;;  %v137_v54 = vld [vmem:[%s4106_s1 + $0x2f0] sm:$0xff] }
  0xc5   :  { %v300_v52 = vld [vmem:[%s4106_s1 + $0x808] sm:$0xff]  ;;  %868 = vmatpush.msrb.mxu3 %v500_v15  ;;  %v197_v55 = vld [vmem:[%s4106_s1 + $0x4d0] sm:$0xff] }
  0xc6   :  { %v368_v16 = vld [vmem:[%s4106_s1 + $0xa28] sm:$0xff]  ;;  %810 = vmatpush.msrb.mxu0 %v300_v52  ;;  %v265_v56 = vld [vmem:[%s4106_s1 + $0x6f0] sm:$0xff] }
  0xc7   :  { %v428_v17 = vld [vmem:[%s4106_s1 + $0xc08] sm:$0xff]  ;;  %829 = vmatpush.msrb.mxu1 %v368_v16  ;;  %811 = vmatmul.f32.vlgmr.msrb.gmra.mxu0 %v2297_v7  ;;  %v225_v7 = vld [vmem:[%s4106_s1 + $0x5b0] sm:$0xff] }
  0xc8   :  { %v496_v18 = vld [vmem:[%s4106_s1 + $0xe28] sm:$0xff]  ;;  %850 = vmatpush.msrb.mxu2 %v428_v17  ;;  %875 = vmatpush.msra.mxu0 %v105_v57  ;;  %v65_v58 = vld [vmem:[%s4106_s1 + $0xb0] sm:$0xff] }
  0xc9   :  { %v364_v20 = vld [vmem:[%s4106_s1 + $0xa08] sm:$0xff]  ;;  %869 = vmatpush.msrb.mxu3 %v496_v18  ;;  %851 = vmatmul.f32.vlgmr.msrb.gmra.mxu2 %v2280_v2  ;;  %v297_v2 = vld [vmem:[%s4106_s1 + $0x7f0] sm:$0xff] }
  0xca   :  { %v492_v21 = vld [vmem:[%s4106_s1 + $0xe08] sm:$0xff]  ;;  %915 = vmatpush.msra.mxu2 %v233_v19  ;;  %830 = vmatpush.msrb.mxu1 %v364_v20  ;;  %v133_v59 = vld [vmem:[%s4106_s1 + $0x2d0] sm:$0xff] }
  0xcb   :  { %870 = vmatpush.msrb.mxu3 %v492_v21  ;;  %876 = vmatpush.msra.mxu0 %v101_v22  ;;  %v193_v60 = vld [vmem:[%s4106_s1 + $0x4b0] sm:$0xff] }
  0xcc   :  { %871 = vmatmul.f32.vlgmr.msrb.gmra.mxu3 %v2303_v8  ;;  %895 = vmatpush.msra.mxu1 %v169_v23  ;;  %v93_v8 = vld [vmem:[%s4106_s1 + $0x190] sm:$0xff] }
  0xcd   :  { %916 = vmatpush.msra.mxu2 %v229_v24  ;;  %935 = vmatpush.msra.mxu3 %v297_v2  ;;  %v261_v61 = vld [vmem:[%s4106_s1 + $0x6d0] sm:$0xff] }
  0xce   :  { %831 = vmatmul.f32.vlgmr.msrb.gmra.mxu1 %v2321_v13  ;;  %877 = vmatpush.msra.mxu0 %v97_v25  ;;  %v89_v13 = vld [vmem:[%s4106_s1 + $0x170] sm:$0xff] }
  0xcf   :  { %896 = vmatpush.msra.mxu1 %v165_v26  ;;  %917 = vmatpush.msra.mxu2 %v225_v7  ;;  %v61_v62 = vld [vmem:[%s4106_s1 + $0x90] sm:$0xff] }
  0xd0   :  { %936 = vmatpush.msra.mxu3 %v293_v27  ;;  %878 = vmatpush.msra.mxu0 %v93_v8  ;;  %v129_v63 = vld [vmem:[%s4106_s1 + $0x2b0] sm:$0xff] }
  0xd1   :  { %897 = vmatpush.msra.mxu1 %v161_v28  ;;  %918 = vmatpush.msra.mxu2 %v221_v29  ;;  %v189_v0 = vld [vmem:[%s4106_s1 + $0x490] sm:$0xff] }
  0xd2   :  { %937 = vmatpush.msra.mxu3 %v289_v30  ;;  %879 = vmatpush.msra.mxu0 %v89_v13  ;;  %v257_v1 = vld [vmem:[%s4106_s1 + $0x6b0] sm:$0xff] }
  0xd3   :  { %898 = vmatpush.msra.mxu1 %v157_v31  ;;  %919 = vmatpush.msra.mxu2 %v217_v32  ;;  %v57_v3 = vld [vmem:[%s4106_s1 + $0x70] sm:$0xff] }
  0xd4   :  { %938 = vmatpush.msra.mxu3 %v285_v33  ;;  %880 = vmatpush.msra.mxu0 %v85_v34  ;;  %v125_v4 = vld [vmem:[%s4106_s1 + $0x290] sm:$0xff] }
  0xd5   :  { %899 = vmatpush.msra.mxu1 %v153_v35  ;;  %920 = vmatpush.msra.mxu2 %v213_v36  ;;  %v185_v5 = vld [vmem:[%s4106_s1 + $0x470] sm:$0xff] }
  0xd6   :  { %939 = vmatpush.msra.mxu3 %v281_v37  ;;  %881 = vmatpush.msra.mxu0 %v81_v38  ;;  %v253_v6 = vld [vmem:[%s4106_s1 + $0x690] sm:$0xff] }
  0xd7   :  { %900 = vmatpush.msra.mxu1 %v149_v39  ;;  %921 = vmatpush.msra.mxu2 %v209_v40  ;;  %v53_v9 = vld [vmem:[%s4106_s1 + $0x50] sm:$0xff] }
  0xd8   :  { %940 = vmatpush.msra.mxu3 %v277_v41  ;;  %882 = vmatpush.msra.mxu0 %v77_v42  ;;  %v121_v10 = vld [vmem:[%s4106_s1 + $0x270] sm:$0xff] }
  0xd9   :  { %901 = vmatpush.msra.mxu1 %v145_v43  ;;  %922 = vmatpush.msra.mxu2 %v205_v44  ;;  %v181_v11 = vld [vmem:[%s4106_s1 + $0x450] sm:$0xff] }
  0xda   :  { %941 = vmatpush.msra.mxu3 %v273_v45  ;;  %883 = vmatpush.msra.mxu0 %v73_v47  ;;  %v249_v46 = vld [vmem:[%s4106_s1 + $0x670] sm:$0xff] }
  0xdb   :  { %902 = vmatpush.msra.mxu1 %v141_v48  ;;  %923 = vmatpush.msra.mxu2 %v201_v49  ;;  %v49_v12 = vld [vmem:[%s4106_s1 + $0x30] sm:$0xff] }
  0xdc   :  { %942 = vmatpush.msra.mxu3 %v269_v50  ;;  %884 = vmatpush.msra.mxu0 %v69_v53  ;;  %v117_v14 = vld [vmem:[%s4106_s1 + $0x250] sm:$0xff] }
  0xdd   :  { %903 = vmatpush.msra.mxu1 %v137_v54  ;;  %924 = vmatpush.msra.mxu2 %v197_v55  ;;  %v177_v51 = vld [vmem:[%s4106_s1 + $0x430] sm:$0xff] }
  0xde   :  { %943 = vmatpush.msra.mxu3 %v265_v56  ;;  %885 = vmatpush.msra.mxu0 %v65_v58  ;;  %v245_v15 = vld [vmem:[%s4106_s1 + $0x650] sm:$0xff] }
  0xdf   :  { %904 = vmatpush.msra.mxu1 %v133_v59  ;;  %925 = vmatpush.msra.mxu2 %v193_v60  ;;  %v45_v52 = vld [vmem:[%s4106_s1 + $0x10] sm:$0xff] }
  0xe0   :  { %944 = vmatpush.msra.mxu3 %v261_v61  ;;  %886 = vmatpush.msra.mxu0 %v61_v62  ;;  %v113_v16 = vld [vmem:[%s4106_s1 + $0x230] sm:$0xff] }
  0xe1   :  { %905 = vmatpush.msra.mxu1 %v129_v63  ;;  %926 = vmatpush.msra.mxu2 %v189_v0  ;;  %v173_v17 = vld [vmem:[%s4106_s1 + $0x410] sm:$0xff]  ;;  %v592_v63 = vpop.f32.mrf.mxu1 }
  0xe2   :  { %945 = vmatpush.msra.mxu3 %v257_v1  ;;  %887 = vmatpush.msra.mxu0 %v57_v3  ;;  %v241_v18 = vld [vmem:[%s4106_s1 + $0x630] sm:$0xff] }
  0xe3   :  { %906 = vmatpush.msra.mxu1 %v125_v4  ;;  %927 = vmatpush.msra.mxu2 %v185_v5  ;;  %v361_v57 = vld [vmem:[%s4106_s1 + $0x9f0] sm:$0xff]  ;;  %v612_v4 = vpop.f32.mrf.mxu2  ;;  %v1819_v5 = vmov 8.0  }
  0xe4   :  { %946 = vmatpush.msra.mxu3 %v253_v6  ;;  %888 = vmatpush.msra.mxu0 %v53_v9  ;;  %v489_v19 = vld [vmem:[%s4106_s1 + $0xdf0] sm:$0xff]  ;;  %1797 = vrcp.f32 %v1819_v5 }
  0xe5   :  { %907 = vmatpush.msra.mxu1 %v121_v10  ;;  %928 = vmatpush.msra.mxu2 %v181_v11  ;;  %v109_v20 = vld [vmem:[%s4106_s1 + $0x210] sm:$0xff] }
  0xe6   :  { %947 = vmatpush.msra.mxu3 %v249_v46  ;;  %889 = vmatpush.msra.mxu0 %v49_v12  ;;  %v237_v21 = vld [vmem:[%s4106_s1 + $0x610] sm:$0xff] }
  0xe7   :  { %908 = vmatpush.msra.mxu1 %v117_v14  ;;  %929 = vmatpush.msra.mxu2 %v177_v51  ;;  %v357_v22 = vld [vmem:[%s4106_s1 + $0x9d0] sm:$0xff]  ;;  %v632_v14 = vpop.f32.mrf.mxu3 }
  0xe8   :  { %948 = vmatpush.msra.mxu3 %v245_v15  ;;  %890 = vmatpush.msra.mxu0 %v45_v52  ;;  %v425_v23 = vld [vmem:[%s4106_s1 + $0xbf0] sm:$0xff] }
  0xe9   :  { %909 = vmatpush.msra.mxu1 %v113_v16  ;;  %930 = vmatpush.msra.mxu2 %v173_v17  ;;  %v485_v24 = vld [vmem:[%s4106_s1 + $0xdd0] sm:$0xff] }
  0xea   :  { %949 = vmatpush.msra.mxu3 %v241_v18  ;;  %955 = vmatpush.msrb.mxu0 %v361_v57  ;;  %v553_v2 = vld [vmem:[%s4106_s1 + $0xff0] sm:$0xff]  ;;  %v3050_v17 = vpop.eup %1797 }
  0xeb   :  { %995 = vmatpush.msrb.mxu2 %v489_v19  ;;  %910 = vmatpush.msra.mxu1 %v109_v20  ;;  %v353_v25 = vld [vmem:[%s4106_s1 + $0x9b0] sm:$0xff]  ;;  %v3061_v20 = vld [vmem:[%s4107_s0] sm:$0xff]  ;;  %vm1226_vm0 = vweird.f32 %v3050_v17 }
  0xec   :  { %950 = vmatpush.msra.mxu3 %v237_v21  ;;  %v421_v26 = vld [vmem:[%s4106_s1 + $0xbd0] sm:$0xff]  ;;  %956 = vmatpush.msrb.mxu0 %v357_v22 }
  0xed   :  { %975 = vmatpush.msrb.mxu1 %v425_v23  ;;  %v481_v7 = vld [vmem:[%s4106_s1 + $0xdb0] sm:$0xff]  ;;  %996 = vmatpush.msrb.mxu2 %v485_v24  ;;  %v3070_v23 = vld [vmem:[%s4107_s0 + $0x18] sm:$0xff] }
  0xee   :  { %v549_v27 = vld [vmem:[%s4106_s1 + $0xfd0] sm:$0xff]  ;;  %1015 = vmatpush.msrb.mxu3 %v553_v2  ;;  %957 = vmatpush.msrb.mxu0 %v353_v25 }
  0xef   :  { %v349_v8 = vld [vmem:[%s4106_s1 + $0x990] sm:$0xff]  ;;  %976 = vmatpush.msrb.mxu1 %v421_v26  ;;  %997 = vmatpush.msrb.mxu2 %v481_v7 }
  0xf0   :  { %v417_v28 = vld [vmem:[%s4106_s1 + $0xbb0] sm:$0xff]  ;;  %1016 = vmatpush.msrb.mxu3 %v549_v27  ;;  %958 = vmatpush.msrb.mxu0 %v349_v8  ;;  %v1222_v27 = vmul.f32 8.0, %v3050_v17  ;;  %v3089_v8 = vld [vmem:[%s4107_s0 + $0x8] sm:$0xff] }
  0xf1   :  { %v477_v29 = vld [vmem:[%s4106_s1 + $0xd90] sm:$0xff]  ;;  %977 = vmatpush.msrb.mxu1 %v417_v28  ;;  %v572_v55 = vpop.f32.mrf.mxu0  ;;  %891 = vmatmul.f32.vlgmr.msra.gmra.mxu0 %v3061_v20 }
  0xf2   :  { %v545_v30 = vld [vmem:[%s4106_s1 + $0xfb0] sm:$0xff]  ;;  %998 = vmatpush.msrb.mxu2 %v477_v29  ;;  %v593_v3 = vadd.f32 %v592_v63, %v572_v55  ;;  %951 = vmatmul.f32.vlgmr.msra.gmra.mxu3 %v3070_v23  ;;  %v222_v63 = vld [vmem:[%s4106_s1 + $0x598] sm:$0xff] }
  0xf3   :  { %v345_v13 = vld [vmem:[%s4106_s1 + $0x970] sm:$0xff]  ;;  %1017 = vmatpush.msrb.mxu3 %v545_v30  ;;  %911 = vmatmul.f32.vlgmr.msra.gmra.mxu1 %v3089_v8 }
  0xf4   :  { %v413_v31 = vld [vmem:[%s4106_s1 + $0xb90] sm:$0xff]  ;;  %959 = vmatpush.msrb.mxu0 %v345_v13  ;;  %v613_v11 = vadd.f32 %v612_v4, %v593_v3  ;;  %v90_v3 = vld [vmem:[%s4106_s1 + $0x178] sm:$0xff] }
  0xf5   :  { %v473_v32 = vld [vmem:[%s4106_s1 + $0xd70] sm:$0xff]  ;;  %978 = vmatpush.msrb.mxu1 %v413_v31  ;;  %v158_v4 = vld [vmem:[%s4106_s1 + $0x398] sm:$0xff] }
  0xf6   :  { %v541_v33 = vld [vmem:[%s4106_s1 + $0xf90] sm:$0xff]  ;;  %999 = vmatpush.msrb.mxu2 %v473_v32  ;;  %v633_v15 = vadd.f32 %v632_v14, %v613_v11  ;;  %v86_v11 = vld [vmem:[%s4106_s1 + $0x158] sm:$0xff] }
  0xf7   :  { %v341_v34 = vld [vmem:[%s4106_s1 + $0x950] sm:$0xff]  ;;  %1018 = vmatpush.msrb.mxu3 %v541_v33  ;;  %v106_v33 = vld [vmem:[%s4106_s1 + $0x1f8] sm:$0xff] }
  0xf8   :  { %v409_v35 = vld [vmem:[%s4106_s1 + $0xb70] sm:$0xff]  ;;  %960 = vmatpush.msrb.mxu0 %v341_v34  ;;  %v214_v14 = vld [vmem:[%s4106_s1 + $0x558] sm:$0xff] }
  0xf9   :  { %v469_v36 = vld [vmem:[%s4106_s1 + $0xd50] sm:$0xff]  ;;  %979 = vmatpush.msrb.mxu1 %v409_v35  ;;  %v234_v35 = vld [vmem:[%s4106_s1 + $0x5f8] sm:$0xff] }
  0xfa   :  { %v537_v37 = vld [vmem:[%s4106_s1 + $0xf70] sm:$0xff]  ;;  %1000 = vmatpush.msrb.mxu2 %v469_v36 }
  0xfb   :  { %v337_v38 = vld [vmem:[%s4106_s1 + $0x930] sm:$0xff]  ;;  %1019 = vmatpush.msrb.mxu3 %v537_v37 }
  0xfc   :  { %v405_v39 = vld [vmem:[%s4106_s1 + $0xb50] sm:$0xff]  ;;  %961 = vmatpush.msrb.mxu0 %v337_v38  ;;  %v1223_v38 = vsub.f32 1.0, %v1222_v27  ;;  %v202_v27 = vld [vmem:[%s4106_s1 + $0x4f8] sm:$0xff] }
  0xfd   :  { %v465_v40 = vld [vmem:[%s4106_s1 + $0xd30] sm:$0xff]  ;;  %980 = vmatpush.msrb.mxu1 %v405_v39 }
  0xfe   :  { %v533_v41 = vld [vmem:[%s4106_s1 + $0xf50] sm:$0xff]  ;;  %1001 = vmatpush.msrb.mxu2 %v465_v40 }
  0xff   :  { %v333_v42 = vld [vmem:[%s4106_s1 + $0x910] sm:$0xff]  ;;  %1020 = vmatpush.msrb.mxu3 %v533_v41 }
 0x100   :  { %v401_v43 = vld [vmem:[%s4106_s1 + $0xb30] sm:$0xff]  ;;  %962 = vmatpush.msrb.mxu0 %v333_v42  ;;  %v652_v19 = vpop.f32.mrf.mxu0  ;;  %v102_v42 = vld [vmem:[%s4106_s1 + $0x1d8] sm:$0xff] }
 0x101   :  { %v461_v44 = vld [vmem:[%s4106_s1 + $0xd10] sm:$0xff]  ;;  %981 = vmatpush.msrb.mxu1 %v401_v43  ;;  %v653_v22 = vadd.f32 %v652_v19, %v633_v15  ;;  %v170_v43 = vld [vmem:[%s4106_s1 + $0x3f8] sm:$0xff] }
 0x102   :  { %v529_v45 = vld [vmem:[%s4106_s1 + $0xf30] sm:$0xff]  ;;  %1002 = vmatpush.msrb.mxu2 %v461_v44  ;;  %v672_v7 = vpop.f32.mrf.mxu1  ;;  %v230_v44 = vld [vmem:[%s4106_s1 + $0x5d8] sm:$0xff] }
 0x103   :  { %v329_v47 = vld [vmem:[%s4106_s1 + $0x8f0] sm:$0xff]  ;;  %1021 = vmatpush.msrb.mxu3 %v529_v45  ;;  %v673_v30 = vadd.f32 %v672_v7, %v653_v22  ;;  %v692_v13 = vpop.f32.mrf.mxu2  ;;  %v146_v22 = vld [vmem:[%s4106_s1 + $0x338] sm:$0xff] }
 0x104   :  { %v397_v48 = vld [vmem:[%s4106_s1 + $0xb10] sm:$0xff]  ;;  %963 = vmatpush.msrb.mxu0 %v329_v47  ;;  %v3137_v47 = vld [vmem:[%s4107_s0 + $0x20] sm:$0xff]  ;;  %v142_v7 = vld [vmem:[%s4106_s1 + $0x318] sm:$0xff] }
 0x105   :  { %v457_v49 = vld [vmem:[%s4106_s1 + $0xcf0] sm:$0xff]  ;;  %982 = vmatpush.msrb.mxu1 %v397_v48  ;;  %v693_v34 = vadd.f32 %v692_v13, %v673_v30  ;;  %v298_v48 = vld [vmem:[%s4106_s1 + $0x7f8] sm:$0xff] }
 0x106   :  { %v525_v50 = vld [vmem:[%s4106_s1 + $0xf10] sm:$0xff]  ;;  %1003 = vmatpush.msrb.mxu2 %v457_v49  ;;  %v712_v37 = vpop.f32.mrf.mxu3  ;;  %v1224_v49 = vmul.f32 %v3050_v17, %v1223_v38  ;;  %v138_v30 = vld [vmem:[%s4106_s1 + $0x2f8] sm:$0xff] }
 0x107   :  { %v325_v53 = vld [vmem:[%s4106_s1 + $0x8d0] sm:$0xff]  ;;  %1022 = vmatpush.msrb.mxu3 %v525_v50  ;;  %v3116_v40 = vadd.f32 %v712_v37, %v693_v34  ;;  %v3147_v50 = vld [vmem:[%s4107_s0 + $0x38] sm:$0xff] }
 0x108   :  { %v393_v54 = vld [vmem:[%s4106_s1 + $0xaf0] sm:$0xff]  ;;  %964 = vmatpush.msrb.mxu0 %v325_v53  ;;  %v98_v53 = vld [vmem:[%s4106_s1 + $0x1b8] sm:$0xff] }
 0x109   :  { %v453_v56 = vld [vmem:[%s4106_s1 + $0xcd0] sm:$0xff]  ;;  %983 = vmatpush.msrb.mxu1 %v393_v54  ;;  %v1197_v45 = vrot.slane %v3116_v40, 4  ;;  %v166_v54 = vld [vmem:[%s4106_s1 + $0x3d8] sm:$0xff] }
 0x10a   :  { %v521_v58 = vld [vmem:[%s4106_s1 + $0xef0] sm:$0xff]  ;;  %1004 = vmatpush.msrb.mxu2 %v453_v56  ;;  %v226_v56 = vld [vmem:[%s4106_s1 + $0x5b8] sm:$0xff] }
 0x10b   :  { %v321_v59 = vld [vmem:[%s4106_s1 + $0x8b0] sm:$0xff]  ;;  %1023 = vmatpush.msrb.mxu3 %v521_v58  ;;  %v1198_v55 = vadd.f32 %v1197_v45, %v3116_v40  ;;  %v294_v58 = vld [vmem:[%s4106_s1 + $0x7d8] sm:$0xff] }
 0x10c   :  { %v389_v60 = vld [vmem:[%s4106_s1 + $0xad0] sm:$0xff]  ;;  %965 = vmatpush.msrb.mxu0 %v321_v59  ;;  %v3166_v59 = vld [vmem:[%s4107_s0 + $0x28] sm:$0xff]  ;;  %v134_v34 = vld [vmem:[%s4106_s1 + $0x2d8] sm:$0xff] }
 0x10d   :  { %v449_v61 = vld [vmem:[%s4106_s1 + $0xcb0] sm:$0xff]  ;;  %984 = vmatpush.msrb.mxu1 %v389_v60  ;;  %v94_v60 = vld [vmem:[%s4106_s1 + $0x198] sm:$0xff] }
 0x10e   :  { %v517_v62 = vld [vmem:[%s4106_s1 + $0xed0] sm:$0xff]  ;;  %1005 = vmatpush.msrb.mxu2 %v449_v61  ;;  %v162_v61 = vld [vmem:[%s4106_s1 + $0x3b8] sm:$0xff] }
 0x10f   :  { %v317_v0 = vld [vmem:[%s4106_s1 + $0x890] sm:$0xff]  ;;  %1024 = vmatpush.msrb.mxu3 %v517_v62  ;;  %v1199_v62 = vrot.slane %v1198_v55, 2  ;;  %v62_v37 = vld [vmem:[%s4106_s1 + $0x98] sm:$0xff] }
 0x110   :  { %v385_v1 = vld [vmem:[%s4106_s1 + $0xab0] sm:$0xff]  ;;  %966 = vmatpush.msrb.mxu0 %v317_v0  ;;  %v290_v0 = vld [vmem:[%s4106_s1 + $0x7b8] sm:$0xff] }
 0x111   :  { %v445_v6 = vld [vmem:[%s4106_s1 + $0xc90] sm:$0xff]  ;;  %985 = vmatpush.msrb.mxu1 %v385_v1  ;;  %v1225_v1 = vadd.f32 %v3050_v17, %v1224_v49  ;;  %v1200_v5 = vadd.f32 %v1199_v62, %v1198_v55  ;;  %v130_v38 = vld [vmem:[%s4106_s1 + $0x2b8] sm:$0xff] }
 0x112   :  { %v513_v9 = vld [vmem:[%s4106_s1 + $0xeb0] sm:$0xff]  ;;  %1006 = vmatpush.msrb.mxu2 %v445_v6  ;;  %v218_v6 = vld [vmem:[%s4106_s1 + $0x578] sm:$0xff] }
 0x113   :  { %v313_v10 = vld [vmem:[%s4106_s1 + $0x870] sm:$0xff]  ;;  %1025 = vmatpush.msrb.mxu3 %v513_v9  ;;  %v286_v9 = vld [vmem:[%s4106_s1 + $0x798] sm:$0xff] }
 0x114   :  { %v381_v46 = vld [vmem:[%s4106_s1 + $0xa90] sm:$0xff]  ;;  %967 = vmatpush.msrb.mxu0 %v313_v10  ;;  %v1201_v10 = vrot.slane %v1200_v5, 1  ;;  %v186_v45 = vld [vmem:[%s4106_s1 + $0x478] sm:$0xff] }
 0x115   :  { %v441_v12 = vld [vmem:[%s4106_s1 + $0xc70] sm:$0xff]  ;;  %986 = vmatpush.msrb.mxu1 %v381_v46  ;;  %v154_v46 = vld [vmem:[%s4106_s1 + $0x378] sm:$0xff] }
 0x116   :  { %v509_v51 = vld [vmem:[%s4106_s1 + $0xe90] sm:$0xff]  ;;  %1007 = vmatpush.msrb.mxu2 %v441_v12  ;;  %v3202_v12 = vsel %vm1226_vm0, %v3050_v17, %v1225_v1  ;;  %v1202_v15 = vadd.f32 %v1201_v10, %v1200_v5  ;;  %v150_v17 = vld [vmem:[%s4106_s1 + $0x358] sm:$0xff] }
 0x117   :  { %v3044_v52 = vld [vmem:[%s4107_s0 + $0x10] sm:$0xff]  ;;  %1026 = vmatpush.msrb.mxu3 %v509_v51  ;;  %v282_v51 = vld [vmem:[%s4106_s1 + $0x778] sm:$0xff] }
 0x118   :  { %931 = vmatmul.f32.vlgmr.msra.gmra.mxu2 %v3044_v52  ;;  %v309_v16 = vld [vmem:[%s4106_s1 + $0x850] sm:$0xff]  ;;  %v1228_v19 = vmul.f32 %v3202_v12, %v1202_v15  ;;  %v54_v49 = vld [vmem:[%s4106_s1 + $0x58] sm:$0xff] }
 0x119   :  { %v377_v18 = vld [vmem:[%s4106_s1 + $0xa70] sm:$0xff]  ;;  %968 = vmatpush.msrb.mxu0 %v309_v16  ;;  %v82_v16 = vld [vmem:[%s4106_s1 + $0x138] sm:$0xff] }
 0x11a   :  { %v437_v57 = vld [vmem:[%s4106_s1 + $0xc50] sm:$0xff]  ;;  %987 = vmatpush.msrb.mxu1 %v377_v18  ;;  %v210_v18 = vld [vmem:[%s4106_s1 + $0x538] sm:$0xff] }
 0x11b   :  { %v505_v21 = vld [vmem:[%s4106_s1 + $0xe70] sm:$0xff]  ;;  %1008 = vmatpush.msrb.mxu2 %v437_v57  ;;  %v278_v57 = vld [vmem:[%s4106_s1 + $0x758] sm:$0xff] }
 0x11c   :  { %v305_v24 = vld [vmem:[%s4106_s1 + $0x830] sm:$0xff]  ;;  %1027 = vmatpush.msrb.mxu3 %v505_v21  ;;  %v78_v21 = vld [vmem:[%s4106_s1 + $0x118] sm:$0xff] }
 0x11d   :  { %v373_v2 = vld [vmem:[%s4106_s1 + $0xa50] sm:$0xff]  ;;  %969 = vmatpush.msrb.mxu0 %v305_v24  ;;  %v206_v24 = vld [vmem:[%s4106_s1 + $0x518] sm:$0xff] }
 0x11e   :  { %v433_v25 = vld [vmem:[%s4106_s1 + $0xc30] sm:$0xff]  ;;  %988 = vmatpush.msrb.mxu1 %v373_v2  ;;  %v274_v2 = vld [vmem:[%s4106_s1 + $0x738] sm:$0xff] }
 0x11f   :  { %v501_v26 = vld [vmem:[%s4106_s1 + $0xe50] sm:$0xff]  ;;  %1009 = vmatpush.msrb.mxu2 %v433_v25  ;;  %v3236_v25 = vsub.f32 %v3116_v40, %v1228_v19  ;;  %v190_v40 = vld [vmem:[%s4106_s1 + $0x498] sm:$0xff] }
 0x120   :  { %v301_v28 = vld [vmem:[%s4106_s1 + $0x810] sm:$0xff]  ;;  %1028 = vmatpush.msrb.mxu3 %v501_v26  ;;  %v74_v26 = vld [vmem:[%s4106_s1 + $0xf8] sm:$0xff] }
 0x121   :  { %v369_v29 = vld [vmem:[%s4106_s1 + $0xa30] sm:$0xff]  ;;  %970 = vmatpush.msrb.mxu0 %v301_v28  ;;  %v270_v28 = vld [vmem:[%s4106_s1 + $0x718] sm:$0xff]  ;;  %v1236_v13 = vmul.f32 %v3236_v25, %v3236_v25 }
 0x122   :  { %v429_v31 = vld [vmem:[%s4106_s1 + $0xc10] sm:$0xff]  ;;  %989 = vmatpush.msrb.mxu1 %v369_v29  ;;  %971 = vmatmul.f32.vlgmr.msrb.gmra.mxu0 %v3137_v47  ;;  %v70_v29 = vld [vmem:[%s4106_s1 + $0xd8] sm:$0xff] }
 0x123   :  { %v497_v32 = vld [vmem:[%s4106_s1 + $0xe30] sm:$0xff]  ;;  %1010 = vmatpush.msrb.mxu2 %v429_v31  ;;  %1035 = vmatpush.msra.mxu0 %v106_v33  ;;  %v198_v31 = vld [vmem:[%s4106_s1 + $0x4d8] sm:$0xff] }
 0x124   :  { %v365_v36 = vld [vmem:[%s4106_s1 + $0xa10] sm:$0xff]  ;;  %1029 = vmatpush.msrb.mxu3 %v497_v32  ;;  %v266_v32 = vld [vmem:[%s4106_s1 + $0x6f8] sm:$0xff] }
 0x125   :  { %v493_v39 = vld [vmem:[%s4106_s1 + $0xe10] sm:$0xff]  ;;  %1075 = vmatpush.msra.mxu2 %v234_v35  ;;  %990 = vmatpush.msrb.mxu1 %v365_v36  ;;  %v66_v33 = vld [vmem:[%s4106_s1 + $0xb8] sm:$0xff] }
 0x126   :  { %v3121_v41 = vld [vmem:[%s4107_s0 + $0x30] sm:$0xff]  ;;  %1030 = vmatpush.msrb.mxu3 %v493_v39  ;;  %1036 = vmatpush.msra.mxu0 %v102_v42  ;;  %v194_v35 = vld [vmem:[%s4106_s1 + $0x4b8] sm:$0xff]  ;;  %v1240_v39 = vrot.slane %v1236_v13, 4 }
 0x127   :  { %1011 = vmatmul.f32.vlgmr.msrb.gmra.mxu2 %v3121_v41  ;;  %1031 = vmatmul.f32.vlgmr.msrb.gmra.mxu3 %v3147_v50  ;;  %v262_v36 = vld [vmem:[%s4106_s1 + $0x6d8] sm:$0xff] }
 0x128   :  { %1055 = vmatpush.msra.mxu1 %v170_v43  ;;  %1076 = vmatpush.msra.mxu2 %v230_v44  ;;  %v258_v42 = vld [vmem:[%s4106_s1 + $0x6b8] sm:$0xff] }
 0x129   :  { %1095 = vmatpush.msra.mxu3 %v298_v48  ;;  %991 = vmatmul.f32.vlgmr.msrb.gmra.mxu1 %v3166_v59  ;;  %v58_v43 = vld [vmem:[%s4106_s1 + $0x78] sm:$0xff] }
 0x12a   :  { %1037 = vmatpush.msra.mxu0 %v98_v53  ;;  %1056 = vmatpush.msra.mxu1 %v166_v54  ;;  %v126_v44 = vld [vmem:[%s4106_s1 + $0x298] sm:$0xff]  ;;  %v1241_v54 = vadd.f32 %v1240_v39, %v1236_v13 }
 0x12b   :  { %1077 = vmatpush.msra.mxu2 %v226_v56  ;;  %1096 = vmatpush.msra.mxu3 %v294_v58  ;;  %v254_v48 = vld [vmem:[%s4106_s1 + $0x698] sm:$0xff] }
 0x12c   :  { %1038 = vmatpush.msra.mxu0 %v94_v60  ;;  %1057 = vmatpush.msra.mxu1 %v162_v61  ;;  %v122_v53 = vld [vmem:[%s4106_s1 + $0x278] sm:$0xff]  ;;  %v1242_v1 = vrot.slane %v1241_v54, 2 }
 0x12d   :  { %1078 = vmatpush.msra.mxu2 %v222_v63  ;;  %1097 = vmatpush.msra.mxu3 %v290_v0  ;;  %v182_v55 = vld [vmem:[%s4106_s1 + $0x458] sm:$0xff] }
 0x12e   :  { %1039 = vmatpush.msra.mxu0 %v90_v3  ;;  %1058 = vmatpush.msra.mxu1 %v158_v4  ;;  %v250_v56 = vld [vmem:[%s4106_s1 + $0x678] sm:$0xff] }
 0x12f   :  { %1079 = vmatpush.msra.mxu2 %v218_v6  ;;  %1098 = vmatpush.msra.mxu3 %v286_v9  ;;  %v50_v58 = vld [vmem:[%s4106_s1 + $0x38] sm:$0xff] }
 0x130   :  { %1040 = vmatpush.msra.mxu0 %v86_v11  ;;  %1059 = vmatpush.msra.mxu1 %v154_v46  ;;  %v118_v60 = vld [vmem:[%s4106_s1 + $0x258] sm:$0xff] }
 0x131   :  { %1080 = vmatpush.msra.mxu2 %v214_v14  ;;  %1099 = vmatpush.msra.mxu3 %v282_v51  ;;  %v178_v61 = vld [vmem:[%s4106_s1 + $0x438] sm:$0xff]  ;;  %v1243_v14 = vadd.f32 %v1242_v1, %v1241_v54 }
 0x132   :  { %1041 = vmatpush.msra.mxu0 %v82_v16  ;;  %1060 = vmatpush.msra.mxu1 %v150_v17  ;;  %v246_v62 = vld [vmem:[%s4106_s1 + $0x658] sm:$0xff] }
 0x133   :  { %1081 = vmatpush.msra.mxu2 %v210_v18  ;;  %1100 = vmatpush.msra.mxu3 %v278_v57  ;;  %v46_v63 = vld [vmem:[%s4106_s1 + $0x18] sm:$0xff] }
 0x134   :  { %1042 = vmatpush.msra.mxu0 %v78_v21  ;;  %1061 = vmatpush.msra.mxu1 %v146_v22  ;;  %v114_v0 = vld [vmem:[%s4106_s1 + $0x238] sm:$0xff]  ;;  %v1244_v22 = vrot.slane %v1243_v14, 1 }
 0x135   :  { %1082 = vmatpush.msra.mxu2 %v206_v24  ;;  %1101 = vmatpush.msra.mxu3 %v274_v2  ;;  %v174_v3 = vld [vmem:[%s4106_s1 + $0x418] sm:$0xff] }
 0x136   :  { %1043 = vmatpush.msra.mxu0 %v74_v26  ;;  %1062 = vmatpush.msra.mxu1 %v142_v7  ;;  %v242_v4 = vld [vmem:[%s4106_s1 + $0x638] sm:$0xff]  ;;  %v1245_v13 = vadd.f32 %v1244_v22, %v1243_v14 }
 0x137   :  { %1083 = vmatpush.msra.mxu2 %v202_v27  ;;  %1102 = vmatpush.msra.mxu3 %v270_v28  ;;  %v362_v5 = vld [vmem:[%s4106_s1 + $0x9f8] sm:$0xff] }
 0x138   :  { %1044 = vmatpush.msra.mxu0 %v70_v29  ;;  %1063 = vmatpush.msra.mxu1 %v138_v30  ;;  %v490_v6 = vld [vmem:[%s4106_s1 + $0xdf8] sm:$0xff]  ;;  %v1264_v39 = vmul.f32 %v1245_v13, %v3202_v12  ;;  %v732_v54 = vpop.f32.mrf.mxu0 }
 0x139   :  { %1084 = vmatpush.msra.mxu2 %v198_v31  ;;  %1103 = vmatpush.msra.mxu3 %v266_v32  ;;  %v110_v9 = vld [vmem:[%s4106_s1 + $0x218] sm:$0xff] }
 0x13a   :  { %1045 = vmatpush.msra.mxu0 %v66_v33  ;;  %1064 = vmatpush.msra.mxu1 %v134_v34  ;;  %v238_v10 = vld [vmem:[%s4106_s1 + $0x618] sm:$0xff] }
 0x13b   :  { %1085 = vmatpush.msra.mxu2 %v194_v35  ;;  %1104 = vmatpush.msra.mxu3 %v262_v36  ;;  %v358_v11 = vld [vmem:[%s4106_s1 + $0x9d8] sm:$0xff] }
 0x13c   :  { %1046 = vmatpush.msra.mxu0 %v62_v37  ;;  %1065 = vmatpush.msra.mxu1 %v130_v38  ;;  %v426_v46 = vld [vmem:[%s4106_s1 + $0xbf8] sm:$0xff] }
 0x13d   :  { %1086 = vmatpush.msra.mxu2 %v190_v40  ;;  %1105 = vmatpush.msra.mxu3 %v258_v42  ;;  %v486_v51 = vld [vmem:[%s4106_s1 + $0xdd8] sm:$0xff] }
 0x13e   :  { %1047 = vmatpush.msra.mxu0 %v58_v43  ;;  %1066 = vmatpush.msra.mxu1 %v126_v44  ;;  %v554_v15 = vld [vmem:[%s4106_s1 + $0xff8] sm:$0xff] }
 0x13f   :  { %1087 = vmatpush.msra.mxu2 %v186_v45  ;;  %1106 = vmatpush.msra.mxu3 %v254_v48  ;;  %v354_v16 = vld [vmem:[%s4106_s1 + $0x9b8] sm:$0xff] }
 0x140   :  { %1048 = vmatpush.msra.mxu0 %v54_v49  ;;  %1067 = vmatpush.msra.mxu1 %v122_v53  ;;  %v422_v17 = vld [vmem:[%s4106_s1 + $0xbd8] sm:$0xff] }
 0x141   :  { %1088 = vmatpush.msra.mxu2 %v182_v55  ;;  %1107 = vmatpush.msra.mxu3 %v250_v56  ;;  %v482_v18 = vld [vmem:[%s4106_s1 + $0xdb8] sm:$0xff]  ;;  %v3451_v55 = vadd.f32 1e-05, %v1264_v39 }
 0x142   :  { %1049 = vmatpush.msra.mxu0 %v50_v58  ;;  %1068 = vmatpush.msra.mxu1 %v118_v60  ;;  %v550_v57 = vld [vmem:[%s4106_s1 + $0xfd8] sm:$0xff] }
 0x143   :  { %1089 = vmatpush.msra.mxu2 %v178_v61  ;;  %1108 = vmatpush.msra.mxu3 %v246_v62  ;;  %v350_v19 = vld [vmem:[%s4106_s1 + $0x998] sm:$0xff]  ;;  %1799 = vrsqrt.f32 %v3451_v55  ;;  %vm1278_vm2 = vweird.f32 %v3451_v55 }
 0x144   :  { %1050 = vmatpush.msra.mxu0 %v46_v63  ;;  %1069 = vmatpush.msra.mxu1 %v114_v0  ;;  %v418_v21 = vld [vmem:[%s4106_s1 + $0xbb8] sm:$0xff]  ;;  %v752_v0 = vpop.f32.mrf.mxu1 }
 0x145   :  { %1090 = vmatpush.msra.mxu2 %v174_v3  ;;  %1109 = vmatpush.msra.mxu3 %v242_v4  ;;  %v478_v24 = vld [vmem:[%s4106_s1 + $0xd98] sm:$0xff]  ;;  %v753_v3 = vadd.f32 %v752_v0, %v732_v54  ;;  %v772_v4 = vpop.f32.mrf.mxu2  ;;  %v1366_v54 = vld [vmem:[%s4108_s4 + $0xa0] sm:$0xff] }
 0x146   :  { %1115 = vmatpush.msrb.mxu0 %v362_v5  ;;  %1070 = vmatpush.msra.mxu1 %v110_v9  ;;  %v546_v2 = vld [vmem:[%s4106_s1 + $0xfb8] sm:$0xff]  ;;  %v1362_v0 = vld [vmem:[%s4108_s4 + $0x80] sm:$0xff] }
 0x147   :  { %1155 = vmatpush.msrb.mxu2 %v490_v6  ;;  %1110 = vmatpush.msra.mxu3 %v238_v10  ;;  %v346_v26 = vld [vmem:[%s4106_s1 + $0x978] sm:$0xff]  ;;  %v773_v10 = vadd.f32 %v772_v4, %v753_v3  ;;  %v1396_v3 = vld [vmem:[%s4108_s4 + $0x190] sm:$0xff] }
 0x148   :  { %1116 = vmatpush.msrb.mxu0 %v358_v11  ;;  %1135 = vmatpush.msrb.mxu1 %v426_v46  ;;  %v414_v7 = vld [vmem:[%s4106_s1 + $0xb98] sm:$0xff]  ;;  %v792_v46 = vpop.f32.mrf.mxu3  ;;  %v1360_v4 = vld [vmem:[%s4108_s4 + $0x70] sm:$0xff] }
 0x149   :  { %1156 = vmatpush.msrb.mxu2 %v486_v51  ;;  %1175 = vmatpush.msrb.mxu3 %v554_v15  ;;  %v474_v27 = vld [vmem:[%s4106_s1 + $0xd78] sm:$0xff]  ;;  %v793_v15 = vadd.f32 %v792_v46, %v773_v10  ;;  %v1358_v10 = vld [vmem:[%s4108_s4 + $0x60] sm:$0xff]  ;;  %v1392_v46 = vld [vmem:[%s4108_s4 + $0x170] sm:$0xff] }
 0x14a   :  { %1117 = vmatpush.msrb.mxu0 %v354_v16  ;;  %1136 = vmatpush.msrb.mxu1 %v422_v17  ;;  %v542_v28 = vld [vmem:[%s4106_s1 + $0xf98] sm:$0xff] }
 0x14b   :  { %1157 = vmatpush.msrb.mxu2 %v482_v18  ;;  %1176 = vmatpush.msrb.mxu3 %v550_v57  ;;  %v342_v29 = vld [vmem:[%s4106_s1 + $0x958] sm:$0xff]  ;;  %v812_v18 = vpop.f32.mrf.mxu0  ;;  %v3505_v57 = vpop.eup %1799 }
 0x14c   :  { %1118 = vmatpush.msrb.mxu0 %v350_v19  ;;  %1137 = vmatpush.msrb.mxu1 %v418_v21  ;;  %v410_v30 = vld [vmem:[%s4106_s1 + $0xb78] sm:$0xff]  ;;  %v813_v19 = vadd.f32 %v812_v18, %v793_v15  ;;  %vm1279_vm1 = vweird.f32 %v3505_v57  ;;  %v1356_v15 = vld [vmem:[%s4108_s4 + $0x50] sm:$0xff] }
 0x14d   :  { %1158 = vmatpush.msrb.mxu2 %v478_v24  ;;  %1177 = vmatpush.msrb.mxu3 %v546_v2  ;;  %v470_v31 = vld [vmem:[%s4106_s1 + $0xd58] sm:$0xff]  ;;  %vm1280_vm3 = vmor %vm1278_vm2, %vm1279_vm1 }
 0x14e   :  { %1119 = vmatpush.msrb.mxu0 %v346_v26  ;;  %1138 = vmatpush.msrb.mxu1 %v414_v7  ;;  %v538_v32 = vld [vmem:[%s4106_s1 + $0xf78] sm:$0xff]  ;;  %v832_v26 = vpop.f32.mrf.mxu1 }
 0x14f   :  { %1159 = vmatpush.msrb.mxu2 %v474_v27  ;;  %1178 = vmatpush.msrb.mxu3 %v542_v28  ;;  %v338_v33 = vld [vmem:[%s4106_s1 + $0x938] sm:$0xff]  ;;  %v833_v28 = vadd.f32 %v832_v26, %v813_v19  ;;  %v1384_v26 = vld [vmem:[%s4108_s4 + $0x130] sm:$0xff] }
 0x150   :  { %v406_v34 = vld [vmem:[%s4106_s1 + $0xb58] sm:$0xff]  ;;  %1120 = vmatpush.msrb.mxu0 %v342_v29  ;;  %1139 = vmatpush.msrb.mxu1 %v410_v30  ;;  %v852_v29 = vpop.f32.mrf.mxu2 }
 0x151   :  { %v466_v35 = vld [vmem:[%s4106_s1 + $0xd38] sm:$0xff]  ;;  %1160 = vmatpush.msrb.mxu2 %v470_v31  ;;  %1179 = vmatpush.msrb.mxu3 %v538_v32  ;;  %v853_v31 = vadd.f32 %v852_v29, %v833_v28  ;;  %v1376_v32 = vld [vmem:[%s4108_s4 + $0xf0] sm:$0xff]  ;;  %v1382_v28 = vld [vmem:[%s4108_s4 + $0x120] sm:$0xff] }
 0x152   :  { %v534_v36 = vld [vmem:[%s4106_s1 + $0xf58] sm:$0xff]  ;;  %1121 = vmatpush.msrb.mxu0 %v338_v33  ;;  %1140 = vmatpush.msrb.mxu1 %v406_v34  ;;  %v872_v34 = vpop.f32.mrf.mxu3  ;;  %v1346_v29 = vld [vmem:[%s4108_s4] sm:$0xff] }
 0x153   :  { %v334_v37 = vld [vmem:[%s4106_s1 + $0x918] sm:$0xff]  ;;  %1161 = vmatpush.msrb.mxu2 %v466_v35  ;;  %1180 = vmatpush.msrb.mxu3 %v534_v36 }
 0x154   :  { %v402_v38 = vld [vmem:[%s4106_s1 + $0xb38] sm:$0xff]  ;;  %1122 = vmatpush.msrb.mxu0 %v334_v37  ;;  %1091 = vmatmul.f32.vlgmr.msra.gmra.mxu2 %v3044_v52  ;;  %v873_v37 = vadd.f32 %v872_v34, %v853_v31  ;;  %v1378_v34 = vld [vmem:[%s4108_s4 + $0x100] sm:$0xff] }
 0x155   :  { %v462_v40 = vld [vmem:[%s4106_s1 + $0xd18] sm:$0xff]  ;;  %1141 = vmatpush.msrb.mxu1 %v402_v38  ;;  %1051 = vmatmul.f32.vlgmr.msra.gmra.mxu0 %v3061_v20  ;;  %v1374_v38 = vld [vmem:[%s4108_s4 + $0xe0] sm:$0xff] }
 0x156   :  { %v530_v42 = vld [vmem:[%s4106_s1 + $0xf38] sm:$0xff]  ;;  %1162 = vmatpush.msrb.mxu2 %v462_v40  ;;  %1111 = vmatmul.f32.vlgmr.msra.gmra.mxu3 %v3070_v23  ;;  %v1203_v39 = vrot.slane %v873_v37, 4  ;;  %v1408_v40 = vld [vmem:[%s4108_s4 + $0x1f0] sm:$0xff] }
 0x157   :  { %v330_v43 = vld [vmem:[%s4106_s1 + $0x8f8] sm:$0xff]  ;;  %1181 = vmatpush.msrb.mxu3 %v530_v42  ;;  %1071 = vmatmul.f32.vlgmr.msra.gmra.mxu1 %v3089_v8  ;;  %v1273_v8 = vmul.f32 %v3505_v57, %v3451_v55 }
 0x158   :  { %v398_v44 = vld [vmem:[%s4106_s1 + $0xb18] sm:$0xff]  ;;  %1123 = vmatpush.msrb.mxu0 %v330_v43  ;;  %v1406_v43 = vld [vmem:[%s4108_s4 + $0x1e0] sm:$0xff] }
 0x159   :  { %v458_v45 = vld [vmem:[%s4106_s1 + $0xcf8] sm:$0xff]  ;;  %1142 = vmatpush.msrb.mxu1 %v398_v44  ;;  %v1274_v35 = vmul.f32 %v3505_v57, %v1273_v8  ;;  %v1370_v44 = vld [vmem:[%s4108_s4 + $0xc0] sm:$0xff]  ;;  %v1348_v8 = vld [vmem:[%s4108_s4 + $0x10] sm:$0xff] }
 0x15a   :  { %v526_v48 = vld [vmem:[%s4106_s1 + $0xf18] sm:$0xff]  ;;  %1163 = vmatpush.msrb.mxu2 %v458_v45  ;;  %v1404_v45 = vld [vmem:[%s4108_s4 + $0x1d0] sm:$0xff] }
 0x15b   :  { %v326_v49 = vld [vmem:[%s4106_s1 + $0x8d8] sm:$0xff]  ;;  %1182 = vmatpush.msrb.mxu3 %v526_v48  ;;  %v1275_v42 = vmul.f32 0.5, %v1274_v35  ;;  %v1375_v35 = vld [vmem:[%s4108_s4 + $0xe8] sm:$0xff] }
 0x15c   :  { %v394_v53 = vld [vmem:[%s4106_s1 + $0xaf8] sm:$0xff]  ;;  %1124 = vmatpush.msrb.mxu0 %v326_v49 }
 0x15d   :  { %v454_v56 = vld [vmem:[%s4106_s1 + $0xcd8] sm:$0xff]  ;;  %1143 = vmatpush.msrb.mxu1 %v394_v53  ;;  %v1276_v48 = vsub.f32 1.5, %v1275_v42  ;;  %v1402_v53 = vld [vmem:[%s4108_s4 + $0x1c0] sm:$0xff] }
 0x15e   :  { %v522_v58 = vld [vmem:[%s4106_s1 + $0xef8] sm:$0xff]  ;;  %1164 = vmatpush.msrb.mxu2 %v454_v56 }
 0x15f   :  { %v322_v60 = vld [vmem:[%s4106_s1 + $0x8b8] sm:$0xff]  ;;  %1183 = vmatpush.msrb.mxu3 %v522_v58  ;;  %v1400_v58 = vld [vmem:[%s4108_s4 + $0x1b0] sm:$0xff] }
 0x160   :  { %v390_v61 = vld [vmem:[%s4106_s1 + $0xad8] sm:$0xff]  ;;  %1125 = vmatpush.msrb.mxu0 %v322_v60  ;;  %v1364_v60 = vld [vmem:[%s4108_s4 + $0x90] sm:$0xff] }
 0x161   :  { %v450_v62 = vld [vmem:[%s4106_s1 + $0xcb8] sm:$0xff]  ;;  %1144 = vmatpush.msrb.mxu1 %v390_v61  ;;  %v1277_v61 = vmul.f32 %v3505_v57, %v1276_v48  ;;  %v1399_v48 = vld [vmem:[%s4108_s4 + $0x1a8] sm:$0xff] }
 0x162   :  { %v518_v63 = vld [vmem:[%s4106_s1 + $0xed8] sm:$0xff]  ;;  %1165 = vmatpush.msrb.mxu2 %v450_v62 }
 0x163   :  { %v318_v1 = vld [vmem:[%s4106_s1 + $0x898] sm:$0xff]  ;;  %1184 = vmatpush.msrb.mxu3 %v518_v63  ;;  %v1398_v63 = vld [vmem:[%s4108_s4 + $0x1a0] sm:$0xff]  ;;  %v1281_v55 = vsel %vm1280_vm3, %v3505_v57, %v1277_v61  ;;  %v1388_v57 = vld [vmem:[%s4108_s4 + $0x150] sm:$0xff] }
 0x164   :  { %v386_v5 = vld [vmem:[%s4106_s1 + $0xab8] sm:$0xff]  ;;  %1126 = vmatpush.msrb.mxu0 %v318_v1 }
 0x165   :  { %v446_v6 = vld [vmem:[%s4106_s1 + $0xc98] sm:$0xff]  ;;  %1145 = vmatpush.msrb.mxu1 %v386_v5  ;;  %v3606_v5 = vld [vmem:[%s4109_s2] sm:$0xf] }
 0x166   :  { %v514_v9 = vld [vmem:[%s4106_s1 + $0xeb8] sm:$0xff]  ;;  %1166 = vmatpush.msrb.mxu2 %v446_v6 }
 0x167   :  { %v314_v11 = vld [vmem:[%s4106_s1 + $0x878] sm:$0xff]  ;;  %1185 = vmatpush.msrb.mxu3 %v514_v9  ;;  %v1394_v9 = vld [vmem:[%s4108_s4 + $0x180] sm:$0xff] }
 0x168   :  { %v382_v14 = vld [vmem:[%s4106_s1 + $0xa98] sm:$0xff]  ;;  %1127 = vmatpush.msrb.mxu0 %v314_v11 }
 0x169   :  { %v442_v51 = vld [vmem:[%s4106_s1 + $0xc78] sm:$0xff]  ;;  %1146 = vmatpush.msrb.mxu1 %v382_v14  ;;  %v1312_v14 = vmul.f32 %v1281_v55, %v3236_v25  ;;  %v1354_v25 = vld [vmem:[%s4108_s4 + $0x40] sm:$0xff]  ;;  %v1391_v55 = vld [vmem:[%s4108_s4 + $0x168] sm:$0xff] }
 0x16a   :  { %v510_v52 = vld [vmem:[%s4106_s1 + $0xe98] sm:$0xff]  ;;  %1167 = vmatpush.msrb.mxu2 %v442_v51  ;;  %v1317_v51 = vperm.slane %v3606_v5, 0 }
 0x16b   :  { %v310_v16 = vld [vmem:[%s4106_s1 + $0x858] sm:$0xff]  ;;  %1186 = vmatpush.msrb.mxu3 %v510_v52 }
 0x16c   :  { %v378_v17 = vld [vmem:[%s4106_s1 + $0xa78] sm:$0xff]  ;;  %1128 = vmatpush.msrb.mxu0 %v310_v16  ;;  %v3630_v16 = vld [vmem:[%s4110_s3] sm:$0xf] }
 0x16d   :  { %v438_v20 = vld [vmem:[%s4106_s1 + $0xc58] sm:$0xff]  ;;  %1147 = vmatpush.msrb.mxu1 %v378_v17  ;;  %v1390_v17 = vld [vmem:[%s4108_s4 + $0x160] sm:$0xff]  ;;  %v1330_v19 = vperm.slane %v3630_v16, 0 }
 0x16e   :  { %v506_v23 = vld [vmem:[%s4106_s1 + $0xe78] sm:$0xff]  ;;  %1168 = vmatpush.msrb.mxu2 %v438_v20  ;;  %v1325_v20 = vmul.f32 %v1317_v51, %v1312_v14 }
 0x16f   :  { %v306_v21 = vld [vmem:[%s4106_s1 + $0x838] sm:$0xff]  ;;  %1187 = vmatpush.msrb.mxu3 %v506_v23  ;;  %v1352_v23 = vld [vmem:[%s4108_s4 + $0x30] sm:$0xff] }
 0x170   :  { %v374_v22 = vld [vmem:[%s4106_s1 + $0xa58] sm:$0xff]  ;;  %1129 = vmatpush.msrb.mxu0 %v306_v21  ;;  %v912_v14 = vpop.f32.mrf.mxu1 }
 0x171   :  { %v434_v24 = vld [vmem:[%s4106_s1 + $0xc38] sm:$0xff]  ;;  %1148 = vmatpush.msrb.mxu1 %v374_v22  ;;  %v1386_v22 = vld [vmem:[%s4108_s4 + $0x140] sm:$0xff] }
 0x172   :  { %v502_v2 = vld [vmem:[%s4106_s1 + $0xe58] sm:$0xff]  ;;  %1169 = vmatpush.msrb.mxu2 %v434_v24  ;;  %v1350_v24 = vld [vmem:[%s4108_s4 + $0x20] sm:$0xff] }
 0x173   :  { %v302_v7 = vld [vmem:[%s4106_s1 + $0x818] sm:$0xff]  ;;  %1188 = vmatpush.msrb.mxu3 %v502_v2 }
 0x174   :  { %v370_v27 = vld [vmem:[%s4106_s1 + $0xa38] sm:$0xff]  ;;  %1130 = vmatpush.msrb.mxu0 %v302_v7  ;;  %v3657_v7 = vadd.f32 %v1330_v19, %v1325_v20  ;;  %v1387_v20 = vld [vmem:[%s4108_s4 + $0x148] sm:$0xff]  ;;  %v1434_v19 = vld [vmem:[%s4108_s4 + $0x2c0] sm:$0xff] }
 0x175   :  { %v430_v30 = vld [vmem:[%s4106_s1 + $0xc18] sm:$0xff]  ;;  %1149 = vmatpush.msrb.mxu1 %v370_v27  ;;  %1131 = vmatmul.f32.vlgmr.msrb.gmra.mxu0 %v3137_v47  ;;  %v1372_v47 = vld [vmem:[%s4108_s4 + $0xd0] sm:$0xff] }
 0x176   :  { %v498_v13 = vld [vmem:[%s4106_s1 + $0xe38] sm:$0xff]  ;;  %1170 = vmatpush.msrb.mxu2 %v430_v30  ;;  %1474 = vmatpush.msra.mxu0 %v1376_v32  ;;  %v1342_v31 = vmax.f32 %v3657_v7, 0.0  ;;  %v1420_v7 = vld [vmem:[%s4108_s4 + $0x250] sm:$0xff] }
 0x177   :  { %v366_v33 = vld [vmem:[%s4106_s1 + $0xa18] sm:$0xff]  ;;  %1189 = vmatpush.msrb.mxu3 %v498_v13  ;;  %1171 = vmatmul.f32.vlgmr.msrb.gmra.mxu2 %v3121_v41  ;;  %v1204_v41 = vadd.f32 %v1203_v39, %v873_v37  ;;  %v1380_v13 = vld [vmem:[%s4108_s4 + $0x110] sm:$0xff]  ;;  %v1407_v39 = vld [vmem:[%s4108_s4 + $0x1e8] sm:$0xff] }
 0x178   :  { %v494_v36 = vld [vmem:[%s4106_s1 + $0xe18] sm:$0xff]  ;;  %1150 = vmatpush.msrb.mxu1 %v366_v33  ;;  %1475 = vmatpush.msra.mxu0 %v1374_v38 }
 0x179   :  { %1190 = vmatpush.msrb.mxu3 %v494_v36  ;;  %1151 = vmatmul.f32.vlgmr.msrb.gmra.mxu1 %v3166_v59  ;;  %v1205_v59 = vrot.slane %v1204_v41, 2  ;;  %v1377_v32 = vld [vmem:[%s4108_s4 + $0xf8] sm:$0xff] }
 0x17a   :  { %1191 = vmatmul.f32.vlgmr.msrb.gmra.mxu3 %v3147_v50  ;;  %1494 = vmatpush.msra.mxu1 %v1408_v40  ;;  %v1368_v50 = vld [vmem:[%s4108_s4 + $0xb0] sm:$0xff]  ;;  %v1409_v36 = vld [vmem:[%s4108_s4 + $0x1f8] sm:$0xff]  ;;  %v1371_v40 = vld [vmem:[%s4108_s4 + $0xc8] sm:$0xff] }
 0x17b   :  { %1476 = vmatpush.msra.mxu0 %v1372_v47  ;;  %v1206_v49 = vadd.f32 %v1205_v59, %v1204_v41  ;;  %v1373_v38 = vld [vmem:[%s4108_s4 + $0xd8] sm:$0xff]  ;;  %v1403_v41 = vld [vmem:[%s4108_s4 + $0x1c8] sm:$0xff] }
 0x17c   :  { %1495 = vmatpush.msra.mxu1 %v1406_v43  ;;  %v1405_v47 = vld [vmem:[%s4108_s4 + $0x1d8] sm:$0xff]  ;;  %v1367_v43 = vld [vmem:[%s4108_s4 + $0xa8] sm:$0xff] }
 0x17d   :  { %1477 = vmatpush.msra.mxu0 %v1370_v44  ;;  %v1207_v56 = vrot.slane %v1206_v49, 1  ;;  %v1369_v42 = vld [vmem:[%s4108_s4 + $0xb8] sm:$0xff] }
 0x17e   :  { %1496 = vmatpush.msra.mxu1 %v1404_v45  ;;  %v1401_v44 = vld [vmem:[%s4108_s4 + $0x1b8] sm:$0xff] }
 0x17f   :  { %1478 = vmatpush.msra.mxu0 %v1368_v50  ;;  %v1208_v62 = vadd.f32 %v1207_v56, %v1206_v49  ;;  %v1365_v50 = vld [vmem:[%s4108_s4 + $0x98] sm:$0xff] }
 0x180   :  { %1497 = vmatpush.msra.mxu1 %v1402_v53  ;;  %v1363_v53 = vld [vmem:[%s4108_s4 + $0x88] sm:$0xff]  ;;  %v1389_v51 = vld [vmem:[%s4108_s4 + $0x158] sm:$0xff] }
 0x181   :  { %1479 = vmatpush.msra.mxu0 %v1366_v54  ;;  %v1229_v1 = vmul.f32 %v3202_v12, %v1208_v62  ;;  %v1397_v54 = vld [vmem:[%s4108_s4 + $0x198] sm:$0xff]  ;;  %v1359_v62 = vld [vmem:[%s4108_s4 + $0x68] sm:$0xff] }
 0x182   :  { %1498 = vmatpush.msra.mxu1 %v1400_v58  ;;  %v1361_v58 = vld [vmem:[%s4108_s4 + $0x78] sm:$0xff] }
 0x183   :  { %1480 = vmatpush.msra.mxu0 %v1364_v60  ;;  %v3609_v6 = vsub.f32 %v873_v37, %v1229_v1  ;;  %v1395_v60 = vld [vmem:[%s4108_s4 + $0x188] sm:$0xff]  ;;  %v1440_v1 = vld [vmem:[%s4108_s4 + $0x2f0] sm:$0xff] }
 0x184   :  { %1499 = vmatpush.msra.mxu1 %v1398_v63  ;;  %v1393_v63 = vld [vmem:[%s4108_s4 + $0x178] sm:$0xff]  ;;  %1514 = vmatpush.msra.mxu2 %v1440_v1 }
 0x185   :  { %1481 = vmatpush.msra.mxu0 %v1362_v0  ;;  %v1237_v11 = vmul.f32 %v3609_v6, %v3609_v6  ;;  %v892_v0 = vpop.f32.mrf.mxu0  ;;  %v1437_v1 = vld [vmem:[%s4108_s4 + $0x2d8] sm:$0xff] }
 0x186   :  { %1500 = vmatpush.msra.mxu1 %v1396_v3 }
 0x187   :  { %1482 = vmatpush.msra.mxu0 %v1360_v4  ;;  %v1246_v52 = vrot.slane %v1237_v11, 4  ;;  %v1357_v4 = vld [vmem:[%s4108_s4 + $0x58] sm:$0xff] }
 0x188   :  { %1501 = vmatpush.msra.mxu1 %v1394_v9  ;;  %v1318_v9 = vperm.slane %v3606_v5, 1 }
 0x189   :  { %1483 = vmatpush.msra.mxu0 %v1358_v10  ;;  %v1247_v18 = vadd.f32 %v1246_v52, %v1237_v11  ;;  %v1438_v10 = vld [vmem:[%s4108_s4 + $0x2e0] sm:$0xff]  ;;  %v913_v52 = vadd.f32 %v912_v14, %v892_v0  ;;  %v1429_v14 = vld [vmem:[%s4108_s4 + $0x298] sm:$0xff] }
 0x18a   :  { %1502 = vmatpush.msra.mxu1 %v1392_v46  ;;  %v1355_v46 = vld [vmem:[%s4108_s4 + $0x48] sm:$0xff]  ;;  %1515 = vmatpush.msra.mxu2 %v1438_v10 }
 0x18b   :  { %1484 = vmatpush.msra.mxu0 %v1356_v15  ;;  %v1248_v21 = vrot.slane %v1247_v18, 2 }
 0x18c   :  { %1503 = vmatpush.msra.mxu1 %v1390_v17 }
 0x18d   :  { %1485 = vmatpush.msra.mxu0 %v1354_v25  ;;  %v1249_v2 = vadd.f32 %v1248_v21, %v1247_v18  ;;  %v1331_v25 = vperm.slane %v3630_v16, 1  ;;  %v1436_v18 = vld [vmem:[%s4108_s4 + $0x2d0] sm:$0xff]  ;;  %v1351_v21 = vld [vmem:[%s4108_s4 + $0x28] sm:$0xff] }
 0x18e   :  { %1504 = vmatpush.msra.mxu1 %v1388_v57  ;;  %v1353_v57 = vld [vmem:[%s4108_s4 + $0x38] sm:$0xff]  ;;  %1516 = vmatpush.msra.mxu2 %v1436_v18  ;;  %v1423_v18 = vld [vmem:[%s4108_s4 + $0x268] sm:$0xff] }
 0x18f   :  { %1486 = vmatpush.msra.mxu0 %v1352_v23  ;;  %v1250_v27 = vrot.slane %v1249_v2, 1 }
 0x190   :  { %1505 = vmatpush.msra.mxu1 %v1386_v22  ;;  %v952_v22 = vpop.f32.mrf.mxu3  ;;  %1517 = vmatpush.msra.mxu2 %v1434_v19  ;;  %v1417_v19 = vld [vmem:[%s4108_s4 + $0x238] sm:$0xff] }
 0x191   :  { %1487 = vmatpush.msra.mxu0 %v1350_v24  ;;  %v1251_v30 = vadd.f32 %v1250_v27, %v1249_v2  ;;  %v1385_v24 = vld [vmem:[%s4108_s4 + $0x138] sm:$0xff] }
 0x192   :  { %1506 = vmatpush.msra.mxu1 %v1384_v26  ;;  %v1349_v27 = vld [vmem:[%s4108_s4 + $0x18] sm:$0xff] }
 0x193   :  { %1488 = vmatpush.msra.mxu0 %v1348_v8  ;;  %v1265_v33 = vmul.f32 %v1251_v30, %v3202_v12  ;;  %v1432_v8 = vld [vmem:[%s4108_s4 + $0x2b0] sm:$0xff]  ;;  %v1383_v30 = vld [vmem:[%s4108_s4 + $0x128] sm:$0xff] }
 0x194   :  { %1507 = vmatpush.msra.mxu1 %v1382_v28  ;;  %1518 = vmatpush.msra.mxu2 %v1432_v8  ;;  %v1472_v8 = vld [vmem:[%s4108_s4 + $0x3f0] sm:$0xff] }
 0x195   :  { %1489 = vmatpush.msra.mxu0 %v1346_v29  ;;  %v1269_v37 = vadd.f32 1e-05, %v1265_v33  ;;  %1534 = vmatpush.msra.mxu3 %v1472_v8  ;;  %v1457_v8 = vld [vmem:[%s4108_s4 + $0x378] sm:$0xff] }
 0x196   :  { %1490 = vmatmul.f32.vlgmr.msra.gmra.mxu0 %v1342_v31  ;;  %1508 = vmatpush.msra.mxu1 %v1380_v13  ;;  %v1430_v13 = vld [vmem:[%s4108_s4 + $0x2a0] sm:$0xff] }
 0x197   :  { %1554 = vmatpush.msrb.mxu0 %v1377_v32  ;;  %1801 = vrsqrt.f32 %v1269_v37  ;;  %vm1288_vm5 = vweird.f32 %v1269_v37  ;;  %v1347_v32 = vld [vmem:[%s4108_s4 + $0x8] sm:$0xff]  ;;  %1519 = vmatpush.msra.mxu2 %v1430_v13  ;;  %v1468_v13 = vld [vmem:[%s4108_s4 + $0x3d0] sm:$0xff] }
 0x198   :  { %1509 = vmatpush.msra.mxu1 %v1378_v34  ;;  %v1381_v34 = vld [vmem:[%s4108_s4 + $0x118] sm:$0xff] }
 0x199   :  { %1555 = vmatpush.msrb.mxu0 %v1375_v35  ;;  %v1428_v35 = vld [vmem:[%s4108_s4 + $0x290] sm:$0xff] }
 0x19a   :  { %1574 = vmatpush.msrb.mxu1 %v1409_v36  ;;  %1520 = vmatpush.msra.mxu2 %v1428_v35 }
 0x19b   :  { %1556 = vmatpush.msrb.mxu0 %v1373_v38  ;;  %v932_v17 = vpop.f32.mrf.mxu2 }
 0x19c   :  { %1575 = vmatpush.msrb.mxu1 %v1407_v39  ;;  %v933_v23 = vadd.f32 %v932_v17, %v913_v52  ;;  %v1379_v39 = vld [vmem:[%s4108_s4 + $0x108] sm:$0xff]  ;;  %v1425_v17 = vld [vmem:[%s4108_s4 + $0x278] sm:$0xff] }
 0x19d   :  { %1557 = vmatpush.msrb.mxu0 %v1371_v40  ;;  %v1802_v59 = vpop.eup %1801  ;;  %v1426_v40 = vld [vmem:[%s4108_s4 + $0x280] sm:$0xff] }
 0x19e   :  { %1576 = vmatpush.msrb.mxu1 %v1405_v47  ;;  %v1283_v45 = vmul.f32 %v1802_v59, %v1269_v37  ;;  %vm1289_vm4 = vweird.f32 %v1802_v59  ;;  %v953_v2 = vadd.f32 %v952_v22, %v933_v23  ;;  %1521 = vmatpush.msra.mxu2 %v1426_v40  ;;  %v1419_v23 = vld [vmem:[%s4108_s4 + $0x248] sm:$0xff]  ;;  %v1413_v22 = vld [vmem:[%s4108_s4 + $0x218] sm:$0xff] }
 0x19f   :  { %1558 = vmatpush.msrb.mxu0 %v1369_v42  ;;  %vm1290_vm6 = vmor %vm1288_vm5, %vm1289_vm4  ;;  %v972_v28 = vpop.f32.mrf.mxu0  ;;  %v1424_v42 = vld [vmem:[%s4108_s4 + $0x270] sm:$0xff] }
 0x1a0   :  { %1577 = vmatpush.msrb.mxu1 %v1403_v41  ;;  %v1284_v49 = vmul.f32 %v1802_v59, %v1283_v45  ;;  %v973_v33 = vadd.f32 %v972_v28, %v953_v2  ;;  %1522 = vmatpush.msra.mxu2 %v1424_v42  ;;  %v1418_v45 = vld [vmem:[%s4108_s4 + $0x240] sm:$0xff] }
 0x1a1   :  { %1559 = vmatpush.msrb.mxu0 %v1367_v43  ;;  %v1470_v28 = vld [vmem:[%s4108_s4 + $0x3e0] sm:$0xff] }
 0x1a2   :  { %1578 = vmatpush.msrb.mxu1 %v1401_v44  ;;  %v1285_v56 = vmul.f32 0.5, %v1284_v49  ;;  %v1422_v44 = vld [vmem:[%s4108_s4 + $0x260] sm:$0xff]  ;;  %1535 = vmatpush.msra.mxu3 %v1470_v28  ;;  %v1455_v28 = vld [vmem:[%s4108_s4 + $0x368] sm:$0xff] }
 0x1a3   :  { %1560 = vmatpush.msrb.mxu0 %v1365_v50  ;;  %1523 = vmatpush.msra.mxu2 %v1422_v44 }
 0x1a4   :  { %1579 = vmatpush.msrb.mxu1 %v1399_v48  ;;  %v1286_v61 = vsub.f32 1.5, %v1285_v56  ;;  %v1416_v48 = vld [vmem:[%s4108_s4 + $0x230] sm:$0xff]  ;;  %1536 = vmatpush.msra.mxu3 %v1468_v13  ;;  %v1451_v13 = vld [vmem:[%s4108_s4 + $0x348] sm:$0xff] }
 0x1a5   :  { %1561 = vmatpush.msrb.mxu0 %v1363_v53  ;;  %1524 = vmatpush.msra.mxu2 %v1420_v7  ;;  %v1414_v53 = vld [vmem:[%s4108_s4 + $0x220] sm:$0xff]  ;;  %v1412_v56 = vld [vmem:[%s4108_s4 + $0x210] sm:$0xff] }
 0x1a6   :  { %1580 = vmatpush.msrb.mxu1 %v1397_v54  ;;  %v1287_v3 = vmul.f32 %v1802_v59, %v1286_v61  ;;  %v992_v36 = vpop.f32.mrf.mxu1  ;;  %v1441_v61 = vld [vmem:[%s4108_s4 + $0x2f8] sm:$0xff] }
 0x1a7   :  { %1562 = vmatpush.msrb.mxu0 %v1361_v58  ;;  %v993_v37 = vadd.f32 %v992_v36, %v973_v33  ;;  %1525 = vmatpush.msra.mxu2 %v1418_v45  ;;  %v1466_v33 = vld [vmem:[%s4108_s4 + $0x3c0] sm:$0xff]  ;;  %v1319_v36 = vperm.slane %v3606_v5, 2 }
 0x1a8   :  { %1581 = vmatpush.msrb.mxu1 %v1395_v60  ;;  %v1291_v11 = vsel %vm1290_vm6, %v1802_v59, %v1287_v3  ;;  %v1410_v60 = vld [vmem:[%s4108_s4 + $0x200] sm:$0xff]  ;;  %1537 = vmatpush.msra.mxu3 %v1466_v33 }
 0x1a9   :  { %1563 = vmatpush.msrb.mxu0 %v1359_v62  ;;  %v1313_v15 = vmul.f32 %v1291_v11, %v3609_v6  ;;  %1526 = vmatpush.msra.mxu2 %v1416_v48  ;;  %v1431_v11 = vld [vmem:[%s4108_s4 + $0x2a8] sm:$0xff]  ;;  %v1458_v48 = vld [vmem:[%s4108_s4 + $0x380] sm:$0xff] }
 0x1aa   :  { %1582 = vmatpush.msrb.mxu1 %v1393_v63  ;;  %v1012_v38 = vpop.f32.mrf.mxu2  ;;  %v1032_v41 = vpop.f32.mrf.mxu3  ;;  %v1439_v63 = vld [vmem:[%s4108_s4 + $0x2e8] sm:$0xff] }
 0x1ab   :  { %1564 = vmatpush.msrb.mxu0 %v1357_v4  ;;  %v1326_v6 = vmul.f32 %v1318_v9, %v1313_v15  ;;  %v1013_v47 = vadd.f32 %v1012_v38, %v993_v37  ;;  %1527 = vmatpush.msra.mxu2 %v1414_v53  ;;  %v1435_v4 = vld [vmem:[%s4108_s4 + $0x2c8] sm:$0xff]  ;;  %v1433_v9 = vld [vmem:[%s4108_s4 + $0x2b8] sm:$0xff] }
 0x1ac   :  { %1583 = vmatpush.msrb.mxu1 %v1391_v55  ;;  %v1427_v15 = vld [vmem:[%s4108_s4 + $0x288] sm:$0xff] }
 0x1ad   :  { %1565 = vmatpush.msrb.mxu0 %v1355_v46  ;;  %v1339_v26 = vadd.f32 %v1331_v25, %v1326_v6  ;;  %v1033_v43 = vadd.f32 %v1032_v41, %v1013_v47  ;;  %1528 = vmatpush.msra.mxu2 %v1412_v56  ;;  %v1332_v41 = vperm.slane %v3630_v16, 2  ;;  %v1456_v56 = vld [vmem:[%s4108_s4 + $0x370] sm:$0xff] }
 0x1ae   :  { %1584 = vmatpush.msrb.mxu1 %v1389_v51 }
 0x1af   :  { %1566 = vmatpush.msrb.mxu0 %v1353_v57  ;;  %v1343_v29 = vmax.f32 %v1339_v26, 0.0  ;;  %v1209_v59 = vrot.slane %v1033_v43, 4  ;;  %1529 = vmatpush.msra.mxu2 %v1410_v60  ;;  %v1411_v26 = vld [vmem:[%s4108_s4 + $0x208] sm:$0xff] }
 0x1b0   :  { %1585 = vmatpush.msrb.mxu1 %v1387_v20  ;;  %v1421_v20 = vld [vmem:[%s4108_s4 + $0x258] sm:$0xff] }
 0x1b1   :  { %1567 = vmatpush.msrb.mxu0 %v1351_v21  ;;  %1510 = vmatmul.f32.vlgmr.msra.gmra.mxu1 %v1343_v29  ;;  %v1415_v21 = vld [vmem:[%s4108_s4 + $0x228] sm:$0xff] }
 0x1b2   :  { %1586 = vmatpush.msrb.mxu1 %v1385_v24  ;;  %1594 = vmatpush.msrb.mxu2 %v1441_v61 }
 0x1b3   :  { %1568 = vmatpush.msrb.mxu0 %v1349_v27 }
 0x1b4   :  { %1587 = vmatpush.msrb.mxu1 %v1383_v30  ;;  %1595 = vmatpush.msrb.mxu2 %v1439_v63 }
 0x1b5   :  { %1569 = vmatpush.msrb.mxu0 %v1347_v32 }
 0x1b6   :  { %1570 = vmatmul.f32.vlgmr.msrb.gmra.mxu0 %v1342_v31  ;;  %1588 = vmatpush.msrb.mxu1 %v1381_v34  ;;  %v1210_v31 = vadd.f32 %v1209_v59, %v1033_v43 }
 0x1b7   :  { %1596 = vmatpush.msrb.mxu2 %v1437_v1 }
 0x1b8   :  { %1589 = vmatpush.msrb.mxu1 %v1379_v39  ;;  %v1211_v50 = vrot.slane %v1210_v31, 2  ;;  %v1464_v39 = vld [vmem:[%s4108_s4 + $0x3b0] sm:$0xff] }
 0x1b9   :  { %1590 = vmatmul.f32.vlgmr.msrb.gmra.mxu1 %v1343_v29  ;;  %1597 = vmatpush.msrb.mxu2 %v1435_v4  ;;  %v1448_v4 = vld [vmem:[%s4108_s4 + $0x330] sm:$0xff] }
 0x1ba   :  { %v1212_v49 = vadd.f32 %v1211_v50, %v1210_v31  ;;  %1538 = vmatpush.msra.mxu3 %v1464_v39  ;;  %v1460_v31 = vld [vmem:[%s4108_s4 + $0x390] sm:$0xff]  ;;  %v1443_v39 = vld [vmem:[%s4108_s4 + $0x308] sm:$0xff] }
 0x1bb   :  { %1598 = vmatpush.msrb.mxu2 %v1433_v9  ;;  %v1446_v9 = vld [vmem:[%s4108_s4 + $0x320] sm:$0xff] }
 0x1bc   :  { %v1213_v54 = vrot.slane %v1212_v49, 1 }
 0x1bd   :  { %1599 = vmatpush.msrb.mxu2 %v1431_v11  ;;  %v1444_v11 = vld [vmem:[%s4108_s4 + $0x310] sm:$0xff] }
 0x1be   :  { %v1214_v58 = vadd.f32 %v1213_v54, %v1212_v49 }
 0x1bf   :  { %1600 = vmatpush.msrb.mxu2 %v1429_v14  ;;  %v1442_v14 = vld [vmem:[%s4108_s4 + $0x300] sm:$0xff] }
 0x1c0   :  { %v1230_v62 = vmul.f32 %v3202_v12, %v1214_v58  ;;  %v1454_v58 = vld [vmem:[%s4108_s4 + $0x360] sm:$0xff] }
 0x1c1   :  { %1601 = vmatpush.msrb.mxu2 %v1427_v15 }
 0x1c2   :  { %v3831_v0 = vsub.f32 %v1033_v43, %v1230_v62  ;;  %v1462_v43 = vld [vmem:[%s4108_s4 + $0x3a0] sm:$0xff]  ;;  %v1452_v62 = vld [vmem:[%s4108_s4 + $0x350] sm:$0xff] }
 0x1c3   :  { %1602 = vmatpush.msrb.mxu2 %v1425_v17  ;;  %1539 = vmatpush.msra.mxu3 %v1462_v43 }
 0x1c4   :  { %v1238_v3 = vmul.f32 %v3831_v0, %v3831_v0 }
 0x1c5   :  { %1603 = vmatpush.msrb.mxu2 %v1423_v18  ;;  %1540 = vmatpush.msra.mxu3 %v1460_v31 }
 0x1c6   :  { %v1252_v55 = vrot.slane %v1238_v3, 4 }
 0x1c7   :  { %1604 = vmatpush.msrb.mxu2 %v1421_v20  ;;  %1541 = vmatpush.msra.mxu3 %v1458_v48 }
 0x1c8   :  { %v1253_v10 = vadd.f32 %v1252_v55, %v1238_v3 }
 0x1c9   :  { %1605 = vmatpush.msrb.mxu2 %v1419_v23  ;;  %1542 = vmatpush.msra.mxu3 %v1456_v56 }
 0x1ca   :  { %v1254_v46 = vrot.slane %v1253_v10, 2 }
 0x1cb   :  { %1606 = vmatpush.msrb.mxu2 %v1417_v19  ;;  %1543 = vmatpush.msra.mxu3 %v1454_v58  ;;  %v1463_v19 = vld [vmem:[%s4108_s4 + $0x3a8] sm:$0xff] }
 0x1cc   :  { %v1255_v51 = vadd.f32 %v1254_v46, %v1253_v10 }
 0x1cd   :  { %1607 = vmatpush.msrb.mxu2 %v1415_v21  ;;  %1544 = vmatpush.msra.mxu3 %v1452_v62  ;;  %v1723_v62 = vld [vmem:[%s4112_s7 + $0x78] sm:$0xff] }
 0x1ce   :  { %v1256_v52 = vrot.slane %v1255_v51, 1  ;;  %1744 = vmatpush.msra.mxu0 %v1723_v62 }
 0x1cf   :  { %1608 = vmatpush.msrb.mxu2 %v1413_v22  ;;  %v1461_v22 = vld [vmem:[%s4108_s4 + $0x398] sm:$0xff] }
 0x1d0   :  { %v1257_v25 = vadd.f32 %v1256_v52, %v1255_v51  ;;  %v1473_v51 = vld [vmem:[%s4108_s4 + $0x3f8] sm:$0xff]  ;;  %v1471_v52 = vld [vmem:[%s4108_s4 + $0x3e8] sm:$0xff] }
 0x1d1   :  { %1609 = vmatpush.msrb.mxu2 %v1411_v26 }
 0x1d2   :  { %v1266_v57 = vmul.f32 %v1257_v25, %v3202_v12  ;;  %v1052_v30 = vpop.f32.mrf.mxu0  ;;  %v1469_v25 = vld [vmem:[%s4108_s4 + $0x3d8] sm:$0xff] }
 0x1d4   :  { %v1270_v6 = vadd.f32 1e-05, %v1266_v57  ;;  %v1072_v35 = vpop.f32.mrf.mxu1  ;;  %v1467_v57 = vld [vmem:[%s4108_s4 + $0x3c8] sm:$0xff] }
 0x1d5   :  { %v1073_v37 = vadd.f32 %v1072_v35, %v1052_v30  ;;  %v1447_v35 = vld [vmem:[%s4108_s4 + $0x328] sm:$0xff] }
 0x1d6   :  { %1803 = vrsqrt.f32 %v1270_v6  ;;  %vm1298_vm8 = vweird.f32 %v1270_v6 }
 0x1d7   :  { %v1092_v38 = vpop.f32.mrf.mxu2 }
 0x1d8   :  { %v1093_v42 = vadd.f32 %v1092_v38, %v1073_v37  ;;  %v1445_v37 = vld [vmem:[%s4108_s4 + $0x318] sm:$0xff] }
 0x1d9   :  { %v1112_v44 = vpop.f32.mrf.mxu3 }
 0x1da   :  { %v1113_v7 = vadd.f32 %v1112_v44, %v1093_v42 }
 0x1dc   :  { %v1804_v24 = vpop.eup %1803 }
 0x1dd   :  { %v1293_v2 = vmul.f32 %v1804_v24, %v1270_v6  ;;  %vm1299_vm7 = vweird.f32 %v1804_v24  ;;  %v1465_v6 = vld [vmem:[%s4108_s4 + $0x3b8] sm:$0xff] }
 0x1de   :  { %vm1300_vm9 = vmor %vm1298_vm8, %vm1299_vm7 }
 0x1df   :  { %v1294_v27 = vmul.f32 %v1804_v24, %v1293_v2  ;;  %v1459_v2 = vld [vmem:[%s4108_s4 + $0x388] sm:$0xff] }
 0x1e1   :  { %v1295_v29 = vmul.f32 0.5, %v1294_v27 }
 0x1e3   :  { %v1296_v32 = vsub.f32 1.5, %v1295_v29  ;;  %v1453_v29 = vld [vmem:[%s4108_s4 + $0x358] sm:$0xff] }
 0x1e5   :  { %v1297_v34 = vmul.f32 %v1804_v24, %v1296_v32 }
 0x1e7   :  { %v1301_v40 = vsel %vm1300_vm9, %v1804_v24, %v1297_v34  ;;  %v1449_v34 = vld [vmem:[%s4108_s4 + $0x338] sm:$0xff] }
 0x1e8   :  { %v1314_v47 = vmul.f32 %v1301_v40, %v3831_v0  ;;  %v1450_v0 = vld [vmem:[%s4108_s4 + $0x340] sm:$0xff] }
 0x1e9   :  { %1545 = vmatpush.msra.mxu3 %v1450_v0 }
 0x1ea   :  { %v1327_v59 = vmul.f32 %v1319_v36, %v1314_v47 }
 0x1eb   :  { %1546 = vmatpush.msra.mxu3 %v1448_v4  ;;  %v1721_v4 = vld [vmem:[%s4112_s7 + $0x68] sm:$0xff] }
 0x1ec   :  { %v1340_v50 = vadd.f32 %v1332_v41, %v1327_v59  ;;  %v1320_v59 = vperm.slane %v3606_v5, 3 }
 0x1ed   :  { %1547 = vmatpush.msra.mxu3 %v1446_v9 }
 0x1ee   :  { %v1344_v54 = vmax.f32 %v1340_v50, 0.0 }
 0x1ef   :  { %1548 = vmatpush.msra.mxu3 %v1444_v11 }
 0x1f0   :  { %1530 = vmatmul.f32.vlgmr.msra.gmra.mxu2 %v1344_v54 }
 0x1f1   :  { %1549 = vmatpush.msra.mxu3 %v1442_v14 }
 0x1f2   :  { %v1132_v45 = vpop.f32.mrf.mxu0 }
 0x1f3   :  { %v1133_v49 = vadd.f32 %v1132_v45, %v1113_v7  ;;  %1614 = vmatpush.msrb.mxu3 %v1473_v51  ;;  %v1333_v45 = vperm.slane %v3630_v16, 3  ;;  %v1722_v16 = vld [vmem:[%s4112_s7 + $0x70] sm:$0xff]  ;;  %v1719_v51 = vld [vmem:[%s4112_s7 + $0x58] sm:$0xff] }
 0x1f4   :  { %1745 = vmatpush.msra.mxu0 %v1722_v16  ;;  %v1725_v16 = vld [vmem:[%s4112_s7 + $0x88] sm:$0xff] }
 0x1f5   :  { %1615 = vmatpush.msrb.mxu3 %v1471_v52 }
 0x1f6   :  { %v1152_v53 = vpop.f32.mrf.mxu1  ;;  %1746 = vmatpush.msra.mxu0 %v1721_v4 }
 0x1f7   :  { %v1153_v60 = vadd.f32 %v1152_v53, %v1133_v49  ;;  %1616 = vmatpush.msrb.mxu3 %v1469_v25  ;;  %v1718_v25 = vld [vmem:[%s4112_s7 + $0x50] sm:$0xff] }
 0x1f8   :  { %1610 = vmatmul.f32.vlgmr.msrb.gmra.mxu2 %v1344_v54 }
 0x1f9   :  { %1617 = vmatpush.msrb.mxu3 %v1467_v57 }
 0x1fa   :  { %v1172_v61 = vpop.f32.mrf.mxu2 }
 0x1fb   :  { %v1173_v63 = vadd.f32 %v1172_v61, %v1153_v60  ;;  %1618 = vmatpush.msrb.mxu3 %v1465_v6  ;;  %v1717_v6 = vld [vmem:[%s4112_s7 + $0x48] sm:$0xff] }
 0x1fd   :  { %v1192_v1 = vpop.f32.mrf.mxu3  ;;  %1619 = vmatpush.msrb.mxu3 %v1463_v19 }
 0x1fe   :  { %v1193_v3 = vadd.f32 %v1192_v1, %v1173_v63 }
 0x1ff   :  { %1620 = vmatpush.msrb.mxu3 %v1461_v22  ;;  %v1716_v22 = vld [vmem:[%s4112_s7 + $0x40] sm:$0xff] }
 0x200   :  { %v1215_v55 = vrot.slane %v1193_v3, 4 }
 0x201   :  { %1621 = vmatpush.msrb.mxu3 %v1459_v2 }
 0x202   :  { %v1216_v10 = vadd.f32 %v1215_v55, %v1193_v3 }
 0x203   :  { %1622 = vmatpush.msrb.mxu3 %v1457_v8  ;;  %v1715_v8 = vld [vmem:[%s4112_s7 + $0x38] sm:$0xff] }
 0x204   :  { %v1217_v46 = vrot.slane %v1216_v10, 2 }
 0x205   :  { %1623 = vmatpush.msrb.mxu3 %v1455_v28 }
 0x206   :  { %v1218_v15 = vadd.f32 %v1217_v46, %v1216_v10  ;;  %v1720_v10 = vld [vmem:[%s4112_s7 + $0x60] sm:$0xff] }
 0x207   :  { %1624 = vmatpush.msrb.mxu3 %v1453_v29  ;;  %1747 = vmatpush.msra.mxu0 %v1720_v10 }
 0x208   :  { %v1219_v17 = vrot.slane %v1218_v15, 1 }
 0x209   :  { %1625 = vmatpush.msrb.mxu3 %v1451_v13  ;;  %1748 = vmatpush.msra.mxu0 %v1719_v51  ;;  %v1734_v13 = vld [vmem:[%s4112_s7 + $0xd0] sm:$0xff] }
 0x20a   :  { %v1220_v18 = vadd.f32 %v1219_v17, %v1218_v15  ;;  %v1739_v15 = vld [vmem:[%s4112_s7 + $0xf8] sm:$0xff] }
 0x20b   :  { %1626 = vmatpush.msrb.mxu3 %v1449_v34  ;;  %1764 = vmatpush.msra.mxu1 %v1739_v15  ;;  %v1713_v34 = vld [vmem:[%s4112_s7 + $0x28] sm:$0xff]  ;;  %v1634_v15 = vld [vmem:[%s4113_s5] sm:$0x3] }
 0x20c   :  { %v1231_v20 = vmul.f32 %v3202_v12, %v1220_v18  ;;  %v1738_v18 = vld [vmem:[%s4112_s7 + $0xf0] sm:$0xff]  ;;  %1749 = vmatpush.msra.mxu0 %v1718_v25 }
 0x20d   :  { %1627 = vmatpush.msrb.mxu3 %v1447_v35  ;;  %1765 = vmatpush.msra.mxu1 %v1738_v18  ;;  %v1733_v35 = vld [vmem:[%s4112_s7 + $0xc8] sm:$0xff] }
 0x20e   :  { %v1235_v23 = vsub.f32 %v1193_v3, %v1231_v20  ;;  %1750 = vmatpush.msra.mxu0 %v1717_v6 }
 0x20f   :  { %1628 = vmatpush.msrb.mxu3 %v1445_v37 }
 0x210   :  { %v1239_v21 = vmul.f32 %v1235_v23, %v1235_v23  ;;  %1751 = vmatpush.msra.mxu0 %v1716_v22 }
 0x211   :  { %1629 = vmatpush.msrb.mxu3 %v1443_v39  ;;  %v1732_v39 = vld [vmem:[%s4112_s7 + $0xc0] sm:$0xff] }
 0x212   :  { %v1258_v24 = vrot.slane %v1239_v21, 4  ;;  %1752 = vmatpush.msra.mxu0 %v1715_v8  ;;  %v1694_v8 = vperm.slane %v1634_v15, 1 }
 0x213   :  { %v1491_v56 = vpop.f32.mrf.mxu0 }
 0x214   :  { %v1259_v26 = vadd.f32 %v1258_v24, %v1239_v21  ;;  %v1736_v24 = vld [vmem:[%s4112_s7 + $0xe0] sm:$0xff] }
 0x216   :  { %v1260_v27 = vrot.slane %v1259_v26, 2 }
 0x218   :  { %v1261_v30 = vadd.f32 %v1260_v27, %v1259_v26  ;;  %v1735_v27 = vld [vmem:[%s4112_s7 + $0xd8] sm:$0xff] }
 0x21a   :  { %v1262_v32 = vrot.slane %v1261_v30, 1 }
 0x21c   :  { %v1263_v33 = vadd.f32 %v1262_v32, %v1261_v30  ;;  %v1714_v30 = vld [vmem:[%s4112_s7 + $0x30] sm:$0xff] }
 0x21d   :  { %1753 = vmatpush.msra.mxu0 %v1714_v30 }
 0x21e   :  { %v1267_v36 = vmul.f32 %v1263_v33, %v3202_v12 }
 0x21f   :  { %1754 = vmatpush.msra.mxu0 %v1713_v34 }
 0x220   :  { %v1271_v38 = vadd.f32 1e-05, %v1267_v36 }
 0x222   :  { %1805 = vrsqrt.f32 %v1271_v38  ;;  %vm1308_vm11 = vweird.f32 %v1271_v38 }
 0x228   :  { %v1806_v40 = vpop.eup %1805 }
 0x229   :  { %v1303_v47 = vmul.f32 %v1806_v40, %v1271_v38  ;;  %vm1309_vm10 = vweird.f32 %v1806_v40  ;;  %v1712_v38 = vld [vmem:[%s4112_s7 + $0x20] sm:$0xff] }
 0x22a   :  { %vm1310_vm12 = vmor %vm1308_vm11, %vm1309_vm10  ;;  %1755 = vmatpush.msra.mxu0 %v1712_v38 }
 0x22b   :  { %v1304_v42 = vmul.f32 %v1806_v40, %v1303_v47 }
 0x22d   :  { %v1305_v41 = vmul.f32 0.5, %v1304_v42  ;;  %v1711_v42 = vld [vmem:[%s4112_s7 + $0x18] sm:$0xff] }
 0x22e   :  { %v1511_v53 = vpop.f32.mrf.mxu1  ;;  %1756 = vmatpush.msra.mxu0 %v1711_v42 }
 0x22f   :  { %v1306_v43 = vsub.f32 1.5, %v1305_v41  ;;  %v1512_v58 = vadd.f32 %v1511_v53, %v1491_v56  ;;  %v1731_v41 = vld [vmem:[%s4112_s7 + $0xb8] sm:$0xff]  ;;  %v1728_v56 = vld [vmem:[%s4112_s7 + $0xa0] sm:$0xff] }
 0x231   :  { %v1307_v44 = vmul.f32 %v1806_v40, %v1306_v43 }
 0x233   :  { %v1311_v7 = vsel %vm1310_vm12, %v1806_v40, %v1307_v44  ;;  %v1571_v1 = vpop.f32.mrf.mxu0 }
 0x234   :  { %v1315_v31 = vmul.f32 %v1311_v7, %v1235_v23  ;;  %v1737_v23 = vld [vmem:[%s4112_s7 + $0xe8] sm:$0xff]  ;;  %v1730_v7 = vld [vmem:[%s4112_s7 + $0xb0] sm:$0xff] }
 0x235   :  { %1766 = vmatpush.msra.mxu1 %v1737_v23 }
 0x236   :  { %v1328_v50 = vmul.f32 %v1320_v59, %v1315_v31  ;;  %v1591_v63 = vpop.f32.mrf.mxu1  ;;  %v1710_v59 = vld [vmem:[%s4112_s7 + $0x10] sm:$0xff] }
 0x237   :  { %v1592_v55 = vadd.f32 %v1591_v63, %v1571_v1  ;;  %1767 = vmatpush.msra.mxu1 %v1736_v24  ;;  %1757 = vmatpush.msra.mxu0 %v1710_v59  ;;  %v1726_v63 = vld [vmem:[%s4112_s7 + $0x90] sm:$0xff] }
 0x238   :  { %v1341_v48 = vadd.f32 %v1333_v45, %v1328_v50  ;;  %v1709_v50 = vld [vmem:[%s4112_s7 + $0x8] sm:$0xff] }
 0x239   :  { %1768 = vmatpush.msra.mxu1 %v1735_v27  ;;  %1758 = vmatpush.msra.mxu0 %v1709_v50 }
 0x23a   :  { %v1345_v49 = vmax.f32 %v1341_v48, 0.0  ;;  %v1729_v48 = vld [vmem:[%s4112_s7 + $0xa8] sm:$0xff] }
 0x23b   :  { %1769 = vmatpush.msra.mxu1 %v1734_v13 }
 0x23c   :  { %1550 = vmatmul.f32.vlgmr.msra.gmra.mxu3 %v1345_v49 }
 0x23d   :  { %1770 = vmatpush.msra.mxu1 %v1733_v35 }
 0x23f   :  { %1771 = vmatpush.msra.mxu1 %v1732_v39 }
 0x241   :  { %1772 = vmatpush.msra.mxu1 %v1731_v41 }
 0x243   :  { %1773 = vmatpush.msra.mxu1 %v1730_v7 }
 0x244   :  { %1630 = vmatmul.f32.vlgmr.msrb.gmra.mxu3 %v1345_v49 }
 0x245   :  { %1774 = vmatpush.msra.mxu1 %v1729_v48 }
 0x247   :  { %1775 = vmatpush.msra.mxu1 %v1728_v56 }
 0x273   :  { %v1531_v54 = vpop.f32.mrf.mxu2 }
 0x274   :  { %v1532_v60 = vadd.f32 %v1531_v54, %v1512_v58  ;;  %v1708_v54 = vld [vmem:[%s4112_s7] sm:$0xff] }
 0x275   :  { %1759 = vmatpush.msra.mxu0 %v1708_v54 }
 0x27b   :  { %v1611_v3 = vpop.f32.mrf.mxu2 }
 0x27c   :  { %v1612_v11 = vadd.f32 %v1611_v3, %v1592_v55  ;;  %v1724_v3 = vld [vmem:[%s4112_s7 + $0x80] sm:$0xff] }
 0x2bf   :  { %v1551_v61 = vpop.f32.mrf.mxu3 }
 0x2c0   :  { %v1552_v5 = vadd.f32 %v1551_v61, %v1532_v60  ;;  %v1727_v61 = vld [vmem:[%s4112_s7 + $0x98] sm:$0xff] }
 0x2c1   :  { %1776 = vmatpush.msra.mxu1 %v1727_v61 }
 0x2c2   :  { %v1636_v0 = vrot.slane %v1552_v5, 4 }
 0x2c3   :  { %1777 = vmatpush.msra.mxu1 %v1726_v63 }
 0x2c4   :  { %v1637_v9 = vadd.f32 %v1636_v0, %v1552_v5 }
 0x2c5   :  { %1778 = vmatpush.msra.mxu1 %v1725_v16 }
 0x2c6   :  { %v1638_v46 = vrot.slane %v1637_v9, 2 }
 0x2c7   :  { %v1631_v14 = vpop.f32.mrf.mxu3  ;;  %1779 = vmatpush.msra.mxu1 %v1724_v3 }
 0x2c8   :  { %v1639_v52 = vadd.f32 %v1638_v46, %v1637_v9  ;;  %v1632_v17 = vadd.f32 %v1631_v14, %v1612_v11 }
 0x2ca   :  { %v1640_v57 = vrot.slane %v1639_v52, 1  ;;  %v1642_v20 = vrot.slane %v1632_v17, 4 }
 0x2cc   :  { %v1641_v19 = vadd.f32 %v1640_v57, %v1639_v52  ;;  %v1643_v21 = vadd.f32 %v1642_v20, %v1632_v17  ;;  %v1693_v57 = vperm.slane %v1634_v15, 0 }
 0x2ce   :  { %v1648_v2 = vmul.f32 %v1641_v19, %v3202_v12  ;;  %v1644_v26 = vrot.slane %v1643_v21, 2 }
 0x2d0   :  { %v4024_v28 = vsub.f32 %v1552_v5, %v1648_v2  ;;  %v1645_v29 = vadd.f32 %v1644_v26, %v1643_v21 }
 0x2d2   :  { %v1652_v32 = vmul.f32 %v4024_v28, %v4024_v28  ;;  %v1646_v33 = vrot.slane %v1645_v29, 1 }
 0x2d4   :  { %v1654_v36 = vrot.slane %v1652_v32, 4  ;;  %v1647_v37 = vadd.f32 %v1646_v33, %v1645_v29 }
 0x2d6   :  { %v1655_v40 = vadd.f32 %v1654_v36, %v1652_v32  ;;  %v1649_v47 = vmul.f32 %v1647_v37, %v3202_v12  ;;  %v1796_v37 = vld [vmem:[%s4115_s9] ss:$0 sm:$0xff] }
 0x2d8   :  { %v1656_v43 = vrot.slane %v1655_v40, 2  ;;  %v4053_v44 = vsub.f32 %v1632_v17, %v1649_v47 }
 0x2da   :  { %v1657_v31 = vadd.f32 %v1656_v43, %v1655_v40  ;;  %v1653_v45 = vmul.f32 %v4053_v44, %v4053_v44 }
 0x2dc   :  { %v1658_v49 = vrot.slane %v1657_v31, 1  ;;  %v1660_v53 = vrot.slane %v1653_v45, 4 }
 0x2de   :  { %v1659_v58 = vadd.f32 %v1658_v49, %v1657_v31  ;;  %v1661_v60 = vadd.f32 %v1660_v53, %v1653_v45 }
 0x2e0   :  { %v1666_v62 = vmul.f32 %v1659_v58, %v3202_v12  ;;  %v1662_v5 = vrot.slane %v1661_v60, 2 }
 0x2e2   :  { %v1668_v0 = vadd.f32 1e-05, %v1666_v62  ;;  %v1663_v1 = vadd.f32 %v1662_v5, %v1661_v60 }
 0x2e4   :  { %1807 = vrsqrt.f32 %v1668_v0  ;;  %v1664_v4 = vrot.slane %v1663_v1, 1  ;;  %vm1676_vm14 = vweird.f32 %v1668_v0 }
 0x2e6   :  { %v1665_v55 = vadd.f32 %v1664_v4, %v1663_v1 }
 0x2e8   :  { %v1667_v9 = vmul.f32 %v1665_v55, %v3202_v12  ;;  %v1635_v12 = vld [vmem:[%s4114_s6] sm:$0x3] }
 0x2e9   :  { %v1700_v19 = vperm.slane %v1635_v12, 0  ;;  %v1701_v13 = vperm.slane %v1635_v12, 1 }
 0x2ea   :  { %v1808_v10 = vpop.eup %1807  ;;  %v1669_v11 = vadd.f32 1e-05, %v1667_v9 }
 0x2eb   :  { %v1671_v46 = vmul.f32 %v1808_v10, %v1668_v0  ;;  %vm1677_vm13 = vweird.f32 %v1808_v10 }
 0x2ec   :  { %1809 = vrsqrt.f32 %v1669_v11  ;;  %vm1678_vm15 = vmor %vm1676_vm14, %vm1677_vm13  ;;  %vm1686_vm1 = vweird.f32 %v1669_v11 }
 0x2ed   :  { %v1672_v14 = vmul.f32 %v1808_v10, %v1671_v46 }
 0x2ef   :  { %v1673_v51 = vmul.f32 0.5, %v1672_v14 }
 0x2f1   :  { %v1674_v52 = vsub.f32 1.5, %v1673_v51 }
 0x2f2   :  { %v1810_v17 = vpop.eup %1809 }
 0x2f3   :  { %v1675_v25 = vmul.f32 %v1808_v10, %v1674_v52  ;;  %v1681_v18 = vmul.f32 %v1810_v17, %v1669_v11  ;;  %vm1687_vm0 = vweird.f32 %v1810_v17 }
 0x2f4   :  { %vm1688_vm2 = vmor %vm1686_vm1, %vm1687_vm0 }
 0x2f5   :  { %v1679_v20 = vsel %vm1678_vm15, %v1808_v10, %v1675_v25  ;;  %v1682_v6 = vmul.f32 %v1810_v17, %v1681_v18 }
 0x2f6   :  { %v1690_v23 = vmul.f32 %v1679_v20, %v4024_v28  ;;  %v1795_v28 = vld [vmem:[%s4111_s8] ss:$0 sm:$0xff] }
 0x2f7   :  { %v1683_v21 = vmul.f32 0.5, %v1682_v6 }
 0x2f8   :  { %v1697_v22 = vmul.f32 %v1693_v57, %v1690_v23 }
 0x2f9   :  { %v1684_v24 = vsub.f32 1.5, %v1683_v21 }
 0x2fa   :  { %v1704_v2 = vadd.f32 %v1700_v19, %v1697_v22 }
 0x2fb   :  { %v1685_v26 = vmul.f32 %v1810_v17, %v1684_v24 }
 0x2fc   :  { %v1706_v27 = vmax.f32 %v1704_v2, 0.0 }
 0x2fd   :  { %v1689_v29 = vsel %vm1688_vm2, %v1810_v17, %v1685_v26 }
 0x2fe   :  { %v1691_v30 = vmul.f32 %v1689_v29, %v4053_v44  ;;  %1760 = vmatmul.f32.vlgmr.msra.gmra.mxu0 %v1706_v27 }
 0x300   :  { %v1698_v32 = vmul.f32 %v1694_v8, %v1691_v30 }
 0x302   :  { %v1705_v33 = vadd.f32 %v1701_v13, %v1698_v32 }
 0x304   :  { %v1707_v34 = vmax.f32 %v1705_v33, 0.0 }
 0x306   :  { %1780 = vmatmul.f32.vlgmr.msra.gmra.mxu1 %v1707_v34 }
 0x37b   :  { %v1761_v35 = vpop.f32.mrf.mxu0 }
 0x37c   :  { %v1762_v36 = vadd.f32 %v1795_v28, %v1761_v35 }
 0x383   :  { %v1781_v38 = vpop.f32.mrf.mxu1 }
 0x384   :  { %v1782_v39 = vadd.f32 %v1781_v38, %v1762_v36 }
 0x386   :  { %v1788_v40 = vadd.f32 %v1796_v37, %v1782_v39 }
 0x388   :  { %1789 = vst [vmem:[%s4116_s10] sm:$0xff] %v1788_v40 }

</bundles_post_ra>
